<compile_context>
chip_gen: v5e
topology: v5e:2x2
jax: 0.10.0
libtpu: 0.0.40
codegen_flags: <defaults>
</compile_context>

<pallas_src>
import jax
import jax.numpy as jnp
from jax.experimental import pallas as pl
from jax.experimental.pallas import tpu as pltpu


def _mrconv_kernel(xtab_ref, xctr_ref, idx_ref, wx_ref, wa_ref, b_ref, out_ref):
    # xtab_ref: (C, n_tab)     full node-feature table, VMEM resident (constant index_map)
    # xctr_ref: (C, T)         center features of this node tile
    # idx_ref : (K, T) int32   neighbor ids for this node tile
    # wx_ref  : (Cout, C)      Conv1d weight slice acting on x
    # wa_ref  : (Cout, C)      Conv1d weight slice acting on the max-relative aggregate
    # b_ref   : (Cout, 1)      bias
    # out_ref : (Cout, T)
    x_tab = xtab_ref[...].astype(jnp.float32)
    x_ctr = xctr_ref[...].astype(jnp.float32)
    n_tab = x_tab.shape[1]
    t = x_ctr.shape[1]
    k_nbrs = idx_ref.shape[0]

    # node-id grid for the one-hot gather, hoisted out of the neighbor loop
    row_ids = jax.lax.broadcasted_iota(jnp.int32, (n_tab, t), 0)

    # gather + running max over the K neighbors, all against the VMEM-resident table:
    # x[:, idx[k, :]] == x_tab @ onehot_k  (MXU-friendly gather, no HBM x_j round-trip)
    g = None
    for k in range(k_nbrs):                                   # K is small & static -> unrolled
        onehot = (row_ids == idx_ref[k:k + 1, :]).astype(jnp.float32)     # (n_tab, T)
        xk = jnp.dot(x_tab, onehot, preferred_element_type=jnp.float32)   # (C, T)
        g = xk if g is None else jnp.maximum(g, xk)

    aggr = g - x_ctr                                          # max-relative feature, (C, T)

    # Conv1d(2C, Cout, 1) == [W_x | W_aggr] @ [x ; aggr]: two 2-D matmuls, no concat copy.
    h = jnp.dot(wx_ref[...].astype(jnp.float32), x_ctr, preferred_element_type=jnp.float32)
    h = h + jnp.dot(wa_ref[...].astype(jnp.float32), aggr, preferred_element_type=jnp.float32)
    h = h + b_ref[...].astype(jnp.float32)                    # bias once, after the max
    out_ref[...] = jnp.maximum(h, 0.0).astype(out_ref.dtype)  # act='relu'


def _round_up(v, m):
    return (v + m - 1) // m * m


def mrconv1d(x_cn, edge_index, w, b, *, tile_n=256):
    """MRConv1d.forward (act='relu', norm=None, aggr='max').

    x_cn:       (C, N) float32 node features, channels-first (Conv1d NCL layout, batch squeezed);
                node-major x is simply x_cn.T.
    edge_index: (2, N*K) int32; edge_index[0] lists K neighbor ids per center node, grouped
                K-consecutive per node (exactly what torch.index_select consumes).
    w:          (Cout, 2*C) or (Cout, 2*C, 1) Conv1d weight.
    b:          (Cout,) Conv1d bias.
    returns:    (Cout, N) = ReLU(Conv1d(concat([x, max_k(x_j - x_i)], channels))).
    """
    C, N = x_cn.shape
    w2 = w.reshape(w.shape[0], 2 * C)                  # squeeze kernel-size-1 dim if present
    c_out = w2.shape[0]
    idx = edge_index[0].reshape(N, -1).astype(jnp.int32)   # (N, K)
    K = idx.shape[1]

    assert tile_n % 128 == 0, "tile_n must be lane-aligned (multiple of 128)"
    n_grid = _round_up(N, tile_n)                      # node-axis padding for the tiled grid
    n_tab = _round_up(N, 128)                          # gather-table lane padding (contraction dim)

    x_tab = jnp.pad(x_cn, ((0, 0), (0, n_tab - N)))    # VMEM-resident gather table
    x_ctr = jnp.pad(x_cn, ((0, 0), (0, n_grid - N)))   # center features, tiled over the grid
    idx_t = jnp.pad(idx, ((0, n_grid - N), (0, 0))).T  # (K, n_grid); pad rows gather node 0 (sliced off)

    wx = w2[:, :C]                                     # acts on x
    wa = w2[:, C:]                                     # acts on the aggregated feature
    b2 = b.reshape(c_out, 1)

    out = pl.pallas_call(
        _mrconv_kernel,
        out_shape=jax.ShapeDtypeStruct((c_out, n_grid), x_cn.dtype),
        grid_spec=pltpu.PrefetchScalarGridSpec(
            num_scalar_prefetch=0,
            grid=(n_grid // tile_n,),
            in_specs=[
                pl.BlockSpec((C, n_tab), lambda i: (0, 0)),     # x table, VMEM resident
                pl.BlockSpec((C, tile_n), lambda i: (0, i)),    # x center tile
                pl.BlockSpec((K, tile_n), lambda i: (0, i)),    # neighbor ids tile
                pl.BlockSpec((c_out, C), lambda i: (0, 0)),     # W_x
                pl.BlockSpec((c_out, C), lambda i: (0, 0)),     # W_aggr
                pl.BlockSpec((c_out, 1), lambda i: (0, 0)),     # bias
            ],
            out_specs=pl.BlockSpec((c_out, tile_n), lambda i: (0, i)),
        ),
        compiler_params=pltpu.CompilerParams(
            dimension_semantics=("parallel",),          # shard node tiles across TensorCores
            vmem_limit_bytes=32 * 1024 * 1024,          # above v5e's 16 MiB scoped default
        ),
    )(x_tab, x_ctr, idx_t, wx, wa, b2)
    return out[:, :N]


if __name__ == "__main__":
    # small shapes; N deliberately NOT a multiple of tile_n to exercise the tail-padding path
    N, C, C_OUT, K = 500, 32, 48, 9

    key = jax.random.PRNGKey(0)
    kx, kw, kb, ke = jax.random.split(key, 4)

    def bf16_exact(a):
        # round test data to bf16-representable values so the check is insensitive to the
        # MXU's default (bf16-input, f32-accumulate) matmul precision mode
        return a.astype(jnp.bfloat16).astype(jnp.float32)

    x_nc = bf16_exact(jax.random.normal(kx, (N, C), jnp.float32))           # node-major (N, C)
    w = bf16_exact(jax.random.normal(kw, (C_OUT, 2 * C), jnp.float32) * 0.1)
    b = bf16_exact(jax.random.normal(kb, (C_OUT,), jnp.float32) * 0.1)
    nbr = jax.random.randint(ke, (N, K), 0, N, dtype=jnp.int32)             # K neighbors per node
    # edge_index[0] = flat neighbor list (K consecutive entries per center node), exactly what
    # torch.index_select consumes; edge_index[1] = repeated center ids (unused by the forward).
    edge_index = jnp.stack(
        [nbr.reshape(-1), jnp.repeat(jnp.arange(N, dtype=jnp.int32), K)], axis=0)

    out = mrconv1d(x_nc.T, edge_index, w, b, tile_n=256)                    # (Cout, N)
    out = jax.block_until_ready(out)

    # pure-JAX mirror of MRConv1d.forward (aggr='max', act='relu', norm=None)
    x_j = x_nc[nbr]                                          # (N, K, C): index_select, grouped per node
    aggr = jnp.max(x_j - x_nc[:, None, :], axis=1)           # (N, C): max-relative aggregation
    ref = jnp.maximum(jnp.concatenate([x_nc, aggr], axis=1) @ w.T + b, 0.0)  # (N, Cout)

    assert out.shape == (C_OUT, N)
    assert jnp.allclose(out.T, ref, rtol=2e-2, atol=2e-2), "kernel output mismatch vs reference"
    assert edge_index.shape == (2, N * K)
    print("KERNEL_OK")
</pallas_src>

<mosaic_0001>
module attributes {stable_mosaic.version = 11 : i64} {
  func.func @_mrconv_kernel(%arg0: i32, %arg1: memref<32x512xf32, #tpu.memory_space<vmem>>, %arg2: memref<32x256xf32, #tpu.memory_space<vmem>>, %arg3: memref<9x256xi32, #tpu.memory_space<vmem>>, %arg4: memref<48x32xf32, #tpu.memory_space<vmem>>, %arg5: memref<48x32xf32, #tpu.memory_space<vmem>>, %arg6: memref<48x1xf32, #tpu.memory_space<vmem>>, %arg7: memref<48x256xf32, #tpu.memory_space<vmem>>) attributes {dimension_semantics = [#tpu.dimension_semantics<parallel>], iteration_bounds = array<i64: 2>, scalar_prefetch = 0 : i64, scratch_operands = 0 : i64, tpu.core_type = #tpu.core_type<tc>, window_params = [{pipeline_mode = #tpu.pipeline_mode<synchronous>, transform_indices = @transform_0, window_bounds = array<i64: 32, 512>}, {transform_indices = @transform_1, window_bounds = array<i64: 32, 256>}, {transform_indices = @transform_2, window_bounds = array<i64: 9, 256>}, {pipeline_mode = #tpu.pipeline_mode<synchronous>, transform_indices = @transform_3, window_bounds = array<i64: 48, 32>}, {pipeline_mode = #tpu.pipeline_mode<synchronous>, transform_indices = @transform_4, window_bounds = array<i64: 48, 32>}, {pipeline_mode = #tpu.pipeline_mode<synchronous>, transform_indices = @transform_5, window_bounds = array<i64: 48, 1>}, {transform_indices = @transform_6, window_bounds = array<i64: 48, 256>}]} {
    %c0 = arith.constant 0 : index
    %c0_0 = arith.constant 0 : index
    %0 = vector.load %arg1[%c0, %c0_0] : memref<32x512xf32, #tpu.memory_space<vmem>>, vector<32x512xf32>
    %c0_1 = arith.constant 0 : index
    %c0_2 = arith.constant 0 : index
    %1 = vector.load %arg2[%c0_1, %c0_2] : memref<32x256xf32, #tpu.memory_space<vmem>>, vector<32x256xf32>
    %2 = tpu.iota {dimensions = array<i32: 0>} : vector<512x256xi32>
    %c0_3 = arith.constant 0 : index
    %c0_4 = arith.constant 0 : index
    %3 = vector.load %arg3[%c0_3, %c0_4] : memref<9x256xi32, #tpu.memory_space<vmem>>, vector<1x256xi32>
    %4 = vector.broadcast %3 : vector<1x256xi32> to vector<512x256xi32>
    %5 = arith.cmpi eq, %2, %4 : vector<512x256xi32>
    %6 = arith.extui %5 : vector<512x256xi1> to vector<512x256xi32>
    %7 = arith.sitofp %6 : vector<512x256xi32> to vector<512x256xf32>
    %cst = arith.constant dense<0.000000e+00> : vector<32x256xf32>
    %8 = tpu.matmul %0, %7, %cst {dimension_numbers = #tpu.dot_dimension_numbers<[1], [0], [0], [1], [0, 0, 1, 1], [], []>} : vector<32x512xf32>, vector<512x256xf32>, vector<32x256xf32> -> vector<32x256xf32>
    %c1 = arith.constant 1 : index
    %c0_5 = arith.constant 0 : index
    %9 = vector.load %arg3[%c1, %c0_5] : memref<9x256xi32, #tpu.memory_space<vmem>>, vector<1x256xi32>
    %10 = vector.broadcast %9 : vector<1x256xi32> to vector<512x256xi32>
    %11 = arith.cmpi eq, %2, %10 : vector<512x256xi32>
    %12 = arith.extui %11 : vector<512x256xi1> to vector<512x256xi32>
    %13 = arith.sitofp %12 : vector<512x256xi32> to vector<512x256xf32>
    %cst_6 = arith.constant dense<0.000000e+00> : vector<32x256xf32>
    %14 = tpu.matmul %0, %13, %cst_6 {dimension_numbers = #tpu.dot_dimension_numbers<[1], [0], [0], [1], [0, 0, 1, 1], [], []>} : vector<32x512xf32>, vector<512x256xf32>, vector<32x256xf32> -> vector<32x256xf32>
    %15 = arith.maximumf %8, %14 : vector<32x256xf32>
    %c2 = arith.constant 2 : index
    %c0_7 = arith.constant 0 : index
    %16 = vector.load %arg3[%c2, %c0_7] : memref<9x256xi32, #tpu.memory_space<vmem>>, vector<1x256xi32>
    %17 = vector.broadcast %16 : vector<1x256xi32> to vector<512x256xi32>
    %18 = arith.cmpi eq, %2, %17 : vector<512x256xi32>
    %19 = arith.extui %18 : vector<512x256xi1> to vector<512x256xi32>
    %20 = arith.sitofp %19 : vector<512x256xi32> to vector<512x256xf32>
    %cst_8 = arith.constant dense<0.000000e+00> : vector<32x256xf32>
    %21 = tpu.matmul %0, %20, %cst_8 {dimension_numbers = #tpu.dot_dimension_numbers<[1], [0], [0], [1], [0, 0, 1, 1], [], []>} : vector<32x512xf32>, vector<512x256xf32>, vector<32x256xf32> -> vector<32x256xf32>
    %22 = arith.maximumf %15, %21 : vector<32x256xf32>
    %c3 = arith.constant 3 : index
    %c0_9 = arith.constant 0 : index
    %23 = vector.load %arg3[%c3, %c0_9] : memref<9x256xi32, #tpu.memory_space<vmem>>, vector<1x256xi32>
    %24 = vector.broadcast %23 : vector<1x256xi32> to vector<512x256xi32>
    %25 = arith.cmpi eq, %2, %24 : vector<512x256xi32>
    %26 = arith.extui %25 : vector<512x256xi1> to vector<512x256xi32>
    %27 = arith.sitofp %26 : vector<512x256xi32> to vector<512x256xf32>
    %cst_10 = arith.constant dense<0.000000e+00> : vector<32x256xf32>
    %28 = tpu.matmul %0, %27, %cst_10 {dimension_numbers = #tpu.dot_dimension_numbers<[1], [0], [0], [1], [0, 0, 1, 1], [], []>} : vector<32x512xf32>, vector<512x256xf32>, vector<32x256xf32> -> vector<32x256xf32>
    %29 = arith.maximumf %22, %28 : vector<32x256xf32>
    %c4 = arith.constant 4 : index
    %c0_11 = arith.constant 0 : index
    %30 = vector.load %arg3[%c4, %c0_11] : memref<9x256xi32, #tpu.memory_space<vmem>>, vector<1x256xi32>
    %31 = vector.broadcast %30 : vector<1x256xi32> to vector<512x256xi32>
    %32 = arith.cmpi eq, %2, %31 : vector<512x256xi32>
    %33 = arith.extui %32 : vector<512x256xi1> to vector<512x256xi32>
    %34 = arith.sitofp %33 : vector<512x256xi32> to vector<512x256xf32>
    %cst_12 = arith.constant dense<0.000000e+00> : vector<32x256xf32>
    %35 = tpu.matmul %0, %34, %cst_12 {dimension_numbers = #tpu.dot_dimension_numbers<[1], [0], [0], [1], [0, 0, 1, 1], [], []>} : vector<32x512xf32>, vector<512x256xf32>, vector<32x256xf32> -> vector<32x256xf32>
    %36 = arith.maximumf %29, %35 : vector<32x256xf32>
    %c5 = arith.constant 5 : index
    %c0_13 = arith.constant 0 : index
    %37 = vector.load %arg3[%c5, %c0_13] : memref<9x256xi32, #tpu.memory_space<vmem>>, vector<1x256xi32>
    %38 = vector.broadcast %37 : vector<1x256xi32> to vector<512x256xi32>
    %39 = arith.cmpi eq, %2, %38 : vector<512x256xi32>
    %40 = arith.extui %39 : vector<512x256xi1> to vector<512x256xi32>
    %41 = arith.sitofp %40 : vector<512x256xi32> to vector<512x256xf32>
    %cst_14 = arith.constant dense<0.000000e+00> : vector<32x256xf32>
    %42 = tpu.matmul %0, %41, %cst_14 {dimension_numbers = #tpu.dot_dimension_numbers<[1], [0], [0], [1], [0, 0, 1, 1], [], []>} : vector<32x512xf32>, vector<512x256xf32>, vector<32x256xf32> -> vector<32x256xf32>
    %43 = arith.maximumf %36, %42 : vector<32x256xf32>
    %c6 = arith.constant 6 : index
    %c0_15 = arith.constant 0 : index
    %44 = vector.load %arg3[%c6, %c0_15] : memref<9x256xi32, #tpu.memory_space<vmem>>, vector<1x256xi32>
    %45 = vector.broadcast %44 : vector<1x256xi32> to vector<512x256xi32>
    %46 = arith.cmpi eq, %2, %45 : vector<512x256xi32>
    %47 = arith.extui %46 : vector<512x256xi1> to vector<512x256xi32>
    %48 = arith.sitofp %47 : vector<512x256xi32> to vector<512x256xf32>
    %cst_16 = arith.constant dense<0.000000e+00> : vector<32x256xf32>
    %49 = tpu.matmul %0, %48, %cst_16 {dimension_numbers = #tpu.dot_dimension_numbers<[1], [0], [0], [1], [0, 0, 1, 1], [], []>} : vector<32x512xf32>, vector<512x256xf32>, vector<32x256xf32> -> vector<32x256xf32>
    %50 = arith.maximumf %43, %49 : vector<32x256xf32>
    %c7 = arith.constant 7 : index
    %c0_17 = arith.constant 0 : index
    %51 = vector.load %arg3[%c7, %c0_17] : memref<9x256xi32, #tpu.memory_space<vmem>>, vector<1x256xi32>
    %52 = vector.broadcast %51 : vector<1x256xi32> to vector<512x256xi32>
    %53 = arith.cmpi eq, %2, %52 : vector<512x256xi32>
    %54 = arith.extui %53 : vector<512x256xi1> to vector<512x256xi32>
    %55 = arith.sitofp %54 : vector<512x256xi32> to vector<512x256xf32>
    %cst_18 = arith.constant dense<0.000000e+00> : vector<32x256xf32>
    %56 = tpu.matmul %0, %55, %cst_18 {dimension_numbers = #tpu.dot_dimension_numbers<[1], [0], [0], [1], [0, 0, 1, 1], [], []>} : vector<32x512xf32>, vector<512x256xf32>, vector<32x256xf32> -> vector<32x256xf32>
    %57 = arith.maximumf %50, %56 : vector<32x256xf32>
    %c8 = arith.constant 8 : index
    %c0_19 = arith.constant 0 : index
    %58 = vector.load %arg3[%c8, %c0_19] : memref<9x256xi32, #tpu.memory_space<vmem>>, vector<1x256xi32>
    %59 = vector.broadcast %58 : vector<1x256xi32> to vector<512x256xi32>
    %60 = arith.cmpi eq, %2, %59 : vector<512x256xi32>
    %61 = arith.extui %60 : vector<512x256xi1> to vector<512x256xi32>
    %62 = arith.sitofp %61 : vector<512x256xi32> to vector<512x256xf32>
    %cst_20 = arith.constant dense<0.000000e+00> : vector<32x256xf32>
    %63 = tpu.matmul %0, %62, %cst_20 {dimension_numbers = #tpu.dot_dimension_numbers<[1], [0], [0], [1], [0, 0, 1, 1], [], []>} : vector<32x512xf32>, vector<512x256xf32>, vector<32x256xf32> -> vector<32x256xf32>
    %64 = arith.maximumf %57, %63 : vector<32x256xf32>
    %65 = arith.subf %64, %1 : vector<32x256xf32>
    %c0_21 = arith.constant 0 : index
    %c0_22 = arith.constant 0 : index
    %66 = vector.load %arg4[%c0_21, %c0_22] : memref<48x32xf32, #tpu.memory_space<vmem>>, vector<48x32xf32>
    %cst_23 = arith.constant dense<0.000000e+00> : vector<48x256xf32>
    %67 = tpu.matmul %66, %1, %cst_23 {dimension_numbers = #tpu.dot_dimension_numbers<[1], [0], [0], [1], [0, 0, 1, 1], [], []>} : vector<48x32xf32>, vector<32x256xf32>, vector<48x256xf32> -> vector<48x256xf32>
    %c0_24 = arith.constant 0 : index
    %c0_25 = arith.constant 0 : index
    %68 = vector.load %arg5[%c0_24, %c0_25] : memref<48x32xf32, #tpu.memory_space<vmem>>, vector<48x32xf32>
    %cst_26 = arith.constant dense<0.000000e+00> : vector<48x256xf32>
    %69 = tpu.matmul %68, %65, %cst_26 {dimension_numbers = #tpu.dot_dimension_numbers<[1], [0], [0], [1], [0, 0, 1, 1], [], []>} : vector<48x32xf32>, vector<32x256xf32>, vector<48x256xf32> -> vector<48x256xf32>
    %70 = arith.addf %67, %69 : vector<48x256xf32>
    %c0_27 = arith.constant 0 : index
    %c0_28 = arith.constant 0 : index
    %71 = vector.load %arg6[%c0_27, %c0_28] : memref<48x1xf32, #tpu.memory_space<vmem>>, vector<48x1xf32>
    %72 = vector.broadcast %71 : vector<48x1xf32> to vector<48x256xf32>
    %73 = arith.addf %70, %72 : vector<48x256xf32>
    %cst_29 = arith.constant 0.000000e+00 : f32
    %74 = vector.broadcast %cst_29 : f32 to vector<48x256xf32>
    %75 = arith.maximumf %73, %74 : vector<48x256xf32>
    %c0_30 = arith.constant 0 : index
    %c0_31 = arith.constant 0 : index
    %76 = vector.load %arg7[%c0_30, %c0_31] : memref<48x256xf32, #tpu.memory_space<vmem>>, vector<48x256xf32>
    tpu.vector_store %arg7[%c0_30, %c0_31], %75 {strides = array<i32>} : memref<48x256xf32, #tpu.memory_space<vmem>>, vector<48x256xf32>,
    return
  }
  func.func @transform_0(%arg0: i32) -> (i32, i32) {
    %c0_i32 = arith.constant 0 : i32
    %c0_i32_0 = arith.constant 0 : i32
    %c0_i32_1 = arith.constant 0 : i32
    return %c0_i32, %c0_i32_0 : i32, i32
  }
  func.func @transform_1(%arg0: i32) -> (i32, i32) {
    %c0_i32 = arith.constant 0 : i32
    %c0_i32_0 = arith.constant 0 : i32
    return %c0_i32, %arg0 : i32, i32
  }
  func.func @transform_2(%arg0: i32) -> (i32, i32) {
    %c0_i32 = arith.constant 0 : i32
    %c0_i32_0 = arith.constant 0 : i32
    return %c0_i32, %arg0 : i32, i32
  }
  func.func @transform_3(%arg0: i32) -> (i32, i32) {
    %c0_i32 = arith.constant 0 : i32
    %c0_i32_0 = arith.constant 0 : i32
    %c0_i32_1 = arith.constant 0 : i32
    return %c0_i32, %c0_i32_0 : i32, i32
  }
  func.func @transform_4(%arg0: i32) -> (i32, i32) {
    %c0_i32 = arith.constant 0 : i32
    %c0_i32_0 = arith.constant 0 : i32
    %c0_i32_1 = arith.constant 0 : i32
    return %c0_i32, %c0_i32_0 : i32, i32
  }
  func.func @transform_5(%arg0: i32) -> (i32, i32) {
    %c0_i32 = arith.constant 0 : i32
    %c0_i32_0 = arith.constant 0 : i32
    %c0_i32_1 = arith.constant 0 : i32
    return %c0_i32, %c0_i32_0 : i32, i32
  }
  func.func @transform_6(%arg0: i32) -> (i32, i32) {
    %c0_i32 = arith.constant 0 : i32
    %c0_i32_0 = arith.constant 0 : i32
    return %c0_i32, %arg0 : i32, i32
  }
}

</mosaic_0001>

<bundles_post_ra>
// kernel: tpu_custom_call.1
= control target key start
LH: loop header
LB: loop body
LE: loop exit
PB: predicated region body
PF: predicated region fallthrough
CT: control target
= control target key end

     0   :  { %s14677_s0 = inlined_call_operand.vmem [shape: f32[32,512], index: 0, kind: input, shape index: {}]   ;;  %s14678_s1 = inlined_call_operand.hbm [shape: f32[32,512], index: 1, kind: input, shape index: {}]   ;;  %s14679_s2 = inlined_call_operand.hbm [shape: s32[9,512], index: 2, kind: input, shape index: {}]   ;;  %s14680_s3 = inlined_call_operand.vmem [shape: f32[48,32], index: 3, kind: input, shape index: {}]   ;;  %s14681_s4 = inlined_call_operand.vmem [shape: f32[48,32], index: 4, kind: input, shape index: {}]   ;;  %s14682_s5 = inlined_call_operand.vmem [shape: f32[48,1], index: 5, kind: input, shape index: {}]   ;;  %s14683_s6 = inlined_call_operand.hbm [shape: f32[48,512], index: 6, kind: output, shape index: {}]  }
   0x1   :  { %14898 = sst [smem:[#allocation235_spill]] %s14678_s1 }
   0x2   :  { %11 = vsyncpa [#allocation3], 0 }
   0x3   :  { %13 = vsyncpa [#allocation3 + $0x1], 0 }
   0x4   :  { %14 = vsyncpa [#allocation6], 0 }
   0x5   :  { %16 = vsyncpa [#allocation6 + $0x1], 0 }
   0x6   :  { %17 = vsyncpa [#allocation4], 0 }
   0x7   :  { %19 = vsyncpa [#allocation4 + $0x1], 0  ;;  %s9087_s21 = smov 0   ;;  %s9089_s22 = smov 0  }
   0x8   :  { %s9091_s23 = smov 0   ;;  %s9093_s24 = smov 0  }
   0x9 LB: > { %14899 = sst [smem:[#allocation11_spill]] %s9038_s23  ;;  %s9108_s25 = sadd.s32 4294967295, %s9042_s24   ;;  %s9042_s24 = sphi %s9093_s24, %s15721_s24   ;;  %s9038_s23 = sphi %s9091_s23, %s15723_s23   ;;  %s9034_s22 = sphi %s9089_s22, %s15725_s22   ;;  %s9030_s21 = sphi %s9087_s21, %s15724_s21  }
   0xa   : > { %s6430_s26 = sadd.s32 4294967294, %s9042_s24   ;;  %s9112_s27 = sadd.s32 1, %s9042_s24  }
   0xb   : > { %14900 = sst [smem:[#allocation12_spill]] %s9112_s27  ;;  %s53_s28 = sadd.s32 1, %s9038_s23 }
   0xc   : > { %s50_s29 = ssub.s32 %s9042_s24, %s9112_s27  ;;  %p60_p0 = scmp.ne.s32.totalorder %s9038_s23, %s9034_s22 }
   0xd   : > { %p51_p1 = scmp.eq.s32.totalorder %s50_s29, 0  ;;  %p61_p2 = scmp.eq.s32.totalorder %s9042_s24, 0 }
   0xe   : > { %p66_p3 = scmp.ne.s32.totalorder %s9034_s22, %s9030_s21  ;;  %p67_p4 = scmp.eq.s32.totalorder %s9108_s25, 0 }
   0xf   : > { %s9124_s30 = scalar_select %p51_p1, %s9038_s23, %s53_s28  }
  0x10   : > { %p9126_p5 = por %p61_p2, %p60_p0  ;;  %p9130_p6 = por %p67_p4, %p66_p3 }
  0x11   : > { %14901 = sst [smem:[#allocation13_spill]] %s9124_s30  ;;  %p179_p7 = scmp.eq.s32.totalorder %s9108_s25, 1 }
  0x12   : > { %p185_p8 = scmp.eq.s32.totalorder %s6430_s26, 1  ;;  %p6432_p9 = scmp.ge.s32.totalorder %s9042_s24, 2 }
  0x13   : > { %p8803_p10 = scmp.lt.s32.totalorder %s9042_s24, 2  ;;  %p9137_p11 = por %p179_p7, %p60_p0 }
  0x14   : > { %p9141_p12 = por %p185_p8, %p66_p3  ;;  %s9146_s11 = sand.u32 1, %s9038_s23  }
  0x15   : > { %s14684_s12 = sshll.u32 %s9042_s24, 4  ;;  %s6433_s13 = sshll.u32 %s9146_s11, 6 }
  0x16   : > { %s14905_s10 = scalar_select %p9141_p12, 1, 0 }
  0x17   : > { %s14907_s1 = sld [smem:[#allocation235_spill]]  ;;  %s221_s18 = scalar_lea.vmem [#allocation2], %s6433_s13 }
  0x18   : > { %14906 = sst [smem:[#allocation14_spill]] %s14905_s10  ;;  %s229_s19 = sshll.u32 %s221_s18, 4  ;;  %s230_s19 = int_to_ptr.vmem [resolvable:$true] %s229_s19 }
  0x19   : > { %p9157_p13 = pnand %p8803_p10, %p9126_p5  ;;  %p6439_p0 = scmp.ge.s32.totalorder %s9042_s24, 1 }
  0x1a   : > { %s218_s26 = scalar_lea.sflag [#allocation3], %s9146_s11 }
  0x1b   : > { %p8916_p2 = pneg %p9157_p13 }
  0x1d   : > { %s226_s16 = scalar_lea.hbm %s14907_s1, %s14684_s12  ;;  %s8919_s14 = scalar_lea.hbm %s14907_s1, 128 }
  0x1e   : > { %s227_s17 = sshll.u32 %s226_s16, 4  ;;  %s228_s17 = int_to_ptr.hbm [resolvable:$true] %s227_s17 }
  0x1f   : > { %s8912_s28 = sshra.s32 %s228_s17, 4  ;;  %s8913_s28 = int_to_ptr.hbm [resolvable:$true] %s8912_s28 }
  0x20   : > { %s8914_s29 = scalar_lea.hbm %s8913_s28, 64  ;;  %p8920_p5 = scmp.lt.s32.totalorder %s8913_s28, %s14907_s1 }
  0x21   : > { %p8915_p1 = scmp.ne.s32.totalorder %s8913_s28, %s8914_s29  ;;  %p8921_p7 = scmp.lt.s32.totalorder %s8919_s14, %s8914_s29 }
  0x23   : > { %p8917_p3 = pnand %p8916_p2, %p8915_p1  ;;  %p8922_p8 = por %p8921_p7, %p8920_p5 }
  0x25   : > { %p8918_p4 = pneg %p8917_p3 }
  0x27   : > { %p8923_p10 = pnand %p8922_p8, %p8918_p4 }
  0x29   : > { %8926 = shalt.err (!%p8923_p10)
}
  0x2a   : > { %s9044_s18 = smov 512   ;;  %s9045_s12 = smov 256  }
  0x2b   : > { %s9046_s30 = smov 16   ;;  %p259_p1 = scmp.lt.s32.totalorder %s9042_s24, 3 }
  0x2c   : > { %8795 = dma.hbm_to_vmem [thread:$0]  (!%p9157_p13), %s228_s17, 1024, %s230_s19, %s218_s26, %s9044_s18, %s9045_s12, %s9046_s30  }
  0x2d   : > { %s6436_s28 = sshll.u32 %s9146_s11, 5  ;;  %s14909_s29 = sshll.u32 %s9042_s24, 4 }
  0x2e   : > { %s248_s14 = scalar_lea.hbm %s14679_s2, %s14909_s29  ;;  %p9187_p3 = pnand %p6439_p0, %p259_p1 }
  0x2f   : > { %s249_s16 = sshll.u32 %s248_s14, 4  ;;  %s243_s1 = scalar_lea.vmem [#allocation5], %s6436_s28  ;;  %s250_s16 = int_to_ptr.hbm [resolvable:$true] %s249_s16 }
  0x30   : > { %s251_s23 = sshll.u32 %s243_s1, 4  ;;  %s240_s27 = scalar_lea.sflag [#allocation6], %s9146_s11  ;;  %s252_s23 = int_to_ptr.vmem [resolvable:$true] %s251_s23 }
  0x31   : > { %s8942_s10 = sshra.s32 %s250_s16, 4  ;;  %s8949_s29 = scalar_lea.hbm %s14679_s2, 64  ;;  %s8943_s10 = int_to_ptr.hbm [resolvable:$true] %s8942_s10 }
  0x32   : > { %s8944_s17 = scalar_lea.hbm %s8943_s10, 32  ;;  %p8950_p0 = scmp.lt.s32.totalorder %s8943_s10, %s14679_s2 }
  0x33   : > { %p8945_p4 = scmp.ne.s32.totalorder %s8943_s10, %s8944_s17  ;;  %p8951_p8 = scmp.lt.s32.totalorder %s8949_s29, %s8944_s17 }
  0x35   : > { %p8947_p5 = pnand %p8945_p4, %p8916_p2  ;;  %p8952_p10 = por %p8951_p8, %p8950_p0 }
  0x37   : > { %p8948_p7 = pneg %p8947_p5 }
  0x39   : > { %p8953_p1 = pnand %p8952_p10, %p8948_p7 }
  0x3b   : > { %8956 = shalt.err (!%p8953_p1)
}
  0x3c   : > { %8798 = dma.hbm_to_vmem [thread:$0]  (!%p9157_p13), %s250_s16, 512, %s252_s23, %s240_s27, %s9044_s18, %s9045_s12, %s9046_s30  }
  0x3d   : > { %263 = sbr.rel (%p9187_p3) target bundleno = 1147 (0x47b), region = 44 }
  0x42   : > { %s9208_s1 = sand.u32 1, %s9034_s22  }
  0x43   : > { %s6440_s11 = sshll.u32 %s9208_s1, 6  ;;  %s266_s10 = scalar_lea.sflag [#allocation3], %s9208_s1 }
  0x44   : > { %s9212_s28 = scalar_lea.vmem [#allocation2], %s6440_s11 }
  0x45   : > { %9017 = dma.done.wait (%p9130_p6), %s266_s10, 1024  }
  0x46   : > { %9019 = vsyncadd (%p9130_p6), %s266_s10, 4294966272  ;;  %s6441_s23 = sshll.u32 %s9208_s1, 5  ;;  %s276_s27 = scalar_lea.sflag [#allocation6], %s9208_s1 }
  0x47   : > { %s9220_s30 = scalar_lea.vmem [#allocation5], %s6441_s23 }
  0x48   : > { %9021 = dma.done.wait (%p9130_p6), %s276_s27, 512  }
  0x49   : > { %9023 = vsyncadd (%p9130_p6), %s276_s27, 4294966784  ;;  %v341_v0 = vlaneseq  ;;  %v9250_v9 = vld [vmem:[%s9220_s30] ss:$8 sm:$0x3]  ;;  %v14804_v21 = vmov 1.0   ;;  %s8785_s18 = smul.u32 96, %s9208_s1 }
  0x4a   : > { %v9262_v13 = vperm.slane %v9250_v9, 0  ;;  %s8784_s15 = sshll.u32 %s9108_s25, 4  ;;  %s6319_s26 = scalar_lea.sflag [#allocation4], %s9208_s1 }
  0x4b   : > { %v9226_v1 = vshrl.u32 %v341_v0, 7  ;;  %s14629_s14 = scalar_lea.vmem [#allocation7], %s8785_s18  ;;  %s6330_s19 = scalar_lea.hbm %s14683_s6, %s8784_s15 }
  0x4c   : > { %s8992_s11 = scalar_lea.hbm %s14683_s6, 192 }
  0x4d   : > { %14911 = vst [vmem:[#allocation15_spill] sm:$0xff] %v9226_v1  ;;  %v9229_v2 = vadd.s32 376, %v9226_v1  ;;  %v9232_v3 = vadd.s32 368, %v9226_v1  ;;  %v9235_v4 = vadd.s32 504, %v9226_v1  ;;  %v9238_v5 = vadd.s32 120, %v9226_v1 }
  0x4e   : > { %v9241_v6 = vadd.s32 248, %v9226_v1  ;;  %v9244_v7 = vadd.s32 360, %v9226_v1  ;;  %v9247_v8 = vadd.s32 496, %v9226_v1  ;;  %v9253_v10 = vadd.s32 112, %v9226_v1 }
  0x4f   : > { %14912 = vst [vmem:[#allocation16_spill] sm:$0xff] %v9229_v2  ;;  %v9256_v11 = vadd.s32 240, %v9226_v1  ;;  %v9259_v12 = vadd.s32 352, %v9226_v1  ;;  %v9265_v14 = vadd.s32 488, %v9226_v1  ;;  %v9268_v15 = vadd.s32 104, %v9226_v1 }
  0x50   : > { %14913 = vst [vmem:[#allocation17_spill] sm:$0xff] %v9253_v10  ;;  %v9271_v16 = vadd.s32 232, %v9226_v1  ;;  %v9274_v17 = vadd.s32 344, %v9226_v1  ;;  %v9277_v18 = vadd.s32 480, %v9226_v1  ;;  %v9280_v19 = vadd.s32 96, %v9226_v1 }
  0x51   : > { %14914 = vst [vmem:[#allocation18_spill] sm:$0xff] %v9265_v14  ;;  %v9283_v20 = vadd.s32 224, %v9226_v1  ;;  %vm503_vm0 = vcmp.eq.s32.totalorder %v9229_v2, %v9262_v13  ;;  %vm501_vm1 = vcmp.eq.s32.totalorder %v9232_v3, %v9262_v13  ;;  %vm535_vm2 = vcmp.eq.s32.totalorder %v9235_v4, %v9262_v13 }
  0x52   : > { %14915 = vst [vmem:[#allocation19_spill] sm:$0xff] %v9268_v15  ;;  %vm439_vm3 = vcmp.eq.s32.totalorder %v9238_v5, %v9262_v13  ;;  %6602 = vmatpush.msk.msra.mxu2 %vm503_vm0, %v14804_v21  ;;  %6618 = vmatpush.msk.msra.mxu3 %vm535_vm2, %v14804_v21  ;;  %vm471_vm4 = vcmp.eq.s32.totalorder %v9241_v6, %v9262_v13  ;;  %v9300_v22 = vadd.s32 336, %v9226_v1  ;;  %v9303_v23 = vadd.s32 472, %v9226_v1 }
  0x53   : > { %14916 = vst [vmem:[#allocation20_spill] sm:$0xff] %v9271_v16  ;;  %vm533_vm5 = vcmp.eq.s32.totalorder %v9247_v8, %v9262_v13  ;;  %6570 = vmatpush.msk.msra.mxu0 %vm439_vm3, %v14804_v21  ;;  %6586 = vmatpush.msk.msra.mxu1 %vm471_vm4, %v14804_v21  ;;  %vm499_vm6 = vcmp.eq.s32.totalorder %v9244_v7, %v9262_v13  ;;  %v9314_v24 = vadd.s32 88, %v9226_v1  ;;  %v9328_v25 = vadd.s32 216, %v9226_v1 }
  0x54   : > { %14917 = vst [vmem:[#allocation21_spill] sm:$0xff] %v9274_v17  ;;  %vm437_vm7 = vcmp.eq.s32.totalorder %v9253_v10, %v9262_v13  ;;  %vm469_vm8 = vcmp.eq.s32.totalorder %v9256_v11, %v9262_v13  ;;  %6603 = vmatpush.msk.msra.mxu2 %vm501_vm1, %v14804_v21  ;;  %6619 = vmatpush.msk.msra.mxu3 %vm533_vm5, %v14804_v21  ;;  %v9337_v26 = vadd.s32 464, %v9226_v1  ;;  %v9340_v27 = vadd.s32 80, %v9226_v1 }
  0x55   : > { %14918 = vst [vmem:[#allocation22_spill] sm:$0xff] %v9277_v18  ;;  %vm531_vm9 = vcmp.eq.s32.totalorder %v9265_v14, %v9262_v13  ;;  %vm435_vm10 = vcmp.eq.s32.totalorder %v9268_v15, %v9262_v13  ;;  %vm467_vm11 = vcmp.eq.s32.totalorder %v9271_v16, %v9262_v13  ;;  %6571 = vmatpush.msk.msra.mxu0 %vm437_vm7, %v14804_v21  ;;  %v9352_v28 = vadd.s32 208, %v9226_v1 }
  0x56   : > { %14919 = vst [vmem:[#allocation23_spill] sm:$0xff] %v9280_v19  ;;  %6587 = vmatpush.msk.msra.mxu1 %vm469_vm8, %v14804_v21  ;;  %vm497_vm12 = vcmp.eq.s32.totalorder %v9259_v12, %v9262_v13  ;;  %vm529_vm13 = vcmp.eq.s32.totalorder %v9277_v18, %v9262_v13  ;;  %6604 = vmatpush.msk.msra.mxu2 %vm499_vm6, %v14804_v21  ;;  %v9361_v29 = vadd.s32 328, %v9226_v1  ;;  %v9364_v30 = vadd.s32 456, %v9226_v1 }
  0x57   : > { %14920 = vst [vmem:[#allocation24_spill] sm:$0xff] %v9300_v22  ;;  %6620 = vmatpush.msk.msra.mxu3 %vm531_vm9, %v14804_v21  ;;  %vm433_vm14 = vcmp.eq.s32.totalorder %v9280_v19, %v9262_v13  ;;  %vm465_vm15 = vcmp.eq.s32.totalorder %v9283_v20, %v9262_v13  ;;  %6572 = vmatpush.msk.msra.mxu0 %vm435_vm10, %v14804_v21  ;;  %v9373_v31 = vadd.s32 72, %v9226_v1  ;;  %v9376_v32 = vadd.s32 200, %v9226_v1 }
  0x58   : > { %14921 = vst [vmem:[#allocation25_spill] sm:$0xff] %v9314_v24  ;;  %6588 = vmatpush.msk.msra.mxu1 %vm467_vm11, %v14804_v21  ;;  %vm495_vm0 = vcmp.eq.s32.totalorder %v9274_v17, %v9262_v13  ;;  %vm527_vm1 = vcmp.eq.s32.totalorder %v9303_v23, %v9262_v13  ;;  %6605 = vmatpush.msk.msra.mxu2 %vm497_vm12, %v14804_v21  ;;  %v9387_v33 = vadd.s32 320, %v9226_v1  ;;  %v9400_v34 = vadd.s32 448, %v9226_v1 }
  0x59   : > { %14922 = vst [vmem:[#allocation26_spill] sm:$0xff] %v9340_v27  ;;  %6621 = vmatpush.msk.msra.mxu3 %vm529_vm13, %v14804_v21  ;;  %vm431_vm2 = vcmp.eq.s32.totalorder %v9314_v24, %v9262_v13  ;;  %vm463_vm3 = vcmp.eq.s32.totalorder %v9328_v25, %v9262_v13  ;;  %6573 = vmatpush.msk.msra.mxu0 %vm433_vm14, %v14804_v21  ;;  %v9403_v35 = vadd.s32 64, %v9226_v1  ;;  %v9406_v36 = vadd.s32 192, %v9226_v1 }
  0x5a   : > { %14923 = vst [vmem:[#allocation27_spill] sm:$0xff] %v9361_v29  ;;  %6589 = vmatpush.msk.msra.mxu1 %vm465_vm15, %v14804_v21  ;;  %vm493_vm4 = vcmp.eq.s32.totalorder %v9300_v22, %v9262_v13  ;;  %vm525_vm5 = vcmp.eq.s32.totalorder %v9337_v26, %v9262_v13  ;;  %vm429_vm6 = vcmp.eq.s32.totalorder %v9340_v27, %v9262_v13  ;;  %v9421_v37 = vadd.s32 312, %v9226_v1 }
  0x5b   : > { %14924 = vst [vmem:[#allocation28_spill] sm:$0xff] %v9364_v30  ;;  %6606 = vmatpush.msk.msra.mxu2 %vm495_vm0, %v14804_v21  ;;  %6622 = vmatpush.msk.msra.mxu3 %vm527_vm1, %v14804_v21  ;;  %vm461_vm7 = vcmp.eq.s32.totalorder %v9352_v28, %v9262_v13  ;;  %vm491_vm8 = vcmp.eq.s32.totalorder %v9361_v29, %v9262_v13  ;;  %v9424_v38 = vadd.s32 440, %v9226_v1  ;;  %v9439_v39 = vadd.s32 56, %v9226_v1 }
  0x5c   : > { %14925 = vst [vmem:[#allocation29_spill] sm:$0xff] %v9373_v31  ;;  %6574 = vmatpush.msk.msra.mxu0 %vm431_vm2, %v14804_v21  ;;  %6590 = vmatpush.msk.msra.mxu1 %vm463_vm3, %v14804_v21  ;;  %vm523_vm9 = vcmp.eq.s32.totalorder %v9364_v30, %v9262_v13  ;;  %vm427_vm10 = vcmp.eq.s32.totalorder %v9373_v31, %v9262_v13  ;;  %v9442_v40 = vadd.s32 184, %v9226_v1  ;;  %v9459_v41 = vadd.s32 304, %v9226_v1 }
  0x5d   : > { %14926 = vst [vmem:[#allocation30_spill] sm:$0xff] %v9376_v32  ;;  %6607 = vmatpush.msk.msra.mxu2 %vm493_vm4, %v14804_v21  ;;  %6623 = vmatpush.msk.msra.mxu3 %vm525_vm5, %v14804_v21  ;;  %vm459_vm11 = vcmp.eq.s32.totalorder %v9376_v32, %v9262_v13  ;;  %vm489_vm12 = vcmp.eq.s32.totalorder %v9387_v33, %v9262_v13  ;;  %v9472_v42 = vadd.s32 432, %v9226_v1  ;;  %v9475_v43 = vadd.s32 48, %v9226_v1 }
  0x5e   : > { %14927 = vst [vmem:[#allocation31_spill] sm:$0xff] %v9387_v33  ;;  %6575 = vmatpush.msk.msra.mxu0 %vm429_vm6, %v14804_v21  ;;  %6591 = vmatpush.msk.msra.mxu1 %vm461_vm7, %v14804_v21  ;;  %vm521_vm13 = vcmp.eq.s32.totalorder %v9400_v34, %v9262_v13  ;;  %vm425_vm14 = vcmp.eq.s32.totalorder %v9403_v35, %v9262_v13  ;;  %v9478_v44 = vadd.s32 176, %v9226_v1  ;;  %v9493_v45 = vadd.s32 296, %v9226_v1 }
  0x5f   : > { %14928 = vst [vmem:[#allocation32_spill] sm:$0xff] %v9400_v34  ;;  %6608 = vmatpush.msk.msra.mxu2 %vm491_vm8, %v14804_v21  ;;  %6624 = vmatpush.msk.msra.mxu3 %vm523_vm9, %v14804_v21  ;;  %vm457_vm15 = vcmp.eq.s32.totalorder %v9406_v36, %v9262_v13  ;;  %vm487_vm0 = vcmp.eq.s32.totalorder %v9421_v37, %v9262_v13  ;;  %v9496_v46 = vadd.s32 424, %v9226_v1  ;;  %v9511_v47 = vadd.s32 40, %v9226_v1 }
  0x60   : > { %14929 = vst [vmem:[#allocation33_spill] sm:$0xff] %v9403_v35  ;;  %6576 = vmatpush.msk.msra.mxu0 %vm427_vm10, %v14804_v21  ;;  %6592 = vmatpush.msk.msra.mxu1 %vm459_vm11, %v14804_v21  ;;  %vm519_vm1 = vcmp.eq.s32.totalorder %v9424_v38, %v9262_v13  ;;  %vm423_vm2 = vcmp.eq.s32.totalorder %v9439_v39, %v9262_v13  ;;  %v9514_v48 = vadd.s32 168, %v9226_v1  ;;  %v9531_v49 = vadd.s32 288, %v9226_v1 }
  0x61   : > { %14930 = vst [vmem:[#allocation34_spill] sm:$0xff] %v9406_v36  ;;  %6609 = vmatpush.msk.msra.mxu2 %vm489_vm12, %v14804_v21  ;;  %6625 = vmatpush.msk.msra.mxu3 %vm521_vm13, %v14804_v21  ;;  %vm455_vm3 = vcmp.eq.s32.totalorder %v9442_v40, %v9262_v13  ;;  %vm485_vm4 = vcmp.eq.s32.totalorder %v9459_v41, %v9262_v13  ;;  %v9544_v50 = vadd.s32 416, %v9226_v1  ;;  %v9547_v51 = vadd.s32 32, %v9226_v1 }
  0x62   : > { %14931 = vst [vmem:[#allocation35_spill] sm:$0xff] %v9421_v37  ;;  %6577 = vmatpush.msk.msra.mxu0 %vm425_vm14, %v14804_v21  ;;  %6593 = vmatpush.msk.msra.mxu1 %vm457_vm15, %v14804_v21  ;;  %vm517_vm5 = vcmp.eq.s32.totalorder %v9472_v42, %v9262_v13  ;;  %vm421_vm6 = vcmp.eq.s32.totalorder %v9475_v43, %v9262_v13  ;;  %v9550_v52 = vadd.s32 160, %v9226_v1  ;;  %v9565_v53 = vadd.s32 280, %v9226_v1 }
  0x63   : > { %14932 = vst [vmem:[#allocation36_spill] sm:$0xff] %v9424_v38  ;;  %6610 = vmatpush.msk.msra.mxu2 %vm487_vm0, %v14804_v21  ;;  %6626 = vmatpush.msk.msra.mxu3 %vm519_vm1, %v14804_v21  ;;  %vm453_vm7 = vcmp.eq.s32.totalorder %v9478_v44, %v9262_v13  ;;  %vm483_vm8 = vcmp.eq.s32.totalorder %v9493_v45, %v9262_v13  ;;  %v9568_v54 = vadd.s32 408, %v9226_v1  ;;  %v9583_v55 = vadd.s32 24, %v9226_v1 }
  0x64   : > { %14933 = vst [vmem:[#allocation37_spill] sm:$0xff] %v9439_v39  ;;  %6578 = vmatpush.msk.msra.mxu0 %vm423_vm2, %v14804_v21  ;;  %6594 = vmatpush.msk.msra.mxu1 %vm455_vm3, %v14804_v21  ;;  %vm515_vm9 = vcmp.eq.s32.totalorder %v9496_v46, %v9262_v13  ;;  %vm419_vm10 = vcmp.eq.s32.totalorder %v9511_v47, %v9262_v13  ;;  %v9586_v56 = vadd.s32 152, %v9226_v1  ;;  %v9603_v57 = vadd.s32 272, %v9226_v1 }
  0x65   : > { %14934 = vst [vmem:[#allocation38_spill] sm:$0xff] %v9442_v40  ;;  %6611 = vmatpush.msk.msra.mxu2 %vm485_vm4, %v14804_v21  ;;  %6627 = vmatpush.msk.msra.mxu3 %vm517_vm5, %v14804_v21  ;;  %vm451_vm11 = vcmp.eq.s32.totalorder %v9514_v48, %v9262_v13  ;;  %vm481_vm12 = vcmp.eq.s32.totalorder %v9531_v49, %v9262_v13  ;;  %v9616_v58 = vadd.s32 400, %v9226_v1  ;;  %v9619_v59 = vadd.s32 16, %v9226_v1 }
  0x66   : > { %14935 = vst [vmem:[#allocation39_spill] sm:$0xff] %v9459_v41  ;;  %6579 = vmatpush.msk.msra.mxu0 %vm421_vm6, %v14804_v21  ;;  %6595 = vmatpush.msk.msra.mxu1 %vm453_vm7, %v14804_v21  ;;  %vm513_vm13 = vcmp.eq.s32.totalorder %v9544_v50, %v9262_v13  ;;  %vm417_vm14 = vcmp.eq.s32.totalorder %v9547_v51, %v9262_v13  ;;  %v9622_v60 = vadd.s32 144, %v9226_v1  ;;  %v9637_v61 = vadd.s32 264, %v9226_v1 }
  0x67   : > { %14936 = vst [vmem:[#allocation40_spill] sm:$0xff] %v9475_v43  ;;  %6612 = vmatpush.msk.msra.mxu2 %vm483_vm8, %v14804_v21  ;;  %6628 = vmatpush.msk.msra.mxu3 %vm515_vm9, %v14804_v21  ;;  %vm449_vm15 = vcmp.eq.s32.totalorder %v9550_v52, %v9262_v13  ;;  %vm479_vm0 = vcmp.eq.s32.totalorder %v9565_v53, %v9262_v13  ;;  %v9640_v62 = vadd.s32 392, %v9226_v1  ;;  %v9655_v63 = vadd.s32 8, %v9226_v1 }
  0x68   : > { %14937 = vst [vmem:[#allocation41_spill] sm:$0xff] %v9478_v44  ;;  %6580 = vmatpush.msk.msra.mxu0 %vm419_vm10, %v14804_v21  ;;  %6596 = vmatpush.msk.msra.mxu1 %vm451_vm11, %v14804_v21  ;;  %vm511_vm1 = vcmp.eq.s32.totalorder %v9568_v54, %v9262_v13  ;;  %vm415_vm2 = vcmp.eq.s32.totalorder %v9583_v55, %v9262_v13  ;;  %v9658_v0 = vadd.s32 136, %v9226_v1 }
  0x69   : > { %14938 = vst [vmem:[#allocation42_spill] sm:$0xff] %v9493_v45  ;;  %6613 = vmatpush.msk.msra.mxu2 %vm481_vm12, %v14804_v21  ;;  %6629 = vmatpush.msk.msra.mxu3 %vm513_vm13, %v14804_v21  ;;  %vm447_vm3 = vcmp.eq.s32.totalorder %v9586_v56, %v9262_v13  ;;  %vm477_vm4 = vcmp.eq.s32.totalorder %v9603_v57, %v9262_v13 }
  0x6a   : > { %14939 = vst [vmem:[#allocation43_spill] sm:$0xff] %v9496_v46  ;;  %6581 = vmatpush.msk.msra.mxu0 %vm417_vm14, %v14804_v21  ;;  %6597 = vmatpush.msk.msra.mxu1 %vm449_vm15, %v14804_v21  ;;  %vm509_vm5 = vcmp.eq.s32.totalorder %v9616_v58, %v9262_v13  ;;  %vm413_vm6 = vcmp.eq.s32.totalorder %v9619_v59, %v9262_v13 }
  0x6b   : > { %14940 = vst [vmem:[#allocation44_spill] sm:$0xff] %v9511_v47  ;;  %6614 = vmatpush.msk.msra.mxu2 %vm479_vm0, %v14804_v21  ;;  %6630 = vmatpush.msk.msra.mxu3 %vm511_vm1, %v14804_v21  ;;  %vm445_vm7 = vcmp.eq.s32.totalorder %v9622_v60, %v9262_v13  ;;  %vm475_vm8 = vcmp.eq.s32.totalorder %v9637_v61, %v9262_v13 }
  0x6c   : > { %14941 = vst [vmem:[#allocation45_spill] sm:$0xff] %v9514_v48  ;;  %6582 = vmatpush.msk.msra.mxu0 %vm415_vm2, %v14804_v21  ;;  %6598 = vmatpush.msk.msra.mxu1 %vm447_vm3, %v14804_v21  ;;  %vm507_vm9 = vcmp.eq.s32.totalorder %v9640_v62, %v9262_v13  ;;  %vm411_vm10 = vcmp.eq.s32.totalorder %v9655_v63, %v9262_v13 }
  0x6d   : > { %14942 = vst [vmem:[#allocation46_spill] sm:$0xff] %v9531_v49  ;;  %6615 = vmatpush.msk.msra.mxu2 %vm477_vm4, %v14804_v21  ;;  %6631 = vmatpush.msk.msra.mxu3 %vm509_vm5, %v14804_v21  ;;  %vm443_vm11 = vcmp.eq.s32.totalorder %v9658_v0, %v9262_v13  ;;  %vm409_vm15 = vcmp.eq.s32.totalorder %v9226_v1, %v9262_v13 }
  0x6e   : > { %14943 = vst [vmem:[#allocation47_spill] sm:$0xff] %v9544_v50  ;;  %6583 = vmatpush.msk.msra.mxu0 %vm413_vm6, %v14804_v21  ;;  %6599 = vmatpush.msk.msra.mxu1 %vm445_vm7, %v14804_v21 }
  0x6f   : > { %14944 = vst [vmem:[#allocation48_spill] sm:$0xff] %v9547_v51  ;;  %6616 = vmatpush.msk.msra.mxu2 %vm475_vm8, %v14804_v21  ;;  %6632 = vmatpush.msk.msra.mxu3 %vm507_vm9, %v14804_v21 }
  0x70   : > { %14945 = vst [vmem:[#allocation49_spill] sm:$0xff] %v9550_v52  ;;  %6584 = vmatpush.msk.msra.mxu0 %vm411_vm10, %v14804_v21  ;;  %6600 = vmatpush.msk.msra.mxu1 %vm443_vm11, %v14804_v21 }
  0x71   : > { %14946 = vst [vmem:[#allocation50_spill] sm:$0xff] %v9565_v53 }
  0x72   : > { %14947 = vst [vmem:[#allocation51_spill] sm:$0xff] %v9568_v54  ;;  %6585 = vmatpush.msk.msra.mxu0 %vm409_vm15, %v14804_v21 }
  0x73   : > { %14948 = vst [vmem:[#allocation52_spill] sm:$0xff] %v9583_v55  ;;  %v9676_v55 = vadd.s32 384, %v9226_v1 }
  0x74   : > { %14949 = vst [vmem:[#allocation53_spill] sm:$0xff] %v9586_v56  ;;  %v9673_v56 = vadd.s32 256, %v9226_v1 }
  0x75   : > { %14950 = vst [vmem:[#allocation54_spill] sm:$0xff] %v9603_v57  ;;  %vm505_vm13 = vcmp.eq.s32.totalorder %v9676_v55, %v9262_v13 }
  0x76   : > { %14951 = vst [vmem:[#allocation55_spill] sm:$0xff] %v9616_v58  ;;  %v9697_v58 = vperm.slane %v9250_v9, 1  ;;  %vm473_vm12 = vcmp.eq.s32.totalorder %v9673_v56, %v9262_v13  ;;  %v9719_v9 = vld [vmem:[%s14677_s0 + $0x10] sm:$0xff]  ;;  %6633 = vmatpush.msk.msra.mxu3 %vm505_vm13, %v14804_v21 }
  0x77   : > { %14952 = vst [vmem:[#allocation56_spill] sm:$0xff] %v9622_v60  ;;  %v9706_v60 = vadd.s32 128, %v9226_v1  ;;  %6617 = vmatpush.msk.msra.mxu2 %vm473_vm12, %v14804_v21  ;;  %v9745_v1 = vld [vmem:[%s14677_s0] sm:$0xff] }
  0x78   : > { %14953 = vst [vmem:[#allocation57_spill] sm:$0xff] %v9637_v61  ;;  %vm504_vm14 = vcmp.eq.s32.totalorder %v9229_v2, %v9697_v58  ;;  %vm536_vm1 = vcmp.eq.s32.totalorder %v9235_v4, %v9697_v58  ;;  %867 = vmatmul.f32.vlgmr.msra.gmra.mxu2 %v9719_v9  ;;  %vm502_vm2 = vcmp.eq.s32.totalorder %v9232_v3, %v9697_v58 }
  0x79   : > { %14954 = vst [vmem:[#allocation58_spill] sm:$0xff] %v9640_v62  ;;  %vm441_vm0 = vcmp.eq.s32.totalorder %v9706_v60, %v9262_v13  ;;  %6666 = vmatpush.msk.msrb.mxu2 %vm504_vm14, %v14804_v21  ;;  %v9752_v13 = vld [vmem:[%s14677_s0 + $0x8] sm:$0xff]  ;;  %vm440_vm3 = vcmp.eq.s32.totalorder %v9238_v5, %v9697_v58  ;;  %6682 = vmatpush.msk.msrb.mxu3 %vm536_vm1, %v14804_v21 }
  0x7a   : > { %14955 = vst [vmem:[#allocation59_spill] sm:$0xff] %v9655_v63  ;;  %6601 = vmatpush.msk.msra.mxu1 %vm441_vm0, %v14804_v21  ;;  %vm472_vm4 = vcmp.eq.s32.totalorder %v9241_v6, %v9697_v58  ;;  %vm500_vm5 = vcmp.eq.s32.totalorder %v9244_v7, %v9697_v58  ;;  %809 = vmatmul.f32.vlgmr.msra.gmra.mxu0 %v9745_v1 }
  0x7b   : > { %14956 = vst [vmem:[#allocation60_spill] sm:$0xff] %v9658_v0  ;;  %v9724_v0 = vld [vmem:[%s14677_s0 + $0x18] sm:$0xff]  ;;  %6667 = vmatpush.msk.msrb.mxu2 %vm502_vm2, %v14804_v21  ;;  %vm534_vm6 = vcmp.eq.s32.totalorder %v9247_v8, %v9697_v58  ;;  %vm438_vm7 = vcmp.eq.s32.totalorder %v9253_v10, %v9697_v58  ;;  %838 = vmatmul.f32.vlgmr.msra.gmra.mxu1 %v9752_v13  ;;  %v9781_v10 = vld [vmem:[%s14677_s0 + $0x30] sm:$0xff] }
  0x7c   : > { %14957 = vst [vmem:[#allocation61_spill] sm:$0xff] %v9673_v56  ;;  %896 = vmatmul.f32.vlgmr.msra.gmra.mxu3 %v9724_v0  ;;  %6634 = vmatpush.msk.msrb.mxu0 %vm440_vm3, %v14804_v21  ;;  %vm470_vm8 = vcmp.eq.s32.totalorder %v9256_v11, %v9697_v58  ;;  %vm498_vm9 = vcmp.eq.s32.totalorder %v9259_v12, %v9697_v58 }
  0x7d   : > { %14958 = vst [vmem:[#allocation62_spill] sm:$0xff] %v9676_v55  ;;  %6650 = vmatpush.msk.msrb.mxu1 %vm472_vm4, %v14804_v21  ;;  %6668 = vmatpush.msk.msrb.mxu2 %vm500_vm5, %v14804_v21  ;;  %vm532_vm10 = vcmp.eq.s32.totalorder %v9265_v14, %v9697_v58  ;;  %vm436_vm11 = vcmp.eq.s32.totalorder %v9268_v15, %v9697_v58  ;;  %v9800_v15 = vld [vmem:[%s14677_s0 + $0x38] sm:$0xff] }
  0x7e   : > { %14959 = vst [vmem:[#allocation63_spill] sm:$0xff] %v9752_v13  ;;  %6683 = vmatpush.msk.msrb.mxu3 %vm534_vm6, %v14804_v21  ;;  %6635 = vmatpush.msk.msrb.mxu0 %vm438_vm7, %v14804_v21  ;;  %vm468_vm12 = vcmp.eq.s32.totalorder %v9271_v16, %v9697_v58  ;;  %vm496_vm13 = vcmp.eq.s32.totalorder %v9274_v17, %v9697_v58 }
  0x7f   : > { %14960 = vst [vmem:[#allocation64_spill] sm:$0xff] %v9781_v10  ;;  %6651 = vmatpush.msk.msrb.mxu1 %vm470_vm8, %v14804_v21  ;;  %6669 = vmatpush.msk.msrb.mxu2 %vm498_vm9, %v14804_v21  ;;  %vm530_vm14 = vcmp.eq.s32.totalorder %v9277_v18, %v9697_v58  ;;  %vm434_vm15 = vcmp.eq.s32.totalorder %v9280_v19, %v9697_v58  ;;  %v9817_v19 = vld [vmem:[%s14677_s0 + $0x20] sm:$0xff] }
  0x80   : > { %6684 = vmatpush.msk.msrb.mxu3 %vm532_vm10, %v14804_v21  ;;  %870 = vmatmul.f32.gmra.mxu2 %v9781_v10  ;;  %14961 = vst [vmem:[#allocation65_spill] sm:$0xff] %v9800_v15  ;;  %vm466_vm0 = vcmp.eq.s32.totalorder %v9283_v20, %v9697_v58  ;;  %vm494_vm1 = vcmp.eq.s32.totalorder %v9300_v22, %v9697_v58  ;;  %v9824_v22 = vld [vmem:[%s14677_s0 + $0x28] sm:$0xff] }
  0x81   : > { %6636 = vmatpush.msk.msrb.mxu0 %vm436_vm11, %v14804_v21  ;;  %6652 = vmatpush.msk.msrb.mxu1 %vm468_vm12, %v14804_v21  ;;  %vm528_vm2 = vcmp.eq.s32.totalorder %v9303_v23, %v9697_v58  ;;  %14962 = vst [vmem:[#allocation66_spill] sm:$0xff] %v9817_v19  ;;  %vm432_vm3 = vcmp.eq.s32.totalorder %v9314_v24, %v9697_v58 }
  0x82   : > { %6670 = vmatpush.msk.msrb.mxu2 %vm496_vm13, %v14804_v21  ;;  %6685 = vmatpush.msk.msrb.mxu3 %vm530_vm14, %v14804_v21  ;;  %14963 = vst [vmem:[#allocation67_spill] sm:$0xff] %v9824_v22  ;;  %vm464_vm4 = vcmp.eq.s32.totalorder %v9328_v25, %v9697_v58  ;;  %vm492_vm5 = vcmp.eq.s32.totalorder %v9361_v29, %v9697_v58 }
  0x83   : > { %6637 = vmatpush.msk.msrb.mxu0 %vm434_vm15, %v14804_v21  ;;  %6653 = vmatpush.msk.msrb.mxu1 %vm466_vm0, %v14804_v21  ;;  %vm526_vm6 = vcmp.eq.s32.totalorder %v9337_v26, %v9697_v58  ;;  %vm430_vm7 = vcmp.eq.s32.totalorder %v9340_v27, %v9697_v58  ;;  %vm462_vm8 = vcmp.eq.s32.totalorder %v9352_v28, %v9697_v58  ;;  %v9853_v27 = vld [vmem:[%s14677_s0 + $0x50] sm:$0xff] }
  0x84   : > { %899 = vmatmul.f32.gmra.mxu3 %v9800_v15  ;;  %6671 = vmatpush.msk.msrb.mxu2 %vm494_vm1, %v14804_v21  ;;  %vm490_vm9 = vcmp.eq.s32.totalorder %v9387_v33, %v9697_v58  ;;  %vm524_vm10 = vcmp.eq.s32.totalorder %v9364_v30, %v9697_v58  ;;  %14964 = vst [vmem:[#allocation68_spill] sm:$0xff] %v9853_v27 }
  0x85   : > { %6686 = vmatpush.msk.msrb.mxu3 %vm528_vm2, %v14804_v21  ;;  %812 = vmatmul.f32.gmra.mxu0 %v9817_v19  ;;  %vm428_vm11 = vcmp.eq.s32.totalorder %v9373_v31, %v9697_v58  ;;  %vm460_vm12 = vcmp.eq.s32.totalorder %v9376_v32, %v9697_v58  ;;  %vm488_vm13 = vcmp.eq.s32.totalorder %v9421_v37, %v9697_v58  ;;  %v9872_v31 = vld [vmem:[%s14677_s0 + $0x58] sm:$0xff] }
  0x86   : > { %841 = vmatmul.f32.gmra.mxu1 %v9824_v22  ;;  %6638 = vmatpush.msk.msrb.mxu0 %vm432_vm3, %v14804_v21  ;;  %vm522_vm14 = vcmp.eq.s32.totalorder %v9400_v34, %v9697_v58  ;;  %14965 = vst [vmem:[#allocation69_spill] sm:$0xff] %v9872_v31  ;;  %vm426_vm15 = vcmp.eq.s32.totalorder %v9403_v35, %v9697_v58  ;;  %v9889_v35 = vld [vmem:[%s14677_s0 + $0x40] sm:$0xff] }
  0x87   : > { %6654 = vmatpush.msk.msrb.mxu1 %vm464_vm4, %v14804_v21  ;;  %6672 = vmatpush.msk.msrb.mxu2 %vm492_vm5, %v14804_v21  ;;  %vm458_vm0 = vcmp.eq.s32.totalorder %v9406_v36, %v9697_v58  ;;  %vm486_vm1 = vcmp.eq.s32.totalorder %v9459_v41, %v9697_v58  ;;  %vm520_vm2 = vcmp.eq.s32.totalorder %v9424_v38, %v9697_v58  ;;  %v9896_v41 = vld [vmem:[%s14677_s0 + $0x48] sm:$0xff] }
  0x88   : > { %6687 = vmatpush.msk.msrb.mxu3 %vm526_vm6, %v14804_v21  ;;  %6639 = vmatpush.msk.msrb.mxu0 %vm430_vm7, %v14804_v21  ;;  %14966 = vst [vmem:[#allocation70_spill] sm:$0xff] %v9889_v35  ;;  %vm424_vm3 = vcmp.eq.s32.totalorder %v9439_v39, %v9697_v58  ;;  %vm456_vm4 = vcmp.eq.s32.totalorder %v9442_v40, %v9697_v58 }
  0x89   : > { %6655 = vmatpush.msk.msrb.mxu1 %vm462_vm8, %v14804_v21  ;;  %6673 = vmatpush.msk.msrb.mxu2 %vm490_vm9, %v14804_v21  ;;  %14967 = vst [vmem:[#allocation71_spill] sm:$0xff] %v9896_v41  ;;  %vm484_vm5 = vcmp.eq.s32.totalorder %v9493_v45, %v9697_v58  ;;  %vm518_vm6 = vcmp.eq.s32.totalorder %v9472_v42, %v9697_v58 }
  0x8a   : > { %6688 = vmatpush.msk.msrb.mxu3 %vm524_vm10, %v14804_v21  ;;  %873 = vmatmul.f32.gmra.mxu2 %v9853_v27  ;;  %vm422_vm7 = vcmp.eq.s32.totalorder %v9475_v43, %v9697_v58  ;;  %vm454_vm8 = vcmp.eq.s32.totalorder %v9478_v44, %v9697_v58  ;;  %vm482_vm9 = vcmp.eq.s32.totalorder %v9531_v49, %v9697_v58  ;;  %v9925_v43 = vld [vmem:[%s14677_s0 + $0x70] sm:$0xff] }
  0x8b   : > { %6640 = vmatpush.msk.msrb.mxu0 %vm428_vm11, %v14804_v21  ;;  %6656 = vmatpush.msk.msrb.mxu1 %vm460_vm12, %v14804_v21  ;;  %vm516_vm10 = vcmp.eq.s32.totalorder %v9496_v46, %v9697_v58  ;;  %14968 = vst [vmem:[#allocation72_spill] sm:$0xff] %v9925_v43  ;;  %vm420_vm11 = vcmp.eq.s32.totalorder %v9511_v47, %v9697_v58  ;;  %v9944_v47 = vld [vmem:[%s14677_s0 + $0x78] sm:$0xff] }
  0x8c   : > { %6674 = vmatpush.msk.msrb.mxu2 %vm488_vm13, %v14804_v21  ;;  %6689 = vmatpush.msk.msrb.mxu3 %vm522_vm14, %v14804_v21  ;;  %vm452_vm12 = vcmp.eq.s32.totalorder %v9514_v48, %v9697_v58  ;;  %vm480_vm13 = vcmp.eq.s32.totalorder %v9565_v53, %v9697_v58  ;;  %vm514_vm14 = vcmp.eq.s32.totalorder %v9544_v50, %v9697_v58 }
  0x8d   : > { %902 = vmatmul.f32.gmra.mxu3 %v9872_v31  ;;  %6641 = vmatpush.msk.msrb.mxu0 %vm426_vm15, %v14804_v21  ;;  %14969 = vst [vmem:[#allocation73_spill] sm:$0xff] %v9944_v47  ;;  %vm418_vm15 = vcmp.eq.s32.totalorder %v9547_v51, %v9697_v58  ;;  %v9961_v51 = vld [vmem:[%s14677_s0 + $0x60] sm:$0xff] }
  0x8e   : > { %6657 = vmatpush.msk.msrb.mxu1 %vm458_vm0, %v14804_v21  ;;  %6675 = vmatpush.msk.msrb.mxu2 %vm486_vm1, %v14804_v21  ;;  %vm450_vm0 = vcmp.eq.s32.totalorder %v9550_v52, %v9697_v58  ;;  %vm478_vm1 = vcmp.eq.s32.totalorder %v9603_v57, %v9697_v58  ;;  %v9971_v57 = vld [vmem:[%s14677_s0 + $0x68] sm:$0xff] }
  0x8f   : > { %6690 = vmatpush.msk.msrb.mxu3 %vm520_vm2, %v14804_v21  ;;  %815 = vmatmul.f32.gmra.mxu0 %v9889_v35  ;;  %vm512_vm2 = vcmp.eq.s32.totalorder %v9568_v54, %v9697_v58  ;;  %14970 = vst [vmem:[#allocation74_spill] sm:$0xff] %v9971_v57  ;;  %v14971_v52 = vld [vmem:[#allocation52_spill] sm:$0xff]  ;;  %v14972_v54 = vld [vmem:[#allocation53_spill] sm:$0xff] }
  0x90   : > { %844 = vmatmul.f32.gmra.mxu1 %v9896_v41  ;;  %6642 = vmatpush.msk.msrb.mxu0 %vm424_vm3, %v14804_v21  ;;  %vm416_vm3 = vcmp.eq.s32.totalorder %v14971_v52, %v9697_v58 }
  0x91   : > { %6658 = vmatpush.msk.msrb.mxu1 %vm456_vm4, %v14804_v21  ;;  %6676 = vmatpush.msk.msrb.mxu2 %vm484_vm5, %v14804_v21  ;;  %vm448_vm4 = vcmp.eq.s32.totalorder %v14972_v54, %v9697_v58  ;;  %vm476_vm5 = vcmp.eq.s32.totalorder %v9637_v61, %v9697_v58  ;;  %v14974_v54 = vld [vmem:[#allocation56_spill] sm:$0xff] }
  0x92   : > { %6691 = vmatpush.msk.msrb.mxu3 %vm518_vm6, %v14804_v21  ;;  %6643 = vmatpush.msk.msrb.mxu0 %vm422_vm7, %v14804_v21  ;;  %vm414_vm7 = vcmp.eq.s32.totalorder %v9619_v59, %v9697_v58 }
  0x93   : > { %6659 = vmatpush.msk.msrb.mxu1 %vm454_vm8, %v14804_v21  ;;  %6677 = vmatpush.msk.msrb.mxu2 %vm482_vm9, %v14804_v21  ;;  %vm446_vm8 = vcmp.eq.s32.totalorder %v14974_v54, %v9697_v58  ;;  %vm474_vm9 = vcmp.eq.s32.totalorder %v9673_v56, %v9697_v58 }
  0x94   : > { %6692 = vmatpush.msk.msrb.mxu3 %vm516_vm10, %v14804_v21  ;;  %876 = vmatmul.f32.gmra.mxu2 %v9925_v43  ;;  %v9964_v43 = vld [vmem:[%s9220_s30 + $0x1] ss:$8 sm:$0x3]  ;;  %vm508_vm10 = vcmp.eq.s32.totalorder %v9640_v62, %v9697_v58 }
  0x95   : > { %6644 = vmatpush.msk.msrb.mxu0 %vm420_vm11, %v14804_v21  ;;  %6660 = vmatpush.msk.msrb.mxu1 %vm452_vm12, %v14804_v21  ;;  %v9988_v52 = vperm.slane %v9964_v43, 0  ;;  %vm412_vm11 = vcmp.eq.s32.totalorder %v9655_v63, %v9697_v58  ;;  %v14976_v62 = vld [vmem:[#allocation15_spill] sm:$0xff] }
  0x96   : > { %6678 = vmatpush.msk.msrb.mxu2 %vm480_vm13, %v14804_v21  ;;  %6693 = vmatpush.msk.msrb.mxu3 %vm514_vm14, %v14804_v21  ;;  %vm506_vm13 = vcmp.eq.s32.totalorder %v9676_v55, %v9697_v58 }
  0x97   : > { %905 = vmatmul.f32.gmra.mxu3 %v9944_v47  ;;  %6645 = vmatpush.msk.msrb.mxu0 %vm418_vm15, %v14804_v21  ;;  %v14973_v47 = vld [vmem:[#allocation55_spill] sm:$0xff]  ;;  %vm1123_vm14 = vcmp.eq.s32.totalorder %v9229_v2, %v9988_v52  ;;  %vm410_vm15 = vcmp.eq.s32.totalorder %v14976_v62, %v9697_v58 }
  0x98   : > { %6661 = vmatpush.msk.msrb.mxu1 %vm450_vm0, %v14804_v21  ;;  %6679 = vmatpush.msk.msrb.mxu2 %vm478_vm1, %v14804_v21  ;;  %vm510_vm6 = vcmp.eq.s32.totalorder %v14973_v47, %v9697_v58  ;;  %vm442_vm0 = vcmp.eq.s32.totalorder %v9706_v60, %v9697_v58  ;;  %vm1121_vm1 = vcmp.eq.s32.totalorder %v9232_v3, %v9988_v52 }
  0x99   : > { %6694 = vmatpush.msk.msrb.mxu3 %vm512_vm2, %v14804_v21  ;;  %818 = vmatmul.f32.gmra.mxu0 %v9961_v51  ;;  %vm1155_vm2 = vcmp.eq.s32.totalorder %v9235_v4, %v9988_v52 }
  0x9a   : > { %847 = vmatmul.f32.gmra.mxu1 %v9971_v57  ;;  %6646 = vmatpush.msk.msrb.mxu0 %vm416_vm3, %v14804_v21  ;;  %v14975_v57 = vld [vmem:[#allocation60_spill] sm:$0xff]  ;;  %vm1059_vm3 = vcmp.eq.s32.totalorder %v9238_v5, %v9988_v52 }
  0x9b   : > { %6662 = vmatpush.msk.msrb.mxu1 %vm448_vm4, %v14804_v21  ;;  %6680 = vmatpush.msk.msrb.mxu2 %vm476_vm5, %v14804_v21  ;;  %vm444_vm12 = vcmp.eq.s32.totalorder %v14975_v57, %v9697_v58  ;;  %vm1091_vm4 = vcmp.eq.s32.totalorder %v9241_v6, %v9988_v52  ;;  %vm1119_vm5 = vcmp.eq.s32.totalorder %v9244_v7, %v9988_v52  ;;  %v14977_v58 = vld [vmem:[#allocation17_spill] sm:$0xff] }
  0x9c   : > { %6695 = vmatpush.msk.msrb.mxu3 %vm510_vm6, %v14804_v21  ;;  %6647 = vmatpush.msk.msrb.mxu0 %vm414_vm7, %v14804_v21  ;;  %vm1153_vm6 = vcmp.eq.s32.totalorder %v9247_v8, %v9988_v52  ;;  %vm1057_vm7 = vcmp.eq.s32.totalorder %v14977_v58, %v9988_v52 }
  0x9d   : > { %6663 = vmatpush.msk.msrb.mxu1 %vm446_vm8, %v14804_v21  ;;  %6681 = vmatpush.msk.msrb.mxu2 %vm474_vm9, %v14804_v21  ;;  %vm1089_vm8 = vcmp.eq.s32.totalorder %v9256_v11, %v9988_v52  ;;  %vm1117_vm9 = vcmp.eq.s32.totalorder %v9259_v12, %v9988_v52 }
  0x9e   : > { %6696 = vmatpush.msk.msrb.mxu3 %vm508_vm10, %v14804_v21  ;;  %983 = vmatmul.f32.vlgmr.msrb.gmra.mxu2 %v9719_v9  ;;  %vm1151_vm10 = vcmp.eq.s32.totalorder %v9265_v14, %v9988_v52  ;;  %v14979_v14 = vld [vmem:[#allocation23_spill] sm:$0xff] }
  0x9f   : > { %6648 = vmatpush.msk.msrb.mxu0 %vm412_vm11, %v14804_v21  ;;  %6664 = vmatpush.msk.msrb.mxu1 %vm444_vm12, %v14804_v21  ;;  %vm1087_vm12 = vcmp.eq.s32.totalorder %v9271_v16, %v9988_v52  ;;  %v14980_v16 = vld [vmem:[#allocation24_spill] sm:$0xff] }
  0xa0   : > { %6697 = vmatpush.msk.msrb.mxu3 %vm506_vm13, %v14804_v21  ;;  %6859 = vmatpush.msk.msra.mxu2 %vm1123_vm14, %v14804_v21  ;;  %vm1115_vm13 = vcmp.eq.s32.totalorder %v9274_v17, %v9988_v52  ;;  %vm1149_vm14 = vcmp.eq.s32.totalorder %v9277_v18, %v9988_v52 }
  0xa1   : > { %1012 = vmatmul.f32.vlgmr.msrb.gmra.mxu3 %v9724_v0  ;;  %6649 = vmatpush.msk.msrb.mxu0 %vm410_vm15, %v14804_v21  ;;  %vm1053_vm15 = vcmp.eq.s32.totalorder %v14979_v14, %v9988_v52 }
  0xa2   : > { %6665 = vmatpush.msk.msrb.mxu1 %vm442_vm0, %v14804_v21  ;;  %6860 = vmatpush.msk.msra.mxu2 %vm1121_vm1, %v14804_v21  ;;  %vm1085_vm0 = vcmp.eq.s32.totalorder %v9283_v20, %v9988_v52  ;;  %vm1113_vm1 = vcmp.eq.s32.totalorder %v14980_v16, %v9988_v52 }
  0xa3   : > { %6875 = vmatpush.msk.msra.mxu3 %vm1155_vm2, %v14804_v21  ;;  %925 = vmatmul.f32.vlgmr.msrb.gmra.mxu0 %v9745_v1  ;;  %vm1147_vm2 = vcmp.eq.s32.totalorder %v9303_v23, %v9988_v52 }
  0xa4   : > { %954 = vmatmul.f32.vlgmr.msrb.gmra.mxu1 %v9752_v13  ;;  %6827 = vmatpush.msk.msra.mxu0 %vm1059_vm3, %v14804_v21  ;;  %v14978_v13 = vld [vmem:[#allocation19_spill] sm:$0xff]  ;;  %vm1051_vm3 = vcmp.eq.s32.totalorder %v9314_v24, %v9988_v52 }
  0xa5   : > { %6843 = vmatpush.msk.msra.mxu1 %vm1091_vm4, %v14804_v21  ;;  %6861 = vmatpush.msk.msra.mxu2 %vm1119_vm5, %v14804_v21  ;;  %vm1055_vm11 = vcmp.eq.s32.totalorder %v14978_v13, %v9988_v52  ;;  %vm1083_vm4 = vcmp.eq.s32.totalorder %v9328_v25, %v9988_v52  ;;  %vm1111_vm5 = vcmp.eq.s32.totalorder %v9361_v29, %v9988_v52 }
  0xa6   : > { %6876 = vmatpush.msk.msra.mxu3 %vm1153_vm6, %v14804_v21  ;;  %6828 = vmatpush.msk.msra.mxu0 %vm1057_vm7, %v14804_v21  ;;  %vm1145_vm6 = vcmp.eq.s32.totalorder %v9337_v26, %v9988_v52 }
  0xa7   : > { %6844 = vmatpush.msk.msra.mxu1 %vm1089_vm8, %v14804_v21  ;;  %6862 = vmatpush.msk.msra.mxu2 %vm1117_vm9, %v14804_v21  ;;  %vm1081_vm8 = vcmp.eq.s32.totalorder %v9352_v28, %v9988_v52  ;;  %vm1109_vm9 = vcmp.eq.s32.totalorder %v9387_v33, %v9988_v52 }
  0xa8   : > { %6877 = vmatpush.msk.msra.mxu3 %vm1151_vm10, %v14804_v21  ;;  %986 = vmatmul.f32.gmra.mxu2 %v9781_v10  ;;  %vm1143_vm10 = vcmp.eq.s32.totalorder %v9364_v30, %v9988_v52  ;;  %v14983_v30 = vld [vmem:[#allocation33_spill] sm:$0xff] }
  0xa9   : > { %6829 = vmatpush.msk.msra.mxu0 %vm1055_vm11, %v14804_v21  ;;  %6845 = vmatpush.msk.msra.mxu1 %vm1087_vm12, %v14804_v21  ;;  %vm1079_vm12 = vcmp.eq.s32.totalorder %v9376_v32, %v9988_v52  ;;  %v14984_v32 = vld [vmem:[#allocation39_spill] sm:$0xff] }
  0xaa   : > { %6863 = vmatpush.msk.msra.mxu2 %vm1115_vm13, %v14804_v21  ;;  %6878 = vmatpush.msk.msra.mxu3 %vm1149_vm14, %v14804_v21  ;;  %vm1107_vm13 = vcmp.eq.s32.totalorder %v9421_v37, %v9988_v52  ;;  %vm1141_vm14 = vcmp.eq.s32.totalorder %v9400_v34, %v9988_v52 }
  0xab   : > { %1015 = vmatmul.f32.gmra.mxu3 %v9800_v15  ;;  %6830 = vmatpush.msk.msra.mxu0 %vm1053_vm15, %v14804_v21  ;;  %v14981_v15 = vld [vmem:[#allocation26_spill] sm:$0xff]  ;;  %vm1045_vm15 = vcmp.eq.s32.totalorder %v14983_v30, %v9988_v52 }
  0xac   : > { %6846 = vmatpush.msk.msra.mxu1 %vm1085_vm0, %v14804_v21  ;;  %6864 = vmatpush.msk.msra.mxu2 %vm1113_vm1, %v14804_v21  ;;  %vm1049_vm7 = vcmp.eq.s32.totalorder %v14981_v15, %v9988_v52  ;;  %vm1077_vm0 = vcmp.eq.s32.totalorder %v9406_v36, %v9988_v52  ;;  %vm1105_vm1 = vcmp.eq.s32.totalorder %v14984_v32, %v9988_v52 }
  0xad   : > { %6879 = vmatpush.msk.msra.mxu3 %vm1147_vm2, %v14804_v21  ;;  %928 = vmatmul.f32.gmra.mxu0 %v9817_v19  ;;  %vm1139_vm2 = vcmp.eq.s32.totalorder %v9424_v38, %v9988_v52 }
  0xae   : > { %957 = vmatmul.f32.gmra.mxu1 %v9824_v22  ;;  %6831 = vmatpush.msk.msra.mxu0 %vm1051_vm3, %v14804_v21  ;;  %v14982_v22 = vld [vmem:[#allocation29_spill] sm:$0xff]  ;;  %vm1043_vm3 = vcmp.eq.s32.totalorder %v9439_v39, %v9988_v52 }
  0xaf   : > { %6847 = vmatpush.msk.msra.mxu1 %vm1083_vm4, %v14804_v21  ;;  %6865 = vmatpush.msk.msra.mxu2 %vm1111_vm5, %v14804_v21  ;;  %vm1047_vm11 = vcmp.eq.s32.totalorder %v14982_v22, %v9988_v52  ;;  %vm1075_vm4 = vcmp.eq.s32.totalorder %v9442_v40, %v9988_v52  ;;  %vm1103_vm5 = vcmp.eq.s32.totalorder %v9493_v45, %v9988_v52 }
  0xb0   : > { %6880 = vmatpush.msk.msra.mxu3 %vm1145_vm6, %v14804_v21  ;;  %6832 = vmatpush.msk.msra.mxu0 %vm1049_vm7, %v14804_v21  ;;  %vm1137_vm6 = vcmp.eq.s32.totalorder %v9472_v42, %v9988_v52 }
  0xb1   : > { %6848 = vmatpush.msk.msra.mxu1 %vm1081_vm8, %v14804_v21  ;;  %6866 = vmatpush.msk.msra.mxu2 %vm1109_vm9, %v14804_v21  ;;  %vm1073_vm8 = vcmp.eq.s32.totalorder %v9478_v44, %v9988_v52  ;;  %vm1101_vm9 = vcmp.eq.s32.totalorder %v9531_v49, %v9988_v52  ;;  %v14988_v49 = vld [vmem:[#allocation48_spill] sm:$0xff] }
  0xb2   : > { %6881 = vmatpush.msk.msra.mxu3 %vm1143_vm10, %v14804_v21  ;;  %989 = vmatmul.f32.gmra.mxu2 %v9853_v27  ;;  %vm1135_vm10 = vcmp.eq.s32.totalorder %v9496_v46, %v9988_v52  ;;  %v14987_v46 = vld [vmem:[#allocation72_spill] sm:$0xff] }
  0xb3   : > { %6833 = vmatpush.msk.msra.mxu0 %vm1047_vm11, %v14804_v21  ;;  %6849 = vmatpush.msk.msra.mxu1 %vm1079_vm12, %v14804_v21  ;;  %vm1071_vm12 = vcmp.eq.s32.totalorder %v9514_v48, %v9988_v52  ;;  %v14989_v48 = vld [vmem:[#allocation49_spill] sm:$0xff] }
  0xb4   : > { %6867 = vmatpush.msk.msra.mxu2 %vm1107_vm13, %v14804_v21  ;;  %6882 = vmatpush.msk.msra.mxu3 %vm1141_vm14, %v14804_v21  ;;  %vm1099_vm13 = vcmp.eq.s32.totalorder %v9565_v53, %v9988_v52  ;;  %vm1133_vm14 = vcmp.eq.s32.totalorder %v9544_v50, %v9988_v52  ;;  %v14991_v50 = vld [vmem:[#allocation51_spill] sm:$0xff] }
  0xb5   : > { %1018 = vmatmul.f32.gmra.mxu3 %v9872_v31  ;;  %6834 = vmatpush.msk.msra.mxu0 %vm1045_vm15, %v14804_v21  ;;  %v14985_v31 = vld [vmem:[#allocation40_spill] sm:$0xff]  ;;  %vm1037_vm15 = vcmp.eq.s32.totalorder %v14988_v49, %v9988_v52 }
  0xb6   : > { %6850 = vmatpush.msk.msra.mxu1 %vm1077_vm0, %v14804_v21  ;;  %6868 = vmatpush.msk.msra.mxu2 %vm1105_vm1, %v14804_v21  ;;  %vm1041_vm7 = vcmp.eq.s32.totalorder %v14985_v31, %v9988_v52  ;;  %vm1069_vm0 = vcmp.eq.s32.totalorder %v14989_v48, %v9988_v52  ;;  %v14993_v49 = vld [vmem:[#allocation52_spill] sm:$0xff] }
  0xb7   : > { %6883 = vmatpush.msk.msra.mxu3 %vm1139_vm2, %v14804_v21  ;;  %931 = vmatmul.f32.gmra.mxu0 %v9889_v35  ;;  %vm1131_vm2 = vcmp.eq.s32.totalorder %v14991_v50, %v9988_v52 }
  0xb8   : > { %960 = vmatmul.f32.gmra.mxu1 %v9896_v41  ;;  %6835 = vmatpush.msk.msra.mxu0 %vm1043_vm3, %v14804_v21  ;;  %v14986_v41 = vld [vmem:[#allocation44_spill] sm:$0xff]  ;;  %vm1035_vm3 = vcmp.eq.s32.totalorder %v14993_v49, %v9988_v52  ;;  %v10199_v49 = vperm.slane %v9964_v43, 1  ;;  %v14997_v43 = vld [vmem:[#allocation63_spill] sm:$0xff] }
  0xb9   : > { %6851 = vmatpush.msk.msra.mxu1 %vm1075_vm4, %v14804_v21  ;;  %6869 = vmatpush.msk.msra.mxu2 %vm1103_vm5, %v14804_v21  ;;  %vm1039_vm11 = vcmp.eq.s32.totalorder %v14986_v41, %v9988_v52  ;;  %v14990_v41 = vld [vmem:[#allocation54_spill] sm:$0xff]  ;;  %vm1095_vm5 = vcmp.eq.s32.totalorder %v9637_v61, %v9988_v52 }
  0xba   : > { %6884 = vmatpush.msk.msra.mxu3 %vm1137_vm6, %v14804_v21  ;;  %6836 = vmatpush.msk.msra.mxu0 %vm1041_vm7, %v14804_v21  ;;  %vm1097_vm1 = vcmp.eq.s32.totalorder %v14990_v41, %v9988_v52  ;;  %v14994_v41 = vld [vmem:[#allocation53_spill] sm:$0xff]  ;;  %vm1129_vm6 = vcmp.eq.s32.totalorder %v14973_v47, %v9988_v52  ;;  %vm1033_vm7 = vcmp.eq.s32.totalorder %v9619_v59, %v9988_v52  ;;  %v14996_v47 = vld [vmem:[#allocation58_spill] sm:$0xff] }
  0xbb   : > { %6852 = vmatpush.msk.msra.mxu1 %vm1073_vm8, %v14804_v21  ;;  %6870 = vmatpush.msk.msra.mxu2 %vm1101_vm9, %v14804_v21  ;;  %vm1067_vm4 = vcmp.eq.s32.totalorder %v14994_v41, %v9988_v52  ;;  %vm1065_vm8 = vcmp.eq.s32.totalorder %v14974_v54, %v9988_v52  ;;  %vm1093_vm9 = vcmp.eq.s32.totalorder %v9673_v56, %v9988_v52 }
  0xbc   : > { %6885 = vmatpush.msk.msra.mxu3 %vm1135_vm10, %v14804_v21  ;;  %992 = vmatmul.f32.gmra.mxu2 %v14987_v46  ;;  %v14992_v46 = vld [vmem:[#allocation73_spill] sm:$0xff]  ;;  %vm1127_vm10 = vcmp.eq.s32.totalorder %v14996_v47, %v9988_v52 }
  0xbd   : > { %6837 = vmatpush.msk.msra.mxu0 %vm1039_vm11, %v14804_v21  ;;  %6853 = vmatpush.msk.msra.mxu1 %vm1071_vm12, %v14804_v21  ;;  %vm1031_vm11 = vcmp.eq.s32.totalorder %v9655_v63, %v9988_v52  ;;  %vm1063_vm12 = vcmp.eq.s32.totalorder %v14975_v57, %v9988_v52 }
  0xbe   : > { %6871 = vmatpush.msk.msra.mxu2 %vm1099_vm13, %v14804_v21  ;;  %6886 = vmatpush.msk.msra.mxu3 %vm1133_vm14, %v14804_v21  ;;  %vm1125_vm13 = vcmp.eq.s32.totalorder %v9676_v55, %v9988_v52  ;;  %vm1124_vm14 = vcmp.eq.s32.totalorder %v9229_v2, %v10199_v49 }
  0xbf   : > { %1021 = vmatmul.f32.gmra.mxu3 %v14992_v46  ;;  %6838 = vmatpush.msk.msra.mxu0 %vm1037_vm15, %v14804_v21  ;;  %v14995_v46 = vld [vmem:[#allocation74_spill] sm:$0xff]  ;;  %vm1029_vm15 = vcmp.eq.s32.totalorder %v14976_v62, %v9988_v52 }
  0xc0   : > { %6854 = vmatpush.msk.msra.mxu1 %vm1069_vm0, %v14804_v21  ;;  %6872 = vmatpush.msk.msra.mxu2 %vm1097_vm1, %v14804_v21  ;;  %vm1061_vm0 = vcmp.eq.s32.totalorder %v9706_v60, %v9988_v52  ;;  %vm1122_vm1 = vcmp.eq.s32.totalorder %v9232_v3, %v10199_v49  ;;  %v14998_v52 = vld [vmem:[#allocation18_spill] sm:$0xff] }
  0xc1   : > { %6887 = vmatpush.msk.msra.mxu3 %vm1131_vm2, %v14804_v21  ;;  %934 = vmatmul.f32.gmra.mxu0 %v9961_v51  ;;  %vm1156_vm2 = vcmp.eq.s32.totalorder %v9235_v4, %v10199_v49 }
  0xc2   : > { %963 = vmatmul.f32.gmra.mxu1 %v14995_v46  ;;  %6839 = vmatpush.msk.msra.mxu0 %vm1035_vm3, %v14804_v21  ;;  %vm1060_vm3 = vcmp.eq.s32.totalorder %v9238_v5, %v10199_v49 }
  0xc3   : > { %6855 = vmatpush.msk.msra.mxu1 %vm1067_vm4, %v14804_v21  ;;  %6873 = vmatpush.msk.msra.mxu2 %vm1095_vm5, %v14804_v21  ;;  %vm1092_vm4 = vcmp.eq.s32.totalorder %v9241_v6, %v10199_v49  ;;  %vm1120_vm5 = vcmp.eq.s32.totalorder %v9244_v7, %v10199_v49 }
  0xc4   : > { %6888 = vmatpush.msk.msra.mxu3 %vm1129_vm6, %v14804_v21  ;;  %6840 = vmatpush.msk.msra.mxu0 %vm1033_vm7, %v14804_v21  ;;  %vm1154_vm6 = vcmp.eq.s32.totalorder %v9247_v8, %v10199_v49  ;;  %vm1058_vm7 = vcmp.eq.s32.totalorder %v14977_v58, %v10199_v49 }
  0xc5   : > { %6856 = vmatpush.msk.msra.mxu1 %vm1065_vm8, %v14804_v21  ;;  %6874 = vmatpush.msk.msra.mxu2 %vm1093_vm9, %v14804_v21  ;;  %vm1090_vm8 = vcmp.eq.s32.totalorder %v9256_v11, %v10199_v49  ;;  %vm1118_vm9 = vcmp.eq.s32.totalorder %v9259_v12, %v10199_v49 }
  0xc6   : > { %6889 = vmatpush.msk.msra.mxu3 %vm1127_vm10, %v14804_v21  ;;  %1487 = vmatmul.f32.vlgmr.msra.gmra.mxu2 %v9719_v9  ;;  %vm1152_vm10 = vcmp.eq.s32.totalorder %v14998_v52, %v10199_v49 }
  0xc7   : > { %6841 = vmatpush.msk.msra.mxu0 %vm1031_vm11, %v14804_v21  ;;  %6857 = vmatpush.msk.msra.mxu1 %vm1063_vm12, %v14804_v21  ;;  %vm1056_vm11 = vcmp.eq.s32.totalorder %v14978_v13, %v10199_v49 }
  0xc8   : > { %6890 = vmatpush.msk.msra.mxu3 %vm1125_vm13, %v14804_v21  ;;  %6923 = vmatpush.msk.msrb.mxu2 %vm1124_vm14, %v14804_v21  ;;  %vm1116_vm13 = vcmp.eq.s32.totalorder %v9274_v17, %v10199_v49  ;;  %vm1150_vm14 = vcmp.eq.s32.totalorder %v9277_v18, %v10199_v49 }
  0xc9   : > { %1516 = vmatmul.f32.vlgmr.msra.gmra.mxu3 %v9724_v0  ;;  %6842 = vmatpush.msk.msra.mxu0 %vm1029_vm15, %v14804_v21  ;;  %vm1054_vm15 = vcmp.eq.s32.totalorder %v14979_v14, %v10199_v49 }
  0xca   : > { %6858 = vmatpush.msk.msra.mxu1 %vm1061_vm0, %v14804_v21  ;;  %6924 = vmatpush.msk.msrb.mxu2 %vm1122_vm1, %v14804_v21  ;;  %vm1086_vm0 = vcmp.eq.s32.totalorder %v9283_v20, %v10199_v49  ;;  %vm1114_vm1 = vcmp.eq.s32.totalorder %v14980_v16, %v10199_v49 }
  0xcb   : > { %6939 = vmatpush.msk.msrb.mxu3 %vm1156_vm2, %v14804_v21  ;;  %1429 = vmatmul.f32.vlgmr.msra.gmra.mxu0 %v9745_v1  ;;  %vm1148_vm2 = vcmp.eq.s32.totalorder %v9303_v23, %v10199_v49 }
  0xcc   : > { %1458 = vmatmul.f32.vlgmr.msra.gmra.mxu1 %v14997_v43  ;;  %6891 = vmatpush.msk.msrb.mxu0 %vm1060_vm3, %v14804_v21  ;;  %v14999_v43 = vld [vmem:[#allocation20_spill] sm:$0xff]  ;;  %vm1052_vm3 = vcmp.eq.s32.totalorder %v9314_v24, %v10199_v49  ;;  %v15001_v24 = vld [vmem:[#allocation67_spill] sm:$0xff] }
  0xcd   : > { %6907 = vmatpush.msk.msrb.mxu1 %vm1092_vm4, %v14804_v21  ;;  %6925 = vmatpush.msk.msrb.mxu2 %vm1120_vm5, %v14804_v21  ;;  %vm1088_vm12 = vcmp.eq.s32.totalorder %v14999_v43, %v10199_v49  ;;  %vm1084_vm4 = vcmp.eq.s32.totalorder %v9328_v25, %v10199_v49  ;;  %vm1112_vm5 = vcmp.eq.s32.totalorder %v9361_v29, %v10199_v49 }
  0xce   : > { %6940 = vmatpush.msk.msrb.mxu3 %vm1154_vm6, %v14804_v21  ;;  %6892 = vmatpush.msk.msrb.mxu0 %vm1058_vm7, %v14804_v21  ;;  %vm1146_vm6 = vcmp.eq.s32.totalorder %v9337_v26, %v10199_v49  ;;  %vm1050_vm7 = vcmp.eq.s32.totalorder %v14981_v15, %v10199_v49 }
  0xcf   : > { %6908 = vmatpush.msk.msrb.mxu1 %vm1090_vm8, %v14804_v21  ;;  %6926 = vmatpush.msk.msrb.mxu2 %vm1118_vm9, %v14804_v21  ;;  %vm1082_vm8 = vcmp.eq.s32.totalorder %v9352_v28, %v10199_v49  ;;  %vm1110_vm9 = vcmp.eq.s32.totalorder %v9387_v33, %v10199_v49 }
  0xd0   : > { %6941 = vmatpush.msk.msrb.mxu3 %vm1152_vm10, %v14804_v21  ;;  %1490 = vmatmul.f32.gmra.mxu2 %v9781_v10  ;;  %v15000_v10 = vld [vmem:[#allocation65_spill] sm:$0xff] }
  0xd1   : > { %6893 = vmatpush.msk.msrb.mxu0 %vm1056_vm11, %v14804_v21  ;;  %6909 = vmatpush.msk.msrb.mxu1 %vm1088_vm12, %v14804_v21  ;;  %vm1048_vm11 = vcmp.eq.s32.totalorder %v14982_v22, %v10199_v49 }
  0xd2   : > { %6927 = vmatpush.msk.msrb.mxu2 %vm1116_vm13, %v14804_v21  ;;  %6942 = vmatpush.msk.msrb.mxu3 %vm1150_vm14, %v14804_v21  ;;  %vm1108_vm13 = vcmp.eq.s32.totalorder %v9421_v37, %v10199_v49  ;;  %vm1142_vm14 = vcmp.eq.s32.totalorder %v9400_v34, %v10199_v49 }
  0xd3   : > { %1519 = vmatmul.f32.gmra.mxu3 %v15000_v10  ;;  %6894 = vmatpush.msk.msrb.mxu0 %vm1054_vm15, %v14804_v21  ;;  %vm1046_vm15 = vcmp.eq.s32.totalorder %v14983_v30, %v10199_v49 }
  0xd4   : > { %6910 = vmatpush.msk.msrb.mxu1 %vm1086_vm0, %v14804_v21  ;;  %6928 = vmatpush.msk.msrb.mxu2 %vm1114_vm1, %v14804_v21  ;;  %vm1078_vm0 = vcmp.eq.s32.totalorder %v9406_v36, %v10199_v49  ;;  %vm1106_vm1 = vcmp.eq.s32.totalorder %v14984_v32, %v10199_v49 }
  0xd5   : > { %6943 = vmatpush.msk.msrb.mxu3 %vm1148_vm2, %v14804_v21  ;;  %1432 = vmatmul.f32.gmra.mxu0 %v9817_v19  ;;  %v15002_v19 = vld [vmem:[#allocation28_spill] sm:$0xff]  ;;  %vm1140_vm2 = vcmp.eq.s32.totalorder %v9424_v38, %v10199_v49 }
  0xd6   : > { %1461 = vmatmul.f32.gmra.mxu1 %v15001_v24  ;;  %6895 = vmatpush.msk.msrb.mxu0 %vm1052_vm3, %v14804_v21  ;;  %vm1144_vm10 = vcmp.eq.s32.totalorder %v15002_v19, %v10199_v49  ;;  %v15003_v24 = vld [vmem:[#allocation30_spill] sm:$0xff]  ;;  %vm1044_vm3 = vcmp.eq.s32.totalorder %v9439_v39, %v10199_v49  ;;  %v15005_v39 = vld [vmem:[#allocation71_spill] sm:$0xff] }
  0xd7   : > { %6911 = vmatpush.msk.msrb.mxu1 %vm1084_vm4, %v14804_v21  ;;  %6929 = vmatpush.msk.msrb.mxu2 %vm1112_vm5, %v14804_v21  ;;  %vm1080_vm12 = vcmp.eq.s32.totalorder %v15003_v24, %v10199_v49  ;;  %vm1076_vm4 = vcmp.eq.s32.totalorder %v9442_v40, %v10199_v49  ;;  %vm1104_vm5 = vcmp.eq.s32.totalorder %v9493_v45, %v10199_v49  ;;  %v15006_v40 = vld [vmem:[#allocation46_spill] sm:$0xff] }
  0xd8   : > { %6944 = vmatpush.msk.msrb.mxu3 %vm1146_vm6, %v14804_v21  ;;  %6896 = vmatpush.msk.msrb.mxu0 %vm1050_vm7, %v14804_v21  ;;  %vm1138_vm6 = vcmp.eq.s32.totalorder %v9472_v42, %v10199_v49  ;;  %vm1042_vm7 = vcmp.eq.s32.totalorder %v14985_v31, %v10199_v49  ;;  %v15009_v31 = vld [vmem:[#allocation45_spill] sm:$0xff] }
  0xd9   : > { %6912 = vmatpush.msk.msrb.mxu1 %vm1082_vm8, %v14804_v21  ;;  %6930 = vmatpush.msk.msrb.mxu2 %vm1110_vm9, %v14804_v21  ;;  %vm1074_vm8 = vcmp.eq.s32.totalorder %v9478_v44, %v10199_v49  ;;  %vm1102_vm9 = vcmp.eq.s32.totalorder %v15006_v40, %v10199_v49  ;;  %v15011_v40 = vld [vmem:[#allocation72_spill] sm:$0xff] }
  0xda   : > { %6945 = vmatpush.msk.msrb.mxu3 %vm1144_vm10, %v14804_v21  ;;  %1493 = vmatmul.f32.gmra.mxu2 %v9853_v27  ;;  %v15004_v27 = vld [vmem:[#allocation69_spill] sm:$0xff] }
  0xdb   : > { %6897 = vmatpush.msk.msrb.mxu0 %vm1048_vm11, %v14804_v21  ;;  %6913 = vmatpush.msk.msrb.mxu1 %vm1080_vm12, %v14804_v21  ;;  %vm1072_vm12 = vcmp.eq.s32.totalorder %v15009_v31, %v10199_v49  ;;  %v15013_v31 = vld [vmem:[#allocation54_spill] sm:$0xff] }
  0xdc   : > { %6931 = vmatpush.msk.msrb.mxu2 %vm1108_vm13, %v14804_v21  ;;  %6946 = vmatpush.msk.msrb.mxu3 %vm1142_vm14, %v14804_v21  ;;  %vm1100_vm13 = vcmp.eq.s32.totalorder %v9565_v53, %v10199_v49 }
  0xdd   : > { %1522 = vmatmul.f32.gmra.mxu3 %v15004_v27  ;;  %6898 = vmatpush.msk.msrb.mxu0 %vm1046_vm15, %v14804_v21 }
  0xde   : > { %6914 = vmatpush.msk.msrb.mxu1 %vm1078_vm0, %v14804_v21  ;;  %6932 = vmatpush.msk.msrb.mxu2 %vm1106_vm1, %v14804_v21  ;;  %vm1070_vm0 = vcmp.eq.s32.totalorder %v14989_v48, %v10199_v49  ;;  %vm1098_vm1 = vcmp.eq.s32.totalorder %v15013_v31, %v10199_v49 }
  0xdf   : > { %6947 = vmatpush.msk.msrb.mxu3 %vm1140_vm2, %v14804_v21  ;;  %1435 = vmatmul.f32.gmra.mxu0 %v9889_v35  ;;  %v15007_v35 = vld [vmem:[#allocation43_spill] sm:$0xff]  ;;  %vm1132_vm2 = vcmp.eq.s32.totalorder %v14991_v50, %v10199_v49 }
  0xe0   : > { %1464 = vmatmul.f32.gmra.mxu1 %v15005_v39  ;;  %6899 = vmatpush.msk.msrb.mxu0 %vm1044_vm3, %v14804_v21  ;;  %vm1136_vm10 = vcmp.eq.s32.totalorder %v15007_v35, %v10199_v49  ;;  %v15008_v39 = vld [vmem:[#allocation44_spill] sm:$0xff]  ;;  %v15010_v35 = vld [vmem:[#allocation47_spill] sm:$0xff] }
  0xe1   : > { %6915 = vmatpush.msk.msrb.mxu1 %vm1076_vm4, %v14804_v21  ;;  %6933 = vmatpush.msk.msrb.mxu2 %vm1104_vm5, %v14804_v21  ;;  %vm1040_vm11 = vcmp.eq.s32.totalorder %v15008_v39, %v10199_v49  ;;  %vm1134_vm14 = vcmp.eq.s32.totalorder %v15010_v35, %v10199_v49  ;;  %v15012_v39 = vld [vmem:[#allocation48_spill] sm:$0xff]  ;;  %vm1068_vm4 = vcmp.eq.s32.totalorder %v14994_v41, %v10199_v49 }
  0xe2   : > { %6948 = vmatpush.msk.msrb.mxu3 %vm1138_vm6, %v14804_v21  ;;  %6900 = vmatpush.msk.msrb.mxu0 %vm1042_vm7, %v14804_v21  ;;  %vm1038_vm15 = vcmp.eq.s32.totalorder %v15012_v39, %v10199_v49  ;;  %v15014_v39 = vld [vmem:[#allocation73_spill] sm:$0xff]  ;;  %v15015_v35 = vld [vmem:[#allocation52_spill] sm:$0xff]  ;;  %vm1096_vm5 = vcmp.eq.s32.totalorder %v9637_v61, %v10199_v49  ;;  %vm1034_vm7 = vcmp.eq.s32.totalorder %v9619_v59, %v10199_v49 }
  0xe3   : > { %6916 = vmatpush.msk.msrb.mxu1 %vm1074_vm8, %v14804_v21  ;;  %6934 = vmatpush.msk.msrb.mxu2 %vm1102_vm9, %v14804_v21  ;;  %vm1036_vm3 = vcmp.eq.s32.totalorder %v15015_v35, %v10199_v49  ;;  %vm1066_vm8 = vcmp.eq.s32.totalorder %v14974_v54, %v10199_v49  ;;  %vm1094_vm9 = vcmp.eq.s32.totalorder %v9673_v56, %v10199_v49 }
  0xe4   : > { %6949 = vmatpush.msk.msrb.mxu3 %vm1136_vm10, %v14804_v21  ;;  %1496 = vmatmul.f32.gmra.mxu2 %v15011_v40  ;;  %v10394_v40 = vld [vmem:[%s9220_s30 + $0x2] ss:$8 sm:$0x3]  ;;  %vm1128_vm10 = vcmp.eq.s32.totalorder %v14996_v47, %v10199_v49 }
  0xe5   : > { %6901 = vmatpush.msk.msrb.mxu0 %vm1040_vm11, %v14804_v21  ;;  %6917 = vmatpush.msk.msrb.mxu1 %vm1072_vm12, %v14804_v21  ;;  %v10413_v35 = vperm.slane %v10394_v40, 0  ;;  %vm1032_vm11 = vcmp.eq.s32.totalorder %v9655_v63, %v10199_v49  ;;  %vm1064_vm12 = vcmp.eq.s32.totalorder %v14975_v57, %v10199_v49 }
  0xe6   : > { %6935 = vmatpush.msk.msrb.mxu2 %vm1100_vm13, %v14804_v21  ;;  %6950 = vmatpush.msk.msrb.mxu3 %vm1134_vm14, %v14804_v21  ;;  %vm1126_vm13 = vcmp.eq.s32.totalorder %v9676_v55, %v10199_v49 }
  0xe7   : > { %1525 = vmatmul.f32.gmra.mxu3 %v15014_v39  ;;  %6902 = vmatpush.msk.msrb.mxu0 %vm1038_vm15, %v14804_v21  ;;  %v15016_v39 = vld [vmem:[#allocation55_spill] sm:$0xff]  ;;  %vm1751_vm14 = vcmp.eq.s32.totalorder %v9229_v2, %v10413_v35  ;;  %vm1030_vm15 = vcmp.eq.s32.totalorder %v14976_v62, %v10199_v49 }
  0xe8   : > { %6918 = vmatpush.msk.msrb.mxu1 %vm1070_vm0, %v14804_v21  ;;  %6936 = vmatpush.msk.msrb.mxu2 %vm1098_vm1, %v14804_v21  ;;  %vm1130_vm6 = vcmp.eq.s32.totalorder %v15016_v39, %v10199_v49  ;;  %vm1062_vm0 = vcmp.eq.s32.totalorder %v9706_v60, %v10199_v49  ;;  %vm1749_vm1 = vcmp.eq.s32.totalorder %v9232_v3, %v10413_v35  ;;  %v15017_v49 = vld [vmem:[#allocation63_spill] sm:$0xff] }
  0xe9   : > { %6951 = vmatpush.msk.msrb.mxu3 %vm1132_vm2, %v14804_v21  ;;  %1438 = vmatmul.f32.gmra.mxu0 %v9961_v51  ;;  %vm1783_vm2 = vcmp.eq.s32.totalorder %v9235_v4, %v10413_v35 }
  0xea   : > { %1467 = vmatmul.f32.gmra.mxu1 %v14995_v46  ;;  %6903 = vmatpush.msk.msrb.mxu0 %vm1036_vm3, %v14804_v21  ;;  %vm1687_vm3 = vcmp.eq.s32.totalorder %v9238_v5, %v10413_v35 }
  0xeb   : > { %6919 = vmatpush.msk.msrb.mxu1 %vm1068_vm4, %v14804_v21  ;;  %6937 = vmatpush.msk.msrb.mxu2 %vm1096_vm5, %v14804_v21  ;;  %vm1719_vm4 = vcmp.eq.s32.totalorder %v9241_v6, %v10413_v35  ;;  %vm1747_vm5 = vcmp.eq.s32.totalorder %v9244_v7, %v10413_v35 }
  0xec   : > { %6952 = vmatpush.msk.msrb.mxu3 %vm1130_vm6, %v14804_v21  ;;  %6904 = vmatpush.msk.msrb.mxu0 %vm1034_vm7, %v14804_v21  ;;  %vm1781_vm6 = vcmp.eq.s32.totalorder %v9247_v8, %v10413_v35  ;;  %vm1685_vm7 = vcmp.eq.s32.totalorder %v14977_v58, %v10413_v35 }
  0xed   : > { %6920 = vmatpush.msk.msrb.mxu1 %vm1066_vm8, %v14804_v21  ;;  %6938 = vmatpush.msk.msrb.mxu2 %vm1094_vm9, %v14804_v21  ;;  %vm1717_vm8 = vcmp.eq.s32.totalorder %v9256_v11, %v10413_v35  ;;  %vm1745_vm9 = vcmp.eq.s32.totalorder %v9259_v12, %v10413_v35 }
  0xee   : > { %6953 = vmatpush.msk.msrb.mxu3 %vm1128_vm10, %v14804_v21  ;;  %1603 = vmatmul.f32.vlgmr.msrb.gmra.mxu2 %v9719_v9  ;;  %vm1779_vm10 = vcmp.eq.s32.totalorder %v14998_v52, %v10413_v35 }
  0xef   : > { %6905 = vmatpush.msk.msrb.mxu0 %vm1032_vm11, %v14804_v21  ;;  %6921 = vmatpush.msk.msrb.mxu1 %vm1064_vm12, %v14804_v21  ;;  %vm1683_vm11 = vcmp.eq.s32.totalorder %v14978_v13, %v10413_v35  ;;  %vm1715_vm12 = vcmp.eq.s32.totalorder %v14999_v43, %v10413_v35 }
  0xf0   : > { %6954 = vmatpush.msk.msrb.mxu3 %vm1126_vm13, %v14804_v21  ;;  %7116 = vmatpush.msk.msra.mxu2 %vm1751_vm14, %v14804_v21  ;;  %vm1743_vm13 = vcmp.eq.s32.totalorder %v9274_v17, %v10413_v35  ;;  %vm1777_vm14 = vcmp.eq.s32.totalorder %v9277_v18, %v10413_v35 }
  0xf1   : > { %1632 = vmatmul.f32.vlgmr.msrb.gmra.mxu3 %v9724_v0  ;;  %6906 = vmatpush.msk.msrb.mxu0 %vm1030_vm15, %v14804_v21  ;;  %vm1681_vm15 = vcmp.eq.s32.totalorder %v14979_v14, %v10413_v35 }
  0xf2   : > { %6922 = vmatpush.msk.msrb.mxu1 %vm1062_vm0, %v14804_v21  ;;  %7117 = vmatpush.msk.msra.mxu2 %vm1749_vm1, %v14804_v21  ;;  %vm1713_vm0 = vcmp.eq.s32.totalorder %v9283_v20, %v10413_v35  ;;  %vm1741_vm1 = vcmp.eq.s32.totalorder %v14980_v16, %v10413_v35 }
  0xf3   : > { %7132 = vmatpush.msk.msra.mxu3 %vm1783_vm2, %v14804_v21  ;;  %1545 = vmatmul.f32.vlgmr.msrb.gmra.mxu0 %v9745_v1  ;;  %v15018_v1 = vld [vmem:[#allocation64_spill] sm:$0xff]  ;;  %vm1775_vm2 = vcmp.eq.s32.totalorder %v9303_v23, %v10413_v35 }
  0xf4   : > { %1574 = vmatmul.f32.vlgmr.msrb.gmra.mxu1 %v15017_v49  ;;  %7084 = vmatpush.msk.msra.mxu0 %vm1687_vm3, %v14804_v21  ;;  %v15021_v49 = vld [vmem:[#allocation25_spill] sm:$0xff] }
  0xf5   : > { %7100 = vmatpush.msk.msra.mxu1 %vm1719_vm4, %v14804_v21  ;;  %7118 = vmatpush.msk.msra.mxu2 %vm1747_vm5, %v14804_v21  ;;  %vm1679_vm3 = vcmp.eq.s32.totalorder %v15021_v49, %v10413_v35  ;;  %vm1711_vm4 = vcmp.eq.s32.totalorder %v9328_v25, %v10413_v35  ;;  %vm1739_vm5 = vcmp.eq.s32.totalorder %v9361_v29, %v10413_v35 }
  0xf6   : > { %7133 = vmatpush.msk.msra.mxu3 %vm1781_vm6, %v14804_v21  ;;  %7085 = vmatpush.msk.msra.mxu0 %vm1685_vm7, %v14804_v21  ;;  %vm1773_vm6 = vcmp.eq.s32.totalorder %v9337_v26, %v10413_v35  ;;  %vm1677_vm7 = vcmp.eq.s32.totalorder %v14981_v15, %v10413_v35 }
  0xf7   : > { %7101 = vmatpush.msk.msra.mxu1 %vm1717_vm8, %v14804_v21  ;;  %7119 = vmatpush.msk.msra.mxu2 %vm1745_vm9, %v14804_v21  ;;  %v10493_v0 = vpop.f32.mrf.mxu0  ;;  %vm1709_vm8 = vcmp.eq.s32.totalorder %v9352_v28, %v10413_v35  ;;  %vm1737_vm9 = vcmp.eq.s32.totalorder %v9387_v33, %v10413_v35 }
  0xf8   : > { %7134 = vmatpush.msk.msra.mxu3 %vm1779_vm10, %v14804_v21  ;;  %1606 = vmatmul.f32.gmra.mxu2 %v15018_v1  ;;  %15019 = vst [vmem:[#allocation15_spill] sm:$0xff] %v10493_v0  ;;  %v10501_v9 = vpop.f32.mrf.mxu1  ;;  %vm1771_vm10 = vcmp.eq.s32.totalorder %v15002_v19, %v10413_v35 }
  0xf9   : > { %7086 = vmatpush.msk.msra.mxu0 %vm1683_vm11, %v14804_v21  ;;  %7102 = vmatpush.msk.msra.mxu1 %vm1715_vm12, %v14804_v21  ;;  %15020 = vst [vmem:[#allocation17_spill] sm:$0xff] %v10501_v9  ;;  %vm1675_vm11 = vcmp.eq.s32.totalorder %v14982_v22, %v10413_v35  ;;  %vm1707_vm12 = vcmp.eq.s32.totalorder %v15003_v24, %v10413_v35 }
  0xfa   : > { %7120 = vmatpush.msk.msra.mxu2 %vm1743_vm13, %v14804_v21  ;;  %7135 = vmatpush.msk.msra.mxu3 %vm1777_vm14, %v14804_v21  ;;  %vm1735_vm13 = vcmp.eq.s32.totalorder %v9421_v37, %v10413_v35  ;;  %vm1769_vm14 = vcmp.eq.s32.totalorder %v9400_v34, %v10413_v35 }
  0xfb   : > { %1635 = vmatmul.f32.gmra.mxu3 %v15000_v10  ;;  %7087 = vmatpush.msk.msra.mxu0 %vm1681_vm15, %v14804_v21  ;;  %v10511_v1 = vpop.f32.mrf.mxu2  ;;  %v15024_v10 = vld [vmem:[#allocation66_spill] sm:$0xff]  ;;  %vm1673_vm15 = vcmp.eq.s32.totalorder %v14983_v30, %v10413_v35 }
  0xfc   : > { %15022 = vst [vmem:[#allocation19_spill] sm:$0xff] %v10511_v1  ;;  %7103 = vmatpush.msk.msra.mxu1 %vm1713_vm0, %v14804_v21  ;;  %7121 = vmatpush.msk.msra.mxu2 %vm1741_vm1, %v14804_v21  ;;  %v15025_v1 = vld [vmem:[#allocation67_spill] sm:$0xff]  ;;  %vm1705_vm0 = vcmp.eq.s32.totalorder %v9406_v36, %v10413_v35  ;;  %vm1733_vm1 = vcmp.eq.s32.totalorder %v14984_v32, %v10413_v35 }
  0xfd   : > { %7136 = vmatpush.msk.msra.mxu3 %vm1775_vm2, %v14804_v21  ;;  %1548 = vmatmul.f32.gmra.mxu0 %v15024_v10  ;;  %vm1767_vm2 = vcmp.eq.s32.totalorder %v9424_v38, %v10413_v35 }
  0xfe   : > { %1577 = vmatmul.f32.gmra.mxu1 %v15025_v1  ;;  %7088 = vmatpush.msk.msra.mxu0 %vm1679_vm3, %v14804_v21  ;;  %v15026_v1 = vld [vmem:[#allocation68_spill] sm:$0xff] }
  0xff   : > { %v10519_v9 = vpop.f32.mrf.mxu3  ;;  %7104 = vmatpush.msk.msra.mxu1 %vm1711_vm4, %v14804_v21  ;;  %7122 = vmatpush.msk.msra.mxu2 %vm1739_vm5, %v14804_v21  ;;  %vm1731_vm5 = vcmp.eq.s32.totalorder %v9493_v45, %v10413_v35  ;;  %v15036_v45 = vld [vmem:[#allocation46_spill] sm:$0xff] }
 0x100   : > { %15023 = vst [vmem:[#allocation23_spill] sm:$0xff] %v10519_v9  ;;  %7137 = vmatpush.msk.msra.mxu3 %vm1773_vm6, %v14804_v21  ;;  %7089 = vmatpush.msk.msra.mxu0 %vm1677_vm7, %v14804_v21  ;;  %vm1765_vm6 = vcmp.eq.s32.totalorder %v9472_v42, %v10413_v35 }
 0x101   : > { %7105 = vmatpush.msk.msra.mxu1 %vm1709_vm8, %v14804_v21  ;;  %7123 = vmatpush.msk.msra.mxu2 %vm1737_vm9, %v14804_v21  ;;  %vm1701_vm8 = vcmp.eq.s32.totalorder %v9478_v44, %v10413_v35  ;;  %vm1729_vm9 = vcmp.eq.s32.totalorder %v15036_v45, %v10413_v35  ;;  %v15040_v45 = vld [vmem:[#allocation47_spill] sm:$0xff]  ;;  %v15042_v44 = vld [vmem:[#allocation48_spill] sm:$0xff] }
 0x102   : > { %7138 = vmatpush.msk.msra.mxu3 %vm1771_vm10, %v14804_v21  ;;  %1609 = vmatmul.f32.gmra.mxu2 %v15026_v1  ;;  %v10553_v10 = vpop.f32.mrf.mxu0  ;;  %v15030_v1 = vld [vmem:[#allocation37_spill] sm:$0xff] }
 0x103   : > { %15027 = vst [vmem:[#allocation24_spill] sm:$0xff] %v10553_v10  ;;  %7090 = vmatpush.msk.msra.mxu0 %vm1675_vm11, %v14804_v21  ;;  %7106 = vmatpush.msk.msra.mxu1 %vm1707_vm12, %v14804_v21  ;;  %v10561_v9 = vpop.f32.mrf.mxu1  ;;  %v10563_v0 = vpop.f32.mrf.mxu2  ;;  %vm1671_vm3 = vcmp.eq.s32.totalorder %v15030_v1, %v10413_v35  ;;  %v15034_v10 = vld [vmem:[#allocation40_spill] sm:$0xff]  ;;  %v15035_v1 = vld [vmem:[#allocation71_spill] sm:$0xff] }
 0x104   : > { %15028 = vst [vmem:[#allocation26_spill] sm:$0xff] %v10561_v9  ;;  %7124 = vmatpush.msk.msra.mxu2 %vm1735_vm13, %v14804_v21  ;;  %7139 = vmatpush.msk.msra.mxu3 %vm1769_vm14, %v14804_v21  ;;  %vm1669_vm7 = vcmp.eq.s32.totalorder %v15034_v10, %v10413_v35  ;;  %vm1727_vm13 = vcmp.eq.s32.totalorder %v9565_v53, %v10413_v35 }
 0x105   : > { %15029 = vst [vmem:[#allocation74_spill] sm:$0xff] %v10563_v0  ;;  %1638 = vmatmul.f32.gmra.mxu3 %v15004_v27  ;;  %7091 = vmatpush.msk.msra.mxu0 %vm1673_vm15, %v14804_v21  ;;  %v15031_v0 = vld [vmem:[#allocation38_spill] sm:$0xff]  ;;  %vm1761_vm14 = vcmp.eq.s32.totalorder %v15040_v45, %v10413_v35  ;;  %vm1665_vm15 = vcmp.eq.s32.totalorder %v15042_v44, %v10413_v35 }
 0x106   : > { %7107 = vmatpush.msk.msra.mxu1 %vm1705_vm0, %v14804_v21  ;;  %7125 = vmatpush.msk.msra.mxu2 %vm1733_vm1, %v14804_v21  ;;  %vm1703_vm4 = vcmp.eq.s32.totalorder %v15031_v0, %v10413_v35  ;;  %v15033_v27 = vld [vmem:[#allocation70_spill] sm:$0xff]  ;;  %vm1697_vm0 = vcmp.eq.s32.totalorder %v14989_v48, %v10413_v35  ;;  %vm1725_vm1 = vcmp.eq.s32.totalorder %v15013_v31, %v10413_v35 }
 0x107   : > { %v10579_v9 = vpop.f32.mrf.mxu3  ;;  %7140 = vmatpush.msk.msra.mxu3 %vm1767_vm2, %v14804_v21  ;;  %1551 = vmatmul.f32.gmra.mxu0 %v15033_v27  ;;  %v15037_v27 = vld [vmem:[#allocation43_spill] sm:$0xff]  ;;  %vm1759_vm2 = vcmp.eq.s32.totalorder %v14991_v50, %v10413_v35 }
 0x108   : > { %15032 = vst [vmem:[#allocation18_spill] sm:$0xff] %v10579_v9  ;;  %1580 = vmatmul.f32.gmra.mxu1 %v15035_v1  ;;  %7092 = vmatpush.msk.msra.mxu0 %vm1671_vm3, %v14804_v21  ;;  %vm1763_vm10 = vcmp.eq.s32.totalorder %v15037_v27, %v10413_v35  ;;  %v15038_v1 = vld [vmem:[#allocation44_spill] sm:$0xff]  ;;  %v15039_v9 = vld [vmem:[#allocation45_spill] sm:$0xff] }
 0x109   : > { %7108 = vmatpush.msk.msra.mxu1 %vm1703_vm4, %v14804_v21  ;;  %7126 = vmatpush.msk.msra.mxu2 %vm1731_vm5, %v14804_v21  ;;  %vm1667_vm11 = vcmp.eq.s32.totalorder %v15038_v1, %v10413_v35  ;;  %vm1699_vm12 = vcmp.eq.s32.totalorder %v15039_v9, %v10413_v35  ;;  %v15041_v27 = vld [vmem:[#allocation72_spill] sm:$0xff]  ;;  %vm1695_vm4 = vcmp.eq.s32.totalorder %v14994_v41, %v10413_v35 }
 0x10a   : > { %7141 = vmatpush.msk.msra.mxu3 %vm1765_vm6, %v14804_v21  ;;  %7093 = vmatpush.msk.msra.mxu0 %vm1669_vm7, %v14804_v21  ;;  %vm1723_vm5 = vcmp.eq.s32.totalorder %v9637_v61, %v10413_v35  ;;  %vm1757_vm6 = vcmp.eq.s32.totalorder %v15016_v39, %v10413_v35  ;;  %vm1661_vm7 = vcmp.eq.s32.totalorder %v9619_v59, %v10413_v35 }
 0x10b   : > { %7109 = vmatpush.msk.msra.mxu1 %vm1701_vm8, %v14804_v21  ;;  %7127 = vmatpush.msk.msra.mxu2 %vm1729_vm9, %v14804_v21  ;;  %vm1693_vm8 = vcmp.eq.s32.totalorder %v14974_v54, %v10413_v35  ;;  %vm1721_vm9 = vcmp.eq.s32.totalorder %v9673_v56, %v10413_v35 }
 0x10c   : > { %7142 = vmatpush.msk.msra.mxu3 %vm1763_vm10, %v14804_v21  ;;  %1612 = vmatmul.f32.gmra.mxu2 %v15041_v27  ;;  %v10613_v1 = vpop.f32.mrf.mxu0  ;;  %v15046_v27 = vld [vmem:[#allocation73_spill] sm:$0xff]  ;;  %vm1755_vm10 = vcmp.eq.s32.totalorder %v14996_v47, %v10413_v35 }
 0x10d   : > { %15043 = vst [vmem:[#allocation65_spill] sm:$0xff] %v10613_v1  ;;  %7094 = vmatpush.msk.msra.mxu0 %vm1667_vm11, %v14804_v21  ;;  %7110 = vmatpush.msk.msra.mxu1 %vm1699_vm12, %v14804_v21  ;;  %v10621_v45 = vpop.f32.mrf.mxu1  ;;  %v10623_v53 = vpop.f32.mrf.mxu2  ;;  %v15047_v1 = vld [vmem:[#allocation52_spill] sm:$0xff]  ;;  %vm1659_vm11 = vcmp.eq.s32.totalorder %v9655_v63, %v10413_v35  ;;  %vm1691_vm12 = vcmp.eq.s32.totalorder %v14975_v57, %v10413_v35 }
 0x10e   : > { %15044 = vst [vmem:[#allocation69_spill] sm:$0xff] %v10621_v45  ;;  %7128 = vmatpush.msk.msra.mxu2 %vm1727_vm13, %v14804_v21  ;;  %7143 = vmatpush.msk.msra.mxu3 %vm1761_vm14, %v14804_v21  ;;  %vm1663_vm3 = vcmp.eq.s32.totalorder %v15047_v1, %v10413_v35  ;;  %vm1753_vm13 = vcmp.eq.s32.totalorder %v9676_v55, %v10413_v35 }
 0x10f   : > { %15045 = vst [vmem:[#allocation54_spill] sm:$0xff] %v10623_v53  ;;  %1641 = vmatmul.f32.gmra.mxu3 %v15046_v27  ;;  %7095 = vmatpush.msk.msra.mxu0 %vm1665_vm15, %v14804_v21  ;;  %v10648_v27 = vperm.slane %v10394_v40, 1  ;;  %v10676_v40 = vld [vmem:[%s14677_s0 + $0x10] sm:$0xff]  ;;  %vm1657_vm15 = vcmp.eq.s32.totalorder %v14976_v62, %v10413_v35 }
 0x110   : > { %7111 = vmatpush.msk.msra.mxu1 %vm1697_vm0, %v14804_v21  ;;  %7129 = vmatpush.msk.msra.mxu2 %vm1725_vm1, %v14804_v21  ;;  %v10639_v53 = vpop.f32.mrf.mxu3  ;;  %vm1689_vm0 = vcmp.eq.s32.totalorder %v9706_v60, %v10413_v35 }
 0x111   : > { %15048 = vst [vmem:[#allocation55_spill] sm:$0xff] %v10639_v53  ;;  %7144 = vmatpush.msk.msra.mxu3 %vm1759_vm2, %v14804_v21  ;;  %1554 = vmatmul.f32.gmra.mxu0 %v9961_v51  ;;  %vm1752_vm14 = vcmp.eq.s32.totalorder %v9229_v2, %v10648_v27  ;;  %vm1750_vm1 = vcmp.eq.s32.totalorder %v9232_v3, %v10648_v27 }
 0x112   : > { %1583 = vmatmul.f32.gmra.mxu1 %v14995_v46  ;;  %7096 = vmatpush.msk.msra.mxu0 %vm1663_vm3, %v14804_v21  ;;  %vm1784_vm2 = vcmp.eq.s32.totalorder %v9235_v4, %v10648_v27  ;;  %vm1688_vm3 = vcmp.eq.s32.totalorder %v9238_v5, %v10648_v27 }
 0x113   : > { %7112 = vmatpush.msk.msra.mxu1 %vm1695_vm4, %v14804_v21  ;;  %7130 = vmatpush.msk.msra.mxu2 %vm1723_vm5, %v14804_v21  ;;  %vm1720_vm4 = vcmp.eq.s32.totalorder %v9241_v6, %v10648_v27  ;;  %vm1748_vm5 = vcmp.eq.s32.totalorder %v9244_v7, %v10648_v27 }
 0x114   : > { %7145 = vmatpush.msk.msra.mxu3 %vm1757_vm6, %v14804_v21  ;;  %7097 = vmatpush.msk.msra.mxu0 %vm1661_vm7, %v14804_v21  ;;  %vm1782_vm6 = vcmp.eq.s32.totalorder %v9247_v8, %v10648_v27  ;;  %vm1686_vm7 = vcmp.eq.s32.totalorder %v14977_v58, %v10648_v27 }
 0x115   : > { %7113 = vmatpush.msk.msra.mxu1 %vm1693_vm8, %v14804_v21  ;;  %7131 = vmatpush.msk.msra.mxu2 %vm1721_vm9, %v14804_v21  ;;  %vm1718_vm8 = vcmp.eq.s32.totalorder %v9256_v11, %v10648_v27  ;;  %vm1746_vm9 = vcmp.eq.s32.totalorder %v9259_v12, %v10648_v27 }
 0x116   : > { %7146 = vmatpush.msk.msra.mxu3 %vm1755_vm10, %v14804_v21  ;;  %2115 = vmatmul.f32.vlgmr.msra.gmra.mxu2 %v10676_v40  ;;  %v10681_v46 = vpop.f32.mrf.mxu0  ;;  %vm1780_vm10 = vcmp.eq.s32.totalorder %v14998_v52, %v10648_v27 }
 0x117   : > { %15049 = vst [vmem:[#allocation63_spill] sm:$0xff] %v10681_v46  ;;  %7098 = vmatpush.msk.msra.mxu0 %vm1659_vm11, %v14804_v21  ;;  %7114 = vmatpush.msk.msra.mxu1 %vm1691_vm12, %v14804_v21  ;;  %v10689_v51 = vpop.f32.mrf.mxu1  ;;  %v10691_v53 = vpop.f32.mrf.mxu2  ;;  %v10700_v46 = vld [vmem:[%s14677_s0 + $0x18] sm:$0xff]  ;;  %vm1684_vm11 = vcmp.eq.s32.totalorder %v14978_v13, %v10648_v27  ;;  %vm1716_vm12 = vcmp.eq.s32.totalorder %v14999_v43, %v10648_v27 }
 0x118   : > { %15050 = vst [vmem:[#allocation64_spill] sm:$0xff] %v10689_v51  ;;  %7147 = vmatpush.msk.msra.mxu3 %vm1753_vm13, %v14804_v21  ;;  %7180 = vmatpush.msk.msrb.mxu2 %vm1752_vm14, %v14804_v21  ;;  %v10728_v51 = vld [vmem:[%s14677_s0 + $0x8] sm:$0xff]  ;;  %vm1744_vm13 = vcmp.eq.s32.totalorder %v9274_v17, %v10648_v27  ;;  %vm1778_vm14 = vcmp.eq.s32.totalorder %v9277_v18, %v10648_v27 }
 0x119   : > { %15051 = vst [vmem:[#allocation25_spill] sm:$0xff] %v10691_v53  ;;  %2144 = vmatmul.f32.vlgmr.msra.gmra.mxu3 %v10700_v46  ;;  %7099 = vmatpush.msk.msra.mxu0 %vm1657_vm15, %v14804_v21  ;;  %v10718_v53 = vld [vmem:[%s14677_s0] sm:$0xff]  ;;  %vm1682_vm15 = vcmp.eq.s32.totalorder %v14979_v14, %v10648_v27 }
 0x11a   : > { %7115 = vmatpush.msk.msra.mxu1 %vm1689_vm0, %v14804_v21  ;;  %7181 = vmatpush.msk.msrb.mxu2 %vm1750_vm1, %v14804_v21  ;;  %v10712_v35 = vpop.f32.mrf.mxu3  ;;  %vm1714_vm0 = vcmp.eq.s32.totalorder %v9283_v20, %v10648_v27  ;;  %vm1742_vm1 = vcmp.eq.s32.totalorder %v14980_v16, %v10648_v27 }
 0x11b   : > { %15052 = vst [vmem:[#allocation66_spill] sm:$0xff] %v10712_v35  ;;  %7196 = vmatpush.msk.msrb.mxu3 %vm1784_vm2, %v14804_v21  ;;  %2057 = vmatmul.f32.vlgmr.msra.gmra.mxu0 %v10718_v53  ;;  %v10756_v35 = vld [vmem:[%s14677_s0 + $0x30] sm:$0xff]  ;;  %vm1776_vm2 = vcmp.eq.s32.totalorder %v9303_v23, %v10648_v27 }
 0x11c   : > { %2086 = vmatmul.f32.vlgmr.msra.gmra.mxu1 %v10728_v51  ;;  %7148 = vmatpush.msk.msrb.mxu0 %vm1688_vm3, %v14804_v21  ;;  %vm1680_vm3 = vcmp.eq.s32.totalorder %v15021_v49, %v10648_v27 }
 0x11d   : > { %7164 = vmatpush.msk.msrb.mxu1 %vm1720_vm4, %v14804_v21  ;;  %7182 = vmatpush.msk.msrb.mxu2 %vm1748_vm5, %v14804_v21  ;;  %vm1712_vm4 = vcmp.eq.s32.totalorder %v9328_v25, %v10648_v27  ;;  %vm1740_vm5 = vcmp.eq.s32.totalorder %v9361_v29, %v10648_v27  ;;  %v10808_v29 = vld [vmem:[%s14677_s0 + $0x28] sm:$0xff] }
 0x11e   : > { %7197 = vmatpush.msk.msrb.mxu3 %vm1782_vm6, %v14804_v21  ;;  %7149 = vmatpush.msk.msrb.mxu0 %vm1686_vm7, %v14804_v21  ;;  %vm1774_vm6 = vcmp.eq.s32.totalorder %v9337_v26, %v10648_v27  ;;  %vm1678_vm7 = vcmp.eq.s32.totalorder %v14981_v15, %v10648_v27 }
 0x11f   : > { %7165 = vmatpush.msk.msrb.mxu1 %vm1718_vm8, %v14804_v21  ;;  %7183 = vmatpush.msk.msrb.mxu2 %vm1746_vm9, %v14804_v21  ;;  %vm1710_vm8 = vcmp.eq.s32.totalorder %v9352_v28, %v10648_v27  ;;  %vm1738_vm9 = vcmp.eq.s32.totalorder %v9387_v33, %v10648_v27 }
 0x120   : > { %7198 = vmatpush.msk.msrb.mxu3 %vm1780_vm10, %v14804_v21  ;;  %2118 = vmatmul.f32.gmra.mxu2 %v10756_v35  ;;  %v10761_v45 = vpop.f32.mrf.mxu0  ;;  %vm1772_vm10 = vcmp.eq.s32.totalorder %v15002_v19, %v10648_v27 }
 0x121   : > { %15053 = vst [vmem:[#allocation67_spill] sm:$0xff] %v10761_v45  ;;  %7150 = vmatpush.msk.msrb.mxu0 %vm1684_vm11, %v14804_v21  ;;  %7166 = vmatpush.msk.msrb.mxu1 %vm1716_vm12, %v14804_v21  ;;  %v10769_v18 = vpop.f32.mrf.mxu1  ;;  %v10771_v17 = vpop.f32.mrf.mxu2  ;;  %v10780_v45 = vld [vmem:[%s14677_s0 + $0x38] sm:$0xff]  ;;  %vm1676_vm11 = vcmp.eq.s32.totalorder %v14982_v22, %v10648_v27  ;;  %vm1708_vm12 = vcmp.eq.s32.totalorder %v15003_v24, %v10648_v27 }
 0x122   : > { %15054 = vst [vmem:[#allocation68_spill] sm:$0xff] %v10769_v18  ;;  %7184 = vmatpush.msk.msrb.mxu2 %vm1744_vm13, %v14804_v21  ;;  %7199 = vmatpush.msk.msrb.mxu3 %vm1778_vm14, %v14804_v21  ;;  %v10798_v18 = vld [vmem:[%s14677_s0 + $0x20] sm:$0xff]  ;;  %vm1736_vm13 = vcmp.eq.s32.totalorder %v9421_v37, %v10648_v27  ;;  %vm1770_vm14 = vcmp.eq.s32.totalorder %v9400_v34, %v10648_v27 }
 0x123   : > { %15055 = vst [vmem:[#allocation70_spill] sm:$0xff] %v10771_v17  ;;  %2147 = vmatmul.f32.gmra.mxu3 %v10780_v45  ;;  %7151 = vmatpush.msk.msrb.mxu0 %vm1682_vm15, %v14804_v21  ;;  %vm1674_vm15 = vcmp.eq.s32.totalorder %v14983_v30, %v10648_v27 }
 0x124   : > { %7167 = vmatpush.msk.msrb.mxu1 %vm1714_vm0, %v14804_v21  ;;  %7185 = vmatpush.msk.msrb.mxu2 %vm1742_vm1, %v14804_v21  ;;  %v10792_v17 = vpop.f32.mrf.mxu3  ;;  %vm1706_vm0 = vcmp.eq.s32.totalorder %v9406_v36, %v10648_v27  ;;  %vm1734_vm1 = vcmp.eq.s32.totalorder %v14984_v32, %v10648_v27 }
 0x125   : > { %15056 = vst [vmem:[#allocation71_spill] sm:$0xff] %v10792_v17  ;;  %7200 = vmatpush.msk.msrb.mxu3 %vm1776_vm2, %v14804_v21  ;;  %2060 = vmatmul.f32.gmra.mxu0 %v10798_v18  ;;  %v10836_v17 = vld [vmem:[%s14677_s0 + $0x50] sm:$0xff]  ;;  %vm1768_vm2 = vcmp.eq.s32.totalorder %v9424_v38, %v10648_v27 }
 0x126   : > { %2089 = vmatmul.f32.gmra.mxu1 %v10808_v29  ;;  %7152 = vmatpush.msk.msrb.mxu0 %vm1680_vm3, %v14804_v21 }
 0x127   : > { %7168 = vmatpush.msk.msrb.mxu1 %vm1712_vm4, %v14804_v21  ;;  %7186 = vmatpush.msk.msrb.mxu2 %vm1740_vm5, %v14804_v21  ;;  %vm1704_vm4 = vcmp.eq.s32.totalorder %v15031_v0, %v10648_v27 }
 0x128   : > { %7201 = vmatpush.msk.msrb.mxu3 %vm1774_vm6, %v14804_v21  ;;  %7153 = vmatpush.msk.msrb.mxu0 %vm1678_vm7, %v14804_v21  ;;  %vm1766_vm6 = vcmp.eq.s32.totalorder %v9472_v42, %v10648_v27  ;;  %vm1670_vm7 = vcmp.eq.s32.totalorder %v15034_v10, %v10648_v27  ;;  %v15068_v10 = vld [vmem:[#allocation43_spill] sm:$0xff] }
 0x129   : > { %7169 = vmatpush.msk.msrb.mxu1 %vm1710_vm8, %v14804_v21  ;;  %7187 = vmatpush.msk.msrb.mxu2 %vm1738_vm9, %v14804_v21 }
 0x12a   : > { %7202 = vmatpush.msk.msrb.mxu3 %vm1772_vm10, %v14804_v21  ;;  %2121 = vmatmul.f32.gmra.mxu2 %v10836_v17  ;;  %v10841_v24 = vpop.f32.mrf.mxu0  ;;  %vm1764_vm10 = vcmp.eq.s32.totalorder %v15068_v10, %v10648_v27 }
 0x12b   : > { %15057 = vst [vmem:[#allocation72_spill] sm:$0xff] %v10841_v24  ;;  %7154 = vmatpush.msk.msrb.mxu0 %vm1676_vm11, %v14804_v21  ;;  %7170 = vmatpush.msk.msrb.mxu1 %vm1708_vm12, %v14804_v21  ;;  %v10849_v34 = vpop.f32.mrf.mxu1  ;;  %v10851_v37 = vpop.f32.mrf.mxu2  ;;  %v10860_v24 = vld [vmem:[%s14677_s0 + $0x58] sm:$0xff]  ;;  %vm1700_vm12 = vcmp.eq.s32.totalorder %v15039_v9, %v10648_v27 }
 0x12c   : > { %15058 = vst [vmem:[#allocation73_spill] sm:$0xff] %v10849_v34  ;;  %7188 = vmatpush.msk.msrb.mxu2 %vm1736_vm13, %v14804_v21  ;;  %7203 = vmatpush.msk.msrb.mxu3 %vm1770_vm14, %v14804_v21  ;;  %v15061_v34 = vld [vmem:[#allocation37_spill] sm:$0xff] }
 0x12d   : > { %15059 = vst [vmem:[#allocation75_spill] sm:$0xff] %v10851_v37  ;;  %2150 = vmatmul.f32.gmra.mxu3 %v10860_v24  ;;  %7155 = vmatpush.msk.msrb.mxu0 %vm1674_vm15, %v14804_v21  ;;  %vm1672_vm3 = vcmp.eq.s32.totalorder %v15061_v34, %v10648_v27  ;;  %v15062_v37 = vld [vmem:[#allocation42_spill] sm:$0xff]  ;;  %vm1666_vm15 = vcmp.eq.s32.totalorder %v15042_v44, %v10648_v27 }
 0x12e   : > { %15060 = vst [vmem:[#allocation76_spill] sm:$0xff] %v10860_v24  ;;  %7171 = vmatpush.msk.msrb.mxu1 %vm1706_vm0, %v14804_v21  ;;  %7189 = vmatpush.msk.msrb.mxu2 %vm1734_vm1, %v14804_v21  ;;  %vm1732_vm5 = vcmp.eq.s32.totalorder %v15062_v37, %v10648_v27  ;;  %v10872_v38 = vpop.f32.mrf.mxu3  ;;  %v10878_v24 = vld [vmem:[%s14677_s0 + $0x40] sm:$0xff]  ;;  %v10888_v37 = vld [vmem:[%s14677_s0 + $0x48] sm:$0xff]  ;;  %vm1698_vm0 = vcmp.eq.s32.totalorder %v14989_v48, %v10648_v27  ;;  %v10943_v48 = vld [vmem:[%s14677_s0 + $0x78] sm:$0xff] }
 0x12f   : > { %15063 = vst [vmem:[#allocation77_spill] sm:$0xff] %v10872_v38  ;;  %7204 = vmatpush.msk.msrb.mxu3 %vm1768_vm2, %v14804_v21  ;;  %2063 = vmatmul.f32.gmra.mxu0 %v10878_v24  ;;  %v15066_v38 = vld [vmem:[#allocation41_spill] sm:$0xff]  ;;  %vm1726_vm1 = vcmp.eq.s32.totalorder %v15013_v31, %v10648_v27  ;;  %vm1760_vm2 = vcmp.eq.s32.totalorder %v14991_v50, %v10648_v27 }
 0x130   : > { %15064 = vst [vmem:[#allocation78_spill] sm:$0xff] %v10878_v24  ;;  %2092 = vmatmul.f32.gmra.mxu1 %v10888_v37  ;;  %7156 = vmatpush.msk.msrb.mxu0 %vm1672_vm3, %v14804_v21  ;;  %vm1702_vm8 = vcmp.eq.s32.totalorder %v15066_v38, %v10648_v27  ;;  %v15067_v24 = vld [vmem:[#allocation46_spill] sm:$0xff]  ;;  %v15071_v38 = vld [vmem:[#allocation47_spill] sm:$0xff]  ;;  %vm1664_vm3 = vcmp.eq.s32.totalorder %v15047_v1, %v10648_v27 }
 0x131   : > { %15065 = vst [vmem:[#allocation79_spill] sm:$0xff] %v10888_v37  ;;  %vm1730_vm9 = vcmp.eq.s32.totalorder %v15067_v24, %v10648_v27  ;;  %7172 = vmatpush.msk.msrb.mxu1 %vm1704_vm4, %v14804_v21  ;;  %7190 = vmatpush.msk.msrb.mxu2 %vm1732_vm5, %v14804_v21  ;;  %v15069_v37 = vld [vmem:[#allocation44_spill] sm:$0xff]  ;;  %v15070_v24 = vld [vmem:[#allocation50_spill] sm:$0xff]  ;;  %vm1762_vm14 = vcmp.eq.s32.totalorder %v15071_v38, %v10648_v27 }
 0x132   : > { %7205 = vmatpush.msk.msrb.mxu3 %vm1766_vm6, %v14804_v21  ;;  %7157 = vmatpush.msk.msrb.mxu0 %vm1670_vm7, %v14804_v21  ;;  %vm1668_vm11 = vcmp.eq.s32.totalorder %v15069_v37, %v10648_v27  ;;  %vm1728_vm13 = vcmp.eq.s32.totalorder %v15070_v24, %v10648_v27  ;;  %v10916_v37 = vld [vmem:[%s14677_s0 + $0x70] sm:$0xff]  ;;  %vm1696_vm4 = vcmp.eq.s32.totalorder %v14994_v41, %v10648_v27 }
 0x133   : > { %7173 = vmatpush.msk.msrb.mxu1 %vm1702_vm8, %v14804_v21  ;;  %7191 = vmatpush.msk.msrb.mxu2 %vm1730_vm9, %v14804_v21  ;;  %vm1724_vm5 = vcmp.eq.s32.totalorder %v9637_v61, %v10648_v27  ;;  %vm1758_vm6 = vcmp.eq.s32.totalorder %v15016_v39, %v10648_v27  ;;  %vm1662_vm7 = vcmp.eq.s32.totalorder %v9619_v59, %v10648_v27 }
 0x134   : > { %7206 = vmatpush.msk.msrb.mxu3 %vm1764_vm10, %v14804_v21  ;;  %2124 = vmatmul.f32.gmra.mxu2 %v10916_v37  ;;  %v10921_v9 = vpop.f32.mrf.mxu0  ;;  %vm1694_vm8 = vcmp.eq.s32.totalorder %v14974_v54, %v10648_v27  ;;  %vm1722_vm9 = vcmp.eq.s32.totalorder %v9673_v56, %v10648_v27  ;;  %vm1756_vm10 = vcmp.eq.s32.totalorder %v14996_v47, %v10648_v27 }
 0x135   : > { %15072 = vst [vmem:[#allocation80_spill] sm:$0xff] %v10921_v9  ;;  %7158 = vmatpush.msk.msrb.mxu0 %vm1668_vm11, %v14804_v21  ;;  %7174 = vmatpush.msk.msrb.mxu1 %vm1700_vm12, %v14804_v21  ;;  %v10929_v38 = vpop.f32.mrf.mxu1  ;;  %v10931_v24 = vpop.f32.mrf.mxu2  ;;  %v10938_v9 = vld [vmem:[%s9220_s30 + $0x3] ss:$8 sm:$0x3]  ;;  %vm1660_vm11 = vcmp.eq.s32.totalorder %v9655_v63, %v10648_v27  ;;  %vm1692_vm12 = vcmp.eq.s32.totalorder %v14975_v57, %v10648_v27 }
 0x136   : > { %15073 = vst [vmem:[#allocation81_spill] sm:$0xff] %v10929_v38  ;;  %7192 = vmatpush.msk.msrb.mxu2 %vm1728_vm13, %v14804_v21  ;;  %7207 = vmatpush.msk.msrb.mxu3 %vm1762_vm14, %v14804_v21  ;;  %v10961_v38 = vld [vmem:[%s14677_s0 + $0x60] sm:$0xff]  ;;  %v10969_v41 = vperm.slane %v10938_v9, 0  ;;  %vm1754_vm13 = vcmp.eq.s32.totalorder %v9676_v55, %v10648_v27 }
 0x137   : > { %15074 = vst [vmem:[#allocation82_spill] sm:$0xff] %v10931_v24  ;;  %2153 = vmatmul.f32.gmra.mxu3 %v10943_v48  ;;  %7159 = vmatpush.msk.msrb.mxu0 %vm1666_vm15, %v14804_v21  ;;  %vm1658_vm15 = vcmp.eq.s32.totalorder %v14976_v62, %v10648_v27 }
 0x138   : > { %7175 = vmatpush.msk.msrb.mxu1 %vm1698_vm0, %v14804_v21  ;;  %7193 = vmatpush.msk.msrb.mxu2 %vm1726_vm1, %v14804_v21  ;;  %v10955_v24 = vpop.f32.mrf.mxu3  ;;  %vm2379_vm14 = vcmp.eq.s32.totalorder %v9229_v2, %v10969_v41  ;;  %vm1690_vm0 = vcmp.eq.s32.totalorder %v9706_v60, %v10648_v27  ;;  %vm2377_vm1 = vcmp.eq.s32.totalorder %v9232_v3, %v10969_v41 }
 0x139   : > { %15075 = vst [vmem:[#allocation83_spill] sm:$0xff] %v10955_v24  ;;  %7208 = vmatpush.msk.msrb.mxu3 %vm1760_vm2, %v14804_v21  ;;  %2066 = vmatmul.f32.gmra.mxu0 %v10961_v38  ;;  %v10974_v21 = vld [vmem:[%s14677_s0 + $0x68] sm:$0xff]  ;;  %v15077_v24 = vmov 1.0   ;;  %vm2411_vm2 = vcmp.eq.s32.totalorder %v9235_v4, %v10969_v41 }
 0x13a   : > { %15076 = vst [vmem:[#allocation84_spill] sm:$0xff] %v10974_v21  ;;  %2095 = vmatmul.f32.gmra.mxu1 %v10974_v21  ;;  %7160 = vmatpush.msk.msrb.mxu0 %vm1664_vm3, %v15077_v24  ;;  %vm2315_vm3 = vcmp.eq.s32.totalorder %v9238_v5, %v10969_v41 }
 0x13b   : > { %7176 = vmatpush.msk.msrb.mxu1 %vm1696_vm4, %v15077_v24  ;;  %7194 = vmatpush.msk.msrb.mxu2 %vm1724_vm5, %v15077_v24  ;;  %vm2347_vm4 = vcmp.eq.s32.totalorder %v9241_v6, %v10969_v41  ;;  %vm2375_vm5 = vcmp.eq.s32.totalorder %v9244_v7, %v10969_v41 }
 0x13c   : > { %7209 = vmatpush.msk.msrb.mxu3 %vm1758_vm6, %v15077_v24  ;;  %7161 = vmatpush.msk.msrb.mxu0 %vm1662_vm7, %v15077_v24  ;;  %vm2409_vm6 = vcmp.eq.s32.totalorder %v9247_v8, %v10969_v41  ;;  %vm2313_vm7 = vcmp.eq.s32.totalorder %v14977_v58, %v10969_v41 }
 0x13d   : > { %7177 = vmatpush.msk.msrb.mxu1 %vm1694_vm8, %v15077_v24  ;;  %7195 = vmatpush.msk.msrb.mxu2 %vm1722_vm9, %v15077_v24  ;;  %vm2345_vm8 = vcmp.eq.s32.totalorder %v9256_v11, %v10969_v41  ;;  %vm2373_vm9 = vcmp.eq.s32.totalorder %v9259_v12, %v10969_v41 }
 0x13e   : > { %7210 = vmatpush.msk.msrb.mxu3 %vm1756_vm10, %v15077_v24  ;;  %2231 = vmatmul.f32.vlgmr.msrb.gmra.mxu2 %v10676_v40  ;;  %v11002_v63 = vpop.f32.mrf.mxu0  ;;  %vm2407_vm10 = vcmp.eq.s32.totalorder %v14998_v52, %v10969_v41 }
 0x13f   : > { %15078 = vst [vmem:[#allocation85_spill] sm:$0xff] %v11002_v63  ;;  %7162 = vmatpush.msk.msrb.mxu0 %vm1660_vm11, %v15077_v24  ;;  %7178 = vmatpush.msk.msrb.mxu1 %vm1692_vm12, %v15077_v24  ;;  %v11010_v2 = vpop.f32.mrf.mxu1  ;;  %v11012_v55 = vpop.f32.mrf.mxu2  ;;  %vm2311_vm11 = vcmp.eq.s32.totalorder %v14978_v13, %v10969_v41  ;;  %vm2343_vm12 = vcmp.eq.s32.totalorder %v14999_v43, %v10969_v41 }
 0x140   : > { %15079 = vst [vmem:[#allocation86_spill] sm:$0xff] %v11010_v2  ;;  %7211 = vmatpush.msk.msrb.mxu3 %vm1754_vm13, %v15077_v24  ;;  %7373 = vmatpush.msk.msra.mxu2 %vm2379_vm14, %v15077_v24 }
 0x141   : > { %15080 = vst [vmem:[#allocation87_spill] sm:$0xff] %v11012_v55  ;;  %2260 = vmatmul.f32.vlgmr.msrb.gmra.mxu3 %v10700_v46  ;;  %7163 = vmatpush.msk.msrb.mxu0 %vm1658_vm15, %v15077_v24  ;;  %v15083_v55 = vld [vmem:[#allocation22_spill] sm:$0xff]  ;;  %vm2309_vm15 = vcmp.eq.s32.totalorder %v14979_v14, %v10969_v41 }
 0x142   : > { %7179 = vmatpush.msk.msrb.mxu1 %vm1690_vm0, %v15077_v24  ;;  %7374 = vmatpush.msk.msra.mxu2 %vm2377_vm1, %v15077_v24  ;;  %v11028_v27 = vpop.f32.mrf.mxu3  ;;  %vm2405_vm14 = vcmp.eq.s32.totalorder %v15083_v55, %v10969_v41  ;;  %vm2341_vm0 = vcmp.eq.s32.totalorder %v9283_v20, %v10969_v41  ;;  %vm2369_vm1 = vcmp.eq.s32.totalorder %v14980_v16, %v10969_v41 }
 0x143   : > { %15081 = vst [vmem:[#allocation88_spill] sm:$0xff] %v11028_v27  ;;  %7389 = vmatpush.msk.msra.mxu3 %vm2411_vm2, %v15077_v24  ;;  %2173 = vmatmul.f32.vlgmr.msrb.gmra.mxu0 %v10718_v53  ;;  %v15082_v27 = vld [vmem:[#allocation21_spill] sm:$0xff]  ;;  %vm2403_vm2 = vcmp.eq.s32.totalorder %v9303_v23, %v10969_v41 }
 0x144   : > { %2202 = vmatmul.f32.vlgmr.msrb.gmra.mxu1 %v10728_v51  ;;  %7341 = vmatpush.msk.msra.mxu0 %vm2315_vm3, %v15077_v24  ;;  %vm2371_vm13 = vcmp.eq.s32.totalorder %v15082_v27, %v10969_v41  ;;  %vm2307_vm3 = vcmp.eq.s32.totalorder %v15021_v49, %v10969_v41 }
 0x145   : > { %7357 = vmatpush.msk.msra.mxu1 %vm2347_vm4, %v15077_v24  ;;  %7375 = vmatpush.msk.msra.mxu2 %vm2375_vm5, %v15077_v24  ;;  %vm2339_vm4 = vcmp.eq.s32.totalorder %v9328_v25, %v10969_v41 }
 0x146   : > { %7390 = vmatpush.msk.msra.mxu3 %vm2409_vm6, %v15077_v24  ;;  %7342 = vmatpush.msk.msra.mxu0 %vm2313_vm7, %v15077_v24  ;;  %vm2401_vm6 = vcmp.eq.s32.totalorder %v9337_v26, %v10969_v41  ;;  %vm2305_vm7 = vcmp.eq.s32.totalorder %v14981_v15, %v10969_v41 }
 0x147   : > { %7358 = vmatpush.msk.msra.mxu1 %vm2345_vm8, %v15077_v24  ;;  %7376 = vmatpush.msk.msra.mxu2 %vm2373_vm9, %v15077_v24  ;;  %vm2337_vm8 = vcmp.eq.s32.totalorder %v9352_v28, %v10969_v41  ;;  %vm2365_vm9 = vcmp.eq.s32.totalorder %v9387_v33, %v10969_v41  ;;  %v15091_v33 = vld [vmem:[#allocation32_spill] sm:$0xff] }
 0x148   : > { %7391 = vmatpush.msk.msra.mxu3 %vm2407_vm10, %v15077_v24  ;;  %2234 = vmatmul.f32.gmra.mxu2 %v10756_v35  ;;  %v11062_v2 = vpop.f32.mrf.mxu0  ;;  %vm2399_vm10 = vcmp.eq.s32.totalorder %v15002_v19, %v10969_v41 }
 0x149   : > { %15084 = vst [vmem:[#allocation89_spill] sm:$0xff] %v11062_v2  ;;  %7343 = vmatpush.msk.msra.mxu0 %vm2311_vm11, %v15077_v24  ;;  %7359 = vmatpush.msk.msra.mxu1 %vm2343_vm12, %v15077_v24  ;;  %v11070_v63 = vpop.f32.mrf.mxu1  ;;  %v11072_v55 = vpop.f32.mrf.mxu2  ;;  %vm2303_vm11 = vcmp.eq.s32.totalorder %v14982_v22, %v10969_v41  ;;  %v15090_v2 = vld [vmem:[#allocation35_spill] sm:$0xff] }
 0x14a   : > { %15085 = vst [vmem:[#allocation90_spill] sm:$0xff] %v11070_v63  ;;  %7377 = vmatpush.msk.msra.mxu2 %vm2371_vm13, %v15077_v24  ;;  %7392 = vmatpush.msk.msra.mxu3 %vm2405_vm14, %v15077_v24  ;;  %vm2363_vm13 = vcmp.eq.s32.totalorder %v15090_v2, %v10969_v41  ;;  %vm2397_vm14 = vcmp.eq.s32.totalorder %v15091_v33, %v10969_v41 }
 0x14b   : > { %15086 = vst [vmem:[#allocation91_spill] sm:$0xff] %v11072_v55  ;;  %2263 = vmatmul.f32.gmra.mxu3 %v10780_v45  ;;  %7344 = vmatpush.msk.msra.mxu0 %vm2309_vm15, %v15077_v24  ;;  %v15087_v55 = vld [vmem:[#allocation27_spill] sm:$0xff]  ;;  %vm2301_vm15 = vcmp.eq.s32.totalorder %v14983_v30, %v10969_v41  ;;  %v15096_v30 = vld [vmem:[#allocation76_spill] sm:$0xff] }
 0x14c   : > { %7360 = vmatpush.msk.msra.mxu1 %vm2341_vm0, %v15077_v24  ;;  %7378 = vmatpush.msk.msra.mxu2 %vm2369_vm1, %v15077_v24  ;;  %vm2367_vm5 = vcmp.eq.s32.totalorder %v15087_v55, %v10969_v41  ;;  %v11088_v63 = vpop.f32.mrf.mxu3  ;;  %vm2333_vm0 = vcmp.eq.s32.totalorder %v9406_v36, %v10969_v41  ;;  %vm2361_vm1 = vcmp.eq.s32.totalorder %v14984_v32, %v10969_v41 }
 0x14d   : > { %15088 = vst [vmem:[#allocation92_spill] sm:$0xff] %v11088_v63  ;;  %7393 = vmatpush.msk.msra.mxu3 %vm2403_vm2, %v15077_v24  ;;  %2176 = vmatmul.f32.gmra.mxu0 %v10798_v18  ;;  %v15089_v63 = vld [vmem:[#allocation30_spill] sm:$0xff] }
 0x14e   : > { %2205 = vmatmul.f32.gmra.mxu1 %v10808_v29  ;;  %7345 = vmatpush.msk.msra.mxu0 %vm2307_vm3, %v15077_v24  ;;  %vm2335_vm12 = vcmp.eq.s32.totalorder %v15089_v63, %v10969_v41  ;;  %vm2299_vm3 = vcmp.eq.s32.totalorder %v15061_v34, %v10969_v41  ;;  %v15100_v34 = vld [vmem:[#allocation40_spill] sm:$0xff] }
 0x14f   : > { %7361 = vmatpush.msk.msra.mxu1 %vm2339_vm4, %v15077_v24  ;;  %7379 = vmatpush.msk.msra.mxu2 %vm2367_vm5, %v15077_v24  ;;  %vm2331_vm4 = vcmp.eq.s32.totalorder %v15031_v0, %v10969_v41  ;;  %v15102_v0 = vld [vmem:[#allocation41_spill] sm:$0xff] }
 0x150   : > { %7394 = vmatpush.msk.msra.mxu3 %vm2401_vm6, %v15077_v24  ;;  %7346 = vmatpush.msk.msra.mxu0 %vm2305_vm7, %v15077_v24  ;;  %vm2393_vm6 = vcmp.eq.s32.totalorder %v9472_v42, %v10969_v41  ;;  %vm2297_vm7 = vcmp.eq.s32.totalorder %v15100_v34, %v10969_v41 }
 0x151   : > { %7362 = vmatpush.msk.msra.mxu1 %vm2337_vm8, %v15077_v24  ;;  %7380 = vmatpush.msk.msra.mxu2 %vm2365_vm9, %v15077_v24  ;;  %vm2329_vm8 = vcmp.eq.s32.totalorder %v15102_v0, %v10969_v41  ;;  %v15107_v0 = vld [vmem:[#allocation47_spill] sm:$0xff] }
 0x152   : > { %7395 = vmatpush.msk.msra.mxu3 %vm2399_vm10, %v15077_v24  ;;  %2237 = vmatmul.f32.gmra.mxu2 %v10836_v17  ;;  %v11122_v22 = vpop.f32.mrf.mxu0  ;;  %vm2391_vm10 = vcmp.eq.s32.totalorder %v15068_v10, %v10969_v41 }
 0x153   : > { %15092 = vst [vmem:[#allocation93_spill] sm:$0xff] %v11122_v22  ;;  %7347 = vmatpush.msk.msra.mxu0 %vm2303_vm11, %v15077_v24  ;;  %7363 = vmatpush.msk.msra.mxu1 %vm2335_vm12, %v15077_v24  ;;  %v11130_v33 = vpop.f32.mrf.mxu1  ;;  %v11132_v2 = vpop.f32.mrf.mxu2  ;;  %v15095_v22 = vld [vmem:[#allocation36_spill] sm:$0xff] }
 0x154   : > { %15093 = vst [vmem:[#allocation94_spill] sm:$0xff] %v11130_v33  ;;  %7381 = vmatpush.msk.msra.mxu2 %vm2363_vm13, %v15077_v24  ;;  %7396 = vmatpush.msk.msra.mxu3 %vm2397_vm14, %v15077_v24  ;;  %vm2395_vm2 = vcmp.eq.s32.totalorder %v15095_v22, %v10969_v41  ;;  %v15101_v22 = vld [vmem:[#allocation79_spill] sm:$0xff]  ;;  %vm2389_vm14 = vcmp.eq.s32.totalorder %v15107_v0, %v10969_v41 }
 0x155   : > { %15094 = vst [vmem:[#allocation95_spill] sm:$0xff] %v11132_v2  ;;  %2266 = vmatmul.f32.gmra.mxu3 %v15096_v30  ;;  %7348 = vmatpush.msk.msra.mxu0 %vm2301_vm15, %v15077_v24  ;;  %v15097_v2 = vld [vmem:[#allocation42_spill] sm:$0xff]  ;;  %vm2293_vm15 = vcmp.eq.s32.totalorder %v15042_v44, %v10969_v41 }
 0x156   : > { %7364 = vmatpush.msk.msra.mxu1 %vm2333_vm0, %v15077_v24  ;;  %7382 = vmatpush.msk.msra.mxu2 %vm2361_vm1, %v15077_v24  ;;  %vm2359_vm5 = vcmp.eq.s32.totalorder %v15097_v2, %v10969_v41  ;;  %v11148_v33 = vpop.f32.mrf.mxu3  ;;  %v15099_v30 = vld [vmem:[#allocation78_spill] sm:$0xff]  ;;  %vm2353_vm1 = vcmp.eq.s32.totalorder %v15013_v31, %v10969_v41 }
 0x157   : > { %15098 = vst [vmem:[#allocation96_spill] sm:$0xff] %v11148_v33  ;;  %7397 = vmatpush.msk.msra.mxu3 %vm2395_vm2, %v15077_v24  ;;  %2179 = vmatmul.f32.gmra.mxu0 %v15099_v30  ;;  %v15103_v2 = vld [vmem:[#allocation46_spill] sm:$0xff]  ;;  %v15104_v33 = vld [vmem:[#allocation44_spill] sm:$0xff]  ;;  %vm2387_vm2 = vcmp.eq.s32.totalorder %v14991_v50, %v10969_v41 }
 0x158   : > { %2208 = vmatmul.f32.gmra.mxu1 %v15101_v22  ;;  %7349 = vmatpush.msk.msra.mxu0 %vm2299_vm3, %v15077_v24  ;;  %vm2357_vm9 = vcmp.eq.s32.totalorder %v15103_v2, %v10969_v41  ;;  %vm2295_vm11 = vcmp.eq.s32.totalorder %v15104_v33, %v10969_v41  ;;  %v15105_v22 = vld [vmem:[#allocation45_spill] sm:$0xff]  ;;  %v15106_v2 = vld [vmem:[#allocation50_spill] sm:$0xff]  ;;  %vm2291_vm3 = vcmp.eq.s32.totalorder %v15047_v1, %v10969_v41 }
 0x159   : > { %7365 = vmatpush.msk.msra.mxu1 %vm2331_vm4, %v15077_v24  ;;  %7383 = vmatpush.msk.msra.mxu2 %vm2359_vm5, %v15077_v24  ;;  %vm2327_vm12 = vcmp.eq.s32.totalorder %v15105_v22, %v10969_v41  ;;  %vm2355_vm13 = vcmp.eq.s32.totalorder %v15106_v2, %v10969_v41  ;;  %v15109_v22 = vld [vmem:[#allocation49_spill] sm:$0xff]  ;;  %vm2351_vm5 = vcmp.eq.s32.totalorder %v9637_v61, %v10969_v41 }
 0x15a   : > { %7398 = vmatpush.msk.msra.mxu3 %vm2393_vm6, %v15077_v24  ;;  %7350 = vmatpush.msk.msra.mxu0 %vm2297_vm7, %v15077_v24  ;;  %vm2325_vm0 = vcmp.eq.s32.totalorder %v15109_v22, %v10969_v41  ;;  %vm2385_vm6 = vcmp.eq.s32.totalorder %v15016_v39, %v10969_v41  ;;  %vm2289_vm7 = vcmp.eq.s32.totalorder %v9619_v59, %v10969_v41 }
 0x15b   : > { %7366 = vmatpush.msk.msra.mxu1 %vm2329_vm8, %v15077_v24  ;;  %7384 = vmatpush.msk.msra.mxu2 %vm2357_vm9, %v15077_v24  ;;  %vm2321_vm8 = vcmp.eq.s32.totalorder %v14974_v54, %v10969_v41  ;;  %vm2349_vm9 = vcmp.eq.s32.totalorder %v9673_v56, %v10969_v41  ;;  %v15116_v56 = vld [vmem:[#allocation16_spill] sm:$0xff] }
 0x15c   : > { %7399 = vmatpush.msk.msra.mxu3 %vm2391_vm10, %v15077_v24  ;;  %2240 = vmatmul.f32.gmra.mxu2 %v10916_v37  ;;  %v11182_v33 = vpop.f32.mrf.mxu0  ;;  %vm2383_vm10 = vcmp.eq.s32.totalorder %v14996_v47, %v10969_v41 }
 0x15d   : > { %15108 = vst [vmem:[#allocation78_spill] sm:$0xff] %v11182_v33  ;;  %7351 = vmatpush.msk.msra.mxu0 %vm2295_vm11, %v15077_v24  ;;  %7367 = vmatpush.msk.msra.mxu1 %vm2327_vm12, %v15077_v24  ;;  %v11190_v0 = vpop.f32.mrf.mxu1  ;;  %v11192_v2 = vpop.f32.mrf.mxu2  ;;  %v11217_v33 = vperm.slane %v10938_v9, 1  ;;  %v15114_v9 = vld [vmem:[#allocation59_spill] sm:$0xff]  ;;  %vm2319_vm12 = vcmp.eq.s32.totalorder %v14975_v57, %v10969_v41 }
 0x15e   : > { %15110 = vst [vmem:[#allocation40_spill] sm:$0xff] %v11190_v0  ;;  %7385 = vmatpush.msk.msra.mxu2 %vm2355_vm13, %v15077_v24  ;;  %7400 = vmatpush.msk.msra.mxu3 %vm2389_vm14, %v15077_v24  ;;  %vm2287_vm11 = vcmp.eq.s32.totalorder %v15114_v9, %v10969_v41 }
 0x15f   : > { %15111 = vst [vmem:[#allocation97_spill] sm:$0xff] %v11192_v2  ;;  %2269 = vmatmul.f32.gmra.mxu3 %v10943_v48  ;;  %7352 = vmatpush.msk.msra.mxu0 %vm2293_vm15, %v15077_v24  ;;  %v15112_v2 = vld [vmem:[#allocation53_spill] sm:$0xff]  ;;  %vm2380_vm14 = vcmp.eq.s32.totalorder %v15116_v56, %v11217_v33  ;;  %vm2285_vm15 = vcmp.eq.s32.totalorder %v14976_v62, %v10969_v41 }
 0x160   : > { %7368 = vmatpush.msk.msra.mxu1 %vm2325_vm0, %v15077_v24  ;;  %7386 = vmatpush.msk.msra.mxu2 %vm2353_vm1, %v15077_v24  ;;  %vm2323_vm4 = vcmp.eq.s32.totalorder %v15112_v2, %v10969_v41  ;;  %v11208_v0 = vpop.f32.mrf.mxu3  ;;  %vm2317_vm0 = vcmp.eq.s32.totalorder %v9706_v60, %v10969_v41  ;;  %vm2378_vm1 = vcmp.eq.s32.totalorder %v9232_v3, %v11217_v33 }
 0x161   : > { %15113 = vst [vmem:[#allocation98_spill] sm:$0xff] %v11208_v0  ;;  %7401 = vmatpush.msk.msra.mxu3 %vm2387_vm2, %v15077_v24  ;;  %2182 = vmatmul.f32.gmra.mxu0 %v10961_v38  ;;  %v15115_v0 = vld [vmem:[#allocation62_spill] sm:$0xff]  ;;  %vm2412_vm2 = vcmp.eq.s32.totalorder %v9235_v4, %v11217_v33 }
 0x162   : > { %2211 = vmatmul.f32.gmra.mxu1 %v10974_v21  ;;  %7353 = vmatpush.msk.msra.mxu0 %vm2291_vm3, %v15077_v24  ;;  %vm2381_vm13 = vcmp.eq.s32.totalorder %v15115_v0, %v10969_v41  ;;  %vm2316_vm3 = vcmp.eq.s32.totalorder %v9238_v5, %v11217_v33 }
 0x163   : > { %7369 = vmatpush.msk.msra.mxu1 %vm2323_vm4, %v15077_v24  ;;  %7387 = vmatpush.msk.msra.mxu2 %vm2351_vm5, %v15077_v24  ;;  %vm2348_vm4 = vcmp.eq.s32.totalorder %v9241_v6, %v11217_v33  ;;  %vm2376_vm5 = vcmp.eq.s32.totalorder %v9244_v7, %v11217_v33 }
 0x164   : > { %7402 = vmatpush.msk.msra.mxu3 %vm2385_vm6, %v15077_v24  ;;  %7354 = vmatpush.msk.msra.mxu0 %vm2289_vm7, %v15077_v24  ;;  %vm2410_vm6 = vcmp.eq.s32.totalorder %v9247_v8, %v11217_v33  ;;  %vm2314_vm7 = vcmp.eq.s32.totalorder %v14977_v58, %v11217_v33 }
 0x165   : > { %7370 = vmatpush.msk.msra.mxu1 %vm2321_vm8, %v15077_v24  ;;  %7388 = vmatpush.msk.msra.mxu2 %vm2349_vm9, %v15077_v24  ;;  %vm2346_vm8 = vcmp.eq.s32.totalorder %v9256_v11, %v11217_v33  ;;  %vm2374_vm9 = vcmp.eq.s32.totalorder %v9259_v12, %v11217_v33 }
 0x166   : > { %7403 = vmatpush.msk.msra.mxu3 %vm2383_vm10, %v15077_v24  ;;  %2743 = vmatmul.f32.vlgmr.msra.gmra.mxu2 %v10676_v40  ;;  %v11245_v9 = vpop.f32.mrf.mxu0  ;;  %vm2408_vm10 = vcmp.eq.s32.totalorder %v14998_v52, %v11217_v33 }
 0x167   : > { %15117 = vst [vmem:[#allocation99_spill] sm:$0xff] %v11245_v9  ;;  %7355 = vmatpush.msk.msra.mxu0 %vm2287_vm11, %v15077_v24  ;;  %7371 = vmatpush.msk.msra.mxu1 %vm2319_vm12, %v15077_v24  ;;  %v11253_v56 = vpop.f32.mrf.mxu1  ;;  %v11255_v0 = vpop.f32.mrf.mxu2  ;;  %vm2312_vm11 = vcmp.eq.s32.totalorder %v14978_v13, %v11217_v33  ;;  %vm2344_vm12 = vcmp.eq.s32.totalorder %v14999_v43, %v11217_v33 }
 0x168   : > { %15118 = vst [vmem:[#allocation100_spill] sm:$0xff] %v11253_v56  ;;  %7404 = vmatpush.msk.msra.mxu3 %vm2381_vm13, %v15077_v24  ;;  %7437 = vmatpush.msk.msrb.mxu2 %vm2380_vm14, %v15077_v24  ;;  %vm2372_vm13 = vcmp.eq.s32.totalorder %v15082_v27, %v11217_v33 }
 0x169   : > { %15119 = vst [vmem:[#allocation101_spill] sm:$0xff] %v11255_v0  ;;  %2772 = vmatmul.f32.vlgmr.msra.gmra.mxu3 %v10700_v46  ;;  %7356 = vmatpush.msk.msra.mxu0 %vm2285_vm15, %v15077_v24  ;;  %vm2310_vm15 = vcmp.eq.s32.totalorder %v14979_v14, %v11217_v33 }
 0x16a   : > { %7372 = vmatpush.msk.msra.mxu1 %vm2317_vm0, %v15077_v24  ;;  %7438 = vmatpush.msk.msrb.mxu2 %vm2378_vm1, %v15077_v24  ;;  %v11271_v41 = vpop.f32.mrf.mxu3  ;;  %vm2342_vm0 = vcmp.eq.s32.totalorder %v9283_v20, %v11217_v33  ;;  %vm2370_vm1 = vcmp.eq.s32.totalorder %v14980_v16, %v11217_v33 }
 0x16b   : > { %15120 = vst [vmem:[#allocation102_spill] sm:$0xff] %v11271_v41  ;;  %7453 = vmatpush.msk.msrb.mxu3 %vm2412_vm2, %v15077_v24  ;;  %2685 = vmatmul.f32.vlgmr.msra.gmra.mxu0 %v10718_v53  ;;  %v15121_v41 = vld [vmem:[#allocation22_spill] sm:$0xff]  ;;  %vm2404_vm2 = vcmp.eq.s32.totalorder %v9303_v23, %v11217_v33 }
 0x16c   : > { %2714 = vmatmul.f32.vlgmr.msra.gmra.mxu1 %v10728_v51  ;;  %7405 = vmatpush.msk.msrb.mxu0 %vm2316_vm3, %v15077_v24  ;;  %vm2406_vm14 = vcmp.eq.s32.totalorder %v15121_v41, %v11217_v33  ;;  %vm2308_vm3 = vcmp.eq.s32.totalorder %v15021_v49, %v11217_v33 }
 0x16d   : > { %7421 = vmatpush.msk.msrb.mxu1 %vm2348_vm4, %v15077_v24  ;;  %7439 = vmatpush.msk.msrb.mxu2 %vm2376_vm5, %v15077_v24  ;;  %vm2340_vm4 = vcmp.eq.s32.totalorder %v9328_v25, %v11217_v33  ;;  %vm2368_vm5 = vcmp.eq.s32.totalorder %v15087_v55, %v11217_v33 }
 0x16e   : > { %7454 = vmatpush.msk.msrb.mxu3 %vm2410_vm6, %v15077_v24  ;;  %7406 = vmatpush.msk.msrb.mxu0 %vm2314_vm7, %v15077_v24  ;;  %vm2402_vm6 = vcmp.eq.s32.totalorder %v9337_v26, %v11217_v33  ;;  %vm2306_vm7 = vcmp.eq.s32.totalorder %v14981_v15, %v11217_v33 }
 0x16f   : > { %7422 = vmatpush.msk.msrb.mxu1 %vm2346_vm8, %v15077_v24  ;;  %7440 = vmatpush.msk.msrb.mxu2 %vm2374_vm9, %v15077_v24  ;;  %vm2338_vm8 = vcmp.eq.s32.totalorder %v9352_v28, %v11217_v33 }
 0x170   : > { %7455 = vmatpush.msk.msrb.mxu3 %vm2408_vm10, %v15077_v24  ;;  %2746 = vmatmul.f32.gmra.mxu2 %v10756_v35  ;;  %v11305_v0 = vpop.f32.mrf.mxu0  ;;  %vm2400_vm10 = vcmp.eq.s32.totalorder %v15002_v19, %v11217_v33  ;;  %v15130_v19 = vld [vmem:[#allocation33_spill] sm:$0xff] }
 0x171   : > { %15122 = vst [vmem:[#allocation103_spill] sm:$0xff] %v11305_v0  ;;  %7407 = vmatpush.msk.msrb.mxu0 %vm2312_vm11, %v15077_v24  ;;  %7423 = vmatpush.msk.msrb.mxu1 %vm2344_vm12, %v15077_v24  ;;  %v11313_v56 = vpop.f32.mrf.mxu1  ;;  %v11315_v9 = vpop.f32.mrf.mxu2  ;;  %vm2336_vm12 = vcmp.eq.s32.totalorder %v15089_v63, %v11217_v33  ;;  %v15128_v0 = vld [vmem:[#allocation35_spill] sm:$0xff] }
 0x172   : > { %15123 = vst [vmem:[#allocation104_spill] sm:$0xff] %v11313_v56  ;;  %7441 = vmatpush.msk.msrb.mxu2 %vm2372_vm13, %v15077_v24  ;;  %7456 = vmatpush.msk.msrb.mxu3 %vm2406_vm14, %v15077_v24  ;;  %v15126_v56 = vld [vmem:[#allocation31_spill] sm:$0xff]  ;;  %vm2364_vm13 = vcmp.eq.s32.totalorder %v15128_v0, %v11217_v33 }
 0x173   : > { %15124 = vst [vmem:[#allocation105_spill] sm:$0xff] %v11315_v9  ;;  %2775 = vmatmul.f32.gmra.mxu3 %v10780_v45  ;;  %7408 = vmatpush.msk.msrb.mxu0 %vm2310_vm15, %v15077_v24  ;;  %vm2366_vm9 = vcmp.eq.s32.totalorder %v15126_v56, %v11217_v33  ;;  %v15129_v56 = vld [vmem:[#allocation32_spill] sm:$0xff]  ;;  %vm2302_vm15 = vcmp.eq.s32.totalorder %v15130_v19, %v11217_v33 }
 0x174   : > { %7424 = vmatpush.msk.msrb.mxu1 %vm2342_vm0, %v15077_v24  ;;  %7442 = vmatpush.msk.msrb.mxu2 %vm2370_vm1, %v15077_v24  ;;  %v11331_v9 = vpop.f32.mrf.mxu3  ;;  %vm2398_vm14 = vcmp.eq.s32.totalorder %v15129_v56, %v11217_v33  ;;  %vm2334_vm0 = vcmp.eq.s32.totalorder %v9406_v36, %v11217_v33  ;;  %vm2362_vm1 = vcmp.eq.s32.totalorder %v14984_v32, %v11217_v33  ;;  %v15135_v19 = vld [vmem:[#allocation76_spill] sm:$0xff]  ;;  %v15136_v36 = vld [vmem:[#allocation37_spill] sm:$0xff] }
 0x175   : > { %15125 = vst [vmem:[#allocation106_spill] sm:$0xff] %v11331_v9  ;;  %7457 = vmatpush.msk.msrb.mxu3 %vm2404_vm2, %v15077_v24  ;;  %2688 = vmatmul.f32.gmra.mxu0 %v10798_v18  ;;  %v15127_v9 = vld [vmem:[#allocation29_spill] sm:$0xff] }
 0x176   : > { %2717 = vmatmul.f32.gmra.mxu1 %v10808_v29  ;;  %7409 = vmatpush.msk.msrb.mxu0 %vm2308_vm3, %v15077_v24  ;;  %vm2304_vm11 = vcmp.eq.s32.totalorder %v15127_v9, %v11217_v33  ;;  %vm2300_vm3 = vcmp.eq.s32.totalorder %v15136_v36, %v11217_v33  ;;  %v15140_v36 = vld [vmem:[#allocation79_spill] sm:$0xff] }
 0x177   : > { %7425 = vmatpush.msk.msrb.mxu1 %vm2340_vm4, %v15077_v24  ;;  %7443 = vmatpush.msk.msrb.mxu2 %vm2368_vm5, %v15077_v24 }
 0x178   : > { %7458 = vmatpush.msk.msrb.mxu3 %vm2402_vm6, %v15077_v24  ;;  %7410 = vmatpush.msk.msrb.mxu0 %vm2306_vm7, %v15077_v24  ;;  %vm2394_vm6 = vcmp.eq.s32.totalorder %v9472_v42, %v11217_v33  ;;  %vm2298_vm7 = vcmp.eq.s32.totalorder %v15100_v34, %v11217_v33 }
 0x179   : > { %7426 = vmatpush.msk.msrb.mxu1 %vm2338_vm8, %v15077_v24  ;;  %7444 = vmatpush.msk.msrb.mxu2 %vm2366_vm9, %v15077_v24 }
 0x17a   : > { %7459 = vmatpush.msk.msrb.mxu3 %vm2400_vm10, %v15077_v24  ;;  %2749 = vmatmul.f32.gmra.mxu2 %v10836_v17  ;;  %v11365_v9 = vpop.f32.mrf.mxu0  ;;  %vm2392_vm10 = vcmp.eq.s32.totalorder %v15068_v10, %v11217_v33  ;;  %v15146_v10 = vld [vmem:[#allocation47_spill] sm:$0xff] }
 0x17b   : > { %15131 = vst [vmem:[#allocation107_spill] sm:$0xff] %v11365_v9  ;;  %7411 = vmatpush.msk.msrb.mxu0 %vm2304_vm11, %v15077_v24  ;;  %7427 = vmatpush.msk.msrb.mxu1 %vm2336_vm12, %v15077_v24  ;;  %v11373_v56 = vpop.f32.mrf.mxu1  ;;  %v11375_v0 = vpop.f32.mrf.mxu2  ;;  %v15134_v9 = vld [vmem:[#allocation36_spill] sm:$0xff] }
 0x17c   : > { %15132 = vst [vmem:[#allocation108_spill] sm:$0xff] %v11373_v56  ;;  %7445 = vmatpush.msk.msrb.mxu2 %vm2364_vm13, %v15077_v24  ;;  %7460 = vmatpush.msk.msrb.mxu3 %vm2398_vm14, %v15077_v24  ;;  %vm2396_vm2 = vcmp.eq.s32.totalorder %v15134_v9, %v11217_v33  ;;  %v15138_v56 = vld [vmem:[#allocation42_spill] sm:$0xff]  ;;  %vm2390_vm14 = vcmp.eq.s32.totalorder %v15146_v10, %v11217_v33 }
 0x17d   : > { %15133 = vst [vmem:[#allocation109_spill] sm:$0xff] %v11375_v0  ;;  %2778 = vmatmul.f32.gmra.mxu3 %v15135_v19  ;;  %7412 = vmatpush.msk.msrb.mxu0 %vm2302_vm15, %v15077_v24  ;;  %v15137_v0 = vld [vmem:[#allocation38_spill] sm:$0xff]  ;;  %vm2360_vm5 = vcmp.eq.s32.totalorder %v15138_v56, %v11217_v33  ;;  %vm2294_vm15 = vcmp.eq.s32.totalorder %v15042_v44, %v11217_v33 }
 0x17e   : > { %7428 = vmatpush.msk.msrb.mxu1 %vm2334_vm0, %v15077_v24  ;;  %7446 = vmatpush.msk.msrb.mxu2 %vm2362_vm1, %v15077_v24  ;;  %vm2332_vm4 = vcmp.eq.s32.totalorder %v15137_v0, %v11217_v33  ;;  %v11391_v32 = vpop.f32.mrf.mxu3  ;;  %v15141_v0 = vld [vmem:[#allocation41_spill] sm:$0xff]  ;;  %v15142_v56 = vld [vmem:[#allocation46_spill] sm:$0xff]  ;;  %vm2326_vm0 = vcmp.eq.s32.totalorder %v15109_v22, %v11217_v33  ;;  %vm2354_vm1 = vcmp.eq.s32.totalorder %v15013_v31, %v11217_v33 }
 0x17f   : > { %15139 = vst [vmem:[#allocation36_spill] sm:$0xff] %v11391_v32  ;;  %7461 = vmatpush.msk.msrb.mxu3 %vm2396_vm2, %v15077_v24  ;;  %2691 = vmatmul.f32.gmra.mxu0 %v15099_v30  ;;  %vm2330_vm8 = vcmp.eq.s32.totalorder %v15141_v0, %v11217_v33  ;;  %vm2358_vm9 = vcmp.eq.s32.totalorder %v15142_v56, %v11217_v33  ;;  %v15143_v32 = vld [vmem:[#allocation44_spill] sm:$0xff]  ;;  %v15145_v56 = vld [vmem:[#allocation50_spill] sm:$0xff] }
 0x180   : > { %2720 = vmatmul.f32.gmra.mxu1 %v15140_v36  ;;  %7413 = vmatpush.msk.msrb.mxu0 %vm2300_vm3, %v15077_v24  ;;  %vm2296_vm11 = vcmp.eq.s32.totalorder %v15143_v32, %v11217_v33  ;;  %v15144_v36 = vld [vmem:[#allocation45_spill] sm:$0xff]  ;;  %vm2356_vm13 = vcmp.eq.s32.totalorder %v15145_v56, %v11217_v33  ;;  %vm2388_vm2 = vcmp.eq.s32.totalorder %v14991_v50, %v11217_v33 }
 0x181   : > { %7429 = vmatpush.msk.msrb.mxu1 %vm2332_vm4, %v15077_v24  ;;  %7447 = vmatpush.msk.msrb.mxu2 %vm2360_vm5, %v15077_v24  ;;  %vm2328_vm12 = vcmp.eq.s32.totalorder %v15144_v36, %v11217_v33  ;;  %vm2292_vm3 = vcmp.eq.s32.totalorder %v15047_v1, %v11217_v33  ;;  %vm2324_vm4 = vcmp.eq.s32.totalorder %v15112_v2, %v11217_v33 }
 0x182   : > { %7462 = vmatpush.msk.msrb.mxu3 %vm2394_vm6, %v15077_v24  ;;  %7414 = vmatpush.msk.msrb.mxu0 %vm2298_vm7, %v15077_v24  ;;  %vm2352_vm5 = vcmp.eq.s32.totalorder %v9637_v61, %v11217_v33  ;;  %vm2386_vm6 = vcmp.eq.s32.totalorder %v15016_v39, %v11217_v33  ;;  %vm2290_vm7 = vcmp.eq.s32.totalorder %v9619_v59, %v11217_v33 }
 0x183   : > { %7430 = vmatpush.msk.msrb.mxu1 %vm2330_vm8, %v15077_v24  ;;  %7448 = vmatpush.msk.msrb.mxu2 %vm2358_vm9, %v15077_v24  ;;  %vm2322_vm8 = vcmp.eq.s32.totalorder %v14974_v54, %v11217_v33  ;;  %v15154_v54 = vld [vmem:[#allocation16_spill] sm:$0xff] }
 0x184   : > { %7463 = vmatpush.msk.msrb.mxu3 %vm2392_vm10, %v15077_v24  ;;  %2752 = vmatmul.f32.gmra.mxu2 %v10916_v37  ;;  %v11425_v32 = vpop.f32.mrf.mxu0  ;;  %vm2384_vm10 = vcmp.eq.s32.totalorder %v14996_v47, %v11217_v33 }
 0x185   : > { %15147 = vst [vmem:[#allocation76_spill] sm:$0xff] %v11425_v32  ;;  %7415 = vmatpush.msk.msrb.mxu0 %vm2296_vm11, %v15077_v24  ;;  %7431 = vmatpush.msk.msrb.mxu1 %vm2328_vm12, %v15077_v24  ;;  %v11433_v10 = vpop.f32.mrf.mxu1  ;;  %v11435_v56 = vpop.f32.mrf.mxu2  ;;  %v11442_v32 = vld [vmem:[%s9220_s30 + $0x4] ss:$8 sm:$0x3]  ;;  %vm2320_vm12 = vcmp.eq.s32.totalorder %v14975_v57, %v11217_v33 }
 0x186   : > { %15148 = vst [vmem:[#allocation110_spill] sm:$0xff] %v11433_v10  ;;  %7449 = vmatpush.msk.msrb.mxu2 %vm2356_vm13, %v15077_v24  ;;  %7464 = vmatpush.msk.msrb.mxu3 %vm2390_vm14, %v15077_v24  ;;  %v11463_v10 = vperm.slane %v11442_v32, 0 }
 0x187   : > { %15149 = vst [vmem:[#allocation111_spill] sm:$0xff] %v11435_v56  ;;  %2781 = vmatmul.f32.gmra.mxu3 %v10943_v48  ;;  %7416 = vmatpush.msk.msrb.mxu0 %vm2294_vm15, %v15077_v24  ;;  %vm2286_vm15 = vcmp.eq.s32.totalorder %v14976_v62, %v11217_v33 }
 0x188   : > { %7432 = vmatpush.msk.msrb.mxu1 %vm2326_vm0, %v15077_v24  ;;  %7450 = vmatpush.msk.msrb.mxu2 %vm2354_vm1, %v15077_v24  ;;  %v11454_v56 = vpop.f32.mrf.mxu3  ;;  %vm3007_vm14 = vcmp.eq.s32.totalorder %v15154_v54, %v11463_v10  ;;  %vm2318_vm0 = vcmp.eq.s32.totalorder %v9706_v60, %v11217_v33  ;;  %vm3005_vm1 = vcmp.eq.s32.totalorder %v9232_v3, %v11463_v10 }
 0x189   : > { %15150 = vst [vmem:[#allocation112_spill] sm:$0xff] %v11454_v56  ;;  %7465 = vmatpush.msk.msrb.mxu3 %vm2388_vm2, %v15077_v24  ;;  %2694 = vmatmul.f32.gmra.mxu0 %v10961_v38  ;;  %v15151_v56 = vld [vmem:[#allocation61_spill] sm:$0xff]  ;;  %vm3039_vm2 = vcmp.eq.s32.totalorder %v9235_v4, %v11463_v10 }
 0x18a   : > { %2723 = vmatmul.f32.gmra.mxu1 %v10974_v21  ;;  %7417 = vmatpush.msk.msrb.mxu0 %vm2292_vm3, %v15077_v24  ;;  %vm2350_vm9 = vcmp.eq.s32.totalorder %v15151_v56, %v11217_v33  ;;  %v15152_v21 = vld [vmem:[#allocation59_spill] sm:$0xff]  ;;  %v15153_v56 = vld [vmem:[#allocation62_spill] sm:$0xff]  ;;  %vm2943_vm3 = vcmp.eq.s32.totalorder %v9238_v5, %v11463_v10 }
 0x18b   : > { %7433 = vmatpush.msk.msrb.mxu1 %vm2324_vm4, %v15077_v24  ;;  %7451 = vmatpush.msk.msrb.mxu2 %vm2352_vm5, %v15077_v24  ;;  %vm2288_vm11 = vcmp.eq.s32.totalorder %v15152_v21, %v11217_v33  ;;  %vm2382_vm13 = vcmp.eq.s32.totalorder %v15153_v56, %v11217_v33  ;;  %vm2975_vm4 = vcmp.eq.s32.totalorder %v9241_v6, %v11463_v10 }
 0x18c   : > { %7466 = vmatpush.msk.msrb.mxu3 %vm2386_vm6, %v15077_v24  ;;  %7418 = vmatpush.msk.msrb.mxu0 %vm2290_vm7, %v15077_v24  ;;  %vm3003_vm5 = vcmp.eq.s32.totalorder %v9244_v7, %v11463_v10  ;;  %vm3037_vm6 = vcmp.eq.s32.totalorder %v9247_v8, %v11463_v10  ;;  %vm2941_vm7 = vcmp.eq.s32.totalorder %v14977_v58, %v11463_v10 }
 0x18d   : > { %7434 = vmatpush.msk.msrb.mxu1 %vm2322_vm8, %v15077_v24  ;;  %7452 = vmatpush.msk.msrb.mxu2 %vm2350_vm9, %v15077_v24  ;;  %vm2973_vm8 = vcmp.eq.s32.totalorder %v9256_v11, %v11463_v10  ;;  %vm3001_vm9 = vcmp.eq.s32.totalorder %v9259_v12, %v11463_v10 }
 0x18e   : > { %7467 = vmatpush.msk.msrb.mxu3 %vm2384_vm10, %v15077_v24  ;;  %2859 = vmatmul.f32.vlgmr.msrb.gmra.mxu2 %v10676_v40  ;;  %v11491_v21 = vpop.f32.mrf.mxu0  ;;  %vm3035_vm10 = vcmp.eq.s32.totalorder %v14998_v52, %v11463_v10 }
 0x18f   : > { %15155 = vst [vmem:[#allocation113_spill] sm:$0xff] %v11491_v21  ;;  %7419 = vmatpush.msk.msrb.mxu0 %vm2288_vm11, %v15077_v24  ;;  %7435 = vmatpush.msk.msrb.mxu1 %vm2320_vm12, %v15077_v24  ;;  %v11499_v54 = vpop.f32.mrf.mxu1  ;;  %v11501_v56 = vpop.f32.mrf.mxu2  ;;  %vm2939_vm11 = vcmp.eq.s32.totalorder %v14978_v13, %v11463_v10  ;;  %vm2971_vm12 = vcmp.eq.s32.totalorder %v14999_v43, %v11463_v10  ;;  %v15170_v21 = vld [vmem:[#allocation34_spill] sm:$0xff] }
 0x190   : > { %15156 = vst [vmem:[#allocation114_spill] sm:$0xff] %v11499_v54  ;;  %7468 = vmatpush.msk.msrb.mxu3 %vm2382_vm13, %v15077_v24  ;;  %7630 = vmatpush.msk.msra.mxu2 %vm3007_vm14, %v15077_v24  ;;  %vm2999_vm13 = vcmp.eq.s32.totalorder %v15082_v27, %v11463_v10  ;;  %vm3033_vm14 = vcmp.eq.s32.totalorder %v15121_v41, %v11463_v10 }
 0x191   : > { %15157 = vst [vmem:[#allocation115_spill] sm:$0xff] %v11501_v56  ;;  %2888 = vmatmul.f32.vlgmr.msrb.gmra.mxu3 %v10700_v46  ;;  %7420 = vmatpush.msk.msrb.mxu0 %vm2286_vm15, %v15077_v24  ;;  %vm2937_vm15 = vcmp.eq.s32.totalorder %v14979_v14, %v11463_v10  ;;  %v15168_v56 = vld [vmem:[#allocation33_spill] sm:$0xff] }
 0x192   : > { %7436 = vmatpush.msk.msrb.mxu1 %vm2318_vm0, %v15077_v24  ;;  %7631 = vmatpush.msk.msra.mxu2 %vm3005_vm1, %v15077_v24  ;;  %v11517_v33 = vpop.f32.mrf.mxu3  ;;  %vm2969_vm0 = vcmp.eq.s32.totalorder %v9283_v20, %v11463_v10  ;;  %vm2997_vm1 = vcmp.eq.s32.totalorder %v14980_v16, %v11463_v10 }
 0x193   : > { %15158 = vst [vmem:[#allocation116_spill] sm:$0xff] %v11517_v33  ;;  %7646 = vmatpush.msk.msra.mxu3 %vm3039_vm2, %v15077_v24  ;;  %2801 = vmatmul.f32.vlgmr.msrb.gmra.mxu0 %v10718_v53  ;;  %vm3031_vm2 = vcmp.eq.s32.totalorder %v9303_v23, %v11463_v10  ;;  %v15167_v33 = vld [vmem:[#allocation32_spill] sm:$0xff] }
 0x194   : > { %2830 = vmatmul.f32.vlgmr.msrb.gmra.mxu1 %v10728_v51  ;;  %7598 = vmatpush.msk.msra.mxu0 %vm2943_vm3, %v15077_v24  ;;  %vm2935_vm3 = vcmp.eq.s32.totalorder %v15021_v49, %v11463_v10 }
 0x195   : > { %7614 = vmatpush.msk.msra.mxu1 %vm2975_vm4, %v15077_v24  ;;  %7632 = vmatpush.msk.msra.mxu2 %vm3003_vm5, %v15077_v24  ;;  %vm2967_vm4 = vcmp.eq.s32.totalorder %v9328_v25, %v11463_v10  ;;  %vm2995_vm5 = vcmp.eq.s32.totalorder %v15087_v55, %v11463_v10 }
 0x196   : > { %7647 = vmatpush.msk.msra.mxu3 %vm3037_vm6, %v15077_v24  ;;  %7599 = vmatpush.msk.msra.mxu0 %vm2941_vm7, %v15077_v24  ;;  %vm3029_vm6 = vcmp.eq.s32.totalorder %v9337_v26, %v11463_v10  ;;  %vm2933_vm7 = vcmp.eq.s32.totalorder %v14981_v15, %v11463_v10 }
 0x197   : > { %7615 = vmatpush.msk.msra.mxu1 %vm2973_vm8, %v15077_v24  ;;  %7633 = vmatpush.msk.msra.mxu2 %vm3001_vm9, %v15077_v24  ;;  %vm2965_vm8 = vcmp.eq.s32.totalorder %v9352_v28, %v11463_v10 }
 0x198   : > { %7648 = vmatpush.msk.msra.mxu3 %vm3035_vm10, %v15077_v24  ;;  %2862 = vmatmul.f32.gmra.mxu2 %v10756_v35  ;;  %v11551_v53 = vpop.f32.mrf.mxu0  ;;  %v15166_v35 = vld [vmem:[#allocation35_spill] sm:$0xff] }
 0x199   : > { %15159 = vst [vmem:[#allocation117_spill] sm:$0xff] %v11551_v53  ;;  %7600 = vmatpush.msk.msra.mxu0 %vm2939_vm11, %v15077_v24  ;;  %7616 = vmatpush.msk.msra.mxu1 %vm2971_vm12, %v15077_v24  ;;  %v11559_v40 = vpop.f32.mrf.mxu1  ;;  %v11561_v46 = vpop.f32.mrf.mxu2  ;;  %vm2963_vm12 = vcmp.eq.s32.totalorder %v15089_v63, %v11463_v10  ;;  %v15179_v53 = vld [vmem:[#allocation46_spill] sm:$0xff] }
 0x19a   : > { %15160 = vst [vmem:[#allocation118_spill] sm:$0xff] %v11559_v40  ;;  %7634 = vmatpush.msk.msra.mxu2 %vm2999_vm13, %v15077_v24  ;;  %7649 = vmatpush.msk.msra.mxu3 %vm3033_vm14, %v15077_v24  ;;  %vm2991_vm13 = vcmp.eq.s32.totalorder %v15166_v35, %v11463_v10  ;;  %vm3025_vm14 = vcmp.eq.s32.totalorder %v15167_v33, %v11463_v10 }
 0x19b   : > { %15161 = vst [vmem:[#allocation119_spill] sm:$0xff] %v11561_v46  ;;  %2891 = vmatmul.f32.gmra.mxu3 %v10780_v45  ;;  %7601 = vmatpush.msk.msra.mxu0 %vm2937_vm15, %v15077_v24  ;;  %v15163_v45 = vld [vmem:[#allocation31_spill] sm:$0xff]  ;;  %vm2929_vm15 = vcmp.eq.s32.totalorder %v15168_v56, %v11463_v10 }
 0x19c   : > { %7617 = vmatpush.msk.msra.mxu1 %vm2969_vm0, %v15077_v24  ;;  %7635 = vmatpush.msk.msra.mxu2 %vm2997_vm1, %v15077_v24  ;;  %v11577_v51 = vpop.f32.mrf.mxu3  ;;  %vm2993_vm9 = vcmp.eq.s32.totalorder %v15163_v45, %v11463_v10  ;;  %vm2961_vm0 = vcmp.eq.s32.totalorder %v15170_v21, %v11463_v10 }
 0x19d   : > { %15162 = vst [vmem:[#allocation120_spill] sm:$0xff] %v11577_v51  ;;  %7650 = vmatpush.msk.msra.mxu3 %vm3031_vm2, %v15077_v24  ;;  %2804 = vmatmul.f32.gmra.mxu0 %v10798_v18  ;;  %v15164_v18 = vld [vmem:[#allocation28_spill] sm:$0xff]  ;;  %v15171_v51 = vld [vmem:[#allocation39_spill] sm:$0xff]  ;;  %vm3023_vm2 = vcmp.eq.s32.totalorder %v15134_v9, %v11463_v10 }
 0x19e   : > { %2833 = vmatmul.f32.gmra.mxu1 %v10808_v29  ;;  %7602 = vmatpush.msk.msra.mxu0 %vm2935_vm3, %v15077_v24  ;;  %vm3027_vm10 = vcmp.eq.s32.totalorder %v15164_v18, %v11463_v10  ;;  %v15165_v29 = vld [vmem:[#allocation29_spill] sm:$0xff]  ;;  %vm2989_vm1 = vcmp.eq.s32.totalorder %v15171_v51, %v11463_v10 }
 0x19f   : > { %7618 = vmatpush.msk.msra.mxu1 %vm2967_vm4, %v15077_v24  ;;  %7636 = vmatpush.msk.msra.mxu2 %vm2995_vm5, %v15077_v24  ;;  %vm2931_vm11 = vcmp.eq.s32.totalorder %v15165_v29, %v11463_v10 }
 0x1a0   : > { %7651 = vmatpush.msk.msra.mxu3 %vm3029_vm6, %v15077_v24  ;;  %7603 = vmatpush.msk.msra.mxu0 %vm2933_vm7, %v15077_v24  ;;  %vm3021_vm6 = vcmp.eq.s32.totalorder %v9472_v42, %v11463_v10  ;;  %vm2925_vm7 = vcmp.eq.s32.totalorder %v15100_v34, %v11463_v10 }
 0x1a1   : > { %7619 = vmatpush.msk.msra.mxu1 %vm2965_vm8, %v15077_v24  ;;  %7637 = vmatpush.msk.msra.mxu2 %vm2993_vm9, %v15077_v24  ;;  %vm2957_vm8 = vcmp.eq.s32.totalorder %v15141_v0, %v11463_v10  ;;  %vm2985_vm9 = vcmp.eq.s32.totalorder %v15179_v53, %v11463_v10  ;;  %v15183_v53 = vld [vmem:[#allocation47_spill] sm:$0xff] }
 0x1a2   : > { %7652 = vmatpush.msk.msra.mxu3 %vm3027_vm10, %v15077_v24  ;;  %2865 = vmatmul.f32.gmra.mxu2 %v10836_v17  ;;  %v11611_v54 = vpop.f32.mrf.mxu0  ;;  %v15174_v17 = vld [vmem:[#allocation37_spill] sm:$0xff] }
 0x1a3   : > { %15169 = vst [vmem:[#allocation28_spill] sm:$0xff] %v11611_v54  ;;  %7604 = vmatpush.msk.msra.mxu0 %vm2931_vm11, %v15077_v24  ;;  %7620 = vmatpush.msk.msra.mxu1 %vm2963_vm12, %v15077_v24  ;;  %v11619_v46 = vpop.f32.mrf.mxu1  ;;  %v11621_v40 = vpop.f32.mrf.mxu2  ;;  %vm2927_vm3 = vcmp.eq.s32.totalorder %v15174_v17, %v11463_v10  ;;  %vm2955_vm12 = vcmp.eq.s32.totalorder %v15144_v36, %v11463_v10 }
 0x1a4   : > { %15172 = vst [vmem:[#allocation33_spill] sm:$0xff] %v11619_v46  ;;  %7638 = vmatpush.msk.msra.mxu2 %vm2991_vm13, %v15077_v24  ;;  %7653 = vmatpush.msk.msra.mxu3 %vm3025_vm14, %v15077_v24  ;;  %v15176_v46 = vld [vmem:[#allocation42_spill] sm:$0xff]  ;;  %vm3017_vm14 = vcmp.eq.s32.totalorder %v15183_v53, %v11463_v10 }
 0x1a5   : > { %15173 = vst [vmem:[#allocation34_spill] sm:$0xff] %v11621_v40  ;;  %2894 = vmatmul.f32.gmra.mxu3 %v15135_v19  ;;  %7605 = vmatpush.msk.msra.mxu0 %vm2929_vm15, %v15077_v24  ;;  %v15175_v40 = vld [vmem:[#allocation38_spill] sm:$0xff]  ;;  %vm2987_vm5 = vcmp.eq.s32.totalorder %v15176_v46, %v11463_v10  ;;  %v15178_v19 = vld [vmem:[#allocation79_spill] sm:$0xff]  ;;  %vm2921_vm15 = vcmp.eq.s32.totalorder %v15042_v44, %v11463_v10 }
 0x1a6   : > { %7621 = vmatpush.msk.msra.mxu1 %vm2961_vm0, %v15077_v24  ;;  %7639 = vmatpush.msk.msra.mxu2 %vm2989_vm1, %v15077_v24  ;;  %vm2959_vm4 = vcmp.eq.s32.totalorder %v15175_v40, %v11463_v10  ;;  %v11637_v54 = vpop.f32.mrf.mxu3  ;;  %vm2953_vm0 = vcmp.eq.s32.totalorder %v15109_v22, %v11463_v10  ;;  %vm2981_vm1 = vcmp.eq.s32.totalorder %v15013_v31, %v11463_v10 }
 0x1a7   : > { %15177 = vst [vmem:[#allocation39_spill] sm:$0xff] %v11637_v54  ;;  %7654 = vmatpush.msk.msra.mxu3 %vm3023_vm2, %v15077_v24  ;;  %2807 = vmatmul.f32.gmra.mxu0 %v15099_v30  ;;  %v15180_v30 = vld [vmem:[#allocation43_spill] sm:$0xff]  ;;  %v15182_v54 = vld [vmem:[#allocation50_spill] sm:$0xff]  ;;  %vm3015_vm2 = vcmp.eq.s32.totalorder %v14991_v50, %v11463_v10 }
 0x1a8   : > { %2836 = vmatmul.f32.gmra.mxu1 %v15178_v19  ;;  %7606 = vmatpush.msk.msra.mxu0 %vm2927_vm3, %v15077_v24  ;;  %vm3019_vm10 = vcmp.eq.s32.totalorder %v15180_v30, %v11463_v10  ;;  %v15181_v19 = vld [vmem:[#allocation44_spill] sm:$0xff]  ;;  %vm2983_vm13 = vcmp.eq.s32.totalorder %v15182_v54, %v11463_v10  ;;  %vm2919_vm3 = vcmp.eq.s32.totalorder %v15047_v1, %v11463_v10 }
 0x1a9   : > { %7622 = vmatpush.msk.msra.mxu1 %vm2959_vm4, %v15077_v24  ;;  %7640 = vmatpush.msk.msra.mxu2 %vm2987_vm5, %v15077_v24  ;;  %vm2923_vm11 = vcmp.eq.s32.totalorder %v15181_v19, %v11463_v10  ;;  %vm2951_vm4 = vcmp.eq.s32.totalorder %v15112_v2, %v11463_v10  ;;  %vm2979_vm5 = vcmp.eq.s32.totalorder %v9637_v61, %v11463_v10 }
 0x1aa   : > { %7655 = vmatpush.msk.msra.mxu3 %vm3021_vm6, %v15077_v24  ;;  %7607 = vmatpush.msk.msra.mxu0 %vm2925_vm7, %v15077_v24  ;;  %vm3013_vm6 = vcmp.eq.s32.totalorder %v15016_v39, %v11463_v10  ;;  %vm2917_vm7 = vcmp.eq.s32.totalorder %v9619_v59, %v11463_v10 }
 0x1ab   : > { %7623 = vmatpush.msk.msra.mxu1 %vm2957_vm8, %v15077_v24  ;;  %7641 = vmatpush.msk.msra.mxu2 %vm2985_vm9, %v15077_v24 }
 0x1ac   : > { %7656 = vmatpush.msk.msra.mxu3 %vm3019_vm10, %v15077_v24  ;;  %2868 = vmatmul.f32.gmra.mxu2 %v10916_v37  ;;  %v11671_v19 = vpop.f32.mrf.mxu0  ;;  %vm3011_vm10 = vcmp.eq.s32.totalorder %v14996_v47, %v11463_v10 }
 0x1ad   : > { %15184 = vst [vmem:[#allocation79_spill] sm:$0xff] %v11671_v19  ;;  %7608 = vmatpush.msk.msra.mxu0 %vm2923_vm11, %v15077_v24  ;;  %7624 = vmatpush.msk.msra.mxu1 %vm2955_vm12, %v15077_v24  ;;  %v11679_v53 = vpop.f32.mrf.mxu1  ;;  %v11681_v54 = vpop.f32.mrf.mxu2  ;;  %vm2947_vm12 = vcmp.eq.s32.totalorder %v14975_v57, %v11463_v10  ;;  %v11734_v19 = vld [vmem:[%s14677_s0 + $0x10] sm:$0xff] }
 0x1ae   : > { %15185 = vst [vmem:[#allocation121_spill] sm:$0xff] %v11679_v53  ;;  %7642 = vmatpush.msk.msra.mxu2 %vm2983_vm13, %v15077_v24  ;;  %7657 = vmatpush.msk.msra.mxu3 %vm3017_vm14, %v15077_v24  ;;  %v15189_v53 = vld [vmem:[#allocation56_spill] sm:$0xff] }
 0x1af   : > { %15186 = vst [vmem:[#allocation122_spill] sm:$0xff] %v11681_v54  ;;  %2897 = vmatmul.f32.gmra.mxu3 %v10943_v48  ;;  %7609 = vmatpush.msk.msra.mxu0 %vm2921_vm15, %v15077_v24  ;;  %v11706_v48 = vperm.slane %v11442_v32, 1  ;;  %v15188_v54 = vld [vmem:[#allocation84_spill] sm:$0xff]  ;;  %vm2949_vm8 = vcmp.eq.s32.totalorder %v15189_v53, %v11463_v10  ;;  %v15191_v32 = vld [vmem:[#allocation59_spill] sm:$0xff]  ;;  %vm2913_vm15 = vcmp.eq.s32.totalorder %v14976_v62, %v11463_v10 }
 0x1b0   : > { %7625 = vmatpush.msk.msra.mxu1 %vm2953_vm0, %v15077_v24  ;;  %7643 = vmatpush.msk.msra.mxu2 %vm2981_vm1, %v15077_v24  ;;  %v11697_v37 = vpop.f32.mrf.mxu3  ;;  %vm2915_vm11 = vcmp.eq.s32.totalorder %v15191_v32, %v11463_v10  ;;  %vm2945_vm0 = vcmp.eq.s32.totalorder %v9706_v60, %v11463_v10 }
 0x1b1   : > { %15187 = vst [vmem:[#allocation123_spill] sm:$0xff] %v11697_v37  ;;  %7658 = vmatpush.msk.msra.mxu3 %vm3015_vm2, %v15077_v24  ;;  %2810 = vmatmul.f32.gmra.mxu0 %v10961_v38  ;;  %v15190_v37 = vld [vmem:[#allocation61_spill] sm:$0xff]  ;;  %v15192_v38 = vld [vmem:[#allocation62_spill] sm:$0xff]  ;;  %vm3006_vm1 = vcmp.eq.s32.totalorder %v9232_v3, %v11706_v48  ;;  %vm3040_vm2 = vcmp.eq.s32.totalorder %v9235_v4, %v11706_v48 }
 0x1b2   : > { %2839 = vmatmul.f32.gmra.mxu1 %v15188_v54  ;;  %7610 = vmatpush.msk.msra.mxu0 %vm2919_vm3, %v15077_v24  ;;  %vm2977_vm9 = vcmp.eq.s32.totalorder %v15190_v37, %v11463_v10  ;;  %vm3009_vm13 = vcmp.eq.s32.totalorder %v15192_v38, %v11463_v10  ;;  %v15193_v54 = vld [vmem:[#allocation16_spill] sm:$0xff]  ;;  %vm2944_vm3 = vcmp.eq.s32.totalorder %v9238_v5, %v11706_v48 }
 0x1b3   : > { %7626 = vmatpush.msk.msra.mxu1 %vm2951_vm4, %v15077_v24  ;;  %7644 = vmatpush.msk.msra.mxu2 %vm2979_vm5, %v15077_v24  ;;  %vm3008_vm14 = vcmp.eq.s32.totalorder %v15193_v54, %v11706_v48  ;;  %vm2976_vm4 = vcmp.eq.s32.totalorder %v9241_v6, %v11706_v48  ;;  %vm3004_vm5 = vcmp.eq.s32.totalorder %v9244_v7, %v11706_v48 }
 0x1b4   : > { %7659 = vmatpush.msk.msra.mxu3 %vm3013_vm6, %v15077_v24  ;;  %7611 = vmatpush.msk.msra.mxu0 %vm2917_vm7, %v15077_v24  ;;  %vm3038_vm6 = vcmp.eq.s32.totalorder %v9247_v8, %v11706_v48  ;;  %vm2942_vm7 = vcmp.eq.s32.totalorder %v14977_v58, %v11706_v48 }
 0x1b5   : > { %7627 = vmatpush.msk.msra.mxu1 %vm2949_vm8, %v15077_v24  ;;  %7645 = vmatpush.msk.msra.mxu2 %vm2977_vm9, %v15077_v24  ;;  %vm2974_vm8 = vcmp.eq.s32.totalorder %v9256_v11, %v11706_v48  ;;  %vm3002_vm9 = vcmp.eq.s32.totalorder %v9259_v12, %v11706_v48 }
 0x1b6   : > { %7660 = vmatpush.msk.msra.mxu3 %vm3011_vm10, %v15077_v24  ;;  %3371 = vmatmul.f32.vlgmr.msra.gmra.mxu2 %v11734_v19  ;;  %v11739_v57 = vpop.f32.mrf.mxu0  ;;  %vm3036_vm10 = vcmp.eq.s32.totalorder %v14998_v52, %v11706_v48 }
 0x1b7   : > { %15194 = vst [vmem:[#allocation84_spill] sm:$0xff] %v11739_v57  ;;  %7612 = vmatpush.msk.msra.mxu0 %vm2915_vm11, %v15077_v24  ;;  %7628 = vmatpush.msk.msra.mxu1 %vm2947_vm12, %v15077_v24  ;;  %v11747_v54 = vpop.f32.mrf.mxu1  ;;  %v11749_v38 = vpop.f32.mrf.mxu2  ;;  %v11758_v57 = vld [vmem:[%s14677_s0 + $0x18] sm:$0xff]  ;;  %vm2940_vm11 = vcmp.eq.s32.totalorder %v14978_v13, %v11706_v48  ;;  %vm2972_vm12 = vcmp.eq.s32.totalorder %v14999_v43, %v11706_v48 }
 0x1b8   : > { %15195 = vst [vmem:[#allocation124_spill] sm:$0xff] %v11747_v54  ;;  %7661 = vmatpush.msk.msra.mxu3 %vm3009_vm13, %v15077_v24  ;;  %7694 = vmatpush.msk.msrb.mxu2 %vm3008_vm14, %v15077_v24  ;;  %v11786_v54 = vld [vmem:[%s14677_s0 + $0x8] sm:$0xff]  ;;  %vm3000_vm13 = vcmp.eq.s32.totalorder %v15082_v27, %v11706_v48  ;;  %vm3034_vm14 = vcmp.eq.s32.totalorder %v15121_v41, %v11706_v48 }
 0x1b9   : > { %15196 = vst [vmem:[#allocation125_spill] sm:$0xff] %v11749_v38  ;;  %3400 = vmatmul.f32.vlgmr.msra.gmra.mxu3 %v11758_v57  ;;  %7613 = vmatpush.msk.msra.mxu0 %vm2913_vm15, %v15077_v24  ;;  %v11776_v38 = vld [vmem:[%s14677_s0] sm:$0xff]  ;;  %vm2938_vm15 = vcmp.eq.s32.totalorder %v14979_v14, %v11706_v48 }
 0x1ba   : > { %7629 = vmatpush.msk.msra.mxu1 %vm2945_vm0, %v15077_v24  ;;  %7695 = vmatpush.msk.msrb.mxu2 %vm3006_vm1, %v15077_v24  ;;  %v11770_v10 = vpop.f32.mrf.mxu3  ;;  %vm2970_vm0 = vcmp.eq.s32.totalorder %v9283_v20, %v11706_v48  ;;  %vm2998_vm1 = vcmp.eq.s32.totalorder %v14980_v16, %v11706_v48 }
 0x1bb   : > { %15197 = vst [vmem:[#allocation126_spill] sm:$0xff] %v11770_v10  ;;  %7710 = vmatpush.msk.msrb.mxu3 %vm3040_vm2, %v15077_v24  ;;  %3313 = vmatmul.f32.vlgmr.msra.gmra.mxu0 %v11776_v38  ;;  %v11814_v10 = vld [vmem:[%s14677_s0 + $0x30] sm:$0xff]  ;;  %vm3032_vm2 = vcmp.eq.s32.totalorder %v9303_v23, %v11706_v48 }
 0x1bc   : > { %3342 = vmatmul.f32.vlgmr.msra.gmra.mxu1 %v11786_v54  ;;  %7662 = vmatpush.msk.msrb.mxu0 %vm2944_vm3, %v15077_v24  ;;  %vm2936_vm3 = vcmp.eq.s32.totalorder %v15021_v49, %v11706_v48 }
 0x1bd   : > { %7678 = vmatpush.msk.msrb.mxu1 %vm2976_vm4, %v15077_v24  ;;  %7696 = vmatpush.msk.msrb.mxu2 %vm3004_vm5, %v15077_v24  ;;  %vm2968_vm4 = vcmp.eq.s32.totalorder %v9328_v25, %v11706_v48  ;;  %vm2996_vm5 = vcmp.eq.s32.totalorder %v15087_v55, %v11706_v48  ;;  %v11866_v55 = vld [vmem:[%s14677_s0 + $0x28] sm:$0xff] }
 0x1be   : > { %7711 = vmatpush.msk.msrb.mxu3 %vm3038_vm6, %v15077_v24  ;;  %7663 = vmatpush.msk.msrb.mxu0 %vm2942_vm7, %v15077_v24  ;;  %vm3030_vm6 = vcmp.eq.s32.totalorder %v9337_v26, %v11706_v48  ;;  %vm2934_vm7 = vcmp.eq.s32.totalorder %v14981_v15, %v11706_v48 }
 0x1bf   : > { %7679 = vmatpush.msk.msrb.mxu1 %vm2974_vm8, %v15077_v24  ;;  %7697 = vmatpush.msk.msrb.mxu2 %vm3002_vm9, %v15077_v24  ;;  %vm2966_vm8 = vcmp.eq.s32.totalorder %v9352_v28, %v11706_v48  ;;  %vm2994_vm9 = vcmp.eq.s32.totalorder %v15163_v45, %v11706_v48 }
 0x1c0   : > { %7712 = vmatpush.msk.msrb.mxu3 %vm3036_vm10, %v15077_v24  ;;  %3374 = vmatmul.f32.gmra.mxu2 %v11814_v10  ;;  %v11819_v43 = vpop.f32.mrf.mxu0  ;;  %vm3028_vm10 = vcmp.eq.s32.totalorder %v15164_v18, %v11706_v48 }
 0x1c1   : > { %15198 = vst [vmem:[#allocation127_spill] sm:$0xff] %v11819_v43  ;;  %7664 = vmatpush.msk.msrb.mxu0 %vm2940_vm11, %v15077_v24  ;;  %7680 = vmatpush.msk.msrb.mxu1 %vm2972_vm12, %v15077_v24  ;;  %v11827_v41 = vpop.f32.mrf.mxu1  ;;  %v11829_v27 = vpop.f32.mrf.mxu2  ;;  %v11838_v43 = vld [vmem:[%s14677_s0 + $0x38] sm:$0xff]  ;;  %vm2932_vm11 = vcmp.eq.s32.totalorder %v15165_v29, %v11706_v48  ;;  %vm2964_vm12 = vcmp.eq.s32.totalorder %v15089_v63, %v11706_v48 }
 0x1c2   : > { %15199 = vst [vmem:[#allocation128_spill] sm:$0xff] %v11827_v41  ;;  %7698 = vmatpush.msk.msrb.mxu2 %vm3000_vm13, %v15077_v24  ;;  %7713 = vmatpush.msk.msrb.mxu3 %vm3034_vm14, %v15077_v24  ;;  %v11856_v41 = vld [vmem:[%s14677_s0 + $0x20] sm:$0xff]  ;;  %vm2992_vm13 = vcmp.eq.s32.totalorder %v15166_v35, %v11706_v48  ;;  %vm3026_vm14 = vcmp.eq.s32.totalorder %v15167_v33, %v11706_v48 }
 0x1c3   : > { %15200 = vst [vmem:[#allocation129_spill] sm:$0xff] %v11829_v27  ;;  %3403 = vmatmul.f32.gmra.mxu3 %v11838_v43  ;;  %7665 = vmatpush.msk.msrb.mxu0 %vm2938_vm15, %v15077_v24  ;;  %vm2930_vm15 = vcmp.eq.s32.totalorder %v15168_v56, %v11706_v48 }
 0x1c4   : > { %7681 = vmatpush.msk.msrb.mxu1 %vm2970_vm0, %v15077_v24  ;;  %7699 = vmatpush.msk.msrb.mxu2 %vm2998_vm1, %v15077_v24  ;;  %v11850_v27 = vpop.f32.mrf.mxu3  ;;  %vm2962_vm0 = vcmp.eq.s32.totalorder %v15170_v21, %v11706_v48  ;;  %vm2990_vm1 = vcmp.eq.s32.totalorder %v15171_v51, %v11706_v48 }
 0x1c5   : > { %15201 = vst [vmem:[#allocation130_spill] sm:$0xff] %v11850_v27  ;;  %7714 = vmatpush.msk.msrb.mxu3 %vm3032_vm2, %v15077_v24  ;;  %3316 = vmatmul.f32.gmra.mxu0 %v11856_v41  ;;  %v11894_v27 = vld [vmem:[%s14677_s0 + $0x50] sm:$0xff]  ;;  %vm3024_vm2 = vcmp.eq.s32.totalorder %v15134_v9, %v11706_v48 }
 0x1c6   : > { %3345 = vmatmul.f32.gmra.mxu1 %v11866_v55  ;;  %7666 = vmatpush.msk.msrb.mxu0 %vm2936_vm3, %v15077_v24  ;;  %vm2928_vm3 = vcmp.eq.s32.totalorder %v15174_v17, %v11706_v48 }
 0x1c7   : > { %7682 = vmatpush.msk.msrb.mxu1 %vm2968_vm4, %v15077_v24  ;;  %7700 = vmatpush.msk.msrb.mxu2 %vm2996_vm5, %v15077_v24  ;;  %vm2960_vm4 = vcmp.eq.s32.totalorder %v15175_v40, %v11706_v48  ;;  %vm2988_vm5 = vcmp.eq.s32.totalorder %v15176_v46, %v11706_v48  ;;  %v11946_v46 = vld [vmem:[%s14677_s0 + $0x48] sm:$0xff] }
 0x1c8   : > { %7715 = vmatpush.msk.msrb.mxu3 %vm3030_vm6, %v15077_v24  ;;  %7667 = vmatpush.msk.msrb.mxu0 %vm2934_vm7, %v15077_v24  ;;  %vm3022_vm6 = vcmp.eq.s32.totalorder %v9472_v42, %v11706_v48  ;;  %vm2926_vm7 = vcmp.eq.s32.totalorder %v15100_v34, %v11706_v48  ;;  %15206 = vst [vmem:[#allocation135_spill] sm:$0xff] %v11946_v46 }
 0x1c9   : > { %7683 = vmatpush.msk.msrb.mxu1 %vm2966_vm8, %v15077_v24  ;;  %7701 = vmatpush.msk.msrb.mxu2 %vm2994_vm9, %v15077_v24  ;;  %vm2958_vm8 = vcmp.eq.s32.totalorder %v15141_v0, %v11706_v48  ;;  %v15210_v0 = vld [vmem:[#allocation47_spill] sm:$0xff] }
 0x1ca   : > { %7716 = vmatpush.msk.msrb.mxu3 %vm3028_vm10, %v15077_v24  ;;  %3377 = vmatmul.f32.gmra.mxu2 %v11894_v27  ;;  %v11899_v63 = vpop.f32.mrf.mxu0  ;;  %vm3020_vm10 = vcmp.eq.s32.totalorder %v15180_v30, %v11706_v48 }
 0x1cb   : > { %15202 = vst [vmem:[#allocation131_spill] sm:$0xff] %v11899_v63  ;;  %7668 = vmatpush.msk.msrb.mxu0 %vm2932_vm11, %v15077_v24  ;;  %7684 = vmatpush.msk.msrb.mxu1 %vm2964_vm12, %v15077_v24  ;;  %v11907_v33 = vpop.f32.mrf.mxu1  ;;  %v11909_v35 = vpop.f32.mrf.mxu2  ;;  %v11918_v63 = vld [vmem:[%s14677_s0 + $0x58] sm:$0xff]  ;;  %vm2956_vm12 = vcmp.eq.s32.totalorder %v15144_v36, %v11706_v48 }
 0x1cc   : > { %15203 = vst [vmem:[#allocation132_spill] sm:$0xff] %v11907_v33  ;;  %7702 = vmatpush.msk.msrb.mxu2 %vm2992_vm13, %v15077_v24  ;;  %7717 = vmatpush.msk.msrb.mxu3 %vm3026_vm14, %v15077_v24  ;;  %v11936_v33 = vld [vmem:[%s14677_s0 + $0x40] sm:$0xff]  ;;  %vm3018_vm14 = vcmp.eq.s32.totalorder %v15210_v0, %v11706_v48 }
 0x1cd   : > { %15204 = vst [vmem:[#allocation133_spill] sm:$0xff] %v11909_v35  ;;  %3406 = vmatmul.f32.gmra.mxu3 %v11918_v63  ;;  %7669 = vmatpush.msk.msrb.mxu0 %vm2930_vm15, %v15077_v24  ;;  %vm2922_vm15 = vcmp.eq.s32.totalorder %v15042_v44, %v11706_v48 }
 0x1ce   : > { %7685 = vmatpush.msk.msrb.mxu1 %vm2962_vm0, %v15077_v24  ;;  %7703 = vmatpush.msk.msrb.mxu2 %vm2990_vm1, %v15077_v24  ;;  %v11930_v35 = vpop.f32.mrf.mxu3  ;;  %vm2954_vm0 = vcmp.eq.s32.totalorder %v15109_v22, %v11706_v48  ;;  %vm2982_vm1 = vcmp.eq.s32.totalorder %v15013_v31, %v11706_v48  ;;  %v12001_v22 = vld [vmem:[%s14677_s0 + $0x78] sm:$0xff] }
 0x1cf   : > { %15205 = vst [vmem:[#allocation134_spill] sm:$0xff] %v11930_v35  ;;  %7718 = vmatpush.msk.msrb.mxu3 %vm3024_vm2, %v15077_v24  ;;  %3319 = vmatmul.f32.gmra.mxu0 %v11936_v33  ;;  %v15207_v35 = vld [vmem:[#allocation46_spill] sm:$0xff]  ;;  %vm3016_vm2 = vcmp.eq.s32.totalorder %v14991_v50, %v11706_v48 }
 0x1d0   : > { %3348 = vmatmul.f32.gmra.mxu1 %v11946_v46  ;;  %7670 = vmatpush.msk.msrb.mxu0 %vm2928_vm3, %v15077_v24  ;;  %vm2986_vm9 = vcmp.eq.s32.totalorder %v15207_v35, %v11706_v48  ;;  %v15208_v46 = vld [vmem:[#allocation44_spill] sm:$0xff]  ;;  %v15209_v35 = vld [vmem:[#allocation50_spill] sm:$0xff]  ;;  %vm2920_vm3 = vcmp.eq.s32.totalorder %v15047_v1, %v11706_v48 }
 0x1d1   : > { %7686 = vmatpush.msk.msrb.mxu1 %vm2960_vm4, %v15077_v24  ;;  %7704 = vmatpush.msk.msrb.mxu2 %vm2988_vm5, %v15077_v24  ;;  %vm2924_vm11 = vcmp.eq.s32.totalorder %v15208_v46, %v11706_v48  ;;  %vm2984_vm13 = vcmp.eq.s32.totalorder %v15209_v35, %v11706_v48  ;;  %v11974_v46 = vld [vmem:[%s14677_s0 + $0x70] sm:$0xff]  ;;  %vm2952_vm4 = vcmp.eq.s32.totalorder %v15112_v2, %v11706_v48 }
 0x1d2   : > { %7719 = vmatpush.msk.msrb.mxu3 %vm3022_vm6, %v15077_v24  ;;  %7671 = vmatpush.msk.msrb.mxu0 %vm2926_vm7, %v15077_v24  ;;  %vm2980_vm5 = vcmp.eq.s32.totalorder %v9637_v61, %v11706_v48  ;;  %vm3014_vm6 = vcmp.eq.s32.totalorder %v15016_v39, %v11706_v48  ;;  %vm2918_vm7 = vcmp.eq.s32.totalorder %v9619_v59, %v11706_v48 }
 0x1d3   : > { %7687 = vmatpush.msk.msrb.mxu1 %vm2958_vm8, %v15077_v24  ;;  %7705 = vmatpush.msk.msrb.mxu2 %vm2986_vm9, %v15077_v24  ;;  %vm2950_vm8 = vcmp.eq.s32.totalorder %v15189_v53, %v11706_v48  ;;  %vm2978_vm9 = vcmp.eq.s32.totalorder %v15190_v37, %v11706_v48  ;;  %v15217_v37 = vld [vmem:[#allocation62_spill] sm:$0xff]  ;;  %v15218_v53 = vld [vmem:[#allocation16_spill] sm:$0xff] }
 0x1d4   : > { %7720 = vmatpush.msk.msrb.mxu3 %vm3020_vm10, %v15077_v24  ;;  %3380 = vmatmul.f32.gmra.mxu2 %v11974_v46  ;;  %v11979_v36 = vpop.f32.mrf.mxu0  ;;  %vm3012_vm10 = vcmp.eq.s32.totalorder %v14996_v47, %v11706_v48 }
 0x1d5   : > { %15211 = vst [vmem:[#allocation136_spill] sm:$0xff] %v11979_v36  ;;  %7672 = vmatpush.msk.msrb.mxu0 %vm2924_vm11, %v15077_v24  ;;  %7688 = vmatpush.msk.msrb.mxu1 %vm2956_vm12, %v15077_v24  ;;  %v11987_v0 = vpop.f32.mrf.mxu1  ;;  %v11989_v35 = vpop.f32.mrf.mxu2  ;;  %v11996_v36 = vld [vmem:[%s9220_s30 + $0x5] ss:$8 sm:$0x3]  ;;  %vm2916_vm11 = vcmp.eq.s32.totalorder %v15191_v32, %v11706_v48 }
 0x1d6   : > { %15212 = vst [vmem:[#allocation137_spill] sm:$0xff] %v11987_v0  ;;  %7706 = vmatpush.msk.msrb.mxu2 %vm2984_vm13, %v15077_v24  ;;  %7721 = vmatpush.msk.msrb.mxu3 %vm3018_vm14, %v15077_v24  ;;  %v12019_v0 = vld [vmem:[%s14677_s0 + $0x60] sm:$0xff]  ;;  %v12027_v2 = vperm.slane %v11996_v36, 0  ;;  %vm3010_vm13 = vcmp.eq.s32.totalorder %v15217_v37, %v11706_v48 }
 0x1d7   : > { %15213 = vst [vmem:[#allocation138_spill] sm:$0xff] %v11989_v35  ;;  %3409 = vmatmul.f32.gmra.mxu3 %v12001_v22  ;;  %7673 = vmatpush.msk.msrb.mxu0 %vm2922_vm15, %v15077_v24  ;;  %vm2914_vm15 = vcmp.eq.s32.totalorder %v14976_v62, %v11706_v48 }
 0x1d8   : > { %7689 = vmatpush.msk.msrb.mxu1 %vm2954_vm0, %v15077_v24  ;;  %7707 = vmatpush.msk.msrb.mxu2 %vm2982_vm1, %v15077_v24  ;;  %v12013_v35 = vpop.f32.mrf.mxu3  ;;  %vm3635_vm14 = vcmp.eq.s32.totalorder %v15218_v53, %v12027_v2  ;;  %vm2946_vm0 = vcmp.eq.s32.totalorder %v9706_v60, %v11706_v48  ;;  %vm3633_vm1 = vcmp.eq.s32.totalorder %v9232_v3, %v12027_v2 }
 0x1d9   : > { %15214 = vst [vmem:[#allocation139_spill] sm:$0xff] %v12013_v35  ;;  %7722 = vmatpush.msk.msrb.mxu3 %vm3016_vm2, %v15077_v24  ;;  %3322 = vmatmul.f32.gmra.mxu0 %v12019_v0  ;;  %v12032_v35 = vld [vmem:[%s14677_s0 + $0x68] sm:$0xff]  ;;  %vm3667_vm2 = vcmp.eq.s32.totalorder %v9235_v4, %v12027_v2 }
 0x1da   : > { %15215 = vst [vmem:[#allocation140_spill] sm:$0xff] %v12032_v35  ;;  %3351 = vmatmul.f32.gmra.mxu1 %v12032_v35  ;;  %7674 = vmatpush.msk.msrb.mxu0 %vm2920_vm3, %v15077_v24  ;;  %v15216_v35 = vld [vmem:[#allocation60_spill] sm:$0xff]  ;;  %vm3571_vm3 = vcmp.eq.s32.totalorder %v9238_v5, %v12027_v2 }
 0x1db   : > { %7690 = vmatpush.msk.msrb.mxu1 %vm2952_vm4, %v15077_v24  ;;  %7708 = vmatpush.msk.msrb.mxu2 %vm2980_vm5, %v15077_v24  ;;  %vm2948_vm12 = vcmp.eq.s32.totalorder %v15216_v35, %v11706_v48  ;;  %vm3603_vm4 = vcmp.eq.s32.totalorder %v9241_v6, %v12027_v2  ;;  %vm3631_vm5 = vcmp.eq.s32.totalorder %v9244_v7, %v12027_v2 }
 0x1dc   : > { %7723 = vmatpush.msk.msrb.mxu3 %vm3014_vm6, %v15077_v24  ;;  %7675 = vmatpush.msk.msrb.mxu0 %vm2918_vm7, %v15077_v24  ;;  %vm3665_vm6 = vcmp.eq.s32.totalorder %v9247_v8, %v12027_v2  ;;  %vm3569_vm7 = vcmp.eq.s32.totalorder %v14977_v58, %v12027_v2 }
 0x1dd   : > { %7691 = vmatpush.msk.msrb.mxu1 %vm2950_vm8, %v15077_v24  ;;  %7709 = vmatpush.msk.msrb.mxu2 %vm2978_vm9, %v15077_v24  ;;  %vm3601_vm8 = vcmp.eq.s32.totalorder %v9256_v11, %v12027_v2  ;;  %vm3629_vm9 = vcmp.eq.s32.totalorder %v9259_v12, %v12027_v2 }
 0x1de   : > { %7724 = vmatpush.msk.msrb.mxu3 %vm3012_vm10, %v15077_v24  ;;  %3487 = vmatmul.f32.vlgmr.msrb.gmra.mxu2 %v11734_v19  ;;  %v12060_v32 = vpop.f32.mrf.mxu0  ;;  %vm3663_vm10 = vcmp.eq.s32.totalorder %v14998_v52, %v12027_v2 }
 0x1df   : > { %15219 = vst [vmem:[#allocation141_spill] sm:$0xff] %v12060_v32  ;;  %7676 = vmatpush.msk.msrb.mxu0 %vm2916_vm11, %v15077_v24  ;;  %7692 = vmatpush.msk.msrb.mxu1 %vm2948_vm12, %v15077_v24  ;;  %v12068_v53 = vpop.f32.mrf.mxu1  ;;  %v12070_v37 = vpop.f32.mrf.mxu2  ;;  %vm3567_vm11 = vcmp.eq.s32.totalorder %v14978_v13, %v12027_v2 }
 0x1e0   : > { %15220 = vst [vmem:[#allocation142_spill] sm:$0xff] %v12068_v53  ;;  %7725 = vmatpush.msk.msrb.mxu3 %vm3010_vm13, %v15077_v24  ;;  %7887 = vmatpush.msk.msra.mxu2 %vm3635_vm14, %v15077_v24  ;;  %v15225_v53 = vld [vmem:[#allocation22_spill] sm:$0xff] }
 0x1e1   : > { %15221 = vst [vmem:[#allocation143_spill] sm:$0xff] %v12070_v37  ;;  %3516 = vmatmul.f32.vlgmr.msrb.gmra.mxu3 %v11758_v57  ;;  %7677 = vmatpush.msk.msrb.mxu0 %vm2914_vm15, %v15077_v24  ;;  %v15224_v37 = vld [vmem:[#allocation21_spill] sm:$0xff]  ;;  %vm3661_vm14 = vcmp.eq.s32.totalorder %v15225_v53, %v12027_v2  ;;  %vm3565_vm15 = vcmp.eq.s32.totalorder %v14979_v14, %v12027_v2 }
 0x1e2   : > { %7693 = vmatpush.msk.msrb.mxu1 %vm2946_vm0, %v15077_v24  ;;  %7888 = vmatpush.msk.msra.mxu2 %vm3633_vm1, %v15077_v24  ;;  %v12086_v48 = vpop.f32.mrf.mxu3  ;;  %vm3627_vm13 = vcmp.eq.s32.totalorder %v15224_v37, %v12027_v2  ;;  %vm3597_vm0 = vcmp.eq.s32.totalorder %v9283_v20, %v12027_v2  ;;  %vm3625_vm1 = vcmp.eq.s32.totalorder %v14980_v16, %v12027_v2 }
 0x1e3   : > { %15222 = vst [vmem:[#allocation144_spill] sm:$0xff] %v12086_v48  ;;  %7903 = vmatpush.msk.msra.mxu3 %vm3667_vm2, %v15077_v24  ;;  %3429 = vmatmul.f32.vlgmr.msrb.gmra.mxu0 %v11776_v38  ;;  %v15223_v48 = vld [vmem:[#allocation20_spill] sm:$0xff]  ;;  %vm3659_vm2 = vcmp.eq.s32.totalorder %v9303_v23, %v12027_v2 }
 0x1e4   : > { %3458 = vmatmul.f32.vlgmr.msrb.gmra.mxu1 %v11786_v54  ;;  %7855 = vmatpush.msk.msra.mxu0 %vm3571_vm3, %v15077_v24  ;;  %vm3599_vm12 = vcmp.eq.s32.totalorder %v15223_v48, %v12027_v2  ;;  %vm3563_vm3 = vcmp.eq.s32.totalorder %v15021_v49, %v12027_v2 }
 0x1e5   : > { %7871 = vmatpush.msk.msra.mxu1 %vm3603_vm4, %v15077_v24  ;;  %7889 = vmatpush.msk.msra.mxu2 %vm3631_vm5, %v15077_v24  ;;  %vm3595_vm4 = vcmp.eq.s32.totalorder %v9328_v25, %v12027_v2 }
 0x1e6   : > { %7904 = vmatpush.msk.msra.mxu3 %vm3665_vm6, %v15077_v24  ;;  %7856 = vmatpush.msk.msra.mxu0 %vm3569_vm7, %v15077_v24  ;;  %vm3657_vm6 = vcmp.eq.s32.totalorder %v9337_v26, %v12027_v2  ;;  %vm3561_vm7 = vcmp.eq.s32.totalorder %v14981_v15, %v12027_v2 }
 0x1e7   : > { %7872 = vmatpush.msk.msra.mxu1 %vm3601_vm8, %v15077_v24  ;;  %7890 = vmatpush.msk.msra.mxu2 %vm3629_vm9, %v15077_v24  ;;  %vm3593_vm8 = vcmp.eq.s32.totalorder %v9352_v28, %v12027_v2  ;;  %vm3621_vm9 = vcmp.eq.s32.totalorder %v15163_v45, %v12027_v2  ;;  %v15233_v45 = vld [vmem:[#allocation32_spill] sm:$0xff] }
 0x1e8   : > { %7905 = vmatpush.msk.msra.mxu3 %vm3663_vm10, %v15077_v24  ;;  %3490 = vmatmul.f32.gmra.mxu2 %v11814_v10  ;;  %v12120_v32 = vpop.f32.mrf.mxu0  ;;  %vm3655_vm10 = vcmp.eq.s32.totalorder %v15164_v18, %v12027_v2 }
 0x1e9   : > { %15226 = vst [vmem:[#allocation145_spill] sm:$0xff] %v12120_v32  ;;  %7857 = vmatpush.msk.msra.mxu0 %vm3567_vm11, %v15077_v24  ;;  %7873 = vmatpush.msk.msra.mxu1 %vm3599_vm12, %v15077_v24  ;;  %v12128_v53 = vpop.f32.mrf.mxu1  ;;  %v12130_v37 = vpop.f32.mrf.mxu2  ;;  %vm3559_vm11 = vcmp.eq.s32.totalorder %v15165_v29, %v12027_v2  ;;  %v15232_v32 = vld [vmem:[#allocation35_spill] sm:$0xff] }
 0x1ea   : > { %15227 = vst [vmem:[#allocation146_spill] sm:$0xff] %v12128_v53  ;;  %7891 = vmatpush.msk.msra.mxu2 %vm3627_vm13, %v15077_v24  ;;  %7906 = vmatpush.msk.msra.mxu3 %vm3661_vm14, %v15077_v24  ;;  %vm3619_vm13 = vcmp.eq.s32.totalorder %v15232_v32, %v12027_v2  ;;  %vm3653_vm14 = vcmp.eq.s32.totalorder %v15233_v45, %v12027_v2 }
 0x1eb   : > { %15228 = vst [vmem:[#allocation147_spill] sm:$0xff] %v12130_v37  ;;  %3519 = vmatmul.f32.gmra.mxu3 %v11838_v43  ;;  %7858 = vmatpush.msk.msra.mxu0 %vm3565_vm15, %v15077_v24  ;;  %v15229_v37 = vld [vmem:[#allocation27_spill] sm:$0xff]  ;;  %vm3557_vm15 = vcmp.eq.s32.totalorder %v15168_v56, %v12027_v2 }
 0x1ec   : > { %7874 = vmatpush.msk.msra.mxu1 %vm3597_vm0, %v15077_v24  ;;  %7892 = vmatpush.msk.msra.mxu2 %vm3625_vm1, %v15077_v24  ;;  %vm3623_vm5 = vcmp.eq.s32.totalorder %v15229_v37, %v12027_v2  ;;  %v12146_v53 = vpop.f32.mrf.mxu3  ;;  %vm3589_vm0 = vcmp.eq.s32.totalorder %v15170_v21, %v12027_v2  ;;  %vm3617_vm1 = vcmp.eq.s32.totalorder %v15171_v51, %v12027_v2 }
 0x1ed   : > { %15230 = vst [vmem:[#allocation148_spill] sm:$0xff] %v12146_v53  ;;  %7907 = vmatpush.msk.msra.mxu3 %vm3659_vm2, %v15077_v24  ;;  %3432 = vmatmul.f32.gmra.mxu0 %v11856_v41  ;;  %v15231_v53 = vld [vmem:[#allocation30_spill] sm:$0xff]  ;;  %vm3651_vm2 = vcmp.eq.s32.totalorder %v15134_v9, %v12027_v2 }
 0x1ee   : > { %3461 = vmatmul.f32.gmra.mxu1 %v11866_v55  ;;  %7859 = vmatpush.msk.msra.mxu0 %vm3563_vm3, %v15077_v24  ;;  %vm3591_vm12 = vcmp.eq.s32.totalorder %v15231_v53, %v12027_v2  ;;  %vm3555_vm3 = vcmp.eq.s32.totalorder %v15174_v17, %v12027_v2 }
 0x1ef   : > { %7875 = vmatpush.msk.msra.mxu1 %vm3595_vm4, %v15077_v24  ;;  %7893 = vmatpush.msk.msra.mxu2 %vm3623_vm5, %v15077_v24  ;;  %vm3587_vm4 = vcmp.eq.s32.totalorder %v15175_v40, %v12027_v2  ;;  %v15240_v40 = vld [vmem:[#allocation41_spill] sm:$0xff] }
 0x1f0   : > { %7908 = vmatpush.msk.msra.mxu3 %vm3657_vm6, %v15077_v24  ;;  %7860 = vmatpush.msk.msra.mxu0 %vm3561_vm7, %v15077_v24  ;;  %vm3649_vm6 = vcmp.eq.s32.totalorder %v9472_v42, %v12027_v2  ;;  %vm3553_vm7 = vcmp.eq.s32.totalorder %v15100_v34, %v12027_v2 }
 0x1f1   : > { %7876 = vmatpush.msk.msra.mxu1 %vm3593_vm8, %v15077_v24  ;;  %7894 = vmatpush.msk.msra.mxu2 %vm3621_vm9, %v15077_v24  ;;  %vm3585_vm8 = vcmp.eq.s32.totalorder %v15240_v40, %v12027_v2  ;;  %v15245_v40 = vld [vmem:[#allocation47_spill] sm:$0xff] }
 0x1f2   : > { %7909 = vmatpush.msk.msra.mxu3 %vm3655_vm10, %v15077_v24  ;;  %3493 = vmatmul.f32.gmra.mxu2 %v11894_v27  ;;  %v12180_v29 = vpop.f32.mrf.mxu0  ;;  %vm3647_vm10 = vcmp.eq.s32.totalorder %v15180_v30, %v12027_v2 }
 0x1f3   : > { %15234 = vst [vmem:[#allocation149_spill] sm:$0xff] %v12180_v29  ;;  %7861 = vmatpush.msk.msra.mxu0 %vm3559_vm11, %v15077_v24  ;;  %7877 = vmatpush.msk.msra.mxu1 %vm3591_vm12, %v15077_v24  ;;  %v12188_v45 = vpop.f32.mrf.mxu1  ;;  %v12190_v32 = vpop.f32.mrf.mxu2  ;;  %v15239_v29 = vld [vmem:[#allocation135_spill] sm:$0xff] }
 0x1f4   : > { %15235 = vst [vmem:[#allocation150_spill] sm:$0xff] %v12188_v45  ;;  %7895 = vmatpush.msk.msra.mxu2 %vm3619_vm13, %v15077_v24  ;;  %7910 = vmatpush.msk.msra.mxu3 %vm3653_vm14, %v15077_v24  ;;  %vm3645_vm14 = vcmp.eq.s32.totalorder %v15245_v40, %v12027_v2 }
 0x1f5   : > { %15236 = vst [vmem:[#allocation151_spill] sm:$0xff] %v12190_v32  ;;  %3522 = vmatmul.f32.gmra.mxu3 %v11918_v63  ;;  %7862 = vmatpush.msk.msra.mxu0 %vm3557_vm15, %v15077_v24  ;;  %v15237_v32 = vld [vmem:[#allocation42_spill] sm:$0xff]  ;;  %vm3549_vm15 = vcmp.eq.s32.totalorder %v15042_v44, %v12027_v2 }
 0x1f6   : > { %7878 = vmatpush.msk.msra.mxu1 %vm3589_vm0, %v15077_v24  ;;  %7896 = vmatpush.msk.msra.mxu2 %vm3617_vm1, %v15077_v24  ;;  %vm3615_vm5 = vcmp.eq.s32.totalorder %v15237_v32, %v12027_v2  ;;  %v12206_v45 = vpop.f32.mrf.mxu3  ;;  %v15241_v32 = vld [vmem:[#allocation46_spill] sm:$0xff]  ;;  %vm3609_vm1 = vcmp.eq.s32.totalorder %v15013_v31, %v12027_v2 }
 0x1f7   : > { %15238 = vst [vmem:[#allocation152_spill] sm:$0xff] %v12206_v45  ;;  %7911 = vmatpush.msk.msra.mxu3 %vm3651_vm2, %v15077_v24  ;;  %3435 = vmatmul.f32.gmra.mxu0 %v11936_v33  ;;  %vm3613_vm9 = vcmp.eq.s32.totalorder %v15241_v32, %v12027_v2  ;;  %v15242_v45 = vld [vmem:[#allocation44_spill] sm:$0xff]  ;;  %v15244_v32 = vld [vmem:[#allocation50_spill] sm:$0xff]  ;;  %vm3643_vm2 = vcmp.eq.s32.totalorder %v14991_v50, %v12027_v2 }
 0x1f8   : > { %3464 = vmatmul.f32.gmra.mxu1 %v15239_v29  ;;  %7863 = vmatpush.msk.msra.mxu0 %vm3555_vm3, %v15077_v24  ;;  %vm3551_vm11 = vcmp.eq.s32.totalorder %v15242_v45, %v12027_v2  ;;  %v15243_v29 = vld [vmem:[#allocation45_spill] sm:$0xff]  ;;  %vm3611_vm13 = vcmp.eq.s32.totalorder %v15244_v32, %v12027_v2  ;;  %vm3547_vm3 = vcmp.eq.s32.totalorder %v15047_v1, %v12027_v2  ;;  %v15252_v1 = vld [vmem:[#allocation140_spill] sm:$0xff] }
 0x1f9   : > { %7879 = vmatpush.msk.msra.mxu1 %vm3587_vm4, %v15077_v24  ;;  %7897 = vmatpush.msk.msra.mxu2 %vm3615_vm5, %v15077_v24  ;;  %vm3583_vm12 = vcmp.eq.s32.totalorder %v15243_v29, %v12027_v2  ;;  %v15247_v29 = vld [vmem:[#allocation49_spill] sm:$0xff]  ;;  %vm3607_vm5 = vcmp.eq.s32.totalorder %v9637_v61, %v12027_v2  ;;  %v15253_v61 = vld [vmem:[#allocation56_spill] sm:$0xff] }
 0x1fa   : > { %7912 = vmatpush.msk.msra.mxu3 %vm3649_vm6, %v15077_v24  ;;  %7864 = vmatpush.msk.msra.mxu0 %vm3553_vm7, %v15077_v24  ;;  %vm3581_vm0 = vcmp.eq.s32.totalorder %v15247_v29, %v12027_v2  ;;  %vm3641_vm6 = vcmp.eq.s32.totalorder %v15016_v39, %v12027_v2  ;;  %vm3545_vm7 = vcmp.eq.s32.totalorder %v9619_v59, %v12027_v2 }
 0x1fb   : > { %7880 = vmatpush.msk.msra.mxu1 %vm3585_vm8, %v15077_v24  ;;  %7898 = vmatpush.msk.msra.mxu2 %vm3613_vm9, %v15077_v24  ;;  %vm3577_vm8 = vcmp.eq.s32.totalorder %v15253_v61, %v12027_v2  ;;  %v15257_v61 = vld [vmem:[#allocation16_spill] sm:$0xff] }
 0x1fc   : > { %7913 = vmatpush.msk.msra.mxu3 %vm3647_vm10, %v15077_v24  ;;  %3496 = vmatmul.f32.gmra.mxu2 %v11974_v46  ;;  %v12240_v45 = vpop.f32.mrf.mxu0  ;;  %vm3639_vm10 = vcmp.eq.s32.totalorder %v14996_v47, %v12027_v2 }
 0x1fd   : > { %15246 = vst [vmem:[#allocation153_spill] sm:$0xff] %v12240_v45  ;;  %7865 = vmatpush.msk.msra.mxu0 %vm3551_vm11, %v15077_v24  ;;  %7881 = vmatpush.msk.msra.mxu1 %vm3583_vm12, %v15077_v24  ;;  %v12248_v40 = vpop.f32.mrf.mxu1  ;;  %v12250_v32 = vpop.f32.mrf.mxu2  ;;  %v12275_v45 = vperm.slane %v11996_v36, 1  ;;  %v15255_v36 = vld [vmem:[#allocation59_spill] sm:$0xff]  ;;  %vm3575_vm12 = vcmp.eq.s32.totalorder %v15216_v35, %v12027_v2 }
 0x1fe   : > { %15248 = vst [vmem:[#allocation154_spill] sm:$0xff] %v12248_v40  ;;  %7899 = vmatpush.msk.msra.mxu2 %vm3611_vm13, %v15077_v24  ;;  %7914 = vmatpush.msk.msra.mxu3 %vm3645_vm14, %v15077_v24  ;;  %vm3543_vm11 = vcmp.eq.s32.totalorder %v15255_v36, %v12027_v2 }
 0x1ff   : > { %15249 = vst [vmem:[#allocation155_spill] sm:$0xff] %v12250_v32  ;;  %3525 = vmatmul.f32.gmra.mxu3 %v12001_v22  ;;  %7866 = vmatpush.msk.msra.mxu0 %vm3549_vm15, %v15077_v24  ;;  %v15250_v32 = vld [vmem:[#allocation53_spill] sm:$0xff]  ;;  %vm3636_vm14 = vcmp.eq.s32.totalorder %v15257_v61, %v12275_v45  ;;  %vm3541_vm15 = vcmp.eq.s32.totalorder %v14976_v62, %v12027_v2 }
 0x200   : > { %7882 = vmatpush.msk.msra.mxu1 %vm3581_vm0, %v15077_v24  ;;  %7900 = vmatpush.msk.msra.mxu2 %vm3609_vm1, %v15077_v24  ;;  %vm3579_vm4 = vcmp.eq.s32.totalorder %v15250_v32, %v12027_v2  ;;  %v12266_v40 = vpop.f32.mrf.mxu3  ;;  %vm3573_vm0 = vcmp.eq.s32.totalorder %v9706_v60, %v12027_v2  ;;  %vm3634_vm1 = vcmp.eq.s32.totalorder %v9232_v3, %v12275_v45 }
 0x201   : > { %15251 = vst [vmem:[#allocation156_spill] sm:$0xff] %v12266_v40  ;;  %7915 = vmatpush.msk.msra.mxu3 %vm3643_vm2, %v15077_v24  ;;  %3438 = vmatmul.f32.gmra.mxu0 %v12019_v0  ;;  %v15254_v40 = vld [vmem:[#allocation61_spill] sm:$0xff]  ;;  %vm3668_vm2 = vcmp.eq.s32.totalorder %v9235_v4, %v12275_v45 }
 0x202   : > { %3467 = vmatmul.f32.gmra.mxu1 %v15252_v1  ;;  %7867 = vmatpush.msk.msra.mxu0 %vm3547_vm3, %v15077_v24  ;;  %vm3605_vm9 = vcmp.eq.s32.totalorder %v15254_v40, %v12027_v2  ;;  %v15256_v40 = vld [vmem:[#allocation62_spill] sm:$0xff]  ;;  %vm3572_vm3 = vcmp.eq.s32.totalorder %v9238_v5, %v12275_v45 }
 0x203   : > { %7883 = vmatpush.msk.msra.mxu1 %vm3579_vm4, %v15077_v24  ;;  %7901 = vmatpush.msk.msra.mxu2 %vm3607_vm5, %v15077_v24  ;;  %vm3637_vm13 = vcmp.eq.s32.totalorder %v15256_v40, %v12027_v2  ;;  %vm3604_vm4 = vcmp.eq.s32.totalorder %v9241_v6, %v12275_v45  ;;  %vm3632_vm5 = vcmp.eq.s32.totalorder %v9244_v7, %v12275_v45 }
 0x204   : > { %7916 = vmatpush.msk.msra.mxu3 %vm3641_vm6, %v15077_v24  ;;  %7868 = vmatpush.msk.msra.mxu0 %vm3545_vm7, %v15077_v24  ;;  %vm3666_vm6 = vcmp.eq.s32.totalorder %v9247_v8, %v12275_v45  ;;  %vm3570_vm7 = vcmp.eq.s32.totalorder %v14977_v58, %v12275_v45 }
 0x205   : > { %7884 = vmatpush.msk.msra.mxu1 %vm3577_vm8, %v15077_v24  ;;  %7902 = vmatpush.msk.msra.mxu2 %vm3605_vm9, %v15077_v24  ;;  %vm3602_vm8 = vcmp.eq.s32.totalorder %v9256_v11, %v12275_v45  ;;  %vm3630_vm9 = vcmp.eq.s32.totalorder %v9259_v12, %v12275_v45 }
 0x206   : > { %7917 = vmatpush.msk.msra.mxu3 %vm3639_vm10, %v15077_v24  ;;  %3999 = vmatmul.f32.vlgmr.msra.gmra.mxu2 %v11734_v19  ;;  %v12303_v36 = vpop.f32.mrf.mxu0  ;;  %vm3664_vm10 = vcmp.eq.s32.totalorder %v14998_v52, %v12275_v45 }
 0x207   : > { %15258 = vst [vmem:[#allocation157_spill] sm:$0xff] %v12303_v36  ;;  %7869 = vmatpush.msk.msra.mxu0 %vm3543_vm11, %v15077_v24  ;;  %7885 = vmatpush.msk.msra.mxu1 %vm3575_vm12, %v15077_v24  ;;  %v12311_v61 = vpop.f32.mrf.mxu1  ;;  %v12313_v40 = vpop.f32.mrf.mxu2  ;;  %vm3568_vm11 = vcmp.eq.s32.totalorder %v14978_v13, %v12275_v45  ;;  %vm3600_vm12 = vcmp.eq.s32.totalorder %v15223_v48, %v12275_v45 }
 0x208   : > { %15259 = vst [vmem:[#allocation158_spill] sm:$0xff] %v12311_v61  ;;  %7918 = vmatpush.msk.msra.mxu3 %vm3637_vm13, %v15077_v24  ;;  %7951 = vmatpush.msk.msrb.mxu2 %vm3636_vm14, %v15077_v24 }
 0x209   : > { %15260 = vst [vmem:[#allocation159_spill] sm:$0xff] %v12313_v40  ;;  %4028 = vmatmul.f32.vlgmr.msra.gmra.mxu3 %v11758_v57  ;;  %7870 = vmatpush.msk.msra.mxu0 %vm3541_vm15, %v15077_v24  ;;  %v15263_v40 = vld [vmem:[#allocation22_spill] sm:$0xff]  ;;  %vm3566_vm15 = vcmp.eq.s32.totalorder %v14979_v14, %v12275_v45 }
 0x20a   : > { %7886 = vmatpush.msk.msra.mxu1 %vm3573_vm0, %v15077_v24  ;;  %7952 = vmatpush.msk.msrb.mxu2 %vm3634_vm1, %v15077_v24  ;;  %v12329_v2 = vpop.f32.mrf.mxu3  ;;  %vm3662_vm14 = vcmp.eq.s32.totalorder %v15263_v40, %v12275_v45  ;;  %vm3598_vm0 = vcmp.eq.s32.totalorder %v9283_v20, %v12275_v45  ;;  %vm3626_vm1 = vcmp.eq.s32.totalorder %v14980_v16, %v12275_v45 }
 0x20b   : > { %15261 = vst [vmem:[#allocation160_spill] sm:$0xff] %v12329_v2  ;;  %7967 = vmatpush.msk.msrb.mxu3 %vm3668_vm2, %v15077_v24  ;;  %3941 = vmatmul.f32.vlgmr.msra.gmra.mxu0 %v11776_v38  ;;  %v15262_v2 = vld [vmem:[#allocation21_spill] sm:$0xff]  ;;  %vm3660_vm2 = vcmp.eq.s32.totalorder %v9303_v23, %v12275_v45 }
 0x20c   : > { %3970 = vmatmul.f32.vlgmr.msra.gmra.mxu1 %v11786_v54  ;;  %7919 = vmatpush.msk.msrb.mxu0 %vm3572_vm3, %v15077_v24  ;;  %vm3628_vm13 = vcmp.eq.s32.totalorder %v15262_v2, %v12275_v45  ;;  %vm3564_vm3 = vcmp.eq.s32.totalorder %v15021_v49, %v12275_v45 }
 0x20d   : > { %7935 = vmatpush.msk.msrb.mxu1 %vm3604_vm4, %v15077_v24  ;;  %7953 = vmatpush.msk.msrb.mxu2 %vm3632_vm5, %v15077_v24  ;;  %vm3596_vm4 = vcmp.eq.s32.totalorder %v9328_v25, %v12275_v45  ;;  %vm3624_vm5 = vcmp.eq.s32.totalorder %v15229_v37, %v12275_v45 }
 0x20e   : > { %7968 = vmatpush.msk.msrb.mxu3 %vm3666_vm6, %v15077_v24  ;;  %7920 = vmatpush.msk.msrb.mxu0 %vm3570_vm7, %v15077_v24  ;;  %vm3658_vm6 = vcmp.eq.s32.totalorder %v9337_v26, %v12275_v45  ;;  %vm3562_vm7 = vcmp.eq.s32.totalorder %v14981_v15, %v12275_v45 }
 0x20f   : > { %7936 = vmatpush.msk.msrb.mxu1 %vm3602_vm8, %v15077_v24  ;;  %7954 = vmatpush.msk.msrb.mxu2 %vm3630_vm9, %v15077_v24  ;;  %vm3594_vm8 = vcmp.eq.s32.totalorder %v9352_v28, %v12275_v45 }
 0x210   : > { %7969 = vmatpush.msk.msrb.mxu3 %vm3664_vm10, %v15077_v24  ;;  %4002 = vmatmul.f32.gmra.mxu2 %v11814_v10  ;;  %v12363_v61 = vpop.f32.mrf.mxu0  ;;  %vm3656_vm10 = vcmp.eq.s32.totalorder %v15164_v18, %v12275_v45 }
 0x211   : > { %15264 = vst [vmem:[#allocation161_spill] sm:$0xff] %v12363_v61  ;;  %7921 = vmatpush.msk.msrb.mxu0 %vm3568_vm11, %v15077_v24  ;;  %7937 = vmatpush.msk.msrb.mxu1 %vm3600_vm12, %v15077_v24  ;;  %v12371_v36 = vpop.f32.mrf.mxu1  ;;  %v12373_v40 = vpop.f32.mrf.mxu2  ;;  %vm3592_vm12 = vcmp.eq.s32.totalorder %v15231_v53, %v12275_v45  ;;  %v15270_v61 = vld [vmem:[#allocation35_spill] sm:$0xff] }
 0x212   : > { %15265 = vst [vmem:[#allocation162_spill] sm:$0xff] %v12371_v36  ;;  %7955 = vmatpush.msk.msrb.mxu2 %vm3628_vm13, %v15077_v24  ;;  %7970 = vmatpush.msk.msrb.mxu3 %vm3662_vm14, %v15077_v24  ;;  %v15268_v36 = vld [vmem:[#allocation31_spill] sm:$0xff]  ;;  %vm3620_vm13 = vcmp.eq.s32.totalorder %v15270_v61, %v12275_v45 }
 0x213   : > { %15266 = vst [vmem:[#allocation163_spill] sm:$0xff] %v12373_v40  ;;  %4031 = vmatmul.f32.gmra.mxu3 %v11838_v43  ;;  %7922 = vmatpush.msk.msrb.mxu0 %vm3566_vm15, %v15077_v24  ;;  %vm3622_vm9 = vcmp.eq.s32.totalorder %v15268_v36, %v12275_v45  ;;  %v15271_v36 = vld [vmem:[#allocation32_spill] sm:$0xff]  ;;  %vm3558_vm15 = vcmp.eq.s32.totalorder %v15168_v56, %v12275_v45 }
 0x214   : > { %7938 = vmatpush.msk.msrb.mxu1 %vm3598_vm0, %v15077_v24  ;;  %7956 = vmatpush.msk.msrb.mxu2 %vm3626_vm1, %v15077_v24  ;;  %v12389_v40 = vpop.f32.mrf.mxu3  ;;  %vm3654_vm14 = vcmp.eq.s32.totalorder %v15271_v36, %v12275_v45  ;;  %vm3590_vm0 = vcmp.eq.s32.totalorder %v15170_v21, %v12275_v45  ;;  %vm3618_vm1 = vcmp.eq.s32.totalorder %v15171_v51, %v12275_v45 }
 0x215   : > { %15267 = vst [vmem:[#allocation164_spill] sm:$0xff] %v12389_v40  ;;  %7971 = vmatpush.msk.msrb.mxu3 %vm3660_vm2, %v15077_v24  ;;  %3944 = vmatmul.f32.gmra.mxu0 %v11856_v41  ;;  %v15269_v40 = vld [vmem:[#allocation29_spill] sm:$0xff]  ;;  %vm3652_vm2 = vcmp.eq.s32.totalorder %v15134_v9, %v12275_v45 }
 0x216   : > { %3973 = vmatmul.f32.gmra.mxu1 %v11866_v55  ;;  %7923 = vmatpush.msk.msrb.mxu0 %vm3564_vm3, %v15077_v24  ;;  %vm3560_vm11 = vcmp.eq.s32.totalorder %v15269_v40, %v12275_v45  ;;  %vm3556_vm3 = vcmp.eq.s32.totalorder %v15174_v17, %v12275_v45  ;;  %v15278_v17 = vld [vmem:[#allocation135_spill] sm:$0xff] }
 0x217   : > { %7939 = vmatpush.msk.msrb.mxu1 %vm3596_vm4, %v15077_v24  ;;  %7957 = vmatpush.msk.msrb.mxu2 %vm3624_vm5, %v15077_v24 }
 0x218   : > { %7972 = vmatpush.msk.msrb.mxu3 %vm3658_vm6, %v15077_v24  ;;  %7924 = vmatpush.msk.msrb.mxu0 %vm3562_vm7, %v15077_v24  ;;  %vm3650_vm6 = vcmp.eq.s32.totalorder %v9472_v42, %v12275_v45  ;;  %vm3554_vm7 = vcmp.eq.s32.totalorder %v15100_v34, %v12275_v45 }
 0x219   : > { %7940 = vmatpush.msk.msrb.mxu1 %vm3594_vm8, %v15077_v24  ;;  %7958 = vmatpush.msk.msrb.mxu2 %vm3622_vm9, %v15077_v24 }
 0x21a   : > { %7973 = vmatpush.msk.msrb.mxu3 %vm3656_vm10, %v15077_v24  ;;  %4005 = vmatmul.f32.gmra.mxu2 %v11894_v27  ;;  %v12423_v40 = vpop.f32.mrf.mxu0  ;;  %vm3648_vm10 = vcmp.eq.s32.totalorder %v15180_v30, %v12275_v45  ;;  %v15284_v30 = vld [vmem:[#allocation47_spill] sm:$0xff] }
 0x21b   : > { %15272 = vst [vmem:[#allocation165_spill] sm:$0xff] %v12423_v40  ;;  %7925 = vmatpush.msk.msrb.mxu0 %vm3560_vm11, %v15077_v24  ;;  %7941 = vmatpush.msk.msrb.mxu1 %vm3592_vm12, %v15077_v24  ;;  %v12431_v36 = vpop.f32.mrf.mxu1  ;;  %v12433_v61 = vpop.f32.mrf.mxu2 }
 0x21c   : > { %15273 = vst [vmem:[#allocation166_spill] sm:$0xff] %v12431_v36  ;;  %7959 = vmatpush.msk.msrb.mxu2 %vm3620_vm13, %v15077_v24  ;;  %7974 = vmatpush.msk.msrb.mxu3 %vm3654_vm14, %v15077_v24  ;;  %v15276_v36 = vld [vmem:[#allocation42_spill] sm:$0xff]  ;;  %vm3646_vm14 = vcmp.eq.s32.totalorder %v15284_v30, %v12275_v45 }
 0x21d   : > { %15274 = vst [vmem:[#allocation167_spill] sm:$0xff] %v12433_v61  ;;  %4034 = vmatmul.f32.gmra.mxu3 %v11918_v63  ;;  %7926 = vmatpush.msk.msrb.mxu0 %vm3558_vm15, %v15077_v24  ;;  %v15275_v61 = vld [vmem:[#allocation38_spill] sm:$0xff]  ;;  %vm3616_vm5 = vcmp.eq.s32.totalorder %v15276_v36, %v12275_v45  ;;  %vm3550_vm15 = vcmp.eq.s32.totalorder %v15042_v44, %v12275_v45 }
 0x21e   : > { %7942 = vmatpush.msk.msrb.mxu1 %vm3590_vm0, %v15077_v24  ;;  %7960 = vmatpush.msk.msrb.mxu2 %vm3618_vm1, %v15077_v24  ;;  %vm3588_vm4 = vcmp.eq.s32.totalorder %v15275_v61, %v12275_v45  ;;  %v12449_v40 = vpop.f32.mrf.mxu3  ;;  %v15279_v61 = vld [vmem:[#allocation41_spill] sm:$0xff]  ;;  %v15280_v36 = vld [vmem:[#allocation46_spill] sm:$0xff]  ;;  %vm3582_vm0 = vcmp.eq.s32.totalorder %v15247_v29, %v12275_v45  ;;  %vm3610_vm1 = vcmp.eq.s32.totalorder %v15013_v31, %v12275_v45  ;;  %v15288_v29 = vld [vmem:[#allocation52_spill] sm:$0xff] }
 0x21f   : > { %15277 = vst [vmem:[#allocation168_spill] sm:$0xff] %v12449_v40  ;;  %7975 = vmatpush.msk.msrb.mxu3 %vm3652_vm2, %v15077_v24  ;;  %3947 = vmatmul.f32.gmra.mxu0 %v11936_v33  ;;  %vm3586_vm8 = vcmp.eq.s32.totalorder %v15279_v61, %v12275_v45  ;;  %vm3614_vm9 = vcmp.eq.s32.totalorder %v15280_v36, %v12275_v45  ;;  %v15281_v40 = vld [vmem:[#allocation44_spill] sm:$0xff]  ;;  %v15283_v36 = vld [vmem:[#allocation50_spill] sm:$0xff] }
 0x220   : > { %3976 = vmatmul.f32.gmra.mxu1 %v15278_v17  ;;  %7927 = vmatpush.msk.msrb.mxu0 %vm3556_vm3, %v15077_v24  ;;  %vm3552_vm11 = vcmp.eq.s32.totalorder %v15281_v40, %v12275_v45  ;;  %v15282_v17 = vld [vmem:[#allocation45_spill] sm:$0xff]  ;;  %vm3612_vm13 = vcmp.eq.s32.totalorder %v15283_v36, %v12275_v45  ;;  %vm3644_vm2 = vcmp.eq.s32.totalorder %v14991_v50, %v12275_v45 }
 0x221   : > { %7943 = vmatpush.msk.msrb.mxu1 %vm3588_vm4, %v15077_v24  ;;  %7961 = vmatpush.msk.msrb.mxu2 %vm3616_vm5, %v15077_v24  ;;  %vm3584_vm12 = vcmp.eq.s32.totalorder %v15282_v17, %v12275_v45  ;;  %vm3548_vm3 = vcmp.eq.s32.totalorder %v15288_v29, %v12275_v45  ;;  %vm3580_vm4 = vcmp.eq.s32.totalorder %v15250_v32, %v12275_v45 }
 0x222   : > { %7976 = vmatpush.msk.msrb.mxu3 %vm3650_vm6, %v15077_v24  ;;  %7928 = vmatpush.msk.msrb.mxu0 %vm3554_vm7, %v15077_v24  ;;  %vm3642_vm6 = vcmp.eq.s32.totalorder %v15016_v39, %v12275_v45  ;;  %vm3546_vm7 = vcmp.eq.s32.totalorder %v9619_v59, %v12275_v45 }
 0x223   : > { %7944 = vmatpush.msk.msrb.mxu1 %vm3586_vm8, %v15077_v24  ;;  %7962 = vmatpush.msk.msrb.mxu2 %vm3614_vm9, %v15077_v24 }
 0x224   : > { %7977 = vmatpush.msk.msrb.mxu3 %vm3648_vm10, %v15077_v24  ;;  %4008 = vmatmul.f32.gmra.mxu2 %v11974_v46  ;;  %v12483_v40 = vpop.f32.mrf.mxu0  ;;  %vm3640_vm10 = vcmp.eq.s32.totalorder %v14996_v47, %v12275_v45 }
 0x225   : > { %15285 = vst [vmem:[#allocation169_spill] sm:$0xff] %v12483_v40  ;;  %7929 = vmatpush.msk.msrb.mxu0 %vm3552_vm11, %v15077_v24  ;;  %7945 = vmatpush.msk.msrb.mxu1 %vm3584_vm12, %v15077_v24  ;;  %v12491_v30 = vpop.f32.mrf.mxu1  ;;  %v12493_v36 = vpop.f32.mrf.mxu2  ;;  %v12500_v40 = vld [vmem:[%s9220_s30 + $0x6] ss:$8 sm:$0x3]  ;;  %vm3576_vm12 = vcmp.eq.s32.totalorder %v15216_v35, %v12275_v45 }
 0x226   : > { %15286 = vst [vmem:[#allocation170_spill] sm:$0xff] %v12491_v30  ;;  %7963 = vmatpush.msk.msrb.mxu2 %vm3612_vm13, %v15077_v24  ;;  %7978 = vmatpush.msk.msrb.mxu3 %vm3646_vm14, %v15077_v24  ;;  %v12521_v29 = vperm.slane %v12500_v40, 0 }
 0x227   : > { %15287 = vst [vmem:[#allocation171_spill] sm:$0xff] %v12493_v36  ;;  %4037 = vmatmul.f32.gmra.mxu3 %v12001_v22  ;;  %7930 = vmatpush.msk.msrb.mxu0 %vm3550_vm15, %v15077_v24  ;;  %v15289_v36 = vld [vmem:[#allocation57_spill] sm:$0xff]  ;;  %vm3542_vm15 = vcmp.eq.s32.totalorder %v14976_v62, %v12275_v45 }
 0x228   : > { %7946 = vmatpush.msk.msrb.mxu1 %vm3582_vm0, %v15077_v24  ;;  %7964 = vmatpush.msk.msrb.mxu2 %vm3610_vm1, %v15077_v24  ;;  %vm3608_vm5 = vcmp.eq.s32.totalorder %v15289_v36, %v12275_v45  ;;  %v12512_v30 = vpop.f32.mrf.mxu3  ;;  %v15291_v36 = vld [vmem:[#allocation56_spill] sm:$0xff]  ;;  %vm3574_vm0 = vcmp.eq.s32.totalorder %v9706_v60, %v12275_v45  ;;  %vm4261_vm1 = vcmp.eq.s32.totalorder %v9232_v3, %v12521_v29 }
 0x229   : > { %15290 = vst [vmem:[#allocation172_spill] sm:$0xff] %v12512_v30  ;;  %7979 = vmatpush.msk.msrb.mxu3 %vm3644_vm2, %v15077_v24  ;;  %3950 = vmatmul.f32.gmra.mxu0 %v12019_v0  ;;  %vm3578_vm8 = vcmp.eq.s32.totalorder %v15291_v36, %v12275_v45  ;;  %v15292_v30 = vld [vmem:[#allocation61_spill] sm:$0xff]  ;;  %v15295_v36 = vld [vmem:[#allocation16_spill] sm:$0xff]  ;;  %vm4295_vm2 = vcmp.eq.s32.totalorder %v9235_v4, %v12521_v29 }
 0x22a   : > { %3979 = vmatmul.f32.gmra.mxu1 %v15252_v1  ;;  %7931 = vmatpush.msk.msrb.mxu0 %vm3548_vm3, %v15077_v24  ;;  %vm3606_vm9 = vcmp.eq.s32.totalorder %v15292_v30, %v12275_v45  ;;  %v15293_v1 = vld [vmem:[#allocation59_spill] sm:$0xff]  ;;  %v15294_v30 = vld [vmem:[#allocation62_spill] sm:$0xff]  ;;  %vm4263_vm14 = vcmp.eq.s32.totalorder %v15295_v36, %v12521_v29  ;;  %vm4199_vm3 = vcmp.eq.s32.totalorder %v9238_v5, %v12521_v29 }
 0x22b   : > { %7947 = vmatpush.msk.msrb.mxu1 %vm3580_vm4, %v15077_v24  ;;  %7965 = vmatpush.msk.msrb.mxu2 %vm3608_vm5, %v15077_v24  ;;  %vm3544_vm11 = vcmp.eq.s32.totalorder %v15293_v1, %v12275_v45  ;;  %vm3638_vm13 = vcmp.eq.s32.totalorder %v15294_v30, %v12275_v45  ;;  %vm4231_vm4 = vcmp.eq.s32.totalorder %v9241_v6, %v12521_v29 }
 0x22c   : > { %7980 = vmatpush.msk.msrb.mxu3 %vm3642_vm6, %v15077_v24  ;;  %7932 = vmatpush.msk.msrb.mxu0 %vm3546_vm7, %v15077_v24  ;;  %vm4259_vm5 = vcmp.eq.s32.totalorder %v9244_v7, %v12521_v29  ;;  %vm4293_vm6 = vcmp.eq.s32.totalorder %v9247_v8, %v12521_v29  ;;  %vm4197_vm7 = vcmp.eq.s32.totalorder %v14977_v58, %v12521_v29 }
 0x22d   : > { %7948 = vmatpush.msk.msrb.mxu1 %vm3578_vm8, %v15077_v24  ;;  %7966 = vmatpush.msk.msrb.mxu2 %vm3606_vm9, %v15077_v24  ;;  %vm4229_vm8 = vcmp.eq.s32.totalorder %v9256_v11, %v12521_v29  ;;  %vm4257_vm9 = vcmp.eq.s32.totalorder %v9259_v12, %v12521_v29 }
 0x22e   : > { %7981 = vmatpush.msk.msrb.mxu3 %vm3640_vm10, %v15077_v24  ;;  %4115 = vmatmul.f32.vlgmr.msrb.gmra.mxu2 %v11734_v19  ;;  %v12549_v1 = vpop.f32.mrf.mxu0  ;;  %vm4291_vm10 = vcmp.eq.s32.totalorder %v14998_v52, %v12521_v29 }
 0x22f   : > { %15296 = vst [vmem:[#allocation173_spill] sm:$0xff] %v12549_v1  ;;  %7933 = vmatpush.msk.msrb.mxu0 %vm3544_vm11, %v15077_v24  ;;  %7949 = vmatpush.msk.msrb.mxu1 %vm3576_vm12, %v15077_v24  ;;  %v12557_v36 = vpop.f32.mrf.mxu1  ;;  %v12559_v30 = vpop.f32.mrf.mxu2  ;;  %vm4195_vm11 = vcmp.eq.s32.totalorder %v14978_v13, %v12521_v29  ;;  %vm4227_vm12 = vcmp.eq.s32.totalorder %v15223_v48, %v12521_v29 }
 0x230   : > { %15297 = vst [vmem:[#allocation174_spill] sm:$0xff] %v12557_v36  ;;  %7982 = vmatpush.msk.msrb.mxu3 %vm3638_vm13, %v15077_v24  ;;  %8144 = vmatpush.msk.msra.mxu2 %vm4263_vm14, %v15077_v24  ;;  %vm4255_vm13 = vcmp.eq.s32.totalorder %v15262_v2, %v12521_v29 }
 0x231   : > { %15298 = vst [vmem:[#allocation175_spill] sm:$0xff] %v12559_v30  ;;  %4144 = vmatmul.f32.vlgmr.msrb.gmra.mxu3 %v11758_v57  ;;  %7934 = vmatpush.msk.msrb.mxu0 %vm3542_vm15, %v15077_v24  ;;  %v15300_v57 = vld [vmem:[#allocation22_spill] sm:$0xff]  ;;  %vm4193_vm15 = vcmp.eq.s32.totalorder %v14979_v14, %v12521_v29 }
 0x232   : > { %7950 = vmatpush.msk.msrb.mxu1 %vm3574_vm0, %v15077_v24  ;;  %8145 = vmatpush.msk.msra.mxu2 %vm4261_vm1, %v15077_v24  ;;  %v12575_v45 = vpop.f32.mrf.mxu3  ;;  %vm4289_vm14 = vcmp.eq.s32.totalorder %v15300_v57, %v12521_v29  ;;  %vm4225_vm0 = vcmp.eq.s32.totalorder %v9283_v20, %v12521_v29  ;;  %vm4253_vm1 = vcmp.eq.s32.totalorder %v14980_v16, %v12521_v29 }
 0x233   : > { %15299 = vst [vmem:[#allocation176_spill] sm:$0xff] %v12575_v45  ;;  %8160 = vmatpush.msk.msra.mxu3 %vm4295_vm2, %v15077_v24  ;;  %4057 = vmatmul.f32.vlgmr.msrb.gmra.mxu0 %v11776_v38  ;;  %vm4287_vm2 = vcmp.eq.s32.totalorder %v9303_v23, %v12521_v29  ;;  %v15308_v45 = vld [vmem:[#allocation32_spill] sm:$0xff] }
 0x234   : > { %4086 = vmatmul.f32.vlgmr.msrb.gmra.mxu1 %v11786_v54  ;;  %8112 = vmatpush.msk.msra.mxu0 %vm4199_vm3, %v15077_v24  ;;  %vm4191_vm3 = vcmp.eq.s32.totalorder %v15021_v49, %v12521_v29 }
 0x235   : > { %8128 = vmatpush.msk.msra.mxu1 %vm4231_vm4, %v15077_v24  ;;  %8146 = vmatpush.msk.msra.mxu2 %vm4259_vm5, %v15077_v24  ;;  %vm4223_vm4 = vcmp.eq.s32.totalorder %v9328_v25, %v12521_v29  ;;  %vm4251_vm5 = vcmp.eq.s32.totalorder %v15229_v37, %v12521_v29 }
 0x236   : > { %8161 = vmatpush.msk.msra.mxu3 %vm4293_vm6, %v15077_v24  ;;  %8113 = vmatpush.msk.msra.mxu0 %vm4197_vm7, %v15077_v24  ;;  %vm4285_vm6 = vcmp.eq.s32.totalorder %v9337_v26, %v12521_v29  ;;  %vm4189_vm7 = vcmp.eq.s32.totalorder %v14981_v15, %v12521_v29 }
 0x237   : > { %8129 = vmatpush.msk.msra.mxu1 %vm4229_vm8, %v15077_v24  ;;  %8147 = vmatpush.msk.msra.mxu2 %vm4257_vm9, %v15077_v24  ;;  %vm4221_vm8 = vcmp.eq.s32.totalorder %v9352_v28, %v12521_v29 }
 0x238   : > { %8162 = vmatpush.msk.msra.mxu3 %vm4291_vm10, %v15077_v24  ;;  %4118 = vmatmul.f32.gmra.mxu2 %v11814_v10  ;;  %v12609_v19 = vpop.f32.mrf.mxu0  ;;  %vm4283_vm10 = vcmp.eq.s32.totalorder %v15164_v18, %v12521_v29 }
 0x239   : > { %15301 = vst [vmem:[#allocation177_spill] sm:$0xff] %v12609_v19  ;;  %8114 = vmatpush.msk.msra.mxu0 %vm4195_vm11, %v15077_v24  ;;  %8130 = vmatpush.msk.msra.mxu1 %vm4227_vm12, %v15077_v24  ;;  %v12617_v38 = vpop.f32.mrf.mxu1  ;;  %v12619_v54 = vpop.f32.mrf.mxu2  ;;  %vm4219_vm12 = vcmp.eq.s32.totalorder %v15231_v53, %v12521_v29  ;;  %v15321_v19 = vld [vmem:[#allocation47_spill] sm:$0xff] }
 0x23a   : > { %15302 = vst [vmem:[#allocation178_spill] sm:$0xff] %v12617_v38  ;;  %8148 = vmatpush.msk.msra.mxu2 %vm4255_vm13, %v15077_v24  ;;  %8163 = vmatpush.msk.msra.mxu3 %vm4289_vm14, %v15077_v24  ;;  %vm4281_vm14 = vcmp.eq.s32.totalorder %v15308_v45, %v12521_v29  ;;  %v15317_v38 = vld [vmem:[#allocation46_spill] sm:$0xff] }
 0x23b   : > { %15303 = vst [vmem:[#allocation179_spill] sm:$0xff] %v12619_v54  ;;  %4147 = vmatmul.f32.gmra.mxu3 %v11838_v43  ;;  %8115 = vmatpush.msk.msra.mxu0 %vm4193_vm15, %v15077_v24  ;;  %v15305_v43 = vld [vmem:[#allocation31_spill] sm:$0xff]  ;;  %vm4185_vm15 = vcmp.eq.s32.totalorder %v15168_v56, %v12521_v29  ;;  %v15314_v54 = vld [vmem:[#allocation42_spill] sm:$0xff] }
 0x23c   : > { %8131 = vmatpush.msk.msra.mxu1 %vm4225_vm0, %v15077_v24  ;;  %8149 = vmatpush.msk.msra.mxu2 %vm4253_vm1, %v15077_v24  ;;  %v12635_v10 = vpop.f32.mrf.mxu3  ;;  %vm4249_vm9 = vcmp.eq.s32.totalorder %v15305_v43, %v12521_v29  ;;  %vm4217_vm0 = vcmp.eq.s32.totalorder %v15170_v21, %v12521_v29  ;;  %vm4245_vm1 = vcmp.eq.s32.totalorder %v15171_v51, %v12521_v29 }
 0x23d   : > { %15304 = vst [vmem:[#allocation180_spill] sm:$0xff] %v12635_v10  ;;  %8164 = vmatpush.msk.msra.mxu3 %vm4287_vm2, %v15077_v24  ;;  %4060 = vmatmul.f32.gmra.mxu0 %v11856_v41  ;;  %v15307_v41 = vld [vmem:[#allocation35_spill] sm:$0xff]  ;;  %vm4279_vm2 = vcmp.eq.s32.totalorder %v15134_v9, %v12521_v29  ;;  %v15313_v10 = vld [vmem:[#allocation38_spill] sm:$0xff] }
 0x23e   : > { %4089 = vmatmul.f32.gmra.mxu1 %v11866_v55  ;;  %8116 = vmatpush.msk.msra.mxu0 %vm4191_vm3, %v15077_v24  ;;  %v15306_v55 = vld [vmem:[#allocation29_spill] sm:$0xff]  ;;  %vm4247_vm13 = vcmp.eq.s32.totalorder %v15307_v41, %v12521_v29 }
 0x23f   : > { %8132 = vmatpush.msk.msra.mxu1 %vm4223_vm4, %v15077_v24  ;;  %8150 = vmatpush.msk.msra.mxu2 %vm4251_vm5, %v15077_v24  ;;  %vm4187_vm11 = vcmp.eq.s32.totalorder %v15306_v55, %v12521_v29  ;;  %vm4215_vm4 = vcmp.eq.s32.totalorder %v15313_v10, %v12521_v29  ;;  %vm4243_vm5 = vcmp.eq.s32.totalorder %v15314_v54, %v12521_v29 }
 0x240   : > { %8165 = vmatpush.msk.msra.mxu3 %vm4285_vm6, %v15077_v24  ;;  %8117 = vmatpush.msk.msra.mxu0 %vm4189_vm7, %v15077_v24  ;;  %vm4277_vm6 = vcmp.eq.s32.totalorder %v9472_v42, %v12521_v29  ;;  %vm4181_vm7 = vcmp.eq.s32.totalorder %v15100_v34, %v12521_v29 }
 0x241   : > { %8133 = vmatpush.msk.msra.mxu1 %vm4221_vm8, %v15077_v24  ;;  %8151 = vmatpush.msk.msra.mxu2 %vm4249_vm9, %v15077_v24  ;;  %vm4213_vm8 = vcmp.eq.s32.totalorder %v15279_v61, %v12521_v29  ;;  %vm4241_vm9 = vcmp.eq.s32.totalorder %v15317_v38, %v12521_v29 }
 0x242   : > { %8166 = vmatpush.msk.msra.mxu3 %vm4283_vm10, %v15077_v24  ;;  %4121 = vmatmul.f32.gmra.mxu2 %v11894_v27  ;;  %v12669_v30 = vpop.f32.mrf.mxu0  ;;  %v15312_v27 = vld [vmem:[#allocation37_spill] sm:$0xff] }
 0x243   : > { %15309 = vst [vmem:[#allocation181_spill] sm:$0xff] %v12669_v30  ;;  %8118 = vmatpush.msk.msra.mxu0 %vm4187_vm11, %v15077_v24  ;;  %8134 = vmatpush.msk.msra.mxu1 %vm4219_vm12, %v15077_v24  ;;  %v12677_v36 = vpop.f32.mrf.mxu1  ;;  %v12679_v1 = vpop.f32.mrf.mxu2  ;;  %vm4183_vm3 = vcmp.eq.s32.totalorder %v15312_v27, %v12521_v29  ;;  %vm4211_vm12 = vcmp.eq.s32.totalorder %v15282_v17, %v12521_v29  ;;  %v15323_v30 = vld [vmem:[#allocation49_spill] sm:$0xff] }
 0x244   : > { %15310 = vst [vmem:[#allocation182_spill] sm:$0xff] %v12677_v36  ;;  %8152 = vmatpush.msk.msra.mxu2 %vm4247_vm13, %v15077_v24  ;;  %8167 = vmatpush.msk.msra.mxu3 %vm4281_vm14, %v15077_v24  ;;  %vm4273_vm14 = vcmp.eq.s32.totalorder %v15321_v19, %v12521_v29 }
 0x245   : > { %15311 = vst [vmem:[#allocation183_spill] sm:$0xff] %v12679_v1  ;;  %4150 = vmatmul.f32.gmra.mxu3 %v11918_v63  ;;  %8119 = vmatpush.msk.msra.mxu0 %vm4185_vm15, %v15077_v24  ;;  %v15316_v63 = vld [vmem:[#allocation135_spill] sm:$0xff]  ;;  %vm4177_vm15 = vcmp.eq.s32.totalorder %v15042_v44, %v12521_v29 }
 0x246   : > { %8135 = vmatpush.msk.msra.mxu1 %vm4217_vm0, %v15077_v24  ;;  %8153 = vmatpush.msk.msra.mxu2 %vm4245_vm1, %v15077_v24  ;;  %v12695_v1 = vpop.f32.mrf.mxu3  ;;  %vm4209_vm0 = vcmp.eq.s32.totalorder %v15323_v30, %v12521_v29  ;;  %vm4237_vm1 = vcmp.eq.s32.totalorder %v15013_v31, %v12521_v29 }
 0x247   : > { %15315 = vst [vmem:[#allocation37_spill] sm:$0xff] %v12695_v1  ;;  %8168 = vmatpush.msk.msra.mxu3 %vm4279_vm2, %v15077_v24  ;;  %4063 = vmatmul.f32.gmra.mxu0 %v11936_v33  ;;  %v15318_v33 = vld [vmem:[#allocation43_spill] sm:$0xff]  ;;  %v15320_v1 = vld [vmem:[#allocation50_spill] sm:$0xff]  ;;  %vm4271_vm2 = vcmp.eq.s32.totalorder %v14991_v50, %v12521_v29 }
 0x248   : > { %4092 = vmatmul.f32.gmra.mxu1 %v15316_v63  ;;  %8120 = vmatpush.msk.msra.mxu0 %vm4183_vm3, %v15077_v24  ;;  %vm4275_vm10 = vcmp.eq.s32.totalorder %v15318_v33, %v12521_v29  ;;  %v15319_v63 = vld [vmem:[#allocation44_spill] sm:$0xff]  ;;  %vm4239_vm13 = vcmp.eq.s32.totalorder %v15320_v1, %v12521_v29 }
 0x249   : > { %8136 = vmatpush.msk.msra.mxu1 %vm4215_vm4, %v15077_v24  ;;  %8154 = vmatpush.msk.msra.mxu2 %vm4243_vm5, %v15077_v24  ;;  %vm4179_vm11 = vcmp.eq.s32.totalorder %v15319_v63, %v12521_v29  ;;  %vm4207_vm4 = vcmp.eq.s32.totalorder %v15250_v32, %v12521_v29 }
 0x24a   : > { %8169 = vmatpush.msk.msra.mxu3 %vm4277_vm6, %v15077_v24  ;;  %8121 = vmatpush.msk.msra.mxu0 %vm4181_vm7, %v15077_v24  ;;  %vm4269_vm6 = vcmp.eq.s32.totalorder %v15016_v39, %v12521_v29  ;;  %vm4173_vm7 = vcmp.eq.s32.totalorder %v9619_v59, %v12521_v29 }
 0x24b   : > { %8137 = vmatpush.msk.msra.mxu1 %vm4213_vm8, %v15077_v24  ;;  %8155 = vmatpush.msk.msra.mxu2 %vm4241_vm9, %v15077_v24 }
 0x24c   : > { %8170 = vmatpush.msk.msra.mxu3 %vm4275_vm10, %v15077_v24  ;;  %4124 = vmatmul.f32.gmra.mxu2 %v11974_v46  ;;  %v12729_v36 = vpop.f32.mrf.mxu0  ;;  %v15326_v46 = vld [vmem:[#allocation52_spill] sm:$0xff]  ;;  %vm4267_vm10 = vcmp.eq.s32.totalorder %v14996_v47, %v12521_v29  ;;  %v12792_v47 = vld [vmem:[%s14677_s0 + $0x10] sm:$0xff] }
 0x24d   : > { %15322 = vst [vmem:[#allocation38_spill] sm:$0xff] %v12729_v36  ;;  %8122 = vmatpush.msk.msra.mxu0 %vm4179_vm11, %v15077_v24  ;;  %8138 = vmatpush.msk.msra.mxu1 %vm4211_vm12, %v15077_v24  ;;  %v12737_v19 = vpop.f32.mrf.mxu1  ;;  %v12739_v1 = vpop.f32.mrf.mxu2  ;;  %vm4175_vm3 = vcmp.eq.s32.totalorder %v15326_v46, %v12521_v29  ;;  %v15329_v36 = vld [vmem:[#allocation140_spill] sm:$0xff]  ;;  %vm4203_vm12 = vcmp.eq.s32.totalorder %v15216_v35, %v12521_v29 }
 0x24e   : > { %15324 = vst [vmem:[#allocation135_spill] sm:$0xff] %v12737_v19  ;;  %8156 = vmatpush.msk.msra.mxu2 %vm4239_vm13, %v15077_v24  ;;  %8171 = vmatpush.msk.msra.mxu3 %vm4273_vm14, %v15077_v24 }
 0x24f   : > { %15325 = vst [vmem:[#allocation184_spill] sm:$0xff] %v12739_v1  ;;  %4153 = vmatmul.f32.gmra.mxu3 %v12001_v22  ;;  %8123 = vmatpush.msk.msra.mxu0 %vm4177_vm15, %v15077_v24  ;;  %v15327_v1 = vld [vmem:[#allocation57_spill] sm:$0xff]  ;;  %v12764_v22 = vperm.slane %v12500_v40, 1  ;;  %v15333_v40 = vld [vmem:[#allocation62_spill] sm:$0xff]  ;;  %vm4169_vm15 = vcmp.eq.s32.totalorder %v14976_v62, %v12521_v29 }
 0x250   : > { %8139 = vmatpush.msk.msra.mxu1 %vm4209_vm0, %v15077_v24  ;;  %8157 = vmatpush.msk.msra.mxu2 %vm4237_vm1, %v15077_v24  ;;  %vm4235_vm5 = vcmp.eq.s32.totalorder %v15327_v1, %v12521_v29  ;;  %v12755_v19 = vpop.f32.mrf.mxu3  ;;  %v15330_v1 = vld [vmem:[#allocation56_spill] sm:$0xff]  ;;  %vm4265_vm13 = vcmp.eq.s32.totalorder %v15333_v40, %v12521_v29  ;;  %vm4201_vm0 = vcmp.eq.s32.totalorder %v9706_v60, %v12521_v29 }
 0x251   : > { %15328 = vst [vmem:[#allocation185_spill] sm:$0xff] %v12755_v19  ;;  %8172 = vmatpush.msk.msra.mxu3 %vm4271_vm2, %v15077_v24  ;;  %4066 = vmatmul.f32.gmra.mxu0 %v12019_v0  ;;  %vm4205_vm8 = vcmp.eq.s32.totalorder %v15330_v1, %v12521_v29  ;;  %v15331_v19 = vld [vmem:[#allocation61_spill] sm:$0xff]  ;;  %v15332_v0 = vld [vmem:[#allocation59_spill] sm:$0xff]  ;;  %vm4262_vm1 = vcmp.eq.s32.totalorder %v9232_v3, %v12764_v22 }
 0x252   : > { %4095 = vmatmul.f32.gmra.mxu1 %v15329_v36  ;;  %8124 = vmatpush.msk.msra.mxu0 %vm4175_vm3, %v15077_v24  ;;  %vm4233_vm9 = vcmp.eq.s32.totalorder %v15331_v19, %v12521_v29  ;;  %vm4171_vm11 = vcmp.eq.s32.totalorder %v15332_v0, %v12521_v29  ;;  %v15334_v36 = vld [vmem:[#allocation16_spill] sm:$0xff]  ;;  %vm4296_vm2 = vcmp.eq.s32.totalorder %v9235_v4, %v12764_v22 }
 0x253   : > { %8140 = vmatpush.msk.msra.mxu1 %vm4207_vm4, %v15077_v24  ;;  %8158 = vmatpush.msk.msra.mxu2 %vm4235_vm5, %v15077_v24  ;;  %vm4264_vm14 = vcmp.eq.s32.totalorder %v15334_v36, %v12764_v22  ;;  %vm4200_vm3 = vcmp.eq.s32.totalorder %v9238_v5, %v12764_v22  ;;  %vm4232_vm4 = vcmp.eq.s32.totalorder %v9241_v6, %v12764_v22 }
 0x254   : > { %8173 = vmatpush.msk.msra.mxu3 %vm4269_vm6, %v15077_v24  ;;  %8125 = vmatpush.msk.msra.mxu0 %vm4173_vm7, %v15077_v24  ;;  %vm4260_vm5 = vcmp.eq.s32.totalorder %v9244_v7, %v12764_v22  ;;  %vm4294_vm6 = vcmp.eq.s32.totalorder %v9247_v8, %v12764_v22  ;;  %vm4198_vm7 = vcmp.eq.s32.totalorder %v14977_v58, %v12764_v22 }
 0x255   : > { %8141 = vmatpush.msk.msra.mxu1 %vm4205_vm8, %v15077_v24  ;;  %8159 = vmatpush.msk.msra.mxu2 %vm4233_vm9, %v15077_v24  ;;  %vm4230_vm8 = vcmp.eq.s32.totalorder %v9256_v11, %v12764_v22  ;;  %vm4258_vm9 = vcmp.eq.s32.totalorder %v9259_v12, %v12764_v22 }
 0x256   : > { %8174 = vmatpush.msk.msra.mxu3 %vm4267_vm10, %v15077_v24  ;;  %4627 = vmatmul.f32.vlgmr.msra.gmra.mxu2 %v12792_v47  ;;  %v12797_v35 = vpop.f32.mrf.mxu0  ;;  %vm4292_vm10 = vcmp.eq.s32.totalorder %v14998_v52, %v12764_v22 }
 0x257   : > { %15335 = vst [vmem:[#allocation140_spill] sm:$0xff] %v12797_v35  ;;  %8126 = vmatpush.msk.msra.mxu0 %vm4171_vm11, %v15077_v24  ;;  %8142 = vmatpush.msk.msra.mxu1 %vm4203_vm12, %v15077_v24  ;;  %v12805_v36 = vpop.f32.mrf.mxu1  ;;  %v12807_v40 = vpop.f32.mrf.mxu2  ;;  %v12816_v35 = vld [vmem:[%s14677_s0 + $0x18] sm:$0xff]  ;;  %vm4196_vm11 = vcmp.eq.s32.totalorder %v14978_v13, %v12764_v22  ;;  %vm4228_vm12 = vcmp.eq.s32.totalorder %v15223_v48, %v12764_v22 }
 0x258   : > { %15336 = vst [vmem:[#allocation186_spill] sm:$0xff] %v12805_v36  ;;  %8175 = vmatpush.msk.msra.mxu3 %vm4265_vm13, %v15077_v24  ;;  %8208 = vmatpush.msk.msrb.mxu2 %vm4264_vm14, %v15077_v24  ;;  %v12844_v36 = vld [vmem:[%s14677_s0 + $0x8] sm:$0xff]  ;;  %vm4256_vm13 = vcmp.eq.s32.totalorder %v15262_v2, %v12764_v22  ;;  %vm4290_vm14 = vcmp.eq.s32.totalorder %v15300_v57, %v12764_v22 }
 0x259   : > { %15337 = vst [vmem:[#allocation187_spill] sm:$0xff] %v12807_v40  ;;  %4656 = vmatmul.f32.vlgmr.msra.gmra.mxu3 %v12816_v35  ;;  %8127 = vmatpush.msk.msra.mxu0 %vm4169_vm15, %v15077_v24  ;;  %v12834_v40 = vld [vmem:[%s14677_s0] sm:$0xff]  ;;  %vm4194_vm15 = vcmp.eq.s32.totalorder %v14979_v14, %v12764_v22 }
 0x25a   : > { %8143 = vmatpush.msk.msra.mxu1 %vm4201_vm0, %v15077_v24  ;;  %8209 = vmatpush.msk.msrb.mxu2 %vm4262_vm1, %v15077_v24  ;;  %v12828_v29 = vpop.f32.mrf.mxu3  ;;  %vm4226_vm0 = vcmp.eq.s32.totalorder %v9283_v20, %v12764_v22  ;;  %vm4254_vm1 = vcmp.eq.s32.totalorder %v14980_v16, %v12764_v22 }
 0x25b   : > { %15338 = vst [vmem:[#allocation188_spill] sm:$0xff] %v12828_v29  ;;  %8224 = vmatpush.msk.msrb.mxu3 %vm4296_vm2, %v15077_v24  ;;  %4569 = vmatmul.f32.vlgmr.msra.gmra.mxu0 %v12834_v40  ;;  %v12872_v29 = vld [vmem:[%s14677_s0 + $0x30] sm:$0xff]  ;;  %vm4288_vm2 = vcmp.eq.s32.totalorder %v9303_v23, %v12764_v22 }
 0x25c   : > { %4598 = vmatmul.f32.vlgmr.msra.gmra.mxu1 %v12844_v36  ;;  %8176 = vmatpush.msk.msrb.mxu0 %vm4200_vm3, %v15077_v24  ;;  %vm4192_vm3 = vcmp.eq.s32.totalorder %v15021_v49, %v12764_v22 }
 0x25d   : > { %8192 = vmatpush.msk.msrb.mxu1 %vm4232_vm4, %v15077_v24  ;;  %8210 = vmatpush.msk.msrb.mxu2 %vm4260_vm5, %v15077_v24  ;;  %vm4224_vm4 = vcmp.eq.s32.totalorder %v9328_v25, %v12764_v22  ;;  %vm4252_vm5 = vcmp.eq.s32.totalorder %v15229_v37, %v12764_v22  ;;  %v12924_v37 = vld [vmem:[%s14677_s0 + $0x28] sm:$0xff] }
 0x25e   : > { %8225 = vmatpush.msk.msrb.mxu3 %vm4294_vm6, %v15077_v24  ;;  %8177 = vmatpush.msk.msrb.mxu0 %vm4198_vm7, %v15077_v24  ;;  %vm4286_vm6 = vcmp.eq.s32.totalorder %v9337_v26, %v12764_v22  ;;  %vm4190_vm7 = vcmp.eq.s32.totalorder %v14981_v15, %v12764_v22 }
 0x25f   : > { %8193 = vmatpush.msk.msrb.mxu1 %vm4230_vm8, %v15077_v24  ;;  %8211 = vmatpush.msk.msrb.mxu2 %vm4258_vm9, %v15077_v24  ;;  %vm4222_vm8 = vcmp.eq.s32.totalorder %v9352_v28, %v12764_v22  ;;  %vm4250_vm9 = vcmp.eq.s32.totalorder %v15305_v43, %v12764_v22 }
 0x260   : > { %8226 = vmatpush.msk.msrb.mxu3 %vm4292_vm10, %v15077_v24  ;;  %4630 = vmatmul.f32.gmra.mxu2 %v12872_v29  ;;  %v12877_v48 = vpop.f32.mrf.mxu0  ;;  %vm4284_vm10 = vcmp.eq.s32.totalorder %v15164_v18, %v12764_v22 }
 0x261   : > { %15339 = vst [vmem:[#allocation189_spill] sm:$0xff] %v12877_v48  ;;  %8178 = vmatpush.msk.msrb.mxu0 %vm4196_vm11, %v15077_v24  ;;  %8194 = vmatpush.msk.msrb.mxu1 %vm4228_vm12, %v15077_v24  ;;  %v12885_v57 = vpop.f32.mrf.mxu1  ;;  %v12887_v2 = vpop.f32.mrf.mxu2  ;;  %v12896_v48 = vld [vmem:[%s14677_s0 + $0x38] sm:$0xff]  ;;  %vm4188_vm11 = vcmp.eq.s32.totalorder %v15306_v55, %v12764_v22  ;;  %vm4220_vm12 = vcmp.eq.s32.totalorder %v15231_v53, %v12764_v22 }
 0x262   : > { %15340 = vst [vmem:[#allocation190_spill] sm:$0xff] %v12885_v57  ;;  %8212 = vmatpush.msk.msrb.mxu2 %vm4256_vm13, %v15077_v24  ;;  %8227 = vmatpush.msk.msrb.mxu3 %vm4290_vm14, %v15077_v24  ;;  %v12914_v57 = vld [vmem:[%s14677_s0 + $0x20] sm:$0xff]  ;;  %vm4248_vm13 = vcmp.eq.s32.totalorder %v15307_v41, %v12764_v22  ;;  %vm4282_vm14 = vcmp.eq.s32.totalorder %v15308_v45, %v12764_v22 }
 0x263   : > { %15341 = vst [vmem:[#allocation191_spill] sm:$0xff] %v12887_v2  ;;  %4659 = vmatmul.f32.gmra.mxu3 %v12896_v48  ;;  %8179 = vmatpush.msk.msrb.mxu0 %vm4194_vm15, %v15077_v24  ;;  %vm4186_vm15 = vcmp.eq.s32.totalorder %v15168_v56, %v12764_v22 }
 0x264   : > { %8195 = vmatpush.msk.msrb.mxu1 %vm4226_vm0, %v15077_v24  ;;  %8213 = vmatpush.msk.msrb.mxu2 %vm4254_vm1, %v15077_v24  ;;  %v12908_v2 = vpop.f32.mrf.mxu3  ;;  %vm4218_vm0 = vcmp.eq.s32.totalorder %v15170_v21, %v12764_v22  ;;  %vm4246_vm1 = vcmp.eq.s32.totalorder %v15171_v51, %v12764_v22 }
 0x265   : > { %15342 = vst [vmem:[#allocation192_spill] sm:$0xff] %v12908_v2  ;;  %8228 = vmatpush.msk.msrb.mxu3 %vm4288_vm2, %v15077_v24  ;;  %4572 = vmatmul.f32.gmra.mxu0 %v12914_v57  ;;  %v12952_v2 = vld [vmem:[%s14677_s0 + $0x50] sm:$0xff]  ;;  %vm4280_vm2 = vcmp.eq.s32.totalorder %v15134_v9, %v12764_v22 }
 0x266   : > { %4601 = vmatmul.f32.gmra.mxu1 %v12924_v37  ;;  %8180 = vmatpush.msk.msrb.mxu0 %vm4192_vm3, %v15077_v24  ;;  %vm4184_vm3 = vcmp.eq.s32.totalorder %v15312_v27, %v12764_v22 }
 0x267   : > { %8196 = vmatpush.msk.msrb.mxu1 %vm4224_vm4, %v15077_v24  ;;  %8214 = vmatpush.msk.msrb.mxu2 %vm4252_vm5, %v15077_v24  ;;  %vm4216_vm4 = vcmp.eq.s32.totalorder %v15313_v10, %v12764_v22  ;;  %vm4244_vm5 = vcmp.eq.s32.totalorder %v15314_v54, %v12764_v22  ;;  %v13004_v54 = vld [vmem:[%s14677_s0 + $0x48] sm:$0xff] }
 0x268   : > { %8229 = vmatpush.msk.msrb.mxu3 %vm4286_vm6, %v15077_v24  ;;  %8181 = vmatpush.msk.msrb.mxu0 %vm4190_vm7, %v15077_v24  ;;  %vm4278_vm6 = vcmp.eq.s32.totalorder %v9472_v42, %v12764_v22  ;;  %vm4182_vm7 = vcmp.eq.s32.totalorder %v15100_v34, %v12764_v22  ;;  %15347 = vst [vmem:[#allocation197_spill] sm:$0xff] %v13004_v54 }
 0x269   : > { %8197 = vmatpush.msk.msrb.mxu1 %vm4222_vm8, %v15077_v24  ;;  %8215 = vmatpush.msk.msrb.mxu2 %vm4250_vm9, %v15077_v24  ;;  %vm4214_vm8 = vcmp.eq.s32.totalorder %v15279_v61, %v12764_v22  ;;  %vm4242_vm9 = vcmp.eq.s32.totalorder %v15317_v38, %v12764_v22  ;;  %v15349_v38 = vld [vmem:[#allocation47_spill] sm:$0xff] }
 0x26a   : > { %8230 = vmatpush.msk.msrb.mxu3 %vm4284_vm10, %v15077_v24  ;;  %4633 = vmatmul.f32.gmra.mxu2 %v12952_v2  ;;  %v12957_v53 = vpop.f32.mrf.mxu0  ;;  %vm4276_vm10 = vcmp.eq.s32.totalorder %v15318_v33, %v12764_v22 }
 0x26b   : > { %15343 = vst [vmem:[#allocation193_spill] sm:$0xff] %v12957_v53  ;;  %8182 = vmatpush.msk.msrb.mxu0 %vm4188_vm11, %v15077_v24  ;;  %8198 = vmatpush.msk.msrb.mxu1 %vm4220_vm12, %v15077_v24  ;;  %v12965_v45 = vpop.f32.mrf.mxu1  ;;  %v12967_v41 = vpop.f32.mrf.mxu2  ;;  %v12976_v53 = vld [vmem:[%s14677_s0 + $0x58] sm:$0xff]  ;;  %vm4180_vm11 = vcmp.eq.s32.totalorder %v15319_v63, %v12764_v22  ;;  %vm4212_vm12 = vcmp.eq.s32.totalorder %v15282_v17, %v12764_v22  ;;  %v13032_v63 = vld [vmem:[%s14677_s0 + $0x70] sm:$0xff] }
 0x26c   : > { %15344 = vst [vmem:[#allocation194_spill] sm:$0xff] %v12965_v45  ;;  %8216 = vmatpush.msk.msrb.mxu2 %vm4248_vm13, %v15077_v24  ;;  %8231 = vmatpush.msk.msrb.mxu3 %vm4282_vm14, %v15077_v24  ;;  %v12994_v45 = vld [vmem:[%s14677_s0 + $0x40] sm:$0xff]  ;;  %vm4274_vm14 = vcmp.eq.s32.totalorder %v15349_v38, %v12764_v22 }
 0x26d   : > { %15345 = vst [vmem:[#allocation195_spill] sm:$0xff] %v12967_v41  ;;  %4662 = vmatmul.f32.gmra.mxu3 %v12976_v53  ;;  %8183 = vmatpush.msk.msrb.mxu0 %vm4186_vm15, %v15077_v24  ;;  %vm4178_vm15 = vcmp.eq.s32.totalorder %v15042_v44, %v12764_v22 }
 0x26e   : > { %8199 = vmatpush.msk.msrb.mxu1 %vm4218_vm0, %v15077_v24  ;;  %8217 = vmatpush.msk.msrb.mxu2 %vm4246_vm1, %v15077_v24  ;;  %v12988_v41 = vpop.f32.mrf.mxu3  ;;  %15350 = vst [vmem:[#allocation198_spill] sm:$0xff] %v13032_v63  ;;  %vm4210_vm0 = vcmp.eq.s32.totalorder %v15323_v30, %v12764_v22  ;;  %vm4238_vm1 = vcmp.eq.s32.totalorder %v15013_v31, %v12764_v22  ;;  %v13059_v30 = vld [vmem:[%s14677_s0 + $0x78] sm:$0xff] }
 0x26f   : > { %15346 = vst [vmem:[#allocation196_spill] sm:$0xff] %v12988_v41  ;;  %8232 = vmatpush.msk.msrb.mxu3 %vm4280_vm2, %v15077_v24  ;;  %4575 = vmatmul.f32.gmra.mxu0 %v12994_v45  ;;  %v15348_v41 = vld [vmem:[#allocation50_spill] sm:$0xff]  ;;  %vm4272_vm2 = vcmp.eq.s32.totalorder %v14991_v50, %v12764_v22 }
 0x270   : > { %4604 = vmatmul.f32.gmra.mxu1 %v13004_v54  ;;  %8184 = vmatpush.msk.msrb.mxu0 %vm4184_vm3, %v15077_v24  ;;  %vm4240_vm13 = vcmp.eq.s32.totalorder %v15348_v41, %v12764_v22  ;;  %15355 = vst [vmem:[#allocation203_spill] sm:$0xff] %v13059_v30  ;;  %vm4176_vm3 = vcmp.eq.s32.totalorder %v15326_v46, %v12764_v22 }
 0x271   : > { %8200 = vmatpush.msk.msrb.mxu1 %vm4216_vm4, %v15077_v24  ;;  %8218 = vmatpush.msk.msrb.mxu2 %vm4244_vm5, %v15077_v24  ;;  %vm4208_vm4 = vcmp.eq.s32.totalorder %v15250_v32, %v12764_v22 }
 0x272   : > { %8233 = vmatpush.msk.msrb.mxu3 %vm4278_vm6, %v15077_v24  ;;  %8185 = vmatpush.msk.msrb.mxu0 %vm4182_vm7, %v15077_v24  ;;  %vm4270_vm6 = vcmp.eq.s32.totalorder %v15016_v39, %v12764_v22  ;;  %vm4174_vm7 = vcmp.eq.s32.totalorder %v9619_v59, %v12764_v22 }
 0x273   : > { %8201 = vmatpush.msk.msrb.mxu1 %vm4214_vm8, %v15077_v24  ;;  %8219 = vmatpush.msk.msrb.mxu2 %vm4242_vm9, %v15077_v24  ;;  %vm4206_vm8 = vcmp.eq.s32.totalorder %v15330_v1, %v12764_v22  ;;  %vm4234_vm9 = vcmp.eq.s32.totalorder %v15331_v19, %v12764_v22  ;;  %v15361_v19 = vld [vmem:[#allocation62_spill] sm:$0xff]  ;;  %v15362_v1 = vld [vmem:[#allocation16_spill] sm:$0xff] }
 0x274   : > { %8234 = vmatpush.msk.msrb.mxu3 %vm4276_vm10, %v15077_v24  ;;  %4636 = vmatmul.f32.gmra.mxu2 %v13032_v63  ;;  %v13037_v17 = vpop.f32.mrf.mxu0 }
 0x275   : > { %15351 = vst [vmem:[#allocation199_spill] sm:$0xff] %v13037_v17  ;;  %8186 = vmatpush.msk.msrb.mxu0 %vm4180_vm11, %v15077_v24  ;;  %8202 = vmatpush.msk.msrb.mxu1 %vm4212_vm12, %v15077_v24  ;;  %v13045_v38 = vpop.f32.mrf.mxu1  ;;  %v13047_v41 = vpop.f32.mrf.mxu2  ;;  %v13054_v17 = vld [vmem:[%s9220_s30 + $0x7] ss:$8 sm:$0x3]  ;;  %vm4172_vm11 = vcmp.eq.s32.totalorder %v15332_v0, %v12764_v22 }
 0x276   : > { %15352 = vst [vmem:[#allocation200_spill] sm:$0xff] %v13045_v38  ;;  %8220 = vmatpush.msk.msrb.mxu2 %vm4240_vm13, %v15077_v24  ;;  %8235 = vmatpush.msk.msrb.mxu3 %vm4274_vm14, %v15077_v24  ;;  %v13085_v32 = vperm.slane %v13054_v17, 0  ;;  %vm4266_vm13 = vcmp.eq.s32.totalorder %v15361_v19, %v12764_v22 }
 0x277   : > { %15353 = vst [vmem:[#allocation201_spill] sm:$0xff] %v13047_v41  ;;  %4665 = vmatmul.f32.gmra.mxu3 %v13059_v30  ;;  %8187 = vmatpush.msk.msrb.mxu0 %vm4178_vm15, %v15077_v24  ;;  %v15356_v41 = vld [vmem:[#allocation57_spill] sm:$0xff]  ;;  %v13077_v30 = vld [vmem:[%s14677_s0 + $0x60] sm:$0xff]  ;;  %vm4170_vm15 = vcmp.eq.s32.totalorder %v14976_v62, %v12764_v22 }
 0x278   : > { %15354 = vst [vmem:[#allocation202_spill] sm:$0xff] %v13054_v17  ;;  %8203 = vmatpush.msk.msrb.mxu1 %vm4210_vm0, %v15077_v24  ;;  %8221 = vmatpush.msk.msrb.mxu2 %vm4238_vm1, %v15077_v24  ;;  %vm4236_vm5 = vcmp.eq.s32.totalorder %v15356_v41, %v12764_v22  ;;  %v13071_v38 = vpop.f32.mrf.mxu3  ;;  %v15359_v17 = vld [vmem:[#allocation58_spill] sm:$0xff]  ;;  %vm4891_vm14 = vcmp.eq.s32.totalorder %v15362_v1, %v13085_v32 }
 0x279   : > { %15357 = vst [vmem:[#allocation204_spill] sm:$0xff] %v13071_v38  ;;  %8236 = vmatpush.msk.msrb.mxu3 %vm4272_vm2, %v15077_v24  ;;  %4578 = vmatmul.f32.gmra.mxu0 %v13077_v30  ;;  %v13090_v38 = vld [vmem:[%s14677_s0 + $0x68] sm:$0xff]  ;;  %vm4268_vm10 = vcmp.eq.s32.totalorder %v15359_v17, %v12764_v22  ;;  %vm4202_vm0 = vcmp.eq.s32.totalorder %v9706_v60, %v12764_v22 }
 0x27a   : > { %15358 = vst [vmem:[#allocation205_spill] sm:$0xff] %v13090_v38  ;;  %4607 = vmatmul.f32.gmra.mxu1 %v13090_v38  ;;  %8188 = vmatpush.msk.msrb.mxu0 %vm4176_vm3, %v15077_v24  ;;  %v15360_v38 = vld [vmem:[#allocation60_spill] sm:$0xff]  ;;  %vm4889_vm1 = vcmp.eq.s32.totalorder %v9232_v3, %v13085_v32  ;;  %vm4923_vm2 = vcmp.eq.s32.totalorder %v9235_v4, %v13085_v32 }
 0x27b   : > { %8204 = vmatpush.msk.msrb.mxu1 %vm4208_vm4, %v15077_v24  ;;  %8222 = vmatpush.msk.msrb.mxu2 %vm4236_vm5, %v15077_v24  ;;  %vm4204_vm12 = vcmp.eq.s32.totalorder %v15360_v38, %v12764_v22  ;;  %vm4827_vm3 = vcmp.eq.s32.totalorder %v9238_v5, %v13085_v32  ;;  %vm4859_vm4 = vcmp.eq.s32.totalorder %v9241_v6, %v13085_v32 }
 0x27c   : > { %8237 = vmatpush.msk.msrb.mxu3 %vm4270_vm6, %v15077_v24  ;;  %8189 = vmatpush.msk.msrb.mxu0 %vm4174_vm7, %v15077_v24  ;;  %vm4887_vm5 = vcmp.eq.s32.totalorder %v9244_v7, %v13085_v32  ;;  %vm4921_vm6 = vcmp.eq.s32.totalorder %v9247_v8, %v13085_v32  ;;  %vm4825_vm7 = vcmp.eq.s32.totalorder %v14977_v58, %v13085_v32 }
 0x27d   : > { %8205 = vmatpush.msk.msrb.mxu1 %vm4206_vm8, %v15077_v24  ;;  %8223 = vmatpush.msk.msrb.mxu2 %vm4234_vm9, %v15077_v24  ;;  %vm4857_vm8 = vcmp.eq.s32.totalorder %v9256_v11, %v13085_v32  ;;  %vm4885_vm9 = vcmp.eq.s32.totalorder %v9259_v12, %v13085_v32 }
 0x27e   : > { %8238 = vmatpush.msk.msrb.mxu3 %vm4268_vm10, %v15077_v24  ;;  %4743 = vmatmul.f32.vlgmr.msrb.gmra.mxu2 %v12792_v47  ;;  %v13118_v0 = vpop.f32.mrf.mxu0  ;;  %vm4919_vm10 = vcmp.eq.s32.totalorder %v14998_v52, %v13085_v32 }
 0x27f   : > { %15363 = vst [vmem:[#allocation206_spill] sm:$0xff] %v13118_v0  ;;  %8190 = vmatpush.msk.msrb.mxu0 %vm4172_vm11, %v15077_v24  ;;  %8206 = vmatpush.msk.msrb.mxu1 %vm4204_vm12, %v15077_v24  ;;  %v13126_v1 = vpop.f32.mrf.mxu1  ;;  %v13128_v19 = vpop.f32.mrf.mxu2  ;;  %vm4823_vm11 = vcmp.eq.s32.totalorder %v14978_v13, %v13085_v32 }
 0x280   : > { %15364 = vst [vmem:[#allocation207_spill] sm:$0xff] %v13126_v1  ;;  %8239 = vmatpush.msk.msrb.mxu3 %vm4266_vm13, %v15077_v24  ;;  %8401 = vmatpush.msk.msra.mxu2 %vm4891_vm14, %v15077_v24  ;;  %v15369_v1 = vld [vmem:[#allocation22_spill] sm:$0xff] }
 0x281   : > { %15365 = vst [vmem:[#allocation208_spill] sm:$0xff] %v13128_v19  ;;  %4772 = vmatmul.f32.vlgmr.msrb.gmra.mxu3 %v12816_v35  ;;  %8191 = vmatpush.msk.msrb.mxu0 %vm4170_vm15, %v15077_v24  ;;  %v15368_v19 = vld [vmem:[#allocation21_spill] sm:$0xff]  ;;  %vm4917_vm14 = vcmp.eq.s32.totalorder %v15369_v1, %v13085_v32  ;;  %vm4821_vm15 = vcmp.eq.s32.totalorder %v14979_v14, %v13085_v32 }
 0x282   : > { %8207 = vmatpush.msk.msrb.mxu1 %vm4202_vm0, %v15077_v24  ;;  %8402 = vmatpush.msk.msra.mxu2 %vm4889_vm1, %v15077_v24  ;;  %v13144_v22 = vpop.f32.mrf.mxu3  ;;  %vm4883_vm13 = vcmp.eq.s32.totalorder %v15368_v19, %v13085_v32  ;;  %vm4853_vm0 = vcmp.eq.s32.totalorder %v9283_v20, %v13085_v32  ;;  %vm4881_vm1 = vcmp.eq.s32.totalorder %v14980_v16, %v13085_v32 }
 0x283   : > { %15366 = vst [vmem:[#allocation209_spill] sm:$0xff] %v13144_v22  ;;  %8417 = vmatpush.msk.msra.mxu3 %vm4923_vm2, %v15077_v24  ;;  %4685 = vmatmul.f32.vlgmr.msrb.gmra.mxu0 %v12834_v40  ;;  %v15367_v22 = vld [vmem:[#allocation20_spill] sm:$0xff]  ;;  %vm4915_vm2 = vcmp.eq.s32.totalorder %v9303_v23, %v13085_v32 }
 0x284   : > { %4714 = vmatmul.f32.vlgmr.msrb.gmra.mxu1 %v12844_v36  ;;  %8369 = vmatpush.msk.msra.mxu0 %vm4827_vm3, %v15077_v24  ;;  %vm4855_vm12 = vcmp.eq.s32.totalorder %v15367_v22, %v13085_v32  ;;  %vm4819_vm3 = vcmp.eq.s32.totalorder %v15021_v49, %v13085_v32 }
 0x285   : > { %8385 = vmatpush.msk.msra.mxu1 %vm4859_vm4, %v15077_v24  ;;  %8403 = vmatpush.msk.msra.mxu2 %vm4887_vm5, %v15077_v24  ;;  %vm4851_vm4 = vcmp.eq.s32.totalorder %v9328_v25, %v13085_v32 }
 0x286   : > { %8418 = vmatpush.msk.msra.mxu3 %vm4921_vm6, %v15077_v24  ;;  %8370 = vmatpush.msk.msra.mxu0 %vm4825_vm7, %v15077_v24  ;;  %vm4913_vm6 = vcmp.eq.s32.totalorder %v9337_v26, %v13085_v32  ;;  %vm4817_vm7 = vcmp.eq.s32.totalorder %v14981_v15, %v13085_v32 }
 0x287   : > { %8386 = vmatpush.msk.msra.mxu1 %vm4857_vm8, %v15077_v24  ;;  %8404 = vmatpush.msk.msra.mxu2 %vm4885_vm9, %v15077_v24  ;;  %vm4849_vm8 = vcmp.eq.s32.totalorder %v9352_v28, %v13085_v32  ;;  %vm4877_vm9 = vcmp.eq.s32.totalorder %v15305_v43, %v13085_v32  ;;  %v15377_v43 = vld [vmem:[#allocation32_spill] sm:$0xff] }
 0x288   : > { %8419 = vmatpush.msk.msra.mxu3 %vm4919_vm10, %v15077_v24  ;;  %4746 = vmatmul.f32.gmra.mxu2 %v12872_v29  ;;  %v13178_v0 = vpop.f32.mrf.mxu0  ;;  %vm4911_vm10 = vcmp.eq.s32.totalorder %v15164_v18, %v13085_v32 }
 0x289   : > { %15370 = vst [vmem:[#allocation20_spill] sm:$0xff] %v13178_v0  ;;  %8371 = vmatpush.msk.msra.mxu0 %vm4823_vm11, %v15077_v24  ;;  %8387 = vmatpush.msk.msra.mxu1 %vm4855_vm12, %v15077_v24  ;;  %v13186_v1 = vpop.f32.mrf.mxu1  ;;  %v13188_v19 = vpop.f32.mrf.mxu2  ;;  %vm4815_vm11 = vcmp.eq.s32.totalorder %v15306_v55, %v13085_v32  ;;  %v15376_v0 = vld [vmem:[#allocation35_spill] sm:$0xff] }
 0x28a   : > { %15371 = vst [vmem:[#allocation210_spill] sm:$0xff] %v13186_v1  ;;  %8405 = vmatpush.msk.msra.mxu2 %vm4883_vm13, %v15077_v24  ;;  %8420 = vmatpush.msk.msra.mxu3 %vm4917_vm14, %v15077_v24  ;;  %vm4875_vm13 = vcmp.eq.s32.totalorder %v15376_v0, %v13085_v32  ;;  %vm4909_vm14 = vcmp.eq.s32.totalorder %v15377_v43, %v13085_v32 }
 0x28b   : > { %15372 = vst [vmem:[#allocation211_spill] sm:$0xff] %v13188_v19  ;;  %4775 = vmatmul.f32.gmra.mxu3 %v12896_v48  ;;  %8372 = vmatpush.msk.msra.mxu0 %vm4821_vm15, %v15077_v24  ;;  %v15373_v19 = vld [vmem:[#allocation27_spill] sm:$0xff]  ;;  %vm4813_vm15 = vcmp.eq.s32.totalorder %v15168_v56, %v13085_v32 }
 0x28c   : > { %8388 = vmatpush.msk.msra.mxu1 %vm4853_vm0, %v15077_v24  ;;  %8406 = vmatpush.msk.msra.mxu2 %vm4881_vm1, %v15077_v24  ;;  %vm4879_vm5 = vcmp.eq.s32.totalorder %v15373_v19, %v13085_v32  ;;  %v13204_v1 = vpop.f32.mrf.mxu3  ;;  %vm4845_vm0 = vcmp.eq.s32.totalorder %v15170_v21, %v13085_v32  ;;  %vm4873_vm1 = vcmp.eq.s32.totalorder %v15171_v51, %v13085_v32 }
 0x28d   : > { %15374 = vst [vmem:[#allocation27_spill] sm:$0xff] %v13204_v1  ;;  %8421 = vmatpush.msk.msra.mxu3 %vm4915_vm2, %v15077_v24  ;;  %4688 = vmatmul.f32.gmra.mxu0 %v12914_v57  ;;  %v15375_v1 = vld [vmem:[#allocation30_spill] sm:$0xff]  ;;  %vm4907_vm2 = vcmp.eq.s32.totalorder %v15134_v9, %v13085_v32 }
 0x28e   : > { %4717 = vmatmul.f32.gmra.mxu1 %v12924_v37  ;;  %8373 = vmatpush.msk.msra.mxu0 %vm4819_vm3, %v15077_v24  ;;  %vm4847_vm12 = vcmp.eq.s32.totalorder %v15375_v1, %v13085_v32  ;;  %vm4811_vm3 = vcmp.eq.s32.totalorder %v15312_v27, %v13085_v32 }
 0x28f   : > { %8389 = vmatpush.msk.msra.mxu1 %vm4851_vm4, %v15077_v24  ;;  %8407 = vmatpush.msk.msra.mxu2 %vm4879_vm5, %v15077_v24  ;;  %vm4843_vm4 = vcmp.eq.s32.totalorder %v15313_v10, %v13085_v32 }
 0x290   : > { %8422 = vmatpush.msk.msra.mxu3 %vm4913_vm6, %v15077_v24  ;;  %8374 = vmatpush.msk.msra.mxu0 %vm4817_vm7, %v15077_v24  ;;  %vm4905_vm6 = vcmp.eq.s32.totalorder %v9472_v42, %v13085_v32  ;;  %vm4809_vm7 = vcmp.eq.s32.totalorder %v15100_v34, %v13085_v32 }
 0x291   : > { %8390 = vmatpush.msk.msra.mxu1 %vm4849_vm8, %v15077_v24  ;;  %8408 = vmatpush.msk.msra.mxu2 %vm4877_vm9, %v15077_v24  ;;  %vm4841_vm8 = vcmp.eq.s32.totalorder %v15279_v61, %v13085_v32  ;;  %v15387_v61 = vld [vmem:[#allocation47_spill] sm:$0xff] }
 0x292   : > { %8423 = vmatpush.msk.msra.mxu3 %vm4911_vm10, %v15077_v24  ;;  %4749 = vmatmul.f32.gmra.mxu2 %v12952_v2  ;;  %v13238_v55 = vpop.f32.mrf.mxu0  ;;  %vm4903_vm10 = vcmp.eq.s32.totalorder %v15318_v33, %v13085_v32 }
 0x293   : > { %15378 = vst [vmem:[#allocation30_spill] sm:$0xff] %v13238_v55  ;;  %8375 = vmatpush.msk.msra.mxu0 %vm4815_vm11, %v15077_v24  ;;  %8391 = vmatpush.msk.msra.mxu1 %vm4847_vm12, %v15077_v24  ;;  %v13246_v43 = vpop.f32.mrf.mxu1  ;;  %v13248_v0 = vpop.f32.mrf.mxu2  ;;  %v15383_v55 = vld [vmem:[#allocation46_spill] sm:$0xff] }
 0x294   : > { %15379 = vst [vmem:[#allocation212_spill] sm:$0xff] %v13246_v43  ;;  %8409 = vmatpush.msk.msra.mxu2 %vm4875_vm13, %v15077_v24  ;;  %8424 = vmatpush.msk.msra.mxu3 %vm4909_vm14, %v15077_v24  ;;  %vm4869_vm9 = vcmp.eq.s32.totalorder %v15383_v55, %v13085_v32  ;;  %v15386_v55 = vld [vmem:[#allocation50_spill] sm:$0xff]  ;;  %vm4901_vm14 = vcmp.eq.s32.totalorder %v15387_v61, %v13085_v32 }
 0x295   : > { %15380 = vst [vmem:[#allocation213_spill] sm:$0xff] %v13248_v0  ;;  %4778 = vmatmul.f32.gmra.mxu3 %v12976_v53  ;;  %8376 = vmatpush.msk.msra.mxu0 %vm4813_vm15, %v15077_v24  ;;  %v15381_v0 = vld [vmem:[#allocation42_spill] sm:$0xff]  ;;  %vm4867_vm13 = vcmp.eq.s32.totalorder %v15386_v55, %v13085_v32  ;;  %vm4805_vm15 = vcmp.eq.s32.totalorder %v15042_v44, %v13085_v32 }
 0x296   : > { %8392 = vmatpush.msk.msra.mxu1 %vm4845_vm0, %v15077_v24  ;;  %8410 = vmatpush.msk.msra.mxu2 %vm4873_vm1, %v15077_v24  ;;  %vm4871_vm5 = vcmp.eq.s32.totalorder %v15381_v0, %v13085_v32  ;;  %v13264_v43 = vpop.f32.mrf.mxu3  ;;  %vm4865_vm1 = vcmp.eq.s32.totalorder %v15013_v31, %v13085_v32 }
 0x297   : > { %15382 = vst [vmem:[#allocation214_spill] sm:$0xff] %v13264_v43  ;;  %8425 = vmatpush.msk.msra.mxu3 %vm4907_vm2, %v15077_v24  ;;  %4691 = vmatmul.f32.gmra.mxu0 %v12994_v45  ;;  %v15384_v43 = vld [vmem:[#allocation44_spill] sm:$0xff]  ;;  %vm4899_vm2 = vcmp.eq.s32.totalorder %v14991_v50, %v13085_v32  ;;  %v15396_v50 = vld [vmem:[#allocation205_spill] sm:$0xff] }
 0x298   : > { %4720 = vmatmul.f32.gmra.mxu1 %v13004_v54  ;;  %8377 = vmatpush.msk.msra.mxu0 %vm4811_vm3, %v15077_v24  ;;  %vm4807_vm11 = vcmp.eq.s32.totalorder %v15384_v43, %v13085_v32  ;;  %v15385_v54 = vld [vmem:[#allocation45_spill] sm:$0xff]  ;;  %vm4803_vm3 = vcmp.eq.s32.totalorder %v15326_v46, %v13085_v32  ;;  %v15395_v46 = vld [vmem:[#allocation202_spill] sm:$0xff] }
 0x299   : > { %8393 = vmatpush.msk.msra.mxu1 %vm4843_vm4, %v15077_v24  ;;  %8411 = vmatpush.msk.msra.mxu2 %vm4871_vm5, %v15077_v24  ;;  %vm4839_vm12 = vcmp.eq.s32.totalorder %v15385_v54, %v13085_v32  ;;  %v15389_v54 = vld [vmem:[#allocation49_spill] sm:$0xff]  ;;  %vm4863_vm5 = vcmp.eq.s32.totalorder %v15356_v41, %v13085_v32  ;;  %v15397_v41 = vld [vmem:[#allocation56_spill] sm:$0xff] }
 0x29a   : > { %8426 = vmatpush.msk.msra.mxu3 %vm4905_vm6, %v15077_v24  ;;  %8378 = vmatpush.msk.msra.mxu0 %vm4809_vm7, %v15077_v24  ;;  %vm4837_vm0 = vcmp.eq.s32.totalorder %v15389_v54, %v13085_v32  ;;  %vm4897_vm6 = vcmp.eq.s32.totalorder %v15016_v39, %v13085_v32  ;;  %vm4801_vm7 = vcmp.eq.s32.totalorder %v9619_v59, %v13085_v32 }
 0x29b   : > { %8394 = vmatpush.msk.msra.mxu1 %vm4841_vm8, %v15077_v24  ;;  %8412 = vmatpush.msk.msra.mxu2 %vm4869_vm9, %v15077_v24  ;;  %vm4833_vm8 = vcmp.eq.s32.totalorder %v15397_v41, %v13085_v32  ;;  %v15401_v41 = vld [vmem:[#allocation16_spill] sm:$0xff] }
 0x29c   : > { %8427 = vmatpush.msk.msra.mxu3 %vm4903_vm10, %v15077_v24  ;;  %4752 = vmatmul.f32.gmra.mxu2 %v13032_v63  ;;  %v13298_v43 = vpop.f32.mrf.mxu0  ;;  %vm4895_vm10 = vcmp.eq.s32.totalorder %v15359_v17, %v13085_v32 }
 0x29d   : > { %15388 = vst [vmem:[#allocation215_spill] sm:$0xff] %v13298_v43  ;;  %8379 = vmatpush.msk.msra.mxu0 %vm4807_vm11, %v15077_v24  ;;  %8395 = vmatpush.msk.msra.mxu1 %vm4839_vm12, %v15077_v24  ;;  %v13306_v61 = vpop.f32.mrf.mxu1  ;;  %v13308_v55 = vpop.f32.mrf.mxu2  ;;  %v15392_v43 = vld [vmem:[#allocation203_spill] sm:$0xff]  ;;  %vm4831_vm12 = vcmp.eq.s32.totalorder %v15360_v38, %v13085_v32 }
 0x29e   : > { %15390 = vst [vmem:[#allocation216_spill] sm:$0xff] %v13306_v61  ;;  %8413 = vmatpush.msk.msra.mxu2 %vm4867_vm13, %v15077_v24  ;;  %8428 = vmatpush.msk.msra.mxu3 %vm4901_vm14, %v15077_v24 }
 0x29f   : > { %15391 = vst [vmem:[#allocation217_spill] sm:$0xff] %v13308_v55  ;;  %4781 = vmatmul.f32.gmra.mxu3 %v15392_v43  ;;  %8380 = vmatpush.msk.msra.mxu0 %vm4805_vm15, %v15077_v24  ;;  %v15393_v55 = vld [vmem:[#allocation53_spill] sm:$0xff]  ;;  %v13333_v43 = vperm.slane %v15395_v46, 1  ;;  %v15399_v46 = vld [vmem:[#allocation59_spill] sm:$0xff]  ;;  %vm4797_vm15 = vcmp.eq.s32.totalorder %v14976_v62, %v13085_v32 }
 0x2a0   : > { %8396 = vmatpush.msk.msra.mxu1 %vm4837_vm0, %v15077_v24  ;;  %8414 = vmatpush.msk.msra.mxu2 %vm4865_vm1, %v15077_v24  ;;  %vm4835_vm4 = vcmp.eq.s32.totalorder %v15393_v55, %v13085_v32  ;;  %v13324_v61 = vpop.f32.mrf.mxu3  ;;  %vm4799_vm11 = vcmp.eq.s32.totalorder %v15399_v46, %v13085_v32  ;;  %vm4829_vm0 = vcmp.eq.s32.totalorder %v9706_v60, %v13085_v32 }
 0x2a1   : > { %15394 = vst [vmem:[#allocation53_spill] sm:$0xff] %v13324_v61  ;;  %8429 = vmatpush.msk.msra.mxu3 %vm4899_vm2, %v15077_v24  ;;  %4694 = vmatmul.f32.gmra.mxu0 %v13077_v30  ;;  %v15398_v61 = vld [vmem:[#allocation61_spill] sm:$0xff]  ;;  %vm4892_vm14 = vcmp.eq.s32.totalorder %v15401_v41, %v13333_v43  ;;  %vm4890_vm1 = vcmp.eq.s32.totalorder %v9232_v3, %v13333_v43 }
 0x2a2   : > { %4723 = vmatmul.f32.gmra.mxu1 %v15396_v50  ;;  %8381 = vmatpush.msk.msra.mxu0 %vm4803_vm3, %v15077_v24  ;;  %vm4861_vm9 = vcmp.eq.s32.totalorder %v15398_v61, %v13085_v32  ;;  %v15400_v61 = vld [vmem:[#allocation62_spill] sm:$0xff]  ;;  %vm4924_vm2 = vcmp.eq.s32.totalorder %v9235_v4, %v13333_v43  ;;  %vm4828_vm3 = vcmp.eq.s32.totalorder %v9238_v5, %v13333_v43 }
 0x2a3   : > { %8397 = vmatpush.msk.msra.mxu1 %vm4835_vm4, %v15077_v24  ;;  %8415 = vmatpush.msk.msra.mxu2 %vm4863_vm5, %v15077_v24  ;;  %vm4893_vm13 = vcmp.eq.s32.totalorder %v15400_v61, %v13085_v32  ;;  %vm4860_vm4 = vcmp.eq.s32.totalorder %v9241_v6, %v13333_v43  ;;  %vm4888_vm5 = vcmp.eq.s32.totalorder %v9244_v7, %v13333_v43 }
 0x2a4   : > { %8430 = vmatpush.msk.msra.mxu3 %vm4897_vm6, %v15077_v24  ;;  %8382 = vmatpush.msk.msra.mxu0 %vm4801_vm7, %v15077_v24  ;;  %vm4922_vm6 = vcmp.eq.s32.totalorder %v9247_v8, %v13333_v43  ;;  %vm4826_vm7 = vcmp.eq.s32.totalorder %v14977_v58, %v13333_v43 }
 0x2a5   : > { %8398 = vmatpush.msk.msra.mxu1 %vm4833_vm8, %v15077_v24  ;;  %8416 = vmatpush.msk.msra.mxu2 %vm4861_vm9, %v15077_v24  ;;  %vm4858_vm8 = vcmp.eq.s32.totalorder %v9256_v11, %v13333_v43  ;;  %vm4886_vm9 = vcmp.eq.s32.totalorder %v9259_v12, %v13333_v43 }
 0x2a6   : > { %8431 = vmatpush.msk.msra.mxu3 %vm4895_vm10, %v15077_v24  ;;  %5255 = vmatmul.f32.vlgmr.msra.gmra.mxu2 %v12792_v47  ;;  %v13361_v46 = vpop.f32.mrf.mxu0  ;;  %vm4920_vm10 = vcmp.eq.s32.totalorder %v14998_v52, %v13333_v43 }
 0x2a7   : > { %15402 = vst [vmem:[#allocation202_spill] sm:$0xff] %v13361_v46  ;;  %8383 = vmatpush.msk.msra.mxu0 %vm4799_vm11, %v15077_v24  ;;  %8399 = vmatpush.msk.msra.mxu1 %vm4831_vm12, %v15077_v24  ;;  %v13369_v41 = vpop.f32.mrf.mxu1  ;;  %v13371_v61 = vpop.f32.mrf.mxu2  ;;  %vm4824_vm11 = vcmp.eq.s32.totalorder %v14978_v13, %v13333_v43  ;;  %vm4856_vm12 = vcmp.eq.s32.totalorder %v15367_v22, %v13333_v43 }
 0x2a8   : > { %15403 = vst [vmem:[#allocation218_spill] sm:$0xff] %v13369_v41  ;;  %8432 = vmatpush.msk.msra.mxu3 %vm4893_vm13, %v15077_v24  ;;  %8465 = vmatpush.msk.msrb.mxu2 %vm4892_vm14, %v15077_v24 }
 0x2a9   : > { %15404 = vst [vmem:[#allocation219_spill] sm:$0xff] %v13371_v61  ;;  %5284 = vmatmul.f32.vlgmr.msra.gmra.mxu3 %v12816_v35  ;;  %8384 = vmatpush.msk.msra.mxu0 %vm4797_vm15, %v15077_v24  ;;  %v15407_v61 = vld [vmem:[#allocation22_spill] sm:$0xff]  ;;  %vm4822_vm15 = vcmp.eq.s32.totalorder %v14979_v14, %v13333_v43 }
 0x2aa   : > { %8400 = vmatpush.msk.msra.mxu1 %vm4829_vm0, %v15077_v24  ;;  %8466 = vmatpush.msk.msrb.mxu2 %vm4890_vm1, %v15077_v24  ;;  %v13387_v32 = vpop.f32.mrf.mxu3  ;;  %vm4918_vm14 = vcmp.eq.s32.totalorder %v15407_v61, %v13333_v43  ;;  %vm4854_vm0 = vcmp.eq.s32.totalorder %v9283_v20, %v13333_v43  ;;  %vm4882_vm1 = vcmp.eq.s32.totalorder %v14980_v16, %v13333_v43 }
 0x2ab   : > { %15405 = vst [vmem:[#allocation220_spill] sm:$0xff] %v13387_v32  ;;  %8481 = vmatpush.msk.msrb.mxu3 %vm4924_vm2, %v15077_v24  ;;  %5197 = vmatmul.f32.vlgmr.msra.gmra.mxu0 %v12834_v40  ;;  %v15406_v32 = vld [vmem:[#allocation21_spill] sm:$0xff]  ;;  %vm4916_vm2 = vcmp.eq.s32.totalorder %v9303_v23, %v13333_v43 }
 0x2ac   : > { %5226 = vmatmul.f32.vlgmr.msra.gmra.mxu1 %v12844_v36  ;;  %8433 = vmatpush.msk.msrb.mxu0 %vm4828_vm3, %v15077_v24  ;;  %vm4884_vm13 = vcmp.eq.s32.totalorder %v15406_v32, %v13333_v43  ;;  %vm4820_vm3 = vcmp.eq.s32.totalorder %v15021_v49, %v13333_v43 }
 0x2ad   : > { %8449 = vmatpush.msk.msrb.mxu1 %vm4860_vm4, %v15077_v24  ;;  %8467 = vmatpush.msk.msrb.mxu2 %vm4888_vm5, %v15077_v24  ;;  %vm4852_vm4 = vcmp.eq.s32.totalorder %v9328_v25, %v13333_v43  ;;  %vm4880_vm5 = vcmp.eq.s32.totalorder %v15373_v19, %v13333_v43 }
 0x2ae   : > { %8482 = vmatpush.msk.msrb.mxu3 %vm4922_vm6, %v15077_v24  ;;  %8434 = vmatpush.msk.msrb.mxu0 %vm4826_vm7, %v15077_v24  ;;  %vm4914_vm6 = vcmp.eq.s32.totalorder %v9337_v26, %v13333_v43  ;;  %vm4818_vm7 = vcmp.eq.s32.totalorder %v14981_v15, %v13333_v43 }
 0x2af   : > { %8450 = vmatpush.msk.msrb.mxu1 %vm4858_vm8, %v15077_v24  ;;  %8468 = vmatpush.msk.msrb.mxu2 %vm4886_vm9, %v15077_v24  ;;  %vm4850_vm8 = vcmp.eq.s32.totalorder %v9352_v28, %v13333_v43 }
 0x2b0   : > { %8483 = vmatpush.msk.msrb.mxu3 %vm4920_vm10, %v15077_v24  ;;  %5258 = vmatmul.f32.gmra.mxu2 %v12872_v29  ;;  %v13421_v41 = vpop.f32.mrf.mxu0  ;;  %vm4912_vm10 = vcmp.eq.s32.totalorder %v15164_v18, %v13333_v43 }
 0x2b1   : > { %15408 = vst [vmem:[#allocation21_spill] sm:$0xff] %v13421_v41  ;;  %8435 = vmatpush.msk.msrb.mxu0 %vm4824_vm11, %v15077_v24  ;;  %8451 = vmatpush.msk.msrb.mxu1 %vm4856_vm12, %v15077_v24  ;;  %v13429_v46 = vpop.f32.mrf.mxu1  ;;  %v13431_v61 = vpop.f32.mrf.mxu2  ;;  %vm4848_vm12 = vcmp.eq.s32.totalorder %v15375_v1, %v13333_v43  ;;  %v15414_v41 = vld [vmem:[#allocation35_spill] sm:$0xff] }
 0x2b2   : > { %15409 = vst [vmem:[#allocation221_spill] sm:$0xff] %v13429_v46  ;;  %8469 = vmatpush.msk.msrb.mxu2 %vm4884_vm13, %v15077_v24  ;;  %8484 = vmatpush.msk.msrb.mxu3 %vm4918_vm14, %v15077_v24  ;;  %v15412_v46 = vld [vmem:[#allocation31_spill] sm:$0xff]  ;;  %vm4876_vm13 = vcmp.eq.s32.totalorder %v15414_v41, %v13333_v43 }
 0x2b3   : > { %15410 = vst [vmem:[#allocation222_spill] sm:$0xff] %v13431_v61  ;;  %5287 = vmatmul.f32.gmra.mxu3 %v12896_v48  ;;  %8436 = vmatpush.msk.msrb.mxu0 %vm4822_vm15, %v15077_v24  ;;  %vm4878_vm9 = vcmp.eq.s32.totalorder %v15412_v46, %v13333_v43  ;;  %v15415_v46 = vld [vmem:[#allocation32_spill] sm:$0xff]  ;;  %vm4814_vm15 = vcmp.eq.s32.totalorder %v15168_v56, %v13333_v43 }
 0x2b4   : > { %8452 = vmatpush.msk.msrb.mxu1 %vm4854_vm0, %v15077_v24  ;;  %8470 = vmatpush.msk.msrb.mxu2 %vm4882_vm1, %v15077_v24  ;;  %v13447_v61 = vpop.f32.mrf.mxu3  ;;  %vm4910_vm14 = vcmp.eq.s32.totalorder %v15415_v46, %v13333_v43  ;;  %vm4846_vm0 = vcmp.eq.s32.totalorder %v15170_v21, %v13333_v43  ;;  %vm4874_vm1 = vcmp.eq.s32.totalorder %v15171_v51, %v13333_v43 }
 0x2b5   : > { %15411 = vst [vmem:[#allocation223_spill] sm:$0xff] %v13447_v61  ;;  %8485 = vmatpush.msk.msrb.mxu3 %vm4916_vm2, %v15077_v24  ;;  %5200 = vmatmul.f32.gmra.mxu0 %v12914_v57  ;;  %v15413_v61 = vld [vmem:[#allocation29_spill] sm:$0xff]  ;;  %vm4908_vm2 = vcmp.eq.s32.totalorder %v15134_v9, %v13333_v43 }
 0x2b6   : > { %5229 = vmatmul.f32.gmra.mxu1 %v12924_v37  ;;  %8437 = vmatpush.msk.msrb.mxu0 %vm4820_vm3, %v15077_v24  ;;  %vm4816_vm11 = vcmp.eq.s32.totalorder %v15413_v61, %v13333_v43  ;;  %vm4812_vm3 = vcmp.eq.s32.totalorder %v15312_v27, %v13333_v43 }
 0x2b7   : > { %8453 = vmatpush.msk.msrb.mxu1 %vm4852_vm4, %v15077_v24  ;;  %8471 = vmatpush.msk.msrb.mxu2 %vm4880_vm5, %v15077_v24  ;;  %vm4844_vm4 = vcmp.eq.s32.totalorder %v15313_v10, %v13333_v43  ;;  %vm4872_vm5 = vcmp.eq.s32.totalorder %v15381_v0, %v13333_v43  ;;  %v15422_v0 = vld [vmem:[#allocation46_spill] sm:$0xff] }
 0x2b8   : > { %8486 = vmatpush.msk.msrb.mxu3 %vm4914_vm6, %v15077_v24  ;;  %8438 = vmatpush.msk.msrb.mxu0 %vm4818_vm7, %v15077_v24  ;;  %vm4906_vm6 = vcmp.eq.s32.totalorder %v9472_v42, %v13333_v43  ;;  %vm4810_vm7 = vcmp.eq.s32.totalorder %v15100_v34, %v13333_v43 }
 0x2b9   : > { %8454 = vmatpush.msk.msrb.mxu1 %vm4850_vm8, %v15077_v24  ;;  %8472 = vmatpush.msk.msrb.mxu2 %vm4878_vm9, %v15077_v24  ;;  %vm4870_vm9 = vcmp.eq.s32.totalorder %v15422_v0, %v13333_v43  ;;  %v15425_v0 = vld [vmem:[#allocation50_spill] sm:$0xff] }
 0x2ba   : > { %8487 = vmatpush.msk.msrb.mxu3 %vm4912_vm10, %v15077_v24  ;;  %5261 = vmatmul.f32.gmra.mxu2 %v12952_v2  ;;  %v13481_v61 = vpop.f32.mrf.mxu0  ;;  %vm4904_vm10 = vcmp.eq.s32.totalorder %v15318_v33, %v13333_v43  ;;  %v15426_v33 = vld [vmem:[#allocation47_spill] sm:$0xff] }
 0x2bb   : > { %15416 = vst [vmem:[#allocation224_spill] sm:$0xff] %v13481_v61  ;;  %8439 = vmatpush.msk.msrb.mxu0 %vm4816_vm11, %v15077_v24  ;;  %8455 = vmatpush.msk.msrb.mxu1 %vm4848_vm12, %v15077_v24  ;;  %v13489_v46 = vpop.f32.mrf.mxu1  ;;  %v13491_v41 = vpop.f32.mrf.mxu2  ;;  %v15421_v61 = vld [vmem:[#allocation41_spill] sm:$0xff] }
 0x2bc   : > { %15417 = vst [vmem:[#allocation225_spill] sm:$0xff] %v13489_v46  ;;  %8473 = vmatpush.msk.msrb.mxu2 %vm4876_vm13, %v15077_v24  ;;  %8488 = vmatpush.msk.msrb.mxu3 %vm4910_vm14, %v15077_v24  ;;  %v15420_v46 = vld [vmem:[#allocation197_spill] sm:$0xff]  ;;  %vm4842_vm8 = vcmp.eq.s32.totalorder %v15421_v61, %v13333_v43  ;;  %vm4868_vm13 = vcmp.eq.s32.totalorder %v15425_v0, %v13333_v43 }
 0x2bd   : > { %15418 = vst [vmem:[#allocation226_spill] sm:$0xff] %v13491_v41  ;;  %5290 = vmatmul.f32.gmra.mxu3 %v12976_v53  ;;  %8440 = vmatpush.msk.msrb.mxu0 %vm4814_vm15, %v15077_v24  ;;  %vm4902_vm14 = vcmp.eq.s32.totalorder %v15426_v33, %v13333_v43  ;;  %vm4806_vm15 = vcmp.eq.s32.totalorder %v15042_v44, %v13333_v43  ;;  %v13558_v44 = vld [vmem:[%s9220_s30 + $0x10] ss:$8 sm:$0x3]  ;;  %s6333_s30 = sshll.u32 %s6330_s19, 4  ;;  %s6334_s30 = int_to_ptr.hbm [resolvable:$true] %s6333_s30 }
 0x2be   : > { %8456 = vmatpush.msk.msrb.mxu1 %vm4846_vm0, %v15077_v24  ;;  %8474 = vmatpush.msk.msrb.mxu2 %vm4874_vm1, %v15077_v24  ;;  %v13507_v41 = vpop.f32.mrf.mxu3  ;;  %vm4838_vm0 = vcmp.eq.s32.totalorder %v15389_v54, %v13333_v43  ;;  %vm4866_vm1 = vcmp.eq.s32.totalorder %v15013_v31, %v13333_v43  ;;  %v15432_v54 = vld [vmem:[#allocation52_spill] sm:$0xff]  ;;  %s8986_s29 = sshra.s32 %s6334_s30, 4  ;;  %s8987_s29 = int_to_ptr.hbm [resolvable:$true] %s8986_s29 }
 0x2bf   : > { %15419 = vst [vmem:[#allocation227_spill] sm:$0xff] %v13507_v41  ;;  %8489 = vmatpush.msk.msrb.mxu3 %vm4908_vm2, %v15077_v24  ;;  %5203 = vmatmul.f32.gmra.mxu0 %v12994_v45  ;;  %v15423_v41 = vld [vmem:[#allocation44_spill] sm:$0xff]  ;;  %s8988_s25 = scalar_lea.hbm %s8987_s29, 96  ;;  %p8993_p3 = scmp.lt.s32.totalorder %s8987_s29, %s14683_s6 }
 0x2c0   : > { %5232 = vmatmul.f32.gmra.mxu1 %v15420_v46  ;;  %8441 = vmatpush.msk.msrb.mxu0 %vm4812_vm3, %v15077_v24  ;;  %vm4808_vm11 = vcmp.eq.s32.totalorder %v15423_v41, %v13333_v43  ;;  %v15424_v46 = vld [vmem:[#allocation45_spill] sm:$0xff]  ;;  %vm4804_vm3 = vcmp.eq.s32.totalorder %v15432_v54, %v13333_v43  ;;  %v13579_v54 = vperm.slane %v13558_v44, 0  ;;  %p8989_p6 = scmp.ne.s32.totalorder %s8987_s29, %s8988_s25  ;;  %p8994_p4 = scmp.lt.s32.totalorder %s8992_s11, %s8988_s25 }
 0x2c1   : > { %8457 = vmatpush.msk.msrb.mxu1 %vm4844_vm4, %v15077_v24  ;;  %8475 = vmatpush.msk.msrb.mxu2 %vm4872_vm5, %v15077_v24  ;;  %vm4840_vm12 = vcmp.eq.s32.totalorder %v15424_v46, %v13333_v43  ;;  %vm4836_vm4 = vcmp.eq.s32.totalorder %v15393_v55, %v13333_v43 }
 0x2c2   : > { %8490 = vmatpush.msk.msrb.mxu3 %vm4906_vm6, %v15077_v24  ;;  %8442 = vmatpush.msk.msrb.mxu0 %vm4810_vm7, %v15077_v24  ;;  %vm4898_vm6 = vcmp.eq.s32.totalorder %v15016_v39, %v13333_v43  ;;  %vm4802_vm7 = vcmp.eq.s32.totalorder %v9619_v59, %v13333_v43  ;;  %p8990_p13 = pnand %p8989_p6, %p9137_p11  ;;  %p8995_p5 = por %p8994_p4, %p8993_p3 }
 0x2c3   : > { %8458 = vmatpush.msk.msrb.mxu1 %vm4842_vm8, %v15077_v24  ;;  %8476 = vmatpush.msk.msrb.mxu2 %vm4870_vm9, %v15077_v24 }
 0x2c4   : > { %8491 = vmatpush.msk.msrb.mxu3 %vm4904_vm10, %v15077_v24  ;;  %5264 = vmatmul.f32.gmra.mxu2 %v13032_v63  ;;  %v13541_v41 = vpop.f32.mrf.mxu0  ;;  %v15431_v63 = vld [vmem:[#allocation203_spill] sm:$0xff]  ;;  %vm4896_vm10 = vcmp.eq.s32.totalorder %v15359_v17, %v13333_v43  ;;  %p8991_p2 = pneg %p8990_p13 }
 0x2c5   : > { %15427 = vst [vmem:[#allocation41_spill] sm:$0xff] %v13541_v41  ;;  %8443 = vmatpush.msk.msrb.mxu0 %vm4808_vm11, %v15077_v24  ;;  %8459 = vmatpush.msk.msrb.mxu1 %vm4840_vm12, %v15077_v24  ;;  %v13549_v33 = vpop.f32.mrf.mxu1  ;;  %v13551_v0 = vpop.f32.mrf.mxu2  ;;  %v15430_v41 = vld [vmem:[#allocation51_spill] sm:$0xff]  ;;  %vm4832_vm12 = vcmp.eq.s32.totalorder %v15360_v38, %v13333_v43 }
 0x2c6   : > { %15428 = vst [vmem:[#allocation45_spill] sm:$0xff] %v13549_v33  ;;  %8477 = vmatpush.msk.msrb.mxu2 %vm4868_vm13, %v15077_v24  ;;  %8492 = vmatpush.msk.msrb.mxu3 %vm4902_vm14, %v15077_v24  ;;  %vm4900_vm2 = vcmp.eq.s32.totalorder %v15430_v41, %v13333_v43  ;;  %p8996_p7 = pnand %p8995_p5, %p8991_p2 }
 0x2c7   : > { %15429 = vst [vmem:[#allocation228_spill] sm:$0xff] %v13551_v0  ;;  %5293 = vmatmul.f32.gmra.mxu3 %v15431_v63  ;;  %8444 = vmatpush.msk.msrb.mxu0 %vm4806_vm15, %v15077_v24  ;;  %v15433_v0 = vld [vmem:[#allocation57_spill] sm:$0xff]  ;;  %vm4798_vm15 = vcmp.eq.s32.totalorder %v14976_v62, %v13333_v43 }
 0x2c8   : > { %8460 = vmatpush.msk.msrb.mxu1 %vm4838_vm0, %v15077_v24  ;;  %8478 = vmatpush.msk.msrb.mxu2 %vm4866_vm1, %v15077_v24  ;;  %vm4864_vm5 = vcmp.eq.s32.totalorder %v15433_v0, %v13333_v43  ;;  %v13570_v33 = vpop.f32.mrf.mxu3  ;;  %v15435_v0 = vld [vmem:[#allocation56_spill] sm:$0xff]  ;;  %vm4830_vm0 = vcmp.eq.s32.totalorder %v9706_v60, %v13333_v43  ;;  %vm5517_vm1 = vcmp.eq.s32.totalorder %v9232_v3, %v13579_v54 }
 0x2c9   : > { %15434 = vst [vmem:[#allocation51_spill] sm:$0xff] %v13570_v33  ;;  %8493 = vmatpush.msk.msrb.mxu3 %vm4900_vm2, %v15077_v24  ;;  %5206 = vmatmul.f32.gmra.mxu0 %v13077_v30  ;;  %vm4834_vm8 = vcmp.eq.s32.totalorder %v15435_v0, %v13333_v43  ;;  %v15436_v33 = vld [vmem:[#allocation61_spill] sm:$0xff]  ;;  %v15439_v0 = vld [vmem:[#allocation16_spill] sm:$0xff]  ;;  %vm5551_vm2 = vcmp.eq.s32.totalorder %v9235_v4, %v13579_v54 }
 0x2ca   : > { %5235 = vmatmul.f32.gmra.mxu1 %v15396_v50  ;;  %8445 = vmatpush.msk.msrb.mxu0 %vm4804_vm3, %v15077_v24  ;;  %vm4862_vm9 = vcmp.eq.s32.totalorder %v15436_v33, %v13333_v43  ;;  %v15437_v50 = vld [vmem:[#allocation59_spill] sm:$0xff]  ;;  %v15438_v33 = vld [vmem:[#allocation62_spill] sm:$0xff]  ;;  %vm5519_vm14 = vcmp.eq.s32.totalorder %v15439_v0, %v13579_v54  ;;  %vm5455_vm3 = vcmp.eq.s32.totalorder %v9238_v5, %v13579_v54 }
 0x2cb   : > { %8461 = vmatpush.msk.msrb.mxu1 %vm4836_vm4, %v15077_v24  ;;  %8479 = vmatpush.msk.msrb.mxu2 %vm4864_vm5, %v15077_v24  ;;  %vm4800_vm11 = vcmp.eq.s32.totalorder %v15437_v50, %v13333_v43  ;;  %vm4894_vm13 = vcmp.eq.s32.totalorder %v15438_v33, %v13333_v43  ;;  %vm5487_vm4 = vcmp.eq.s32.totalorder %v9241_v6, %v13579_v54 }
 0x2cc   : > { %8494 = vmatpush.msk.msrb.mxu3 %vm4898_vm6, %v15077_v24  ;;  %8446 = vmatpush.msk.msrb.mxu0 %vm4802_vm7, %v15077_v24  ;;  %vm5515_vm5 = vcmp.eq.s32.totalorder %v9244_v7, %v13579_v54  ;;  %vm5549_vm6 = vcmp.eq.s32.totalorder %v9247_v8, %v13579_v54  ;;  %vm5453_vm7 = vcmp.eq.s32.totalorder %v14977_v58, %v13579_v54 }
 0x2cd   : > { %8462 = vmatpush.msk.msrb.mxu1 %vm4834_vm8, %v15077_v24  ;;  %8480 = vmatpush.msk.msrb.mxu2 %vm4862_vm9, %v15077_v24  ;;  %vm5485_vm8 = vcmp.eq.s32.totalorder %v9256_v11, %v13579_v54  ;;  %vm5513_vm9 = vcmp.eq.s32.totalorder %v9259_v12, %v13579_v54 }
 0x2ce   : > { %8495 = vmatpush.msk.msrb.mxu3 %vm4896_vm10, %v15077_v24  ;;  %5371 = vmatmul.f32.vlgmr.msrb.gmra.mxu2 %v12792_v47  ;;  %v13607_v50 = vpop.f32.mrf.mxu0  ;;  %vm5547_vm10 = vcmp.eq.s32.totalorder %v14998_v52, %v13579_v54 }
 0x2cf   : > { %15440 = vst [vmem:[#allocation203_spill] sm:$0xff] %v13607_v50  ;;  %8447 = vmatpush.msk.msrb.mxu0 %vm4800_vm11, %v15077_v24  ;;  %8463 = vmatpush.msk.msrb.mxu1 %vm4832_vm12, %v15077_v24  ;;  %v13615_v0 = vpop.f32.mrf.mxu1  ;;  %v13617_v33 = vpop.f32.mrf.mxu2  ;;  %vm5451_vm11 = vcmp.eq.s32.totalorder %v14978_v13, %v13579_v54  ;;  %vm5483_vm12 = vcmp.eq.s32.totalorder %v15367_v22, %v13579_v54 }
 0x2d0   : > { %15441 = vst [vmem:[#allocation229_spill] sm:$0xff] %v13615_v0  ;;  %8496 = vmatpush.msk.msrb.mxu3 %vm4894_vm13, %v15077_v24  ;;  %8658 = vmatpush.msk.msra.mxu2 %vm5519_vm14, %v15077_v24  ;;  %vm5511_vm13 = vcmp.eq.s32.totalorder %v15406_v32, %v13579_v54 }
 0x2d1   : > { %15442 = vst [vmem:[#allocation230_spill] sm:$0xff] %v13617_v33  ;;  %5400 = vmatmul.f32.vlgmr.msrb.gmra.mxu3 %v12816_v35  ;;  %8448 = vmatpush.msk.msrb.mxu0 %vm4798_vm15, %v15077_v24  ;;  %v15444_v35 = vld [vmem:[#allocation22_spill] sm:$0xff]  ;;  %vm5449_vm15 = vcmp.eq.s32.totalorder %v14979_v14, %v13579_v54 }
 0x2d2   : > { %8464 = vmatpush.msk.msrb.mxu1 %vm4830_vm0, %v15077_v24  ;;  %8659 = vmatpush.msk.msra.mxu2 %vm5517_vm1, %v15077_v24  ;;  %v13633_v47 = vpop.f32.mrf.mxu3  ;;  %vm5545_vm14 = vcmp.eq.s32.totalorder %v15444_v35, %v13579_v54  ;;  %vm5481_vm0 = vcmp.eq.s32.totalorder %v9283_v20, %v13579_v54  ;;  %vm5509_vm1 = vcmp.eq.s32.totalorder %v14980_v16, %v13579_v54 }
 0x2d3   : > { %15443 = vst [vmem:[#allocation231_spill] sm:$0xff] %v13633_v47  ;;  %8674 = vmatpush.msk.msra.mxu3 %vm5551_vm2, %v15077_v24  ;;  %5313 = vmatmul.f32.vlgmr.msrb.gmra.mxu0 %v12834_v40  ;;  %vm5543_vm2 = vcmp.eq.s32.totalorder %v9303_v23, %v13579_v54  ;;  %v15452_v47 = vld [vmem:[#allocation32_spill] sm:$0xff] }
 0x2d4   : > { %5342 = vmatmul.f32.vlgmr.msrb.gmra.mxu1 %v12844_v36  ;;  %8626 = vmatpush.msk.msra.mxu0 %vm5455_vm3, %v15077_v24  ;;  %vm5447_vm3 = vcmp.eq.s32.totalorder %v15021_v49, %v13579_v54 }
 0x2d5   : > { %8642 = vmatpush.msk.msra.mxu1 %vm5487_vm4, %v15077_v24  ;;  %8660 = vmatpush.msk.msra.mxu2 %vm5515_vm5, %v15077_v24  ;;  %vm5479_vm4 = vcmp.eq.s32.totalorder %v9328_v25, %v13579_v54  ;;  %vm5507_vm5 = vcmp.eq.s32.totalorder %v15373_v19, %v13579_v54 }
 0x2d6   : > { %8675 = vmatpush.msk.msra.mxu3 %vm5549_vm6, %v15077_v24  ;;  %8627 = vmatpush.msk.msra.mxu0 %vm5453_vm7, %v15077_v24  ;;  %vm5541_vm6 = vcmp.eq.s32.totalorder %v9337_v26, %v13579_v54  ;;  %vm5445_vm7 = vcmp.eq.s32.totalorder %v14981_v15, %v13579_v54 }
 0x2d7   : > { %8643 = vmatpush.msk.msra.mxu1 %vm5485_vm8, %v15077_v24  ;;  %8661 = vmatpush.msk.msra.mxu2 %vm5513_vm9, %v15077_v24  ;;  %vm5477_vm8 = vcmp.eq.s32.totalorder %v9352_v28, %v13579_v54 }
 0x2d8   : > { %8676 = vmatpush.msk.msra.mxu3 %vm5547_vm10, %v15077_v24  ;;  %5374 = vmatmul.f32.gmra.mxu2 %v12872_v29  ;;  %v13667_v43 = vpop.f32.mrf.mxu0  ;;  %vm5539_vm10 = vcmp.eq.s32.totalorder %v15164_v18, %v13579_v54 }
 0x2d9   : > { %15445 = vst [vmem:[#allocation22_spill] sm:$0xff] %v13667_v43  ;;  %8628 = vmatpush.msk.msra.mxu0 %vm5451_vm11, %v15077_v24  ;;  %8644 = vmatpush.msk.msra.mxu1 %vm5483_vm12, %v15077_v24  ;;  %v13675_v40 = vpop.f32.mrf.mxu1  ;;  %v13677_v36 = vpop.f32.mrf.mxu2  ;;  %vm5475_vm12 = vcmp.eq.s32.totalorder %v15375_v1, %v13579_v54  ;;  %v15465_v43 = vld [vmem:[#allocation48_spill] sm:$0xff] }
 0x2da   : > { %15446 = vst [vmem:[#allocation232_spill] sm:$0xff] %v13675_v40  ;;  %8662 = vmatpush.msk.msra.mxu2 %vm5511_vm13, %v15077_v24  ;;  %8677 = vmatpush.msk.msra.mxu3 %vm5545_vm14, %v15077_v24  ;;  %vm5537_vm14 = vcmp.eq.s32.totalorder %v15452_v47, %v13579_v54  ;;  %v15464_v40 = vld [vmem:[#allocation198_spill] sm:$0xff] }
 0x2db   : > { %15447 = vst [vmem:[#allocation233_spill] sm:$0xff] %v13677_v36  ;;  %5403 = vmatmul.f32.gmra.mxu3 %v12896_v48  ;;  %8629 = vmatpush.msk.msra.mxu0 %vm5449_vm15, %v15077_v24  ;;  %v15449_v48 = vld [vmem:[#allocation31_spill] sm:$0xff]  ;;  %vm5441_vm15 = vcmp.eq.s32.totalorder %v15168_v56, %v13579_v54  ;;  %v15459_v36 = vld [vmem:[#allocation46_spill] sm:$0xff] }
 0x2dc   : > { %8645 = vmatpush.msk.msra.mxu1 %vm5481_vm0, %v15077_v24  ;;  %8663 = vmatpush.msk.msra.mxu2 %vm5509_vm1, %v15077_v24  ;;  %v13693_v29 = vpop.f32.mrf.mxu3  ;;  %vm5505_vm9 = vcmp.eq.s32.totalorder %v15449_v48, %v13579_v54  ;;  %vm5473_vm0 = vcmp.eq.s32.totalorder %v15170_v21, %v13579_v54  ;;  %vm5501_vm1 = vcmp.eq.s32.totalorder %v15171_v51, %v13579_v54 }
 0x2dd   : > { %15448 = vst [vmem:[#allocation234_spill] sm:$0xff] %v13693_v29  ;;  %8678 = vmatpush.msk.msra.mxu3 %vm5543_vm2, %v15077_v24  ;;  %5316 = vmatmul.f32.gmra.mxu0 %v12914_v57  ;;  %v15451_v57 = vld [vmem:[#allocation35_spill] sm:$0xff]  ;;  %vm5535_vm2 = vcmp.eq.s32.totalorder %v15134_v9, %v13579_v54 }
 0x2de   : > { %5345 = vmatmul.f32.gmra.mxu1 %v12924_v37  ;;  %8630 = vmatpush.msk.msra.mxu0 %vm5447_vm3, %v15077_v24  ;;  %v15450_v37 = vld [vmem:[#allocation29_spill] sm:$0xff]  ;;  %vm5503_vm13 = vcmp.eq.s32.totalorder %v15451_v57, %v13579_v54  ;;  %vm5439_vm3 = vcmp.eq.s32.totalorder %v15312_v27, %v13579_v54 }
 0x2df   : > { %8646 = vmatpush.msk.msra.mxu1 %vm5479_vm4, %v15077_v24  ;;  %8664 = vmatpush.msk.msra.mxu2 %vm5507_vm5, %v15077_v24  ;;  %vm5443_vm11 = vcmp.eq.s32.totalorder %v15450_v37, %v13579_v54  ;;  %vm5471_vm4 = vcmp.eq.s32.totalorder %v15313_v10, %v13579_v54 }
 0x2e0   : > { %8679 = vmatpush.msk.msra.mxu3 %vm5541_vm6, %v15077_v24  ;;  %8631 = vmatpush.msk.msra.mxu0 %vm5445_vm7, %v15077_v24  ;;  %vm5533_vm6 = vcmp.eq.s32.totalorder %v9472_v42, %v13579_v54  ;;  %vm5437_vm7 = vcmp.eq.s32.totalorder %v15100_v34, %v13579_v54 }
 0x2e1   : > { %8647 = vmatpush.msk.msra.mxu1 %vm5477_vm8, %v15077_v24  ;;  %8665 = vmatpush.msk.msra.mxu2 %vm5505_vm9, %v15077_v24  ;;  %vm5469_vm8 = vcmp.eq.s32.totalorder %v15421_v61, %v13579_v54  ;;  %vm5497_vm9 = vcmp.eq.s32.totalorder %v15459_v36, %v13579_v54 }
 0x2e2   : > { %8680 = vmatpush.msk.msra.mxu3 %vm5539_vm10, %v15077_v24  ;;  %5377 = vmatmul.f32.gmra.mxu2 %v12952_v2  ;;  %v13727_v33 = vpop.f32.mrf.mxu0  ;;  %v15456_v2 = vld [vmem:[#allocation42_spill] sm:$0xff] }
 0x2e3   : > { %15453 = vst [vmem:[#allocation31_spill] sm:$0xff] %v13727_v33  ;;  %8632 = vmatpush.msk.msra.mxu0 %vm5443_vm11, %v15077_v24  ;;  %8648 = vmatpush.msk.msra.mxu1 %vm5475_vm12, %v15077_v24  ;;  %v13735_v0 = vpop.f32.mrf.mxu1  ;;  %v13737_v50 = vpop.f32.mrf.mxu2  ;;  %vm5499_vm5 = vcmp.eq.s32.totalorder %v15456_v2, %v13579_v54  ;;  %vm5467_vm12 = vcmp.eq.s32.totalorder %v15424_v46, %v13579_v54  ;;  %v15467_v33 = vld [vmem:[#allocation49_spill] sm:$0xff] }
 0x2e4   : > { %15454 = vst [vmem:[#allocation29_spill] sm:$0xff] %v13735_v0  ;;  %8666 = vmatpush.msk.msra.mxu2 %vm5503_vm13, %v15077_v24  ;;  %8681 = vmatpush.msk.msra.mxu3 %vm5537_vm14, %v15077_v24 }
 0x2e5   : > { %15455 = vst [vmem:[#allocation35_spill] sm:$0xff] %v13737_v50  ;;  %5406 = vmatmul.f32.gmra.mxu3 %v12976_v53  ;;  %8633 = vmatpush.msk.msra.mxu0 %vm5441_vm15, %v15077_v24  ;;  %v15458_v53 = vld [vmem:[#allocation197_spill] sm:$0xff]  ;;  %v15463_v50 = vld [vmem:[#allocation47_spill] sm:$0xff]  ;;  %vm5433_vm15 = vcmp.eq.s32.totalorder %v15465_v43, %v13579_v54 }
 0x2e6   : > { %8649 = vmatpush.msk.msra.mxu1 %vm5473_vm0, %v15077_v24  ;;  %8667 = vmatpush.msk.msra.mxu2 %vm5501_vm1, %v15077_v24  ;;  %v13753_v29 = vpop.f32.mrf.mxu3  ;;  %vm5529_vm14 = vcmp.eq.s32.totalorder %v15463_v50, %v13579_v54  ;;  %vm5465_vm0 = vcmp.eq.s32.totalorder %v15467_v33, %v13579_v54  ;;  %vm5493_vm1 = vcmp.eq.s32.totalorder %v15013_v31, %v13579_v54 }
 0x2e7   : > { %15457 = vst [vmem:[#allocation32_spill] sm:$0xff] %v13753_v29  ;;  %8682 = vmatpush.msk.msra.mxu3 %vm5535_vm2, %v15077_v24  ;;  %5319 = vmatmul.f32.gmra.mxu0 %v12994_v45  ;;  %v15460_v45 = vld [vmem:[#allocation43_spill] sm:$0xff]  ;;  %v15462_v29 = vld [vmem:[#allocation50_spill] sm:$0xff]  ;;  %vm5527_vm2 = vcmp.eq.s32.totalorder %v15430_v41, %v13579_v54 }
 0x2e8   : > { %5348 = vmatmul.f32.gmra.mxu1 %v15458_v53  ;;  %8634 = vmatpush.msk.msra.mxu0 %vm5439_vm3, %v15077_v24  ;;  %vm5531_vm10 = vcmp.eq.s32.totalorder %v15460_v45, %v13579_v54  ;;  %v15461_v53 = vld [vmem:[#allocation44_spill] sm:$0xff]  ;;  %vm5495_vm13 = vcmp.eq.s32.totalorder %v15462_v29, %v13579_v54 }
 0x2e9   : > { %8650 = vmatpush.msk.msra.mxu1 %vm5471_vm4, %v15077_v24  ;;  %8668 = vmatpush.msk.msra.mxu2 %vm5499_vm5, %v15077_v24  ;;  %vm5435_vm11 = vcmp.eq.s32.totalorder %v15461_v53, %v13579_v54  ;;  %vm5463_vm4 = vcmp.eq.s32.totalorder %v15393_v55, %v13579_v54 }
 0x2ea   : > { %8683 = vmatpush.msk.msra.mxu3 %vm5533_vm6, %v15077_v24  ;;  %8635 = vmatpush.msk.msra.mxu0 %vm5437_vm7, %v15077_v24  ;;  %vm5525_vm6 = vcmp.eq.s32.totalorder %v15016_v39, %v13579_v54  ;;  %vm5429_vm7 = vcmp.eq.s32.totalorder %v9619_v59, %v13579_v54 }
 0x2eb   : > { %8651 = vmatpush.msk.msra.mxu1 %vm5469_vm8, %v15077_v24  ;;  %8669 = vmatpush.msk.msra.mxu2 %vm5497_vm9, %v15077_v24 }
 0x2ec   : > { %8684 = vmatpush.msk.msra.mxu3 %vm5531_vm10, %v15077_v24  ;;  %5380 = vmatmul.f32.gmra.mxu2 %v15464_v40  ;;  %v13787_v0 = vpop.f32.mrf.mxu0  ;;  %v15470_v40 = vld [vmem:[#allocation52_spill] sm:$0xff]  ;;  %vm5523_vm10 = vcmp.eq.s32.totalorder %v15359_v17, %v13579_v54  ;;  %v13850_v17 = vld [vmem:[%s14677_s0 + $0x10] sm:$0xff] }
 0x2ed   : > { %15466 = vst [vmem:[#allocation42_spill] sm:$0xff] %v13787_v0  ;;  %8636 = vmatpush.msk.msra.mxu0 %vm5435_vm11, %v15077_v24  ;;  %8652 = vmatpush.msk.msra.mxu1 %vm5467_vm12, %v15077_v24  ;;  %v13795_v50 = vpop.f32.mrf.mxu1  ;;  %v13797_v29 = vpop.f32.mrf.mxu2  ;;  %vm5431_vm3 = vcmp.eq.s32.totalorder %v15470_v40, %v13579_v54  ;;  %v15473_v0 = vld [vmem:[#allocation205_spill] sm:$0xff]  ;;  %vm5459_vm12 = vcmp.eq.s32.totalorder %v15360_v38, %v13579_v54 }
 0x2ee   : > { %15468 = vst [vmem:[#allocation197_spill] sm:$0xff] %v13795_v50  ;;  %8670 = vmatpush.msk.msra.mxu2 %vm5495_vm13, %v15077_v24  ;;  %8685 = vmatpush.msk.msra.mxu3 %vm5529_vm14, %v15077_v24 }
 0x2ef   : > { %15469 = vst [vmem:[#allocation46_spill] sm:$0xff] %v13797_v29  ;;  %5409 = vmatmul.f32.gmra.mxu3 %v15431_v63  ;;  %8637 = vmatpush.msk.msra.mxu0 %vm5433_vm15, %v15077_v24  ;;  %v15471_v29 = vld [vmem:[#allocation57_spill] sm:$0xff]  ;;  %v13822_v63 = vperm.slane %v13558_v44, 1  ;;  %v15476_v44 = vld [vmem:[#allocation59_spill] sm:$0xff]  ;;  %vm5425_vm15 = vcmp.eq.s32.totalorder %v14976_v62, %v13579_v54 }
 0x2f0   : > { %8653 = vmatpush.msk.msra.mxu1 %vm5465_vm0, %v15077_v24  ;;  %8671 = vmatpush.msk.msra.mxu2 %vm5493_vm1, %v15077_v24  ;;  %vm5491_vm5 = vcmp.eq.s32.totalorder %v15471_v29, %v13579_v54  ;;  %v13813_v50 = vpop.f32.mrf.mxu3  ;;  %v15474_v29 = vld [vmem:[#allocation56_spill] sm:$0xff]  ;;  %vm5427_vm11 = vcmp.eq.s32.totalorder %v15476_v44, %v13579_v54  ;;  %vm5457_vm0 = vcmp.eq.s32.totalorder %v9706_v60, %v13579_v54 }
 0x2f1   : > { %15472 = vst [vmem:[#allocation43_spill] sm:$0xff] %v13813_v50  ;;  %8686 = vmatpush.msk.msra.mxu3 %vm5527_vm2, %v15077_v24  ;;  %5322 = vmatmul.f32.gmra.mxu0 %v13077_v30  ;;  %vm5461_vm8 = vcmp.eq.s32.totalorder %v15474_v29, %v13579_v54  ;;  %v15475_v50 = vld [vmem:[#allocation61_spill] sm:$0xff]  ;;  %v15477_v30 = vld [vmem:[#allocation62_spill] sm:$0xff]  ;;  %vm5518_vm1 = vcmp.eq.s32.totalorder %v9232_v3, %v13822_v63 }
 0x2f2   : > { %5351 = vmatmul.f32.gmra.mxu1 %v15473_v0  ;;  %8638 = vmatpush.msk.msra.mxu0 %vm5431_vm3, %v15077_v24  ;;  %vm5489_vm9 = vcmp.eq.s32.totalorder %v15475_v50, %v13579_v54  ;;  %vm5521_vm13 = vcmp.eq.s32.totalorder %v15477_v30, %v13579_v54  ;;  %v15478_v0 = vld [vmem:[#allocation16_spill] sm:$0xff]  ;;  %vm5552_vm2 = vcmp.eq.s32.totalorder %v9235_v4, %v13822_v63  ;;  %v13892_v4 = vld [vmem:[%s14677_s0] sm:$0xff] }
 0x2f3   : > { %8654 = vmatpush.msk.msra.mxu1 %vm5463_vm4, %v15077_v24  ;;  %8672 = vmatpush.msk.msra.mxu2 %vm5491_vm5, %v15077_v24  ;;  %vm5520_vm14 = vcmp.eq.s32.totalorder %v15478_v0, %v13822_v63  ;;  %vm5456_vm3 = vcmp.eq.s32.totalorder %v9238_v5, %v13822_v63  ;;  %vm5488_vm4 = vcmp.eq.s32.totalorder %v9241_v6, %v13822_v63  ;;  %v13902_v5 = vld [vmem:[%s14677_s0 + $0x8] sm:$0xff]  ;;  %v13930_v6 = vld [vmem:[%s14677_s0 + $0x30] sm:$0xff] }
 0x2f4   : > { %8687 = vmatpush.msk.msra.mxu3 %vm5525_vm6, %v15077_v24  ;;  %8639 = vmatpush.msk.msra.mxu0 %vm5429_vm7, %v15077_v24  ;;  %vm5516_vm5 = vcmp.eq.s32.totalorder %v9244_v7, %v13822_v63  ;;  %vm5550_vm6 = vcmp.eq.s32.totalorder %v9247_v8, %v13822_v63  ;;  %vm5454_vm7 = vcmp.eq.s32.totalorder %v14977_v58, %v13822_v63  ;;  %v8911_v54 = vld [vmem:[%s14677_s0 + $0x68] sm:$0xff] }
 0x2f5   : > { %8655 = vmatpush.msk.msra.mxu1 %vm5461_vm8, %v15077_v24  ;;  %8673 = vmatpush.msk.msra.mxu2 %vm5489_vm9, %v15077_v24  ;;  %vm5486_vm8 = vcmp.eq.s32.totalorder %v9256_v11, %v13822_v63  ;;  %vm5514_vm9 = vcmp.eq.s32.totalorder %v9259_v12, %v13822_v63  ;;  %v13954_v12 = vld [vmem:[%s14677_s0 + $0x38] sm:$0xff] }
 0x2f6   : > { %8688 = vmatpush.msk.msra.mxu3 %vm5523_vm10, %v15077_v24  ;;  %5883 = vmatmul.f32.vlgmr.msra.gmra.mxu2 %v13850_v17  ;;  %v13855_v38 = vpop.f32.mrf.mxu0  ;;  %vm5548_vm10 = vcmp.eq.s32.totalorder %v14998_v52, %v13822_v63 }
 0x2f7   : > { %15479 = vst [vmem:[#allocation44_spill] sm:$0xff] %v13855_v38  ;;  %8640 = vmatpush.msk.msra.mxu0 %vm5427_vm11, %v15077_v24  ;;  %8656 = vmatpush.msk.msra.mxu1 %vm5459_vm12, %v15077_v24  ;;  %v13863_v0 = vpop.f32.mrf.mxu1  ;;  %v13865_v30 = vpop.f32.mrf.mxu2  ;;  %v13874_v38 = vld [vmem:[%s14677_s0 + $0x18] sm:$0xff]  ;;  %vm5452_vm11 = vcmp.eq.s32.totalorder %v14978_v13, %v13822_v63  ;;  %vm5484_vm12 = vcmp.eq.s32.totalorder %v15367_v22, %v13822_v63  ;;  %v14062_v13 = vld [vmem:[%s14677_s0 + $0x48] sm:$0xff] }
 0x2f8   : > { %8689 = vmatpush.msk.msra.mxu3 %vm5521_vm13, %v15077_v24  ;;  %8722 = vmatpush.msk.msrb.mxu2 %vm5520_vm14, %v15077_v24  ;;  %vm5512_vm13 = vcmp.eq.s32.totalorder %v15406_v32, %v13822_v63  ;;  %vm5546_vm14 = vcmp.eq.s32.totalorder %v15444_v35, %v13822_v63 }
 0x2f9   : > { %5912 = vmatmul.f32.vlgmr.msra.gmra.mxu3 %v13874_v38  ;;  %8641 = vmatpush.msk.msra.mxu0 %vm5425_vm15, %v15077_v24  ;;  %vm5450_vm15 = vcmp.eq.s32.totalorder %v14979_v14, %v13822_v63 }
 0x2fa   : > { %8657 = vmatpush.msk.msra.mxu1 %vm5457_vm0, %v15077_v24  ;;  %8723 = vmatpush.msk.msrb.mxu2 %vm5518_vm1, %v15077_v24  ;;  %v13886_v3 = vpop.f32.mrf.mxu3  ;;  %vm5482_vm0 = vcmp.eq.s32.totalorder %v9283_v20, %v13822_v63  ;;  %vm5510_vm1 = vcmp.eq.s32.totalorder %v14980_v16, %v13822_v63  ;;  %v13972_v16 = vld [vmem:[%s14677_s0 + $0x20] sm:$0xff]  ;;  %v13982_v20 = vld [vmem:[%s14677_s0 + $0x28] sm:$0xff] }
 0x2fb   : > { %8738 = vmatpush.msk.msrb.mxu3 %vm5552_vm2, %v15077_v24  ;;  %5825 = vmatmul.f32.vlgmr.msra.gmra.mxu0 %v13892_v4  ;;  %vm5544_vm2 = vcmp.eq.s32.totalorder %v9303_v23, %v13822_v63 }
 0x2fc   : > { %5854 = vmatmul.f32.vlgmr.msra.gmra.mxu1 %v13902_v5  ;;  %8690 = vmatpush.msk.msrb.mxu0 %vm5456_vm3, %v15077_v24  ;;  %vm5448_vm3 = vcmp.eq.s32.totalorder %v15021_v49, %v13822_v63 }
 0x2fd   : > { %8706 = vmatpush.msk.msrb.mxu1 %vm5488_vm4, %v15077_v24  ;;  %8724 = vmatpush.msk.msrb.mxu2 %vm5516_vm5, %v15077_v24  ;;  %vm5480_vm4 = vcmp.eq.s32.totalorder %v9328_v25, %v13822_v63  ;;  %vm5508_vm5 = vcmp.eq.s32.totalorder %v15373_v19, %v13822_v63  ;;  %v8910_v19 = vld [vmem:[%s14677_s0 + $0x60] sm:$0xff] }
 0x2fe   : > { %8739 = vmatpush.msk.msrb.mxu3 %vm5550_vm6, %v15077_v24  ;;  %8691 = vmatpush.msk.msrb.mxu0 %vm5454_vm7, %v15077_v24  ;;  %vm5542_vm6 = vcmp.eq.s32.totalorder %v9337_v26, %v13822_v63  ;;  %vm5446_vm7 = vcmp.eq.s32.totalorder %v14981_v15, %v13822_v63  ;;  %v14010_v15 = vld [vmem:[%s14677_s0 + $0x50] sm:$0xff] }
 0x2ff   : > { %8707 = vmatpush.msk.msrb.mxu1 %vm5486_vm8, %v15077_v24  ;;  %8725 = vmatpush.msk.msrb.mxu2 %vm5514_vm9, %v15077_v24  ;;  %vm5478_vm8 = vcmp.eq.s32.totalorder %v9352_v28, %v13822_v63  ;;  %vm5506_vm9 = vcmp.eq.s32.totalorder %v15449_v48, %v13822_v63  ;;  %v14034_v28 = vld [vmem:[%s14677_s0 + $0x58] sm:$0xff] }
 0x300   : > { %8740 = vmatpush.msk.msrb.mxu3 %vm5548_vm10, %v15077_v24  ;;  %5886 = vmatmul.f32.gmra.mxu2 %v13930_v6  ;;  %v13935_v7 = vpop.f32.mrf.mxu0  ;;  %vm5540_vm10 = vcmp.eq.s32.totalorder %v15164_v18, %v13822_v63 }
 0x301   : > { %15480 = vst [vmem:[#allocation198_spill] sm:$0xff] %v13935_v7  ;;  %8692 = vmatpush.msk.msrb.mxu0 %vm5452_vm11, %v15077_v24  ;;  %8708 = vmatpush.msk.msrb.mxu1 %vm5484_vm12, %v15077_v24  ;;  %v13943_v8 = vpop.f32.mrf.mxu1  ;;  %v13945_v11 = vpop.f32.mrf.mxu2  ;;  %vm5444_vm11 = vcmp.eq.s32.totalorder %v15450_v37, %v13822_v63  ;;  %vm5476_vm12 = vcmp.eq.s32.totalorder %v15375_v1, %v13822_v63 }
 0x302   : > { %15481 = vst [vmem:[#allocation48_spill] sm:$0xff] %v13943_v8  ;;  %8726 = vmatpush.msk.msrb.mxu2 %vm5512_vm13, %v15077_v24  ;;  %8741 = vmatpush.msk.msrb.mxu3 %vm5546_vm14, %v15077_v24  ;;  %vm5504_vm13 = vcmp.eq.s32.totalorder %v15451_v57, %v13822_v63  ;;  %vm5538_vm14 = vcmp.eq.s32.totalorder %v15452_v47, %v13822_v63  ;;  %v15613_v8 = vld [vmem:[#allocation179_spill] sm:$0xff] }
 0x303   : > { %15482 = vst [vmem:[#allocation49_spill] sm:$0xff] %v13945_v11  ;;  %5915 = vmatmul.f32.gmra.mxu3 %v13954_v12  ;;  %8693 = vmatpush.msk.msrb.mxu0 %vm5450_vm15, %v15077_v24  ;;  %vm5442_vm15 = vcmp.eq.s32.totalorder %v15168_v56, %v13822_v63  ;;  %v14052_v56 = vld [vmem:[%s14677_s0 + $0x40] sm:$0xff] }
 0x304   : > { %8709 = vmatpush.msk.msrb.mxu1 %vm5482_vm0, %v15077_v24  ;;  %8727 = vmatpush.msk.msrb.mxu2 %vm5510_vm1, %v15077_v24  ;;  %v13966_v14 = vpop.f32.mrf.mxu3  ;;  %vm5474_vm0 = vcmp.eq.s32.totalorder %v15170_v21, %v13822_v63  ;;  %vm5502_vm1 = vcmp.eq.s32.totalorder %v15171_v51, %v13822_v63 }
 0x305   : > { %15483 = vst [vmem:[#allocation52_spill] sm:$0xff] %v13966_v14  ;;  %8742 = vmatpush.msk.msrb.mxu3 %vm5544_vm2, %v15077_v24  ;;  %5828 = vmatmul.f32.gmra.mxu0 %v13972_v16  ;;  %vm5536_vm2 = vcmp.eq.s32.totalorder %v15134_v9, %v13822_v63  ;;  %v14108_v9 = vld [vmem:[%s14677_s0 + $0x78] sm:$0xff] }
 0x306   : > { %5857 = vmatmul.f32.gmra.mxu1 %v13982_v20  ;;  %8694 = vmatpush.msk.msrb.mxu0 %vm5448_vm3, %v15077_v24  ;;  %vm5440_vm3 = vcmp.eq.s32.totalorder %v15312_v27, %v13822_v63  ;;  %v15572_v14 = vld [vmem:[#allocation18_spill] sm:$0xff] }
 0x307   : > { %8710 = vmatpush.msk.msrb.mxu1 %vm5480_vm4, %v15077_v24  ;;  %8728 = vmatpush.msk.msrb.mxu2 %vm5508_vm5, %v15077_v24  ;;  %vm5472_vm4 = vcmp.eq.s32.totalorder %v15313_v10, %v13822_v63  ;;  %vm5500_vm5 = vcmp.eq.s32.totalorder %v15456_v2, %v13822_v63 }
 0x308   : > { %8743 = vmatpush.msk.msrb.mxu3 %vm5542_vm6, %v15077_v24  ;;  %8695 = vmatpush.msk.msrb.mxu0 %vm5446_vm7, %v15077_v24  ;;  %vm5534_vm6 = vcmp.eq.s32.totalorder %v9472_v42, %v13822_v63  ;;  %vm5438_vm7 = vcmp.eq.s32.totalorder %v15100_v34, %v13822_v63  ;;  %v15486_v34 = vld [vmem:[#allocation50_spill] sm:$0xff]  ;;  %v15487_v42 = vld [vmem:[#allocation47_spill] sm:$0xff] }
 0x309   : > { %8711 = vmatpush.msk.msrb.mxu1 %vm5478_vm8, %v15077_v24  ;;  %8729 = vmatpush.msk.msrb.mxu2 %vm5506_vm9, %v15077_v24  ;;  %vm5470_vm8 = vcmp.eq.s32.totalorder %v15421_v61, %v13822_v63  ;;  %vm5498_vm9 = vcmp.eq.s32.totalorder %v15459_v36, %v13822_v63  ;;  %v14090_v61 = vld [vmem:[%s14677_s0 + $0x70] sm:$0xff] }
 0x30a   : > { %8744 = vmatpush.msk.msrb.mxu3 %vm5540_vm10, %v15077_v24  ;;  %5889 = vmatmul.f32.gmra.mxu2 %v14010_v15  ;;  %v14015_v23 = vpop.f32.mrf.mxu0  ;;  %vm5532_vm10 = vcmp.eq.s32.totalorder %v15460_v45, %v13822_v63 }
 0x30b   : > { %8696 = vmatpush.msk.msrb.mxu0 %vm5444_vm11, %v15077_v24  ;;  %8712 = vmatpush.msk.msrb.mxu1 %vm5476_vm12, %v15077_v24  ;;  %v14023_v25 = vpop.f32.mrf.mxu1  ;;  %v14025_v26 = vpop.f32.mrf.mxu2  ;;  %vm5436_vm11 = vcmp.eq.s32.totalorder %v15461_v53, %v13822_v63  ;;  %vm5468_vm12 = vcmp.eq.s32.totalorder %v15424_v46, %v13822_v63 }
 0x30c   : > { %15484 = vst [vmem:[#allocation205_spill] sm:$0xff] %v14025_v26  ;;  %8730 = vmatpush.msk.msrb.mxu2 %vm5504_vm13, %v15077_v24  ;;  %8745 = vmatpush.msk.msrb.mxu3 %vm5538_vm14, %v15077_v24  ;;  %vm5496_vm13 = vcmp.eq.s32.totalorder %v15486_v34, %v13822_v63  ;;  %vm5530_vm14 = vcmp.eq.s32.totalorder %v15487_v42, %v13822_v63  ;;  %v15493_v34 = vld [vmem:[#allocation76_spill] sm:$0xff]  ;;  %v15494_v42 = vld [vmem:[#allocation110_spill] sm:$0xff]  ;;  %v15585_v26 = vld [vmem:[#allocation135_spill] sm:$0xff] }
 0x30d   : > { %5918 = vmatmul.f32.gmra.mxu3 %v14034_v28  ;;  %8697 = vmatpush.msk.msrb.mxu0 %vm5442_vm15, %v15077_v24  ;;  %vm5434_vm15 = vcmp.eq.s32.totalorder %v15465_v43, %v13822_v63 }
 0x30e   : > { %8713 = vmatpush.msk.msrb.mxu1 %vm5474_vm0, %v15077_v24  ;;  %8731 = vmatpush.msk.msrb.mxu2 %vm5502_vm1, %v15077_v24  ;;  %v14046_v21 = vpop.f32.mrf.mxu3  ;;  %vm5466_vm0 = vcmp.eq.s32.totalorder %v15467_v33, %v13822_v63  ;;  %vm5494_vm1 = vcmp.eq.s32.totalorder %v15013_v31, %v13822_v63  ;;  %v15488_v31 = vld [vmem:[#allocation57_spill] sm:$0xff] }
 0x30f   : > { %15485 = vst [vmem:[#allocation56_spill] sm:$0xff] %v14046_v21  ;;  %8746 = vmatpush.msk.msrb.mxu3 %vm5536_vm2, %v15077_v24  ;;  %5831 = vmatmul.f32.gmra.mxu0 %v14052_v56  ;;  %vm5528_vm2 = vcmp.eq.s32.totalorder %v15430_v41, %v13822_v63  ;;  %v15573_v21 = vld [vmem:[#allocation120_spill] sm:$0xff] }
 0x310   : > { %5860 = vmatmul.f32.gmra.mxu1 %v14062_v13  ;;  %8698 = vmatpush.msk.msrb.mxu0 %vm5440_vm3, %v15077_v24  ;;  %vm5432_vm3 = vcmp.eq.s32.totalorder %v15470_v40, %v13822_v63 }
 0x311   : > { %8714 = vmatpush.msk.msrb.mxu1 %vm5472_vm4, %v15077_v24  ;;  %8732 = vmatpush.msk.msrb.mxu2 %vm5500_vm5, %v15077_v24  ;;  %vm5464_vm4 = vcmp.eq.s32.totalorder %v15393_v55, %v13822_v63  ;;  %vm5492_vm5 = vcmp.eq.s32.totalorder %v15488_v31, %v13822_v63  ;;  %v15497_v31 = vld [vmem:[#allocation136_spill] sm:$0xff] }
 0x312   : > { %8747 = vmatpush.msk.msrb.mxu3 %vm5534_vm6, %v15077_v24  ;;  %8699 = vmatpush.msk.msrb.mxu0 %vm5438_vm7, %v15077_v24  ;;  %vm5526_vm6 = vcmp.eq.s32.totalorder %v15016_v39, %v13822_v63  ;;  %vm5430_vm7 = vcmp.eq.s32.totalorder %v9619_v59, %v13822_v63  ;;  %v15489_v39 = vld [vmem:[#allocation58_spill] sm:$0xff]  ;;  %v15490_v59 = vld [vmem:[#allocation60_spill] sm:$0xff] }
 0x313   : > { %8715 = vmatpush.msk.msrb.mxu1 %vm5470_vm8, %v15077_v24  ;;  %8733 = vmatpush.msk.msrb.mxu2 %vm5498_vm9, %v15077_v24  ;;  %vm5462_vm8 = vcmp.eq.s32.totalorder %v15474_v29, %v13822_v63  ;;  %vm5490_vm9 = vcmp.eq.s32.totalorder %v15475_v50, %v13822_v63  ;;  %v15491_v50 = vld [vmem:[#allocation62_spill] sm:$0xff] }
 0x314   : > { %8748 = vmatpush.msk.msrb.mxu3 %vm5532_vm10, %v15077_v24  ;;  %5892 = vmatmul.f32.gmra.mxu2 %v14090_v61  ;;  %v4692_v58 = vpop.f32.mrf.mxu0  ;;  %vm5524_vm10 = vcmp.eq.s32.totalorder %v15489_v39, %v13822_v63 }
 0x315   : > { %8700 = vmatpush.msk.msrb.mxu0 %vm5436_vm11, %v15077_v24  ;;  %8716 = vmatpush.msk.msrb.mxu1 %vm5468_vm12, %v15077_v24  ;;  %v4721_v52 = vpop.f32.mrf.mxu1  ;;  %v4750_v49 = vpop.f32.mrf.mxu2  ;;  %vm5428_vm11 = vcmp.eq.s32.totalorder %v15476_v44, %v13822_v63  ;;  %vm5460_vm12 = vcmp.eq.s32.totalorder %v15490_v59, %v13822_v63  ;;  %v15501_v59 = vld [vmem:[#allocation169_spill] sm:$0xff] }
 0x316   : > { %8734 = vmatpush.msk.msrb.mxu2 %vm5496_vm13, %v15077_v24  ;;  %8749 = vmatpush.msk.msrb.mxu3 %vm5530_vm14, %v15077_v24  ;;  %v4722_v1 = vadd.f32 %v4721_v52, %v4692_v58  ;;  %vm5522_vm13 = vcmp.eq.s32.totalorder %v15491_v50, %v13822_v63  ;;  %vm5426_vm14 = vcmp.eq.s32.totalorder %v14976_v62, %v13822_v63  ;;  %v15502_v50 = vld [vmem:[#allocation170_spill] sm:$0xff] }
 0x317   : > { %5921 = vmatmul.f32.gmra.mxu3 %v14108_v9  ;;  %8701 = vmatpush.msk.msrb.mxu0 %vm5434_vm15, %v15077_v24  ;;  %vm5458_vm15 = vcmp.eq.s32.totalorder %v9706_v60, %v13822_v63 }
 0x318   : > { %8717 = vmatpush.msk.msrb.mxu1 %vm5466_vm0, %v15077_v24  ;;  %8735 = vmatpush.msk.msrb.mxu2 %vm5494_vm1, %v15077_v24  ;;  %v4751_v51 = vadd.f32 %v4750_v49, %v4722_v1  ;;  %v4779_v18 = vpop.f32.mrf.mxu3  ;;  %v15495_v49 = vld [vmem:[#allocation80_spill] sm:$0xff]  ;;  %v15496_v1 = vld [vmem:[#allocation81_spill] sm:$0xff]  ;;  %vm6069_vm0 = vcmask 261120  }
 0x319   : > { %8750 = vmatpush.msk.msrb.mxu3 %vm5528_vm2, %v15077_v24  ;;  %5834 = vmatmul.f32.gmra.mxu0 %v8910_v19 }
 0x31a   : > { %5863 = vmatmul.f32.gmra.mxu1 %v8911_v54  ;;  %8702 = vmatpush.msk.msrb.mxu0 %vm5432_vm3, %v15077_v24  ;;  %v14136_v10 = vadd.f32 %v4779_v18, %v4751_v51  ;;  %v15498_v51 = vld [vmem:[#allocation137_spill] sm:$0xff] }
 0x31b   : > { %8718 = vmatpush.msk.msrb.mxu1 %vm5464_vm4, %v15077_v24  ;;  %8736 = vmatpush.msk.msrb.mxu2 %vm5492_vm5, %v15077_v24  ;;  %v2210_v18 = vadd.f32 %v15498_v51, %v15497_v31  ;;  %v15518_v51 = vld [vmem:[#allocation51_spill] sm:$0xff] }
 0x31c   : > { %8751 = vmatpush.msk.msrb.mxu3 %vm5526_vm6, %v15077_v24  ;;  %8703 = vmatpush.msk.msrb.mxu0 %vm5430_vm7, %v15077_v24 }
 0x31d   : > { %8719 = vmatpush.msk.msrb.mxu1 %vm5462_vm8, %v15077_v24  ;;  %8737 = vmatpush.msk.msrb.mxu2 %vm5490_vm9, %v15077_v24 }
 0x31e   : > { %8752 = vmatpush.msk.msrb.mxu3 %vm5524_vm10, %v15077_v24  ;;  %5999 = vmatmul.f32.vlgmr.msrb.gmra.mxu2 %v13850_v17  ;;  %v4695_v55 = vpop.f32.mrf.mxu0 }
 0x31f   : > { %8704 = vmatpush.msk.msrb.mxu0 %vm5428_vm11, %v15077_v24  ;;  %8720 = vmatpush.msk.msrb.mxu1 %vm5460_vm12, %v15077_v24  ;;  %v4724_v41 = vpop.f32.mrf.mxu1  ;;  %v4753_v27 = vpop.f32.mrf.mxu2 }
 0x320   : > { %8753 = vmatpush.msk.msrb.mxu3 %vm5522_vm13, %v15077_v24  ;;  %v4725_v33 = vadd.f32 %v4724_v41, %v4695_v55  ;;  %v2838_v55 = vadd.f32 %v15502_v50, %v15501_v59  ;;  %v15503_v41 = vld [vmem:[#allocation82_spill] sm:$0xff] }
 0x321   : > { %6028 = vmatmul.f32.vlgmr.msrb.gmra.mxu3 %v13874_v38  ;;  %8705 = vmatpush.msk.msrb.mxu0 %vm5426_vm14, %v15077_v24 }
 0x322   : > { %8721 = vmatpush.msk.msrb.mxu1 %vm5458_vm15, %v15077_v24  ;;  %5941 = vmatmul.f32.vlgmr.msrb.gmra.mxu0 %v13892_v4  ;;  %v4754_v62 = vadd.f32 %v4753_v27, %v4725_v33  ;;  %v4782_v17 = vpop.f32.mrf.mxu3  ;;  %v15504_v33 = vld [vmem:[#allocation138_spill] sm:$0xff] }
 0x323   : > { %5970 = vmatmul.f32.vlgmr.msrb.gmra.mxu1 %v13902_v5 }
 0x324   : > { %v14166_v22 = vadd.f32 %v4782_v17, %v4754_v62  ;;  %v2239_v62 = vadd.f32 %v15504_v33, %v2210_v18  ;;  %v15505_v17 = vld [vmem:[#allocation199_spill] sm:$0xff] }
 0x326   : > { %15492 = vst [vmem:[#allocation61_spill] sm:$0xff] %v14166_v22  ;;  %6002 = vmatmul.f32.gmra.mxu2 %v13930_v6 }
 0x328   : > { %v5198_v60 = vpop.f32.mrf.mxu0 }
 0x329   : > { %6031 = vmatmul.f32.gmra.mxu3 %v13954_v12  ;;  %v5227_v46 = vpop.f32.mrf.mxu1  ;;  %v5256_v32 = vpop.f32.mrf.mxu2 }
 0x32a   : > { %5944 = vmatmul.f32.gmra.mxu0 %v13972_v16  ;;  %v5228_v38 = vadd.f32 %v5227_v46, %v5198_v60  ;;  %v15506_v60 = vld [vmem:[#allocation200_spill] sm:$0xff] }
 0x32b   : > { %5973 = vmatmul.f32.gmra.mxu1 %v13982_v20  ;;  %v3466_v46 = vadd.f32 %v15506_v60, %v15505_v17  ;;  %v15558_v60 = vld [vmem:[#allocation150_spill] sm:$0xff] }
 0x32c   : > { %v5257_v24 = vadd.f32 %v5256_v32, %v5228_v38  ;;  %v5285_v47 = vpop.f32.mrf.mxu3 }
 0x32e   : > { %6005 = vmatmul.f32.gmra.mxu2 %v14010_v15  ;;  %v14173_v35 = vadd.f32 %v5285_v47, %v5257_v24  ;;  %v15507_v47 = vld [vmem:[#allocation112_spill] sm:$0xff] }
 0x331   : > { %6034 = vmatmul.f32.gmra.mxu3 %v14034_v28 }
 0x332   : > { %5947 = vmatmul.f32.gmra.mxu0 %v14052_v56  ;;  %v5201_v43 = vpop.f32.mrf.mxu0 }
 0x333   : > { %5976 = vmatmul.f32.gmra.mxu1 %v14062_v13  ;;  %v5230_v36 = vpop.f32.mrf.mxu1  ;;  %v5259_v29 = vpop.f32.mrf.mxu2 }
 0x334   : > { %v5231_v48 = vadd.f32 %v5230_v36, %v5201_v43  ;;  %v15508_v36 = vld [vmem:[#allocation171_spill] sm:$0xff] }
 0x336   : > { %6008 = vmatmul.f32.gmra.mxu2 %v14090_v61  ;;  %v5260_v37 = vadd.f32 %v5259_v29, %v5231_v48  ;;  %v5288_v57 = vpop.f32.mrf.mxu3  ;;  %v1582_v61 = vadd.f32 %v15494_v42, %v15493_v34  ;;  %v2867_v29 = vadd.f32 %v15508_v36, %v2838_v55  ;;  %v15509_v48 = vld [vmem:[#allocation41_spill] sm:$0xff]  ;;  %v15514_v34 = vld [vmem:[#allocation172_spill] sm:$0xff] }
 0x337   : > { %v14242_v36 = vld [vmem:[%s9212_s28 + $0x30] sm:$0xff] }
 0x338   : > { %v14179_v2 = vadd.f32 %v5288_v57, %v5260_v37  ;;  %v15510_v37 = vld [vmem:[#allocation45_spill] sm:$0xff]  ;;  %v2896_v42 = vadd.f32 %v15514_v34, %v2867_v29  ;;  %6188 = vmatpush.msra.mxu2 %v14242_v36  ;;  %v15532_v34 = vld [vmem:[#allocation99_spill] sm:$0xff] }
 0x339   : > { %6037 = vmatmul.f32.gmra.mxu3 %v14108_v9  ;;  %v962_v9 = vadd.f32 %v15496_v1, %v15495_v49  ;;  %v4094_v57 = vadd.f32 %v15510_v37, %v15509_v48  ;;  %v15517_v1 = vld [vmem:[#allocation204_spill] sm:$0xff]  ;;  %v15524_v29 = vld [vmem:[#allocation89_spill] sm:$0xff]  ;;  %v15525_v48 = vld [vmem:[#allocation90_spill] sm:$0xff] }
 0x33a   : > { %5950 = vmatmul.f32.gmra.mxu0 %v8910_v19  ;;  %v1460_v37 = vadd.f32 %v15525_v48, %v15524_v29  ;;  %v15544_v48 = vld [vmem:[#allocation79_spill] sm:$0xff] }
 0x33b   : > { %5979 = vmatmul.f32.gmra.mxu1 %v8911_v54  ;;  %v15500_v54 = vld [vmem:[#allocation111_spill] sm:$0xff]  ;;  %v991_v27 = vadd.f32 %v15503_v41, %v962_v9 }
 0x33c   : > { %v5204_v45 = vpop.f32.mrf.mxu0  ;;  %v1611_v39 = vadd.f32 %v15500_v54, %v1582_v61  ;;  %v15515_v61 = vld [vmem:[#allocation228_spill] sm:$0xff] }
 0x33d   : > { %v5233_v53 = vpop.f32.mrf.mxu1  ;;  %v5262_v40 = vpop.f32.mrf.mxu2 }
 0x33e   : > { %v5234_v63 = vadd.f32 %v5233_v53, %v5204_v45  ;;  %v1640_v43 = vadd.f32 %v15507_v47, %v1611_v39  ;;  %v15511_v53 = vld [vmem:[#allocation83_spill] sm:$0xff] }
 0x340   : > { %v5263_v44 = vadd.f32 %v5262_v40, %v5234_v63  ;;  %v5291_v4 = vpop.f32.mrf.mxu3  ;;  %v1020_v40 = vadd.f32 %v15511_v53, %v991_v27  ;;  %v15512_v63 = vld [vmem:[#allocation139_spill] sm:$0xff] }
 0x342   : > { %v14182_v5 = vadd.f32 %v5291_v4, %v5263_v44  ;;  %v2268_v44 = vadd.f32 %v15512_v63, %v2239_v62  ;;  %v15513_v4 = vld [vmem:[#allocation201_spill] sm:$0xff]  ;;  %v14252_v63 = vld [vmem:[%s9212_s28 + $0x20] sm:$0xff] }
 0x343   : > { %6189 = vmatpush.msra.mxu2 %v14252_v63 }
 0x346   : > { %v14184_v6 = vpop.f32.mrf.mxu0 }
 0x347   : > { %v14186_v12 = vpop.f32.mrf.mxu1  ;;  %v14188_v16 = vpop.f32.mrf.mxu2 }
 0x34a   : > { %v14190_v20 = vpop.f32.mrf.mxu3 }
 0x350   : > { %v5314_v15 = vpop.f32.mrf.mxu0 }
 0x351   : > { %v5343_v28 = vpop.f32.mrf.mxu1  ;;  %v5372_v56 = vpop.f32.mrf.mxu2 }
 0x352   : > { %v5344_v13 = vadd.f32 %v5343_v28, %v5314_v15  ;;  %v3495_v15 = vadd.f32 %v15513_v4, %v3466_v46  ;;  %v15529_v4 = vld [vmem:[#allocation17_spill] sm:$0xff] }
 0x354   : > { %v5373_v58 = vadd.f32 %v5372_v56, %v5344_v13  ;;  %v5401_v52 = vpop.f32.mrf.mxu3  ;;  %v1650_v13 = vmax.f32 %v1020_v40, %v1640_v43  ;;  %v3524_v9 = vadd.f32 %v15517_v1, %v3495_v15 }
 0x356   : > { %v14198_v19 = vadd.f32 %v5401_v52, %v5373_v58  ;;  %v4123_v58 = vadd.f32 %v15515_v61, %v4094_v57  ;;  %v2278_v49 = vmax.f32 %v1650_v13, %v2268_v44  ;;  %v15526_v57 = vld [vmem:[#allocation93_spill] sm:$0xff]  ;;  %v15528_v44 = vld [vmem:[#allocation15_spill] sm:$0xff] }
 0x357   : > { %v840_v15 = vadd.f32 %v15529_v4, %v15528_v44  ;;  %v15546_v44 = vld [vmem:[#allocation91_spill] sm:$0xff] }
 0x358   : > { %15499 = vst [vmem:[#allocation59_spill] sm:$0xff] %v14198_v19  ;;  %v2906_v31 = vmax.f32 %v2278_v49, %v2896_v42  ;;  %v4152_v18 = vadd.f32 %v15518_v51, %v4123_v58  ;;  %v15533_v42 = vld [vmem:[#allocation100_spill] sm:$0xff]  ;;  %v15535_v49 = vld [vmem:[#allocation26_spill] sm:$0xff]  ;;  %v1489_v4 = vadd.f32 %v15546_v44, %v1460_v37  ;;  %v15556_v44 = vld [vmem:[#allocation119_spill] sm:$0xff] }
 0x359   : > { %v1469_v61 = vadd.f32 %v15533_v42, %v15532_v34  ;;  %v15534_v58 = vld [vmem:[#allocation24_spill] sm:$0xff]  ;;  %v15559_v19 = vld [vmem:[#allocation54_spill] sm:$0xff] }
 0x35a   : > { %v5317_v32 = vpop.f32.mrf.mxu0  ;;  %v3534_v50 = vmax.f32 %v2906_v31, %v3524_v9  ;;  %v843_v1 = vadd.f32 %v15535_v49, %v15534_v58  ;;  %v15536_v9 = vld [vmem:[#allocation117_spill] sm:$0xff]  ;;  %v15537_v31 = vld [vmem:[#allocation118_spill] sm:$0xff]  ;;  %v15548_v34 = vld [vmem:[#allocation84_spill] sm:$0xff] }
 0x35b   : > { %v5346_v38 = vpop.f32.mrf.mxu1  ;;  %v5375_v24 = vpop.f32.mrf.mxu2  ;;  %v2088_v51 = vadd.f32 %v15537_v31, %v15536_v9  ;;  %v15549_v42 = vld [vmem:[#allocation124_spill] sm:$0xff]  ;;  %v14282_v49 = vld [vmem:[%s9212_s28] sm:$0xff] }
 0x35c   : > { %v5347_v45 = vadd.f32 %v5346_v38, %v5317_v32  ;;  %v4162_v41 = vmax.f32 %v3534_v50, %v4152_v18  ;;  %v14266_v18 = vld [vmem:[%s9212_s28 + $0x10] sm:$0xff]  ;;  %v15540_v50 = vld [vmem:[#allocation63_spill] sm:$0xff]  ;;  %v2097_v58 = vadd.f32 %v15549_v42, %v15548_v34 }
 0x35d   : > { %6190 = vmatpush.msra.mxu2 %v14266_v18  ;;  %v15550_v9 = vld [vmem:[#allocation19_spill] sm:$0xff] }
 0x35e   : > { %v5376_v28 = vadd.f32 %v5375_v24, %v5347_v45  ;;  %v5404_v56 = vpop.f32.mrf.mxu3  ;;  %v14221_v62 = vmax.f32 %v4162_v41, %v14136_v10  ;;  %v15527_v45 = vld [vmem:[#allocation94_spill] sm:$0xff]  ;;  %v869_v31 = vadd.f32 %v15550_v9, %v840_v15  ;;  %v15560_v9 = vld [vmem:[#allocation25_spill] sm:$0xff] }
 0x35f   : > { %v1463_v53 = vadd.f32 %v15527_v45, %v15526_v57  ;;  %v15545_v57 = vld [vmem:[#allocation121_spill] sm:$0xff]  ;;  %6191 = vmatpush.msra.mxu2 %v14282_v49 }
 0x360   : > { %v14216_v52 = vadd.f32 %v5404_v56, %v5376_v28  ;;  %15519 = vst [vmem:[#allocation50_spill] sm:$0xff] %v14221_v62  ;;  %v15530_v28 = vld [vmem:[#allocation78_spill] sm:$0xff]  ;;  %v15531_v56 = vld [vmem:[#allocation40_spill] sm:$0xff]  ;;  %v2094_v45 = vadd.f32 %v15545_v57, %v15544_v48  ;;  %v15565_v62 = vld [vmem:[#allocation125_spill] sm:$0xff] }
 0x361   : > { %v1466_v13 = vadd.f32 %v15531_v56, %v15530_v28  ;;  %v15547_v28 = vld [vmem:[#allocation95_spill] sm:$0xff]  ;;  %v15555_v57 = vld [vmem:[#allocation74_spill] sm:$0xff] }
 0x362   : > { %15516 = vst [vmem:[#allocation16_spill] sm:$0xff] %v14216_v52  ;;  %v1492_v56 = vadd.f32 %v15547_v28, %v1463_v53  ;;  %v872_v37 = vadd.f32 %v15555_v57, %v843_v1  ;;  %v2117_v53 = vadd.f32 %v15556_v44, %v2088_v51  ;;  %v15557_v28 = vld [vmem:[#allocation149_spill] sm:$0xff]  ;;  %v15563_v1 = vld [vmem:[#allocation92_spill] sm:$0xff]  ;;  %v15567_v52 = vld [vmem:[#allocation154_spill] sm:$0xff] }
 0x363   : > { %v2719_v34 = vadd.f32 %v15558_v60, %v15557_v28  ;;  %v1518_v57 = vadd.f32 %v15563_v1, %v1489_v4  ;;  %v15564_v51 = vld [vmem:[#allocation96_spill] sm:$0xff]  ;;  %v2126_v60 = vadd.f32 %v15565_v62, %v2097_v58  ;;  %v15566_v28 = vld [vmem:[#allocation153_spill] sm:$0xff]  ;;  %v15574_v4 = vld [vmem:[#allocation151_spill] sm:$0xff] }
 0x364   : > { %v5320_v54 = vpop.f32.mrf.mxu0  ;;  %v1521_v44 = vadd.f32 %v15564_v51, %v1492_v56  ;;  %v2722_v22 = vadd.f32 %v15567_v52, %v15566_v28  ;;  %v2146_v11 = vadd.f32 %v15573_v21, %v2117_v53  ;;  %v15575_v56 = vld [vmem:[#allocation157_spill] sm:$0xff]  ;;  %v15576_v51 = vld [vmem:[#allocation158_spill] sm:$0xff]  ;;  %v15577_v52 = vld [vmem:[#allocation55_spill] sm:$0xff] }
 0x365   : > { %v5349_v39 = vpop.f32.mrf.mxu1  ;;  %v5378_v59 = vpop.f32.mrf.mxu2  ;;  %v2748_v1 = vadd.f32 %v15574_v4, %v2719_v34  ;;  %v2725_v62 = vadd.f32 %v15576_v51, %v15575_v56  ;;  %v15582_v21 = vld [vmem:[#allocation155_spill] sm:$0xff]  ;;  %v15584_v51 = vld [vmem:[#allocation38_spill] sm:$0xff] }
 0x366   : > { %v5350_v55 = vadd.f32 %v5349_v39, %v5320_v54  ;;  %v15538_v54 = vld [vmem:[#allocation65_spill] sm:$0xff]  ;;  %v2751_v53 = vadd.f32 %v15582_v21, %v2722_v22 }
 0x367   : > { %v15539_v39 = vld [vmem:[#allocation69_spill] sm:$0xff] }
 0x368   : > { %v5379_v27 = vadd.f32 %v5378_v59, %v5350_v55  ;;  %v5407_v33 = vpop.f32.mrf.mxu3  ;;  %v846_v59 = vadd.f32 %v15539_v39, %v15538_v54  ;;  %v15541_v55 = vld [vmem:[#allocation64_spill] sm:$0xff]  ;;  %v15551_v54 = vld [vmem:[#allocation97_spill] sm:$0xff] }
 0x369   : > { %v849_v41 = vadd.f32 %v15541_v55, %v15540_v50  ;;  %v1495_v39 = vadd.f32 %v15551_v54, %v1466_v13  ;;  %v15552_v50 = vld [vmem:[#allocation101_spill] sm:$0xff]  ;;  %v15561_v54 = vld [vmem:[#allocation34_spill] sm:$0xff] }
 0x36a   : > { %v14223_v17 = vadd.f32 %v5407_v33, %v5379_v27  ;;  %v15542_v27 = vld [vmem:[#allocation28_spill] sm:$0xff]  ;;  %v15543_v33 = vld [vmem:[#allocation33_spill] sm:$0xff]  ;;  %v1498_v55 = vadd.f32 %v15552_v50, %v1469_v61  ;;  %v875_v15 = vadd.f32 %v15559_v19, %v846_v59  ;;  %v15562_v50 = vld [vmem:[#allocation122_spill] sm:$0xff] }
 0x36b   : > { %v2091_v29 = vadd.f32 %v15543_v33, %v15542_v27  ;;  %v15553_v27 = vld [vmem:[#allocation145_spill] sm:$0xff]  ;;  %v15554_v33 = vld [vmem:[#allocation146_spill] sm:$0xff]  ;;  %v878_v13 = vadd.f32 %v15560_v9, %v849_v41  ;;  %v15568_v19 = vld [vmem:[#allocation23_spill] sm:$0xff] }
 0x36c   : > { %15520 = vst [vmem:[#allocation47_spill] sm:$0xff] %v14223_v17  ;;  %v2716_v48 = vadd.f32 %v15554_v33, %v15553_v27  ;;  %v2123_v17 = vadd.f32 %v15562_v50, %v2094_v45  ;;  %v898_v59 = vadd.f32 %v15568_v19, %v869_v31  ;;  %v15569_v41 = vld [vmem:[#allocation98_spill] sm:$0xff]  ;;  %v15571_v45 = vld [vmem:[#allocation147_spill] sm:$0xff]  ;;  %v904_v28 = vadd.f32 %v15577_v52, %v875_v15  ;;  %v15590_v22 = vld [vmem:[#allocation181_spill] sm:$0xff] }
 0x36d   : > { %v2120_v61 = vadd.f32 %v15561_v54, %v2091_v29  ;;  %v1524_v9 = vadd.f32 %v15569_v41, %v1495_v39  ;;  %v15570_v29 = vld [vmem:[#allocation102_spill] sm:$0xff]  ;;  %v15579_v39 = vld [vmem:[#allocation39_spill] sm:$0xff]  ;;  %v3350_v15 = vadd.f32 %v15585_v26, %v15584_v51  ;;  %v15601_v51 = vld [vmem:[#allocation212_spill] sm:$0xff] }
 0x36e   : > { %v14227_v46 = vpop.f32.mrf.mxu0  ;;  %v1527_v54 = vadd.f32 %v15570_v29, %v1498_v55  ;;  %v2745_v50 = vadd.f32 %v15571_v45, %v2716_v48  ;;  %v15578_v31 = vld [vmem:[#allocation66_spill] sm:$0xff]  ;;  %v15580_v55 = vld [vmem:[#allocation123_spill] sm:$0xff]  ;;  %v1645_v48 = vmax.f32 %v898_v59, %v1518_v57  ;;  %v15588_v57 = vld [vmem:[#allocation140_spill] sm:$0xff] }
 0x36f   : > { %v14229_v32 = vpop.f32.mrf.mxu1  ;;  %v14231_v38 = vpop.f32.mrf.mxu2  ;;  %v907_v19 = vadd.f32 %v15578_v31, %v878_v13  ;;  %v2149_v41 = vadd.f32 %v15579_v39, %v2120_v61  ;;  %v2152_v29 = vadd.f32 %v15580_v55, %v2123_v17  ;;  %v1649_v34 = vmax.f32 %v904_v28, %v1524_v9  ;;  %v15586_v13 = vld [vmem:[#allocation152_spill] sm:$0xff]  ;;  %v15587_v31 = vld [vmem:[#allocation159_spill] sm:$0xff]  ;;  %v15591_v9 = vld [vmem:[#allocation182_spill] sm:$0xff] }
 0x370   : > { %15521 = vst [vmem:[#allocation57_spill] sm:$0xff] %v14229_v32  ;;  %v14331_v52 = vmax.f32 %v1645_v48, %v2146_v11  ;;  %v2777_v61 = vadd.f32 %v15586_v13, %v2748_v1  ;;  %v2754_v17 = vadd.f32 %v15587_v31, %v2725_v62  ;;  %v15592_v28 = vld [vmem:[#allocation215_spill] sm:$0xff]  ;;  %v15594_v39 = vld [vmem:[#allocation156_spill] sm:$0xff]  ;;  %v15595_v11 = vld [vmem:[#allocation177_spill] sm:$0xff] }
 0x371   : > { %15522 = vst [vmem:[#allocation58_spill] sm:$0xff] %v14231_v38  ;;  %v1651_v4 = vmax.f32 %v907_v19, %v1527_v54  ;;  %v15583_v38 = vld [vmem:[#allocation148_spill] sm:$0xff]  ;;  %v2277_v59 = vmax.f32 %v1649_v34, %v2152_v29  ;;  %v3347_v54 = vadd.f32 %v15591_v9, %v15590_v22  ;;  %v2780_v26 = vadd.f32 %v15594_v39, %v2751_v53  ;;  %v15596_v55 = vld [vmem:[#allocation178_spill] sm:$0xff] }
 0x372   : > { %v14233_v24 = vpop.f32.mrf.mxu3  ;;  %v14327_v56 = vadd.f32 %v15583_v38, %v2745_v50  ;;  %v15593_v38 = vld [vmem:[#allocation216_spill] sm:$0xff]  ;;  %v3344_v48 = vadd.f32 %v15596_v55, %v15595_v11  ;;  %v15597_v1 = vld [vmem:[#allocation202_spill] sm:$0xff]  ;;  %v15607_v55 = vld [vmem:[#allocation183_spill] sm:$0xff] }
 0x373   : > { %15523 = vst [vmem:[#allocation60_spill] sm:$0xff] %v14233_v24  ;;  %v901_v24 = vadd.f32 %v15572_v14, %v872_v37  ;;  %v15581_v14 = vld [vmem:[#allocation126_spill] sm:$0xff]  ;;  %v3978_v50 = vadd.f32 %v15593_v38, %v15592_v28  ;;  %v15599_v29 = vld [vmem:[#allocation184_spill] sm:$0xff]  ;;  %v15605_v28 = vld [vmem:[#allocation187_spill] sm:$0xff] }
 0x374   : > { %v2155_v37 = vadd.f32 %v15581_v14, %v2126_v60  ;;  %v15598_v14 = vld [vmem:[#allocation218_spill] sm:$0xff]  ;;  %v15604_v22 = vld [vmem:[#allocation160_spill] sm:$0xff] }
 0x375   : > { %v1647_v45 = vmax.f32 %v901_v24, %v1521_v44  ;;  %v15589_v24 = vld [vmem:[#allocation186_spill] sm:$0xff]  ;;  %v3981_v62 = vadd.f32 %v15598_v14, %v15597_v1  ;;  %v2783_v9 = vadd.f32 %v15604_v22, %v2754_v17  ;;  %v15606_v39 = vld [vmem:[#allocation44_spill] sm:$0xff]  ;;  %v15610_v14 = vld [vmem:[#allocation217_spill] sm:$0xff] }
 0x376   : > { %v3353_v44 = vadd.f32 %v15589_v24, %v15588_v57  ;;  %v2279_v19 = vmax.f32 %v1651_v4, %v2155_v37  ;;  %v15600_v34 = vld [vmem:[#allocation30_spill] sm:$0xff]  ;;  %v15603_v57 = vld [vmem:[#allocation197_spill] sm:$0xff]  ;;  %v4609_v11 = vadd.f32 %v13863_v0, %v15606_v39  ;;  %v15626_v32 = vld [vmem:[#allocation220_spill] sm:$0xff] }
 0x377   : > { %v2275_v60 = vmax.f32 %v1647_v45, %v2149_v41  ;;  %v2901_v41 = vmax.f32 %v14331_v52, %v14327_v56  ;;  %v3379_v45 = vadd.f32 %v15599_v29, %v3350_v15  ;;  %v3975_v13 = vadd.f32 %v15601_v51, %v15600_v34  ;;  %v15602_v31 = vld [vmem:[#allocation42_spill] sm:$0xff]  ;;  %v15608_v52 = vld [vmem:[#allocation20_spill] sm:$0xff]  ;;  %v15611_v34 = vld [vmem:[#allocation31_spill] sm:$0xff] }
 0x378   : > { %v14235_v47 = vpop.f32.mrf.mxu0  ;;  %v4606_v37 = vadd.f32 %v15603_v57, %v15602_v31  ;;  %v3382_v38 = vadd.f32 %v15605_v28, %v3353_v44  ;;  %v3376_v56 = vadd.f32 %v15607_v55, %v3347_v54  ;;  %v15609_v15 = vld [vmem:[#allocation210_spill] sm:$0xff]  ;;  %v4007_v29 = vadd.f32 %v15610_v14, %v3978_v50  ;;  %v15612_v51 = vld [vmem:[#allocation29_spill] sm:$0xff] }
 0x379   : > { %v14237_v43 = vpop.f32.mrf.mxu1  ;;  %v14239_v10 = vpop.f32.mrf.mxu2  ;;  %v2903_v24 = vmax.f32 %v2275_v60, %v2777_v61  ;;  %v3972_v1 = vadd.f32 %v15609_v15, %v15608_v52  ;;  %v4603_v31 = vadd.f32 %v15612_v51, %v15611_v34  ;;  %v2905_v57 = vmax.f32 %v2277_v59, %v2780_v26  ;;  %v15614_v60 = vld [vmem:[#allocation219_spill] sm:$0xff]  ;;  %v15615_v0 = vld [vmem:[#allocation185_spill] sm:$0xff]  ;;  %v15617_v55 = vld [vmem:[#allocation22_spill] sm:$0xff] }
 0x37a   : > { %v3373_v61 = vadd.f32 %v15613_v8, %v3344_v48  ;;  %v4010_v17 = vadd.f32 %v15614_v60, %v3981_v62  ;;  %v5237_v44 = vadd.f32 %v14186_v12, %v14184_v6  ;;  %v3408_v28 = vadd.f32 %v15615_v0, %v3379_v45  ;;  %v15616_v54 = vld [vmem:[#allocation213_spill] sm:$0xff]  ;;  %v15618_v52 = vld [vmem:[#allocation232_spill] sm:$0xff]  ;;  %v15619_v50 = vld [vmem:[#allocation46_spill] sm:$0xff] }
 0x37b   : > { %v4004_v39 = vadd.f32 %v15616_v54, %v3975_v13  ;;  %v4600_v15 = vadd.f32 %v15618_v52, %v15617_v55  ;;  %v4635_v14 = vadd.f32 %v15619_v50, %v4606_v37  ;;  %v2907_v7 = vmax.f32 %v2279_v19, %v2783_v9  ;;  %v15620_v34 = vld [vmem:[#allocation188_spill] sm:$0xff]  ;;  %v15621_v48 = vld [vmem:[#allocation37_spill] sm:$0xff]  ;;  %v15622_v51 = vld [vmem:[#allocation211_spill] sm:$0xff] }
 0x37c   : > { %v14249_v40 = vpop.f32.mrf.mxu3  ;;  %v3411_v59 = vadd.f32 %v15620_v34, %v3382_v38  ;;  %v4638_v8 = vadd.f32 %v13865_v30, %v4609_v11  ;;  %v3405_v62 = vadd.f32 %v15621_v48, %v3376_v56  ;;  %v4001_v6 = vadd.f32 %v15622_v51, %v3972_v1  ;;  %v15623_v12 = vld [vmem:[#allocation53_spill] sm:$0xff]  ;;  %v15624_v45 = vld [vmem:[#allocation35_spill] sm:$0xff]  ;;  %v15625_v13 = vld [vmem:[#allocation180_spill] sm:$0xff] }
 0x37d   : > { %v4036_v60 = vadd.f32 %v15623_v12, %v4007_v29  ;;  %v4632_v0 = vadd.f32 %v15624_v45, %v4603_v31  ;;  %v3402_v54 = vadd.f32 %v15625_v13, %v3373_v61  ;;  %v4039_v55 = vadd.f32 %v15626_v32, %v4010_v17  ;;  %v15627_v30 = vld [vmem:[#allocation214_spill] sm:$0xff]  ;;  %v15629_v11 = vld [vmem:[#allocation43_spill] sm:$0xff]  ;;  %v14408_v13 = vld [vmem:[%s9212_s28 + $0x28] sm:$0xff] }
 0x37e   : > { %v5266_v37 = vadd.f32 %v14188_v16, %v5237_v44  ;;  %v3533_v9 = vmax.f32 %v2905_v57, %v3408_v28  ;;  %v4664_v56 = vadd.f32 %v15629_v11, %v4635_v14  ;;  %v3535_v1 = vmax.f32 %v2907_v7, %v3411_v59  ;;  %v15630_v16 = vld [vmem:[#allocation27_spill] sm:$0xff]  ;;  %v15632_v34 = vld [vmem:[#allocation234_spill] sm:$0xff] }
 0x37f   : > { %v4667_v29 = vadd.f32 %v13886_v3, %v4638_v8  ;;  %v5856_v31 = vadd.f32 %v14237_v43, %v14235_v47  ;;  %v3531_v17 = vmax.f32 %v2903_v24, %v3405_v62  ;;  %v4030_v44 = vadd.f32 %v15630_v16, %v4001_v6  ;;  %v14401_v12 = vld [vmem:[%s9212_s28 + $0x38] sm:$0xff]  ;;  %v15637_v11 = vld [vmem:[#allocation107_spill] sm:$0xff]  ;;  %v15641_v16 = vld [vmem:[#allocation72_spill] sm:$0xff] }
 0x380   : > { %v4161_v52 = vmax.f32 %v3533_v9, %v4036_v60  ;;  %v3529_v3 = vmax.f32 %v2901_v41, %v3402_v54  ;;  %6223 = vmatpush.msra.mxu3 %v14401_v12 }
 0x381   : > { %v5885_v24 = vadd.f32 %v14239_v10, %v5856_v31  ;;  %v15639_v31 = vld [vmem:[#allocation113_spill] sm:$0xff] }
 0x382   : > { %v14294_v42 = vpop.f32.mrf.mxu0  ;;  %v4789_v43 = vmax.f32 %v4161_v52, %v4664_v56  ;;  %v4157_v48 = vmax.f32 %v3529_v3, %v4030_v44  ;;  %6224 = vmatpush.msra.mxu3 %v14408_v13  ;;  %v15638_v56 = vld [vmem:[#allocation108_spill] sm:$0xff]  ;;  %v15642_v44 = vld [vmem:[#allocation73_spill] sm:$0xff] }
 0x383   : > { %v14300_v27 = vpop.f32.mrf.mxu1  ;;  %v14302_v33 = vpop.f32.mrf.mxu2  ;;  %v5914_v60 = vadd.f32 %v14249_v40, %v5885_v24  ;;  %v15634_v40 = vld [vmem:[#allocation104_spill] sm:$0xff]  ;;  %v959_v52 = vadd.f32 %v15642_v44, %v15641_v16  ;;  %v15651_v24 = vld [vmem:[#allocation109_spill] sm:$0xff]  ;;  %v15668_v16 = vld [vmem:[#allocation207_spill] sm:$0xff] }
 0x384   : > { %v5859_v19 = vadd.f32 %v14300_v27, %v14294_v42  ;;  %v15631_v42 = vld [vmem:[#allocation32_spill] sm:$0xff] }
 0x385   : > { %v4661_v27 = vadd.f32 %v15631_v42, %v4632_v0 }
 0x386   : > { %v14318_v58 = vpop.f32.mrf.mxu3  ;;  %v5888_v7 = vadd.f32 %v14302_v33, %v5859_v19  ;;  %v5417_v33 = vmax.f32 %v4789_v43, %v14182_v5  ;;  %v14418_v19 = vld [vmem:[%s9212_s28 + $0x18] sm:$0xff] }
 0x387   : > { %6225 = vmatpush.msra.mxu3 %v14418_v19  ;;  %v15650_v43 = vld [vmem:[#allocation70_spill] sm:$0xff] }
 0x388   : > { %v5917_v51 = vadd.f32 %v14318_v58, %v5888_v7  ;;  %v15646_v7 = vld [vmem:[#allocation131_spill] sm:$0xff] }
 0x38c   : > { %v5832_v21 = vpop.f32.mrf.mxu0 }
 0x38d   : > { %v5861_v4 = vpop.f32.mrf.mxu1  ;;  %v5890_v53 = vpop.f32.mrf.mxu2 }
 0x38e   : > { %v5862_v26 = vadd.f32 %v5861_v4, %v5832_v21  ;;  %v4033_v21 = vadd.f32 %v15627_v30, %v4004_v39  ;;  %v15628_v4 = vld [vmem:[#allocation233_spill] sm:$0xff]  ;;  %v4163_v39 = vmax.f32 %v3535_v1, %v4039_v55 }
 0x38f   : > { %v4629_v38 = vadd.f32 %v15628_v4, %v4600_v15  ;;  %v5295_v15 = vadd.f32 %v14190_v20, %v5266_v37  ;;  %v6057_v20 = vld [vmem:[%s14680_s3] sm:$0xff]  ;;  %v15636_v4 = vld [vmem:[#allocation68_spill] sm:$0xff] }
 0x390   : > { %v5919_v22 = vpop.f32.mrf.mxu3  ;;  %v5891_v61 = vadd.f32 %v5890_v53, %v5862_v26  ;;  %v4159_v14 = vmax.f32 %v3531_v17, %v4033_v21  ;;  %v4791_v53 = vmax.f32 %v4163_v39, %v4667_v29  ;;  %8766 = vmatmul.msk.f32.vlgmr.msra.gmra.mxu2 %vm6069_vm0, %v6057_v20  ;;  %v15635_v21 = vld [vmem:[#allocation67_spill] sm:$0xff]  ;;  %v14431_v29 = vld [vmem:[%s9212_s28 + $0x8] sm:$0xff]  ;;  %v15645_v39 = vld [vmem:[#allocation105_spill] sm:$0xff]  ;;  %s6331_s28 = sshll.u32 %s14629_s14, 4  ;;  %s6332_s28 = int_to_ptr.vmem [resolvable:$true] %s6331_s28 }
 0x391   : > { %v4658_v47 = vadd.f32 %v15632_v34, %v4629_v38  ;;  %v956_v38 = vadd.f32 %v15636_v4, %v15635_v21  ;;  %6226 = vmatpush.msra.mxu3 %v14431_v29  ;;  %v6058_v17 = vld [vmem:[%s14680_s3 + $0x8] sm:$0xff]  ;;  %v15649_v34 = vld [vmem:[#allocation142_spill] sm:$0xff]  ;;  %v15663_v4 = vld [vmem:[#allocation143_spill] sm:$0xff] }
 0x392   : > { %v5920_v59 = vadd.f32 %v5919_v22, %v5891_v61  ;;  %v4787_v62 = vmax.f32 %v4159_v14, %v4661_v27  ;;  %v5419_v41 = vmax.f32 %v4791_v53, %v5295_v15  ;;  %v15640_v61 = vld [vmem:[#allocation114_spill] sm:$0xff]  ;;  %8772 = vmatmul.msk.f32.vlgmr.msra.gmra.mxu3 %vm6069_vm0, %v6057_v20  ;;  %v15648_v14 = vld [vmem:[#allocation141_spill] sm:$0xff]  ;;  %v15654_v20 = vld [vmem:[#allocation115_spill] sm:$0xff] }
 0x393   : > { %v4785_v10 = vmax.f32 %v4157_v48, %v4658_v47  ;;  %v2213_v47 = vadd.f32 %v15649_v34, %v15648_v14  ;;  %v985_v53 = vadd.f32 %v15650_v43, %v956_v38  ;;  %v15674_v14 = vld [vmem:[#allocation77_spill] sm:$0xff]  ;;  %v15676_v43 = vld [vmem:[#allocation190_spill] sm:$0xff] }
 0x394   : > { %v5415_v22 = vmax.f32 %v4787_v62, %v14179_v2  ;;  %v6045_v45 = vmax.f32 %v5417_v33, %v5920_v59  ;;  %v15633_v2 = vld [vmem:[#allocation103_spill] sm:$0xff] }
 0x395   : > { %v5413_v58 = vmax.f32 %v4785_v10, %v14173_v35  ;;  %v1576_v9 = vadd.f32 %v15634_v40, %v15633_v2  ;;  %v1579_v35 = vadd.f32 %v15638_v56, %v15637_v11  ;;  %v14461_v62 = vld [vmem:[%s14681_s4] sm:$0xff]  ;;  %v15657_v10 = vld [vmem:[#allocation173_spill] sm:$0xff]  ;;  %v15661_v2 = vld [vmem:[#allocation106_spill] sm:$0xff]  ;;  %v2242_v38 = vadd.f32 %v15663_v4, %v2213_v47 }
 0x396   : > { %v5835_v32 = vpop.f32.mrf.mxu0  ;;  %v6043_v54 = vmax.f32 %v5415_v22, %v5917_v51  ;;  %v15656_v51 = vld [vmem:[#allocation166_spill] sm:$0xff]  ;;  %v15664_v56 = vld [vmem:[#allocation71_spill] sm:$0xff]  ;;  %v15675_v47 = vld [vmem:[#allocation189_spill] sm:$0xff] }
 0x397   : > { %v5864_v57 = vpop.f32.mrf.mxu1  ;;  %v5893_v28 = vpop.f32.mrf.mxu2  ;;  %v6041_v1 = vmax.f32 %v5413_v58, %v5914_v60  ;;  %v1605_v15 = vadd.f32 %v15645_v39, %v1576_v9  ;;  %v1608_v59 = vadd.f32 %v15651_v24, %v1579_v35  ;;  %v15658_v22 = vld [vmem:[#allocation174_spill] sm:$0xff]  ;;  %v15662_v9 = vld [vmem:[#allocation133_spill] sm:$0xff]  ;;  %v1014_v35 = vadd.f32 %v15664_v56, %v985_v53  ;;  %v15672_v39 = vld [vmem:[#allocation167_spill] sm:$0xff] }
 0x398   : > { %v5865_v50 = vadd.f32 %v5864_v57, %v5835_v32  ;;  %v1585_v32 = vadd.f32 %v15640_v61, %v15639_v31  ;;  %v6051_v27 = vsub.f32 %v6043_v54, %v14266_v18  ;;  %v15644_v57 = vld [vmem:[#allocation86_spill] sm:$0xff]  ;;  %8767 = vmatmul.msk.f32.gmra.mxu2 %vm6069_vm0, %v6058_v17  ;;  %v15652_v18 = vld [vmem:[#allocation127_spill] sm:$0xff]  ;;  %v2841_v60 = vadd.f32 %v15658_v22, %v15657_v10  ;;  %v15666_v31 = vld [vmem:[#allocation129_spill] sm:$0xff] }
 0x399   : > { %v6049_v48 = vsub.f32 %v6041_v1, %v14282_v49  ;;  %v15660_v49 = vld [vmem:[#allocation87_spill] sm:$0xff]  ;;  %v1634_v40 = vadd.f32 %v15661_v2, %v1605_v15  ;;  %v15665_v1 = vld [vmem:[#allocation36_spill] sm:$0xff]  ;;  %v3460_v53 = vadd.f32 %v15676_v43, %v15675_v47  ;;  %v15677_v24 = vld [vmem:[#allocation193_spill] sm:$0xff] }
 0x39a   : > { %v5894_v8 = vadd.f32 %v5893_v28, %v5865_v50  ;;  %v5922_v26 = vpop.f32.mrf.mxu3  ;;  %v15647_v50 = vld [vmem:[#allocation132_spill] sm:$0xff]  ;;  %v1614_v33 = vadd.f32 %v15654_v20, %v1585_v32  ;;  %v15667_v32 = vld [vmem:[#allocation206_spill] sm:$0xff]  ;;  %8773 = vmatmul.msk.f32.gmra.mxu3 %vm6069_vm0, %v6058_v17  ;;  %v15687_v56 = vld [vmem:[#allocation225_spill] sm:$0xff] }
 0x39b   : > { %v2207_v3 = vadd.f32 %v15647_v50, %v15646_v7  ;;  %v3469_v44 = vadd.f32 %v15668_v16, %v15667_v32  ;;  %v15673_v7 = vld [vmem:[#allocation175_spill] sm:$0xff]  ;;  %v15683_v22 = vld [vmem:[#allocation144_spill] sm:$0xff] }
 0x39c   : > { %v5923_v6 = vadd.f32 %v5922_v26, %v5894_v8  ;;  %v15653_v8 = vld [vmem:[#allocation128_spill] sm:$0xff]  ;;  %v2870_v50 = vadd.f32 %v15673_v7, %v2841_v60  ;;  %v2271_v60 = vadd.f32 %v15683_v22, %v2242_v38  ;;  %v15691_v16 = vld [vmem:[#allocation191_spill] sm:$0xff]  ;;  %v15695_v7 = vld [vmem:[#allocation230_spill] sm:$0xff] }
 0x39d   : > { %v2204_v26 = vadd.f32 %v15653_v8, %v15652_v18  ;;  %v2236_v21 = vadd.f32 %v15662_v9, %v2207_v3  ;;  %v6059_v3 = vld [vmem:[%s14680_s3 + $0x10] sm:$0xff]  ;;  %v15679_v8 = vld [vmem:[#allocation203_spill] sm:$0xff]  ;;  %v15685_v2 = vld [vmem:[#allocation208_spill] sm:$0xff] }
 0x39e   : > { %v6047_v0 = vmax.f32 %v5419_v41, %v5923_v6  ;;  %v15655_v41 = vld [vmem:[#allocation165_spill] sm:$0xff]  ;;  %v3498_v9 = vadd.f32 %v15685_v2, %v3469_v44  ;;  %v15686_v4 = vld [vmem:[#allocation224_spill] sm:$0xff]  ;;  %v15705_v2 = vld [vmem:[#allocation231_spill] sm:$0xff] }
 0x39f   : > { %v14410_v5 = vpop.f32.mrf.mxu0  ;;  %v2835_v6 = vadd.f32 %v15656_v51, %v15655_v41  ;;  %v2233_v61 = vadd.f32 %v15666_v31, %v2204_v26  ;;  %v15680_v26 = vld [vmem:[#allocation229_spill] sm:$0xff]  ;;  %v1646_v51 = vmax.f32 %v1014_v35, %v1634_v40  ;;  %v14515_v17 = vld [vmem:[%s14681_s4 + $0x8] sm:$0xff]  ;;  %v15688_v40 = vld [vmem:[#allocation163_spill] sm:$0xff] }
 0x3a0   : > { %v6055_v55 = vsub.f32 %v6047_v0, %v14242_v36  ;;  %v14415_v37 = vpop.f32.mrf.mxu1  ;;  %v6053_v36 = vsub.f32 %v6045_v45, %v14252_v63  ;;  %v15643_v63 = vld [vmem:[#allocation85_spill] sm:$0xff]  ;;  %v15659_v0 = vld [vmem:[#allocation75_spill] sm:$0xff]  ;;  %8768 = vmatmul.msk.f32.gmra.mxu2 %vm6069_vm0, %v6059_v3  ;;  %v15689_v35 = vld [vmem:[#allocation168_spill] sm:$0xff] }
 0x3a1   : > { %v14422_v30 = vpop.f32.mrf.mxu2  ;;  %v965_v28 = vadd.f32 %v15644_v57, %v15643_v63  ;;  %v988_v58 = vadd.f32 %v15659_v0, %v959_v52  ;;  %v15669_v52 = vld [vmem:[#allocation116_spill] sm:$0xff]  ;;  %v15670_v63 = vld [vmem:[#allocation161_spill] sm:$0xff]  ;;  %v15671_v57 = vld [vmem:[#allocation162_spill] sm:$0xff]  ;;  %v2864_v15 = vadd.f32 %v15672_v39, %v2835_v6 }
 0x3a2   : > { %6100 = vmatpush.msra.mxu0 %v6055_v55  ;;  %v15682_v6 = vld [vmem:[#allocation134_spill] sm:$0xff]  ;;  %v15690_v31 = vld [vmem:[#allocation176_spill] sm:$0xff]  ;;  %8774 = vmatmul.msk.f32.gmra.mxu3 %vm6069_vm0, %v6059_v3  ;;  %v9048_v3 = vmov 0  }
 0x3a3   : > { %v994_v55 = vadd.f32 %v15660_v49, %v965_v28  ;;  %v2832_v28 = vadd.f32 %v15671_v57, %v15670_v63  ;;  %v1017_v34 = vadd.f32 %v15674_v14, %v988_v58  ;;  %v2265_v10 = vadd.f32 %v15682_v6, %v2236_v21  ;;  %v15684_v58 = vld [vmem:[#allocation130_spill] sm:$0xff]  ;;  %v15693_v63 = vld [vmem:[#allocation21_spill] sm:$0xff]  ;;  %8845 = vset.pattern.permute.xlu0 %v9048_v3 }
 0x3a4   : > { %v14441_v42 = vpop.f32.mrf.mxu3  ;;  %6101 = vmatpush.msra.mxu0 %v6053_v36  ;;  %v1637_v36 = vadd.f32 %v15665_v1, %v1608_v59  ;;  %v15678_v59 = vld [vmem:[#allocation194_spill] sm:$0xff]  ;;  %v2262_v49 = vadd.f32 %v15684_v58, %v2233_v61  ;;  %v4091_v1 = vadd.f32 %v15687_v56, %v15686_v4  ;;  %v2893_v38 = vadd.f32 %v15689_v35, %v2864_v15  ;;  %v15694_v57 = vld [vmem:[#allocation221_spill] sm:$0xff] }
 0x3a5   : > { %v3463_v18 = vadd.f32 %v15678_v59, %v15677_v24  ;;  %v2861_v21 = vadd.f32 %v15688_v40, %v2832_v28  ;;  %v2899_v32 = vadd.f32 %v15690_v31, %v2870_v50  ;;  %v3489_v61 = vadd.f32 %v15691_v16, %v3460_v53  ;;  %v15696_v28 = vld [vmem:[#allocation57_spill] sm:$0xff]  ;;  %v15704_v58 = vld [vmem:[#allocation222_spill] sm:$0xff]  ;;  %8846 = vset.pattern.permute.xlu1 %v9048_v3 }
 0x3a6   : > { %6102 = vmatpush.msra.mxu0 %v6051_v27  ;;  %v1643_v27 = vadd.f32 %v15669_v52, %v1614_v33  ;;  %v15681_v33 = vld [vmem:[#allocation88_spill] sm:$0xff]  ;;  %v1648_v0 = vmax.f32 %v1017_v34, %v1637_v36  ;;  %v15692_v52 = vld [vmem:[#allocation195_spill] sm:$0xff]  ;;  %v4088_v39 = vadd.f32 %v15694_v57, %v15693_v63  ;;  %v5353_v15 = vadd.f32 %v15696_v28, %v14227_v46  ;;  %v15697_v24 = vld [vmem:[#allocation209_spill] sm:$0xff] }
 0x3a7   : > { %v14468_v45 = vpop.f32.mrf.mxu0  ;;  %v1023_v41 = vadd.f32 %v15681_v33, %v994_v55  ;;  %v3492_v44 = vadd.f32 %v15692_v52, %v3463_v18  ;;  %v2274_v53 = vmax.f32 %v1646_v51, %v2262_v49  ;;  %v3527_v59 = vadd.f32 %v15697_v24, %v3498_v9  ;;  %v15698_v18 = vld [vmem:[#allocation226_spill] sm:$0xff]  ;;  %v15702_v46 = vld [vmem:[#allocation192_spill] sm:$0xff]  ;;  %v15706_v56 = vld [vmem:[#allocation205_spill] sm:$0xff]  ;;  %8847 = vset.pattern.permute.xlu2 %v9048_v3 }
 0x3a8   : > { %v14471_v54 = vpop.f32.mrf.mxu1  ;;  %6103 = vmatpush.msra.mxu0 %v6049_v48  ;;  %v4097_v48 = vadd.f32 %v15680_v26, %v15679_v8  ;;  %v2276_v47 = vmax.f32 %v1648_v0, %v2265_v10  ;;  %v4120_v8 = vadd.f32 %v15698_v18, %v4091_v1  ;;  %v15699_v26 = vld [vmem:[#allocation198_spill] sm:$0xff]  ;;  %v15703_v0 = vld [vmem:[#allocation196_spill] sm:$0xff]  ;;  %v4117_v49 = vadd.f32 %v15704_v58, %v4088_v39  ;;  %v14554_v16 = vld [vmem:[%s14681_s4 + $0x10] sm:$0xff] }
 0x3a9   : > { %v14477_v11 = vpop.f32.mrf.mxu2  ;;  %8754 = vmatmul.msk.f32.vlgmr.msra.gmra.mxu0 %vm6069_vm0, %v14461_v62  ;;  %v1652_v55 = vmax.f32 %v1023_v41, %v1643_v27  ;;  %v4719_v27 = vadd.f32 %v14023_v25, %v14015_v23  ;;  %v15701_v41 = vld [vmem:[#allocation164_spill] sm:$0xff]  ;;  %v6060_v25 = vld [vmem:[%s14680_s3 + $0x18] sm:$0xff]  ;;  %v3521_v51 = vadd.f32 %v15703_v0, %v3492_v44  ;;  %v15710_v57 = vld [vmem:[#allocation223_spill] sm:$0xff] }
 0x3aa   : > { %v4126_v14 = vadd.f32 %v15695_v7, %v4097_v48  ;;  %v15700_v48 = vld [vmem:[#allocation48_spill] sm:$0xff]  ;;  %v2890_v6 = vadd.f32 %v15701_v41, %v2861_v21  ;;  %v2904_v10 = vmax.f32 %v2276_v47, %v2893_v38  ;;  %v5975_v21 = vadd.f32 %v14471_v54, %v14468_v45  ;;  %8769 = vmatmul.msk.f32.gmra.mxu2 %vm6069_vm0, %v6060_v25  ;;  %v15708_v38 = vld [vmem:[#allocation227_spill] sm:$0xff]  ;;  %v15716_v58 = vld [vmem:[#allocation50_spill] sm:$0xff] }
 0x3ab   : > { %v2280_v43 = vmax.f32 %v1652_v55, %v2271_v60  ;;  %v4716_v33 = vadd.f32 %v15700_v48, %v15699_v26  ;;  %v3518_v60 = vadd.f32 %v15702_v46, %v3489_v61  ;;  %v4748_v1 = vadd.f32 %v15706_v56, %v4719_v27  ;;  %v15707_v55 = vld [vmem:[#allocation58_spill] sm:$0xff]  ;;  %v6246_v61 = vld [vmem:[%s14682_s5] sm:$0xff]  ;;  %8775 = vmatmul.msk.f32.gmra.mxu3 %vm6069_vm0, %v6060_v25  ;;  %v15715_v0 = vld [vmem:[#allocation16_spill] sm:$0xff] }
 0x3ac   : > { %v14501_v20 = vpop.f32.mrf.mxu3  ;;  %v4155_v9 = vadd.f32 %v15705_v2, %v4126_v14  ;;  %v5382_v40 = vadd.f32 %v15707_v55, %v5353_v15  ;;  %v4149_v31 = vadd.f32 %v15708_v38, %v4120_v8  ;;  %v5972_v45 = vadd.f32 %v14415_v37, %v14410_v5  ;;  %6254 = vperm.xlu0 %8845, %v6246_v61   ;;  %v6248_v38 = vld [vmem:[%s14682_s5 + $0x10] sm:$0xff] }
 0x3ad   : > { %v2908_v22 = vmax.f32 %v2280_v43, %v2899_v32  ;;  %v15709_v32 = vld [vmem:[#allocation49_spill] sm:$0xff]  ;;  %v2902_v44 = vmax.f32 %v2274_v53, %v2890_v6  ;;  %v3532_v63 = vmax.f32 %v2904_v10, %v3521_v51  ;;  %v4146_v39 = vadd.f32 %v15710_v57, %v4117_v49  ;;  %v15712_v43 = vld [vmem:[#allocation60_spill] sm:$0xff]  ;;  %v15717_v49 = vld [vmem:[#allocation47_spill] sm:$0xff]  ;;  %6264 = vperm.xlu1 %8846, %v6248_v38  }
 0x3ae   : > { %v5411_v27 = vadd.f32 %v15712_v43, %v5382_v40  ;;  %v6004_v28 = vadd.f32 %v14477_v11, %v5975_v21  ;;  %v6001_v8 = vadd.f32 %v14422_v30, %v5972_v45  ;;  %v6066_v30 = vld [vmem:[%s14681_s4 + $0x18] sm:$0xff]  ;;  %v15718_v2 = vmax.f32 %v15716_v58, %v15717_v49 }
 0x3af   : > { %v5948_v36 = vpop.f32.mrf.mxu0  ;;  %v3536_v35 = vmax.f32 %v2908_v22, %v3527_v59  ;;  %v3530_v5 = vmax.f32 %v2902_v44, %v3518_v60  ;;  %v4160_v37 = vmax.f32 %v3532_v63, %v4149_v31  ;;  %v15714_v59 = vld [vmem:[#allocation61_spill] sm:$0xff]  ;;  %v6247_v60 = vld [vmem:[%s14682_s5 + $0x8] sm:$0xff]  ;;  %v6249_v31 = vld [vmem:[%s14682_s5 + $0x18] sm:$0xff] }
 0x3b0   : > { %v5977_v34 = vpop.f32.mrf.mxu1  ;;  %v6033_v22 = vadd.f32 %v14501_v20, %v6004_v28  ;;  %v6030_v25 = vadd.f32 %v14441_v42, %v6001_v8  ;;  %v6062_v42 = vld [vmem:[%s14680_s3 + $0x28] sm:$0xff] }
 0x3b1   : > { %v6006_v50 = vpop.f32.mrf.mxu2  ;;  %8755 = vmatmul.msk.f32.gmra.mxu0 %vm6069_vm0, %v14515_v17  ;;  %v5978_v23 = vadd.f32 %v5977_v34, %v5948_v36  ;;  %v4745_v36 = vadd.f32 %v15709_v32, %v4716_v33  ;;  %v4164_v7 = vmax.f32 %v3536_v35, %v4155_v9  ;;  %v15711_v34 = vld [vmem:[#allocation56_spill] sm:$0xff]  ;;  %v6061_v33 = vld [vmem:[%s14680_s3 + $0x20] sm:$0xff]  ;;  %v4158_v11 = vmax.f32 %v3530_v5, %v4146_v39 }
 0x3b2   : > { %v4777_v47 = vadd.f32 %v15711_v34, %v4748_v1  ;;  %8770 = vmatmul.msk.f32.gmra.mxu2 %vm6069_vm0, %v6061_v33 }
 0x3b3   : > { %v6007_v54 = vadd.f32 %v6006_v50, %v5978_v23  ;;  %v15713_v50 = vld [vmem:[#allocation52_spill] sm:$0xff]  ;;  %v4792_v18 = vmax.f32 %v4164_v7, %v15714_v59  ;;  %8776 = vmatmul.msk.f32.gmra.mxu3 %vm6069_vm0, %v6061_v33 }
 0x3b4   : > { %v6035_v4 = vpop.f32.mrf.mxu3  ;;  %v4774_v53 = vadd.f32 %v15713_v50, %v4745_v36  ;;  %v4788_v6 = vmax.f32 %v4160_v37, %v4777_v47  ;;  %6259 = vperm.xlu0 %8845, %v6247_v60  }
 0x3b5   : > { %v6036_v26 = vadd.f32 %v6035_v4, %v6007_v54  ;;  %v5420_v10 = vmax.f32 %v4792_v18, %v5411_v27  ;;  %v15719_v4 = vld [vmem:[#allocation59_spill] sm:$0xff]  ;;  %6269 = vperm.xlu1 %8846, %v6249_v31  }
 0x3b6   : > { %v4786_v46 = vmax.f32 %v4158_v11, %v4774_v53  ;;  %v5416_v51 = vmax.f32 %v4788_v6, %v15715_v0 }
 0x3b7   : > { %v5951_v52 = vpop.f32.mrf.mxu0  ;;  %v6046_v20 = vmax.f32 %v15718_v2, %v6036_v26 }
 0x3b8   : > { %v5980_v14 = vpop.f32.mrf.mxu1  ;;  %v5414_v56 = vmax.f32 %v4786_v46, %v15719_v4  ;;  %v6044_v1 = vmax.f32 %v5416_v51, %v6033_v22 }
 0x3b9   : > { %v5981_v15 = vadd.f32 %v5980_v14, %v5951_v52  ;;  %v6009_v24 = vpop.f32.mrf.mxu2  ;;  %8756 = vmatmul.msk.f32.gmra.mxu0 %vm6069_vm0, %v14554_v16  ;;  %v6054_v21 = vsub.f32 %v6046_v20, %v14408_v13 }
 0x3ba   : > { %v6042_v40 = vmax.f32 %v5414_v56, %v6030_v25  ;;  %v6052_v35 = vsub.f32 %v6044_v1, %v14418_v19  ;;  %8771 = vmatmul.msk.f32.gmra.mxu2 %vm6069_vm0, %v6062_v42  ;;  %v6068_v19 = vld [vmem:[%s14681_s4 + $0x28] sm:$0xff] }
 0x3bb   : > { %v6010_v48 = vadd.f32 %v6009_v24, %v5981_v15  ;;  %8777 = vmatmul.msk.f32.gmra.mxu3 %vm6069_vm0, %v6062_v42 }
 0x3bc   : > { %v6038_v41 = vpop.f32.mrf.mxu3  ;;  %v6050_v13 = vsub.f32 %v6042_v40, %v14431_v29  ;;  %v6250_v29 = vld [vmem:[%s14682_s5 + $0x20] sm:$0xff] }
 0x3bd   : > { %v6039_v23 = vadd.f32 %v6038_v41, %v6010_v48  ;;  %6274 = vperm.xlu2 %8847, %v6250_v29  }
 0x3bf   : > { %v6048_v9 = vmax.f32 %v5420_v10, %v6039_v23 }
 0x3c1   : > { %v6056_v55 = vsub.f32 %v6048_v9, %v14401_v12  ;;  %8757 = vmatmul.msk.f32.gmra.mxu0 %vm6069_vm0, %v6066_v30  ;;  %v6067_v12 = vld [vmem:[%s14681_s4 + $0x20] sm:$0xff] }
 0x3c3   : > { %6135 = vmatpush.msra.mxu1 %v6056_v55 }
 0x3c5   : > { %6136 = vmatpush.msra.mxu1 %v6054_v21 }
 0x3c7   : > { %6137 = vmatpush.msra.mxu1 %v6052_v35 }
 0x3c9   : > { %6138 = vmatpush.msra.mxu1 %v6050_v13  ;;  %8758 = vmatmul.msk.f32.gmra.mxu0 %vm6069_vm0, %v6067_v12 }
 0x3ca   : > { %8760 = vmatmul.msk.f32.vlgmr.msra.gmra.mxu1 %vm6069_vm0, %v14461_v62  ;;  %v6251_v62 = vld [vmem:[%s14682_s5 + $0x28] sm:$0xff] }
 0x3cb   : > { %6279 = vperm.xlu2 %8847, %v6251_v62  }
 0x3d1   : > { %8759 = vmatmul.msk.f32.gmra.mxu0 %vm6069_vm0, %v6068_v19 }
 0x3d2   : > { %8761 = vmatmul.msk.f32.gmra.mxu1 %vm6069_vm0, %v14515_v17 }
 0x3da   : > { %8762 = vmatmul.msk.f32.gmra.mxu1 %vm6069_vm0, %v14554_v16 }
 0x3e2   : > { %8763 = vmatmul.msk.f32.gmra.mxu1 %vm6069_vm0, %v6066_v30 }
 0x3ea   : > { %8764 = vmatmul.msk.f32.gmra.mxu1 %vm6069_vm0, %v6067_v12 }
 0x3f2   : > { %8765 = vmatmul.msk.f32.gmra.mxu1 %vm6069_vm0, %v6068_v19 }
 0x413   : > { %v6193_v17 = vpop.f32.mrf.mxu2 }
 0x415   : > { %v6228_v27 = vpop.f32.mrf.mxu3 }
 0x417   : > { %v6275_v53 = vpop.permute.xlu2 %6274 }
 0x41b   : > { %v6196_v3 = vpop.f32.mrf.mxu2 }
 0x41d   : > { %v6231_v18 = vpop.f32.mrf.mxu3 }
 0x41e   : > { %v6255_v61 = vpop.permute.xlu0 %6254 }
 0x41f   : > { %v6265_v47 = vpop.permute.xlu1 %6264 }
 0x423   : > { %v6199_v44 = vpop.f32.mrf.mxu2 }
 0x425   : > { %v6280_v46 = vpop.permute.xlu2 %6279  ;;  %v6234_v60 = vpop.f32.mrf.mxu3 }
 0x426   : > { %v6105_v32 = vpop.f32.mrf.mxu0  ;;  %v6260_v63 = vpop.permute.xlu0 %6259 }
 0x427   : > { %v6194_v36 = vadd.f32 %v6193_v17, %v6105_v32  ;;  %v6270_v5 = vpop.permute.xlu1 %6269 }
 0x429   : > { %v6282_v45 = vadd.f32 %v6255_v61, %v6194_v36 }
 0x42b   : > { %v6294_v54 = vmax.f32 %v6282_v45, 0.0 }
 0x42d   : > { %6306 = vst [vmem:[%s14629_s14] sm:$0xff] %v6294_v54  ;;  %v6202_v34 = vpop.f32.mrf.mxu2 }
 0x42e   : > { %v6108_v52 = vpop.f32.mrf.mxu0  ;;  %v6237_v4 = vpop.f32.mrf.mxu3 }
 0x42f   : > { %v6197_v16 = vadd.f32 %v6196_v3, %v6108_v52 }
 0x431   : > { %v6284_v57 = vadd.f32 %v6260_v63, %v6197_v16 }
 0x433   : > { %v6296_v39 = vmax.f32 %v6284_v57, 0.0 }
 0x435   : > { %6308 = vst [vmem:[%s14629_s14 + $0x10] sm:$0xff] %v6296_v39  ;;  %v6205_v37 = vpop.f32.mrf.mxu2 }
 0x436   : > { %v6111_v7 = vpop.f32.mrf.mxu0  ;;  %v6240_v42 = vpop.f32.mrf.mxu3 }
 0x437   : > { %v6200_v14 = vadd.f32 %v6199_v44, %v6111_v7 }
 0x439   : > { %v6286_v43 = vadd.f32 %v6265_v47, %v6200_v14 }
 0x43b   : > { %v6298_v28 = vmax.f32 %v6286_v43, 0.0 }
 0x43d   : > { %6310 = vst [vmem:[%s14629_s14 + $0x20] sm:$0xff] %v6298_v28  ;;  %v6208_v22 = vpop.f32.mrf.mxu2 }
 0x43e   : > { %v6114_v15 = vpop.f32.mrf.mxu0  ;;  %v6243_v31 = vpop.f32.mrf.mxu3 }
 0x43f   : > { %v6203_v24 = vadd.f32 %v6202_v34, %v6114_v15 }
 0x441   : > { %v6288_v50 = vadd.f32 %v6270_v5, %v6203_v24 }
 0x443   : > { %v6300_v59 = vmax.f32 %v6288_v50, 0.0 }
 0x445   : > { %6312 = vst [vmem:[%s14629_s14 + $0x30] sm:$0xff] %v6300_v59 }
 0x446   : > { %v6117_v8 = vpop.f32.mrf.mxu0 }
 0x447   : > { %v6140_v26 = vpop.f32.mrf.mxu1  ;;  %v6206_v48 = vadd.f32 %v6205_v37, %v6117_v8 }
 0x448   : > { %v6229_v33 = vadd.f32 %v6228_v27, %v6140_v26 }
 0x449   : > { %v6290_v11 = vadd.f32 %v6275_v53, %v6206_v48 }
 0x44a   : > { %v6283_v41 = vadd.f32 %v6255_v61, %v6229_v33 }
 0x44b   : > { %v6302_v6 = vmax.f32 %v6290_v11, 0.0 }
 0x44c   : > { %v6295_v10 = vmax.f32 %v6283_v41, 0.0 }
 0x44d   : > { %6314 = vst [vmem:[%s14629_s14 + $0x40] sm:$0xff] %v6302_v6 }
 0x44e   : > { %6307 = vst [vmem:[%s14629_s14 + $0x8] sm:$0xff] %v6295_v10  ;;  %v6120_v23 = vpop.f32.mrf.mxu0 }
 0x44f   : > { %v6143_v30 = vpop.f32.mrf.mxu1  ;;  %v6209_v0 = vadd.f32 %v6208_v22, %v6120_v23 }
 0x450   : > { %v6232_v51 = vadd.f32 %v6231_v18, %v6143_v30 }
 0x451   : > { %v6292_v25 = vadd.f32 %v6280_v46, %v6209_v0 }
 0x452   : > { %v6285_v58 = vadd.f32 %v6260_v63, %v6232_v51 }
 0x453   : > { %v6304_v49 = vmax.f32 %v6292_v25, 0.0 }
 0x454   : > { %v6297_v2 = vmax.f32 %v6285_v58, 0.0 }
 0x455   : > { %6316 = vst [vmem:[%s14629_s14 + $0x50] sm:$0xff] %v6304_v49 }
 0x456   : > { %6309 = vst [vmem:[%s14629_s14 + $0x18] sm:$0xff] %v6297_v2 }
 0x457   : > { %v6146_v20 = vpop.f32.mrf.mxu1 }
 0x458   : > { %v6235_v9 = vadd.f32 %v6234_v60, %v6146_v20 }
 0x45a   : > { %v6287_v56 = vadd.f32 %v6265_v47, %v6235_v9 }
 0x45c   : > { %v6299_v1 = vmax.f32 %v6287_v56, 0.0 }
 0x45e   : > { %6311 = vst [vmem:[%s14629_s14 + $0x28] sm:$0xff] %v6299_v1 }
 0x45f   : > { %v6149_v55 = vpop.f32.mrf.mxu1 }
 0x460   : > { %v6238_v40 = vadd.f32 %v6237_v4, %v6149_v55 }
 0x462   : > { %v6289_v21 = vadd.f32 %v6270_v5, %v6238_v40 }
 0x464   : > { %v6301_v35 = vmax.f32 %v6289_v21, 0.0 }
 0x466   : > { %6313 = vst [vmem:[%s14629_s14 + $0x38] sm:$0xff] %v6301_v35 }
 0x467   : > { %v6152_v12 = vpop.f32.mrf.mxu1 }
 0x468   : > { %v6241_v38 = vadd.f32 %v6240_v42, %v6152_v12 }
 0x46a   : > { %v6291_v13 = vadd.f32 %v6275_v53, %v6241_v38 }
 0x46c   : > { %v6303_v19 = vmax.f32 %v6291_v13, 0.0 }
 0x46e   : > { %6315 = vst [vmem:[%s14629_s14 + $0x48] sm:$0xff] %v6303_v19 }
 0x46f   : > { %v6155_v29 = vpop.f32.mrf.mxu1 }
 0x470   : > { %v6244_v62 = vadd.f32 %v6243_v31, %v6155_v29 }
 0x472   : > { %v6293_v17 = vadd.f32 %v6280_v46, %v6244_v62 }
 0x474   : > { %v6305_v32 = vmax.f32 %v6293_v17, 0.0 }
 0x476   : > { %6317 = vst [vmem:[%s14629_s14 + $0x58] sm:$0xff] %v6305_v32 }
 0x477   : > { %8999 = shalt.err (!%p8996_p7)
}
 0x478   : > { %s9049_s1 = smov 256   ;;  %s9050_s27 = smov 512  }
 0x479   : > { %s9051_s8 = smov 16  }
 0x47a   : > { %8790 = dma.vmem_to_hbm [thread:$0]  (%p9137_p11), %s6332_s28, 1536, %s6334_s30, %s6319_s26, %s9049_s1, %s9050_s27, %s9051_s8  }
 0x47b PF: > { %s6348_s20 = sand.u32 1, %s9030_s21   ;;  %p8800_p0 = pnand %p6432_p9, %p9141_p12 }
 0x47c   : > { %s6349_s18 = scalar_lea.sflag [#allocation4], %s6348_s20 }
 0x47d   : > { %p8801_p8 = pneg %p8800_p0 }
 0x47f   : > { %9025 = dma.done.wait (%p8801_p8), %s6349_s18, 1536  }
 0x480   : > { %9027 = vsyncadd (%p8801_p8), %s6349_s18, 4294965760  ;;  %s15721_s24 = sld [smem:[#allocation12_spill]]  ;;  %s15724_s21 = smov %s9034_s22 }
 0x481   : > { %s15722_s14 = sld [smem:[#allocation11_spill]] }
 0x482   : > { %s15723_s23 = sld [smem:[#allocation13_spill]] }
 0x486   : > { %p22_p10 = scmp.ge.s32.totalorder %s15721_s24, 4  }
 0x487   : > { %s15725_s22 = smov %s15722_s14 }
 0x488   :  { %24 = sbr.rel (!%p22_p10) target bundleno = 9 (0x9), region = 110 }
 0x48d   :  { %6355 = vsyncpa [#allocation3], 1 }
 0x48e   :  { %6357 = vsyncpa [#allocation3 + $0x1], 1 }
 0x48f   :  { %6358 = vsyncpa [#allocation6], 1 }
 0x490   :  { %6360 = vsyncpa [#allocation6 + $0x1], 1 }
 0x491   :  { %6361 = vsyncpa [#allocation4], 1 }
 0x492   :  { %6363 = vsyncpa [#allocation4 + $0x1], 1 }

</bundles_post_ra>
